<compile_context>
chip_gen: v7x
topology: tpu7x:2x2x1
jax: 0.10.0
libtpu: 0.0.40
codegen_flags: <defaults>
</compile_context>

<pallas_src>
import jax
import jax.numpy as jnp
from jax.experimental import pallas as pl
from jax.experimental.pallas import tpu as pltpu


def _round_up(x, m):
    return (x + m - 1) // m * m


# ---------------------------------------------------------------------------
# Fused kernel: input-gates prologue + LSTM recurrence + FC/log_softmax epilogue
#   x_ref   : (Tc, BT, E)    time-major embedded tokens for this chunk
#   wih_ref : (E,  4Hp)      input->gates weights   (transposed, gate-padded)
#   whh_ref : (Hp, 4Hp)      hidden->gates weights  (transposed, gate-padded)
#   b_ref   : (1,  4Hp)      b_ih + b_hh            (gate-padded, f32)
#   wfc_ref : (Hp, NTp)      FC weights             (transposed, padded)
#   bfc_ref : (1,  NTp)      FC bias (padded lanes = -1e30)
#   out_ref : (Tc, BT, NTp)  log-probabilities for this chunk
#   gx_sc   : (Tc, BT, 4Hp)  f32 precomputed input gates (VMEM scratch)
#   h_sc/c_sc: (BT, Hp)      f32 LSTM state, persists across time chunks
# ---------------------------------------------------------------------------
def fused_net_kernel(x_ref, wih_ref, whh_ref, b_ref, wfc_ref, bfc_ref,
                     out_ref, gx_sc, h_sc, c_sc):
    tc = x_ref.shape[0]
    hp = h_sc.shape[1]
    mm_dtype = whh_ref.dtype

    # h/c carry lives in VMEM scratch across grid steps.  This RELIES on the
    # time axis being the LAST grid axis (iterated innermost) and being marked
    # "arbitrary"; the batch axis may be split across cores (each core sees a
    # full t = 0..last sweep per batch tile).  Do not reorder the grid.
    @pl.when(pl.program_id(1) == 0)
    def _():
        h_sc[...] = jnp.zeros_like(h_sc)
        c_sc[...] = jnp.zeros_like(c_sc)

    # ---- chunk prologue: input->gates for every step of this chunk ---------
    # Independent of the recurrence, so these matmuls pipeline on the MXU off
    # the serial per-step path.
    for i in range(tc):
        gx_sc[i] = (jnp.dot(x_ref[i], wih_ref[...],
                            preferred_element_type=jnp.float32)
                    + b_ref[...])

    # ---- serial recurrence: Tc fully-unrolled LSTM steps --------------------
    # Gate slices are 128-lane-tile aligned (Hp = 128*k) -> no cross-lane
    # shuffles on the serial path.  gx_sc[i] / out_ref[i] are leading-axis,
    # full-tile unmasked accesses (time-major layout).
    h = h_sc[...]
    c = c_sc[...]
    for i in range(tc):
        gates = gx_sc[i] + jnp.dot(h.astype(mm_dtype), whh_ref[...],
                                   preferred_element_type=jnp.float32)
        i_g = jax.nn.sigmoid(gates[:, 0 * hp:1 * hp])
        f_g = jax.nn.sigmoid(gates[:, 1 * hp:2 * hp])
        g_g = jnp.tanh(gates[:, 2 * hp:3 * hp])
        o_g = jax.nn.sigmoid(gates[:, 3 * hp:4 * hp])
        c = f_g * c + i_g * g_g
        h = o_g * jnp.tanh(c)

        # ---- fused FC + log_softmax epilogue for this step ------------------
        # Depends on this step's h but not on the next step, so it schedules
        # off the serial h->h chain; exp/log/reduce use EUP/XLU slots that are
        # otherwise idle.  Output is the only HBM write of the whole pipeline.
        logits = (jnp.dot(h.astype(mm_dtype), wfc_ref[...],
                          preferred_element_type=jnp.float32) + bfc_ref[...])
        out_ref[i] = jax.nn.log_softmax(logits, axis=-1).astype(out_ref.dtype)

    h_sc[...] = h
    c_sc[...] = c


# ---------------------------------------------------------------------------
# Wrapper
# ---------------------------------------------------------------------------
def net_forward_pallas(token_ids, emb_table, w_ih, w_hh, b_ih, b_hh, w_fc, b_fc,
                       *, batch_tile=32, time_chunk=16,
                       compute_dtype=jnp.float32):
    """token_ids: (B, T) int32.  Returns (B*T, num_tags) log-probabilities.

    compute_dtype: jnp.bfloat16 puts all MXU operands on the bf16 fast path
    (recommended on v6e/v7x; also valid on v5e).  Gate math, accumulation and
    the h/c state always stay f32.
    """
    B, T = token_ids.shape
    E = emb_table.shape[1]
    H = w_hh.shape[1]
    NT = w_fc.shape[0]

    Hp = _round_up(H, 128)                  # hidden padded to full lanes
    NTp = _round_up(NT, 128)                # tags padded to full lanes
    H4 = 4 * Hp

    # Batch tile: as large as the (padded) batch allows, but keep >= 2 batch
    # tiles when possible so v7x megacore can split the recurrence across its
    # two TensorCores (time cannot be split — it is a recurrence).
    B8 = _round_up(B, 8)
    BT = max(8, min(_round_up(batch_tile, 8), B8))
    if B8 >= 16 and B8 // BT < 2:
        BT = max(8, _round_up(B8 // 2, 8))
    Bp = _round_up(B, BT)

    Tc = max(1, min(time_chunk, T))         # fully-unrolled steps per grid step
    Tp = _round_up(T, Tc)

    f32 = jnp.float32
    NEG = jnp.float32(-1e30)

    # ---- glue: embedding gather straight into the padded time-major layout --
    # Padding happens on the tiny int32 index array (pad index 0 is harmless:
    # padded rows/steps are stripped and never feed real outputs), so there is
    # no extra (Bp, Tp, E) float pad pass in XLA.
    # TODO(synk): the embedding gather itself stays in XLA (jnp.take); a
    # scalar-prefetch DMA-gather Pallas kernel is possible but not worth it.
    ids_p = jnp.zeros((Bp, Tp), token_ids.dtype).at[:B, :T].set(token_ids)
    x_tm = jnp.take(emb_table, ids_p.T, axis=0).astype(compute_dtype)  # (Tp,Bp,E)

    # ---- pad & transpose weights (each gate block i|f|g|o padded H->Hp) -----
    # Padding is inert: padded hidden units get zero weights & zero bias, so
    # their gates give c_pad = 0, h_pad = 0 forever; padded-h rows of whh_t /
    # wfc_t are zero so they never feed real units; padded tags get logit
    # -1e30, whose exp underflows to exactly 0 in the softmax.
    # (H=32 -> Hp=128 inflates the per-step MXU work; kept for lane-aligned
    #  gate slices per the review — revisit only if profiling says so.)
    wih_p = jnp.zeros((4, Hp, E), f32).at[:, :H, :].set(w_ih.reshape(4, H, E))
    whh_p = jnp.zeros((4, Hp, Hp), f32).at[:, :H, :H].set(w_hh.reshape(4, H, H))
    b_p = jnp.zeros((4, Hp), f32).at[:, :H].set((b_ih + b_hh).reshape(4, H))
    wih_t = wih_p.reshape(H4, E).T.astype(compute_dtype)            # (E,  4Hp)
    whh_t = whh_p.reshape(H4, Hp).T.astype(compute_dtype)           # (Hp, 4Hp)
    bias = b_p.reshape(1, H4)                                       # (1, 4Hp)

    wfc_t = jnp.zeros((Hp, NTp), f32).at[:H, :NT].set(w_fc.T).astype(
        compute_dtype)                                              # (Hp, NTp)
    bfc = jnp.full((1, NTp), NEG, f32).at[0, :NT].set(b_fc)         # (1, NTp)

    # ---- single fused pallas_call -------------------------------------------
    # NOTE: time MUST stay the last grid axis ("arbitrary"); h/c carry in
    # scratch depends on it.
    grid = (Bp // BT, Tp // Tc)
    out_tm = pl.pallas_call(
        fused_net_kernel,
        out_shape=jax.ShapeDtypeStruct((Tp, Bp, NTp), jnp.float32),
        grid_spec=pltpu.PrefetchScalarGridSpec(
            num_scalar_prefetch=0,
            grid=grid,
            in_specs=[
                pl.BlockSpec((Tc, BT, E), lambda b, t: (t, b, 0)),
                pl.BlockSpec((E, H4), lambda b, t: (0, 0)),
                pl.BlockSpec((Hp, H4), lambda b, t: (0, 0)),
                pl.BlockSpec((1, H4), lambda b, t: (0, 0)),
                pl.BlockSpec((Hp, NTp), lambda b, t: (0, 0)),
                pl.BlockSpec((1, NTp), lambda b, t: (0, 0)),
            ],
            out_specs=pl.BlockSpec((Tc, BT, NTp), lambda b, t: (t, b, 0)),
            scratch_shapes=[
                pltpu.VMEM((Tc, BT, H4), jnp.float32),   # gates_x (chunk)
                pltpu.VMEM((BT, Hp), jnp.float32),       # h state (f32)
                pltpu.VMEM((BT, Hp), jnp.float32),       # c state (f32)
            ]),
        compiler_params=pltpu.CompilerParams(
            # batch tiles independent (v7x megacore); time is a recurrence.
            dimension_semantics=("parallel", "arbitrary")),
    )(x_tm, wih_t, whh_t, bias, wfc_t, bfc)

    # ---- glue: strip padding, back to PyTorch's (B*T, NT) view --------------
    out = out_tm[:T, :B, :NT]                       # (T, B, NT), small
    out = jnp.transpose(out, (1, 0, 2)).reshape(B * T, NT)
    return out


def _reference_forward(token_ids, emb_table, w_ih, w_hh, b_ih, b_hh, w_fc, b_fc):
    """Pure-JAX reference (lax.scan LSTM) for a correctness sanity check."""
    B, T = token_ids.shape
    H = w_hh.shape[1]
    x = jnp.take(emb_table, token_ids, axis=0)                # (B, T, E)

    def step(carry, x_t):
        h, c = carry
        gates = x_t @ w_ih.T + h @ w_hh.T + b_ih + b_hh
        i = jax.nn.sigmoid(gates[:, 0 * H:1 * H])
        f = jax.nn.sigmoid(gates[:, 1 * H:2 * H])
        g = jnp.tanh(gates[:, 2 * H:3 * H])
        o = jax.nn.sigmoid(gates[:, 3 * H:4 * H])
        c = f * c + i * g
        h = o * jnp.tanh(c)
        return (h, c), h

    init = (jnp.zeros((B, H), jnp.float32), jnp.zeros((B, H), jnp.float32))
    _, hs = jax.lax.scan(step, init, jnp.transpose(x, (1, 0, 2)))   # (T, B, H)
    hs = jnp.transpose(hs, (1, 0, 2)).reshape(B * T, H)
    logits = hs @ w_fc.T + b_fc
    return jax.nn.log_softmax(logits, axis=1)


if __name__ == "__main__":
    # Small synthetic config consistent with the module's params.
    VOCAB = 64          # synthetic (real: 37049)
    EMB = 32            # embedding_dim
    HID = 32            # lstm_hidden_dim
    NUM_TAGS = 17       # number_of_tags
    B, T = 2, 24        # Tp pads to 32 -> two time chunks (carry + padding)

    key = jax.random.PRNGKey(0)
    keys = jax.random.split(key, 8)

    emb_table = jax.random.normal(keys[0], (VOCAB, EMB), jnp.float32) * 0.1
    w_ih = jax.random.normal(keys[1], (4 * HID, EMB), jnp.float32) * 0.1
    w_hh = jax.random.normal(keys[2], (4 * HID, HID), jnp.float32) * 0.1
    b_ih = jax.random.normal(keys[3], (4 * HID,), jnp.float32) * 0.1
    b_hh = jax.random.normal(keys[4], (4 * HID,), jnp.float32) * 0.1
    w_fc = jax.random.normal(keys[5], (NUM_TAGS, HID), jnp.float32) * 0.1
    b_fc = jax.random.normal(keys[6], (NUM_TAGS,), jnp.float32) * 0.1
    token_ids = jax.random.randint(keys[7], (B, T), 0, VOCAB, dtype=jnp.int32)

    ref = _reference_forward(token_ids, emb_table, w_ih, w_hh, b_ih, b_hh,
                             w_fc, b_fc)

    # f32 MXU path: matches the PyTorch module numerics closely.
    out_f32 = net_forward_pallas(token_ids, emb_table, w_ih, w_hh, b_ih, b_hh,
                                 w_fc, b_fc, batch_tile=32, time_chunk=16,
                                 compute_dtype=jnp.float32)
    out_f32 = jax.block_until_ready(out_f32)
    assert out_f32.shape == (B * T, NUM_TAGS), out_f32.shape
    assert jnp.allclose(out_f32, ref, atol=5e-4, rtol=5e-4), (
        float(jnp.max(jnp.abs(out_f32 - ref))))

    # bf16 MXU-operand path (recommended default on v6e/v7x); looser tolerance
    # since matmul inputs are bf16-rounded (gate math / state stay f32).
    out_bf16 = net_forward_pallas(token_ids, emb_table, w_ih, w_hh, b_ih, b_hh,
                                  w_fc, b_fc, batch_tile=32, time_chunk=16,
                                  compute_dtype=jnp.bfloat16)
    out_bf16 = jax.block_until_ready(out_bf16)
    assert out_bf16.shape == (B * T, NUM_TAGS), out_bf16.shape
    assert bool(jnp.all(jnp.isfinite(out_bf16)))
    assert jnp.allclose(out_bf16, ref, atol=0.15, rtol=0.15), (
        float(jnp.max(jnp.abs(out_bf16 - ref))))

    print("KERNEL_OK")
</pallas_src>

<mosaic_0001>
module attributes {stable_mosaic.version = 11 : i64} {
  func.func @fused_net_kernel(%arg0: i32, %arg1: i32, %arg2: memref<16x8x32xf32, #tpu.memory_space<vmem>>, %arg3: memref<32x512xf32, #tpu.memory_space<vmem>>, %arg4: memref<128x512xf32, #tpu.memory_space<vmem>>, %arg5: memref<1x512xf32, #tpu.memory_space<vmem>>, %arg6: memref<128x128xf32, #tpu.memory_space<vmem>>, %arg7: memref<1x128xf32, #tpu.memory_space<vmem>>, %arg8: memref<16x8x128xf32, #tpu.memory_space<vmem>>, %arg9: memref<16x8x512xf32, #tpu.memory_space<vmem>>, %arg10: memref<8x128xf32, #tpu.memory_space<vmem>>, %arg11: memref<8x128xf32, #tpu.memory_space<vmem>>) attributes {dimension_semantics = [#tpu.dimension_semantics<parallel>, #tpu.dimension_semantics<arbitrary>], iteration_bounds = array<i64: 1, 2>, scalar_prefetch = 0 : i64, scratch_operands = 3 : i64, tpu.core_type = #tpu.core_type<tc>, window_params = [{transform_indices = @transform_0, window_bounds = array<i64: 16, 8, 32>}, {pipeline_mode = #tpu.pipeline_mode<synchronous>, transform_indices = @transform_1, window_bounds = array<i64: 32, 512>}, {pipeline_mode = #tpu.pipeline_mode<synchronous>, transform_indices = @transform_2, window_bounds = array<i64: 128, 512>}, {pipeline_mode = #tpu.pipeline_mode<synchronous>, transform_indices = @transform_3, window_bounds = array<i64: 1, 512>}, {pipeline_mode = #tpu.pipeline_mode<synchronous>, transform_indices = @transform_4, window_bounds = array<i64: 128, 128>}, {pipeline_mode = #tpu.pipeline_mode<synchronous>, transform_indices = @transform_5, window_bounds = array<i64: 1, 128>}, {transform_indices = @transform_6, window_bounds = array<i64: 16, 8, 128>}]} {
    %c0_i32 = arith.constant 0 : i32
    %0 = arith.cmpi eq, %arg1, %c0_i32 : i32
    %1 = arith.extui %0 : i1 to i32
    %c0_i32_0 = arith.constant 0 : i32
    %2 = arith.cmpi ne, %1, %c0_i32_0 : i32
    scf.if %2 {
      %cst_488 = arith.constant 0.000000e+00 : f32
      %967 = vector.broadcast %cst_488 : f32 to vector<8x128xf32>
      %c0_489 = arith.constant 0 : index
      %c0_490 = arith.constant 0 : index
      %968 = vector.load %arg10[%c0_489, %c0_490] : memref<8x128xf32, #tpu.memory_space<vmem>>, vector<8x128xf32>
      tpu.vector_store %arg10[%c0_489, %c0_490], %967 {strides = array<i32>} : memref<8x128xf32, #tpu.memory_space<vmem>>, vector<8x128xf32>,
      %cst_491 = arith.constant 0.000000e+00 : f32
      %969 = vector.broadcast %cst_491 : f32 to vector<8x128xf32>
      %c0_492 = arith.constant 0 : index
      %c0_493 = arith.constant 0 : index
      %970 = vector.load %arg11[%c0_492, %c0_493] : memref<8x128xf32, #tpu.memory_space<vmem>>, vector<8x128xf32>
      tpu.vector_store %arg11[%c0_492, %c0_493], %969 {strides = array<i32>} : memref<8x128xf32, #tpu.memory_space<vmem>>, vector<8x128xf32>,
    } else {
    }
    %c0 = arith.constant 0 : index
    %c0_1 = arith.constant 0 : index
    %c0_2 = arith.constant 0 : index
    %3 = vector.load %arg2[%c0, %c0_1, %c0_2] : memref<16x8x32xf32, #tpu.memory_space<vmem>>, vector<1x8x32xf32>
    %4 = vector.shape_cast %3 : vector<1x8x32xf32> to vector<8x32xf32>
    %c0_3 = arith.constant 0 : index
    %c0_4 = arith.constant 0 : index
    %5 = vector.load %arg3[%c0_3, %c0_4] : memref<32x512xf32, #tpu.memory_space<vmem>>, vector<32x512xf32>
    %cst = arith.constant dense<0.000000e+00> : vector<8x512xf32>
    %6 = tpu.matmul %4, %5, %cst {dimension_numbers = #tpu.dot_dimension_numbers<[1], [0], [0], [1], [0, 0, 1, 1], [], []>} : vector<8x32xf32>, vector<32x512xf32>, vector<8x512xf32> -> vector<8x512xf32>
    %c0_5 = arith.constant 0 : index
    %c0_6 = arith.constant 0 : index
    %7 = vector.load %arg5[%c0_5, %c0_6] : memref<1x512xf32, #tpu.memory_space<vmem>>, vector<1x512xf32>
    %8 = vector.broadcast %7 : vector<1x512xf32> to vector<8x512xf32>
    %9 = arith.addf %6, %8 : vector<8x512xf32>
    %c0_7 = arith.constant 0 : index
    %c0_8 = arith.constant 0 : index
    %c0_9 = arith.constant 0 : index
    %10 = vector.load %arg9[%c0_7, %c0_8, %c0_9] : memref<16x8x512xf32, #tpu.memory_space<vmem>>, vector<1x8x512xf32>
    %11 = vector.shape_cast %10 : vector<1x8x512xf32> to vector<8x512xf32>
    %12 = vector.shape_cast %9 : vector<8x512xf32> to vector<1x8x512xf32>
    tpu.vector_store %arg9[%c0_7, %c0_8, %c0_9], %12 {strides = array<i32>} : memref<16x8x512xf32, #tpu.memory_space<vmem>>, vector<1x8x512xf32>,
    %c1 = arith.constant 1 : index
    %c0_10 = arith.constant 0 : index
    %c0_11 = arith.constant 0 : index
    %13 = vector.load %arg2[%c1, %c0_10, %c0_11] : memref<16x8x32xf32, #tpu.memory_space<vmem>>, vector<1x8x32xf32>
    %14 = vector.shape_cast %13 : vector<1x8x32xf32> to vector<8x32xf32>
    %c0_12 = arith.constant 0 : index
    %c0_13 = arith.constant 0 : index
    %15 = vector.load %arg3[%c0_12, %c0_13] : memref<32x512xf32, #tpu.memory_space<vmem>>, vector<32x512xf32>
    %cst_14 = arith.constant dense<0.000000e+00> : vector<8x512xf32>
    %16 = tpu.matmul %14, %15, %cst_14 {dimension_numbers = #tpu.dot_dimension_numbers<[1], [0], [0], [1], [0, 0, 1, 1], [], []>} : vector<8x32xf32>, vector<32x512xf32>, vector<8x512xf32> -> vector<8x512xf32>
    %c0_15 = arith.constant 0 : index
    %c0_16 = arith.constant 0 : index
    %17 = vector.load %arg5[%c0_15, %c0_16] : memref<1x512xf32, #tpu.memory_space<vmem>>, vector<1x512xf32>
    %18 = vector.broadcast %17 : vector<1x512xf32> to vector<8x512xf32>
    %19 = arith.addf %16, %18 : vector<8x512xf32>
    %c1_17 = arith.constant 1 : index
    %c0_18 = arith.constant 0 : index
    %c0_19 = arith.constant 0 : index
    %20 = vector.load %arg9[%c1_17, %c0_18, %c0_19] : memref<16x8x512xf32, #tpu.memory_space<vmem>>, vector<1x8x512xf32>
    %21 = vector.shape_cast %20 : vector<1x8x512xf32> to vector<8x512xf32>
    %22 = vector.shape_cast %19 : vector<8x512xf32> to vector<1x8x512xf32>
    tpu.vector_store %arg9[%c1_17, %c0_18, %c0_19], %22 {strides = array<i32>} : memref<16x8x512xf32, #tpu.memory_space<vmem>>, vector<1x8x512xf32>,
    %c2 = arith.constant 2 : index
    %c0_20 = arith.constant 0 : index
    %c0_21 = arith.constant 0 : index
    %23 = vector.load %arg2[%c2, %c0_20, %c0_21] : memref<16x8x32xf32, #tpu.memory_space<vmem>>, vector<1x8x32xf32>
    %24 = vector.shape_cast %23 : vector<1x8x32xf32> to vector<8x32xf32>
    %c0_22 = arith.constant 0 : index
    %c0_23 = arith.constant 0 : index
    %25 = vector.load %arg3[%c0_22, %c0_23] : memref<32x512xf32, #tpu.memory_space<vmem>>, vector<32x512xf32>
    %cst_24 = arith.constant dense<0.000000e+00> : vector<8x512xf32>
    %26 = tpu.matmul %24, %25, %cst_24 {dimension_numbers = #tpu.dot_dimension_numbers<[1], [0], [0], [1], [0, 0, 1, 1], [], []>} : vector<8x32xf32>, vector<32x512xf32>, vector<8x512xf32> -> vector<8x512xf32>
    %c0_25 = arith.constant 0 : index
    %c0_26 = arith.constant 0 : index
    %27 = vector.load %arg5[%c0_25, %c0_26] : memref<1x512xf32, #tpu.memory_space<vmem>>, vector<1x512xf32>
    %28 = vector.broadcast %27 : vector<1x512xf32> to vector<8x512xf32>
    %29 = arith.addf %26, %28 : vector<8x512xf32>
    %c2_27 = arith.constant 2 : index
    %c0_28 = arith.constant 0 : index
    %c0_29 = arith.constant 0 : index
    %30 = vector.load %arg9[%c2_27, %c0_28, %c0_29] : memref<16x8x512xf32, #tpu.memory_space<vmem>>, vector<1x8x512xf32>
    %31 = vector.shape_cast %30 : vector<1x8x512xf32> to vector<8x512xf32>
    %32 = vector.shape_cast %29 : vector<8x512xf32> to vector<1x8x512xf32>
    tpu.vector_store %arg9[%c2_27, %c0_28, %c0_29], %32 {strides = array<i32>} : memref<16x8x512xf32, #tpu.memory_space<vmem>>, vector<1x8x512xf32>,
    %c3 = arith.constant 3 : index
    %c0_30 = arith.constant 0 : index
    %c0_31 = arith.constant 0 : index
    %33 = vector.load %arg2[%c3, %c0_30, %c0_31] : memref<16x8x32xf32, #tpu.memory_space<vmem>>, vector<1x8x32xf32>
    %34 = vector.shape_cast %33 : vector<1x8x32xf32> to vector<8x32xf32>
    %c0_32 = arith.constant 0 : index
    %c0_33 = arith.constant 0 : index
    %35 = vector.load %arg3[%c0_32, %c0_33] : memref<32x512xf32, #tpu.memory_space<vmem>>, vector<32x512xf32>
    %cst_34 = arith.constant dense<0.000000e+00> : vector<8x512xf32>
    %36 = tpu.matmul %34, %35, %cst_34 {dimension_numbers = #tpu.dot_dimension_numbers<[1], [0], [0], [1], [0, 0, 1, 1], [], []>} : vector<8x32xf32>, vector<32x512xf32>, vector<8x512xf32> -> vector<8x512xf32>
    %c0_35 = arith.constant 0 : index
    %c0_36 = arith.constant 0 : index
    %37 = vector.load %arg5[%c0_35, %c0_36] : memref<1x512xf32, #tpu.memory_space<vmem>>, vector<1x512xf32>
    %38 = vector.broadcast %37 : vector<1x512xf32> to vector<8x512xf32>
    %39 = arith.addf %36, %38 : vector<8x512xf32>
    %c3_37 = arith.constant 3 : index
    %c0_38 = arith.constant 0 : index
    %c0_39 = arith.constant 0 : index
    %40 = vector.load %arg9[%c3_37, %c0_38, %c0_39] : memref<16x8x512xf32, #tpu.memory_space<vmem>>, vector<1x8x512xf32>
    %41 = vector.shape_cast %40 : vector<1x8x512xf32> to vector<8x512xf32>
    %42 = vector.shape_cast %39 : vector<8x512xf32> to vector<1x8x512xf32>
    tpu.vector_store %arg9[%c3_37, %c0_38, %c0_39], %42 {strides = array<i32>} : memref<16x8x512xf32, #tpu.memory_space<vmem>>, vector<1x8x512xf32>,
    %c4 = arith.constant 4 : index
    %c0_40 = arith.constant 0 : index
    %c0_41 = arith.constant 0 : index
    %43 = vector.load %arg2[%c4, %c0_40, %c0_41] : memref<16x8x32xf32, #tpu.memory_space<vmem>>, vector<1x8x32xf32>
    %44 = vector.shape_cast %43 : vector<1x8x32xf32> to vector<8x32xf32>
    %c0_42 = arith.constant 0 : index
    %c0_43 = arith.constant 0 : index
    %45 = vector.load %arg3[%c0_42, %c0_43] : memref<32x512xf32, #tpu.memory_space<vmem>>, vector<32x512xf32>
    %cst_44 = arith.constant dense<0.000000e+00> : vector<8x512xf32>
    %46 = tpu.matmul %44, %45, %cst_44 {dimension_numbers = #tpu.dot_dimension_numbers<[1], [0], [0], [1], [0, 0, 1, 1], [], []>} : vector<8x32xf32>, vector<32x512xf32>, vector<8x512xf32> -> vector<8x512xf32>
    %c0_45 = arith.constant 0 : index
    %c0_46 = arith.constant 0 : index
    %47 = vector.load %arg5[%c0_45, %c0_46] : memref<1x512xf32, #tpu.memory_space<vmem>>, vector<1x512xf32>
    %48 = vector.broadcast %47 : vector<1x512xf32> to vector<8x512xf32>
    %49 = arith.addf %46, %48 : vector<8x512xf32>
    %c4_47 = arith.constant 4 : index
    %c0_48 = arith.constant 0 : index
    %c0_49 = arith.constant 0 : index
    %50 = vector.load %arg9[%c4_47, %c0_48, %c0_49] : memref<16x8x512xf32, #tpu.memory_space<vmem>>, vector<1x8x512xf32>
    %51 = vector.shape_cast %50 : vector<1x8x512xf32> to vector<8x512xf32>
    %52 = vector.shape_cast %49 : vector<8x512xf32> to vector<1x8x512xf32>
    tpu.vector_store %arg9[%c4_47, %c0_48, %c0_49], %52 {strides = array<i32>} : memref<16x8x512xf32, #tpu.memory_space<vmem>>, vector<1x8x512xf32>,
    %c5 = arith.constant 5 : index
    %c0_50 = arith.constant 0 : index
    %c0_51 = arith.constant 0 : index
    %53 = vector.load %arg2[%c5, %c0_50, %c0_51] : memref<16x8x32xf32, #tpu.memory_space<vmem>>, vector<1x8x32xf32>
    %54 = vector.shape_cast %53 : vector<1x8x32xf32> to vector<8x32xf32>
    %c0_52 = arith.constant 0 : index
    %c0_53 = arith.constant 0 : index
    %55 = vector.load %arg3[%c0_52, %c0_53] : memref<32x512xf32, #tpu.memory_space<vmem>>, vector<32x512xf32>
    %cst_54 = arith.constant dense<0.000000e+00> : vector<8x512xf32>
    %56 = tpu.matmul %54, %55, %cst_54 {dimension_numbers = #tpu.dot_dimension_numbers<[1], [0], [0], [1], [0, 0, 1, 1], [], []>} : vector<8x32xf32>, vector<32x512xf32>, vector<8x512xf32> -> vector<8x512xf32>
    %c0_55 = arith.constant 0 : index
    %c0_56 = arith.constant 0 : index
    %57 = vector.load %arg5[%c0_55, %c0_56] : memref<1x512xf32, #tpu.memory_space<vmem>>, vector<1x512xf32>
    %58 = vector.broadcast %57 : vector<1x512xf32> to vector<8x512xf32>
    %59 = arith.addf %56, %58 : vector<8x512xf32>
    %c5_57 = arith.constant 5 : index
    %c0_58 = arith.constant 0 : index
    %c0_59 = arith.constant 0 : index
    %60 = vector.load %arg9[%c5_57, %c0_58, %c0_59] : memref<16x8x512xf32, #tpu.memory_space<vmem>>, vector<1x8x512xf32>
    %61 = vector.shape_cast %60 : vector<1x8x512xf32> to vector<8x512xf32>
    %62 = vector.shape_cast %59 : vector<8x512xf32> to vector<1x8x512xf32>
    tpu.vector_store %arg9[%c5_57, %c0_58, %c0_59], %62 {strides = array<i32>} : memref<16x8x512xf32, #tpu.memory_space<vmem>>, vector<1x8x512xf32>,
    %c6 = arith.constant 6 : index
    %c0_60 = arith.constant 0 : index
    %c0_61 = arith.constant 0 : index
    %63 = vector.load %arg2[%c6, %c0_60, %c0_61] : memref<16x8x32xf32, #tpu.memory_space<vmem>>, vector<1x8x32xf32>
    %64 = vector.shape_cast %63 : vector<1x8x32xf32> to vector<8x32xf32>
    %c0_62 = arith.constant 0 : index
    %c0_63 = arith.constant 0 : index
    %65 = vector.load %arg3[%c0_62, %c0_63] : memref<32x512xf32, #tpu.memory_space<vmem>>, vector<32x512xf32>
    %cst_64 = arith.constant dense<0.000000e+00> : vector<8x512xf32>
    %66 = tpu.matmul %64, %65, %cst_64 {dimension_numbers = #tpu.dot_dimension_numbers<[1], [0], [0], [1], [0, 0, 1, 1], [], []>} : vector<8x32xf32>, vector<32x512xf32>, vector<8x512xf32> -> vector<8x512xf32>
    %c0_65 = arith.constant 0 : index
    %c0_66 = arith.constant 0 : index
    %67 = vector.load %arg5[%c0_65, %c0_66] : memref<1x512xf32, #tpu.memory_space<vmem>>, vector<1x512xf32>
    %68 = vector.broadcast %67 : vector<1x512xf32> to vector<8x512xf32>
    %69 = arith.addf %66, %68 : vector<8x512xf32>
    %c6_67 = arith.constant 6 : index
    %c0_68 = arith.constant 0 : index
    %c0_69 = arith.constant 0 : index
    %70 = vector.load %arg9[%c6_67, %c0_68, %c0_69] : memref<16x8x512xf32, #tpu.memory_space<vmem>>, vector<1x8x512xf32>
    %71 = vector.shape_cast %70 : vector<1x8x512xf32> to vector<8x512xf32>
    %72 = vector.shape_cast %69 : vector<8x512xf32> to vector<1x8x512xf32>
    tpu.vector_store %arg9[%c6_67, %c0_68, %c0_69], %72 {strides = array<i32>} : memref<16x8x512xf32, #tpu.memory_space<vmem>>, vector<1x8x512xf32>,
    %c7 = arith.constant 7 : index
    %c0_70 = arith.constant 0 : index
    %c0_71 = arith.constant 0 : index
    %73 = vector.load %arg2[%c7, %c0_70, %c0_71] : memref<16x8x32xf32, #tpu.memory_space<vmem>>, vector<1x8x32xf32>
    %74 = vector.shape_cast %73 : vector<1x8x32xf32> to vector<8x32xf32>
    %c0_72 = arith.constant 0 : index
    %c0_73 = arith.constant 0 : index
    %75 = vector.load %arg3[%c0_72, %c0_73] : memref<32x512xf32, #tpu.memory_space<vmem>>, vector<32x512xf32>
    %cst_74 = arith.constant dense<0.000000e+00> : vector<8x512xf32>
    %76 = tpu.matmul %74, %75, %cst_74 {dimension_numbers = #tpu.dot_dimension_numbers<[1], [0], [0], [1], [0, 0, 1, 1], [], []>} : vector<8x32xf32>, vector<32x512xf32>, vector<8x512xf32> -> vector<8x512xf32>
    %c0_75 = arith.constant 0 : index
    %c0_76 = arith.constant 0 : index
    %77 = vector.load %arg5[%c0_75, %c0_76] : memref<1x512xf32, #tpu.memory_space<vmem>>, vector<1x512xf32>
    %78 = vector.broadcast %77 : vector<1x512xf32> to vector<8x512xf32>
    %79 = arith.addf %76, %78 : vector<8x512xf32>
    %c7_77 = arith.constant 7 : index
    %c0_78 = arith.constant 0 : index
    %c0_79 = arith.constant 0 : index
    %80 = vector.load %arg9[%c7_77, %c0_78, %c0_79] : memref<16x8x512xf32, #tpu.memory_space<vmem>>, vector<1x8x512xf32>
    %81 = vector.shape_cast %80 : vector<1x8x512xf32> to vector<8x512xf32>
    %82 = vector.shape_cast %79 : vector<8x512xf32> to vector<1x8x512xf32>
    tpu.vector_store %arg9[%c7_77, %c0_78, %c0_79], %82 {strides = array<i32>} : memref<16x8x512xf32, #tpu.memory_space<vmem>>, vector<1x8x512xf32>,
    %c8 = arith.constant 8 : index
    %c0_80 = arith.constant 0 : index
    %c0_81 = arith.constant 0 : index
    %83 = vector.load %arg2[%c8, %c0_80, %c0_81] : memref<16x8x32xf32, #tpu.memory_space<vmem>>, vector<1x8x32xf32>
    %84 = vector.shape_cast %83 : vector<1x8x32xf32> to vector<8x32xf32>
    %c0_82 = arith.constant 0 : index
    %c0_83 = arith.constant 0 : index
    %85 = vector.load %arg3[%c0_82, %c0_83] : memref<32x512xf32, #tpu.memory_space<vmem>>, vector<32x512xf32>
    %cst_84 = arith.constant dense<0.000000e+00> : vector<8x512xf32>
    %86 = tpu.matmul %84, %85, %cst_84 {dimension_numbers = #tpu.dot_dimension_numbers<[1], [0], [0], [1], [0, 0, 1, 1], [], []>} : vector<8x32xf32>, vector<32x512xf32>, vector<8x512xf32> -> vector<8x512xf32>
    %c0_85 = arith.constant 0 : index
    %c0_86 = arith.constant 0 : index
    %87 = vector.load %arg5[%c0_85, %c0_86] : memref<1x512xf32, #tpu.memory_space<vmem>>, vector<1x512xf32>
    %88 = vector.broadcast %87 : vector<1x512xf32> to vector<8x512xf32>
    %89 = arith.addf %86, %88 : vector<8x512xf32>
    %c8_87 = arith.constant 8 : index
    %c0_88 = arith.constant 0 : index
    %c0_89 = arith.constant 0 : index
    %90 = vector.load %arg9[%c8_87, %c0_88, %c0_89] : memref<16x8x512xf32, #tpu.memory_space<vmem>>, vector<1x8x512xf32>
    %91 = vector.shape_cast %90 : vector<1x8x512xf32> to vector<8x512xf32>
    %92 = vector.shape_cast %89 : vector<8x512xf32> to vector<1x8x512xf32>
    tpu.vector_store %arg9[%c8_87, %c0_88, %c0_89], %92 {strides = array<i32>} : memref<16x8x512xf32, #tpu.memory_space<vmem>>, vector<1x8x512xf32>,
    %c9 = arith.constant 9 : index
    %c0_90 = arith.constant 0 : index
    %c0_91 = arith.constant 0 : index
    %93 = vector.load %arg2[%c9, %c0_90, %c0_91] : memref<16x8x32xf32, #tpu.memory_space<vmem>>, vector<1x8x32xf32>
    %94 = vector.shape_cast %93 : vector<1x8x32xf32> to vector<8x32xf32>
    %c0_92 = arith.constant 0 : index
    %c0_93 = arith.constant 0 : index
    %95 = vector.load %arg3[%c0_92, %c0_93] : memref<32x512xf32, #tpu.memory_space<vmem>>, vector<32x512xf32>
    %cst_94 = arith.constant dense<0.000000e+00> : vector<8x512xf32>
    %96 = tpu.matmul %94, %95, %cst_94 {dimension_numbers = #tpu.dot_dimension_numbers<[1], [0], [0], [1], [0, 0, 1, 1], [], []>} : vector<8x32xf32>, vector<32x512xf32>, vector<8x512xf32> -> vector<8x512xf32>
    %c0_95 = arith.constant 0 : index
    %c0_96 = arith.constant 0 : index
    %97 = vector.load %arg5[%c0_95, %c0_96] : memref<1x512xf32, #tpu.memory_space<vmem>>, vector<1x512xf32>
    %98 = vector.broadcast %97 : vector<1x512xf32> to vector<8x512xf32>
    %99 = arith.addf %96, %98 : vector<8x512xf32>
    %c9_97 = arith.constant 9 : index
    %c0_98 = arith.constant 0 : index
    %c0_99 = arith.constant 0 : index
    %100 = vector.load %arg9[%c9_97, %c0_98, %c0_99] : memref<16x8x512xf32, #tpu.memory_space<vmem>>, vector<1x8x512xf32>
    %101 = vector.shape_cast %100 : vector<1x8x512xf32> to vector<8x512xf32>
    %102 = vector.shape_cast %99 : vector<8x512xf32> to vector<1x8x512xf32>
    tpu.vector_store %arg9[%c9_97, %c0_98, %c0_99], %102 {strides = array<i32>} : memref<16x8x512xf32, #tpu.memory_space<vmem>>, vector<1x8x512xf32>,
    %c10 = arith.constant 10 : index
    %c0_100 = arith.constant 0 : index
    %c0_101 = arith.constant 0 : index
    %103 = vector.load %arg2[%c10, %c0_100, %c0_101] : memref<16x8x32xf32, #tpu.memory_space<vmem>>, vector<1x8x32xf32>
    %104 = vector.shape_cast %103 : vector<1x8x32xf32> to vector<8x32xf32>
    %c0_102 = arith.constant 0 : index
    %c0_103 = arith.constant 0 : index
    %105 = vector.load %arg3[%c0_102, %c0_103] : memref<32x512xf32, #tpu.memory_space<vmem>>, vector<32x512xf32>
    %cst_104 = arith.constant dense<0.000000e+00> : vector<8x512xf32>
    %106 = tpu.matmul %104, %105, %cst_104 {dimension_numbers = #tpu.dot_dimension_numbers<[1], [0], [0], [1], [0, 0, 1, 1], [], []>} : vector<8x32xf32>, vector<32x512xf32>, vector<8x512xf32> -> vector<8x512xf32>
    %c0_105 = arith.constant 0 : index
    %c0_106 = arith.constant 0 : index
    %107 = vector.load %arg5[%c0_105, %c0_106] : memref<1x512xf32, #tpu.memory_space<vmem>>, vector<1x512xf32>
    %108 = vector.broadcast %107 : vector<1x512xf32> to vector<8x512xf32>
    %109 = arith.addf %106, %108 : vector<8x512xf32>
    %c10_107 = arith.constant 10 : index
    %c0_108 = arith.constant 0 : index
    %c0_109 = arith.constant 0 : index
    %110 = vector.load %arg9[%c10_107, %c0_108, %c0_109] : memref<16x8x512xf32, #tpu.memory_space<vmem>>, vector<1x8x512xf32>
    %111 = vector.shape_cast %110 : vector<1x8x512xf32> to vector<8x512xf32>
    %112 = vector.shape_cast %109 : vector<8x512xf32> to vector<1x8x512xf32>
    tpu.vector_store %arg9[%c10_107, %c0_108, %c0_109], %112 {strides = array<i32>} : memref<16x8x512xf32, #tpu.memory_space<vmem>>, vector<1x8x512xf32>,
    %c11 = arith.constant 11 : index
    %c0_110 = arith.constant 0 : index
    %c0_111 = arith.constant 0 : index
    %113 = vector.load %arg2[%c11, %c0_110, %c0_111] : memref<16x8x32xf32, #tpu.memory_space<vmem>>, vector<1x8x32xf32>
    %114 = vector.shape_cast %113 : vector<1x8x32xf32> to vector<8x32xf32>
    %c0_112 = arith.constant 0 : index
    %c0_113 = arith.constant 0 : index
    %115 = vector.load %arg3[%c0_112, %c0_113] : memref<32x512xf32, #tpu.memory_space<vmem>>, vector<32x512xf32>
    %cst_114 = arith.constant dense<0.000000e+00> : vector<8x512xf32>
    %116 = tpu.matmul %114, %115, %cst_114 {dimension_numbers = #tpu.dot_dimension_numbers<[1], [0], [0], [1], [0, 0, 1, 1], [], []>} : vector<8x32xf32>, vector<32x512xf32>, vector<8x512xf32> -> vector<8x512xf32>
    %c0_115 = arith.constant 0 : index
    %c0_116 = arith.constant 0 : index
    %117 = vector.load %arg5[%c0_115, %c0_116] : memref<1x512xf32, #tpu.memory_space<vmem>>, vector<1x512xf32>
    %118 = vector.broadcast %117 : vector<1x512xf32> to vector<8x512xf32>
    %119 = arith.addf %116, %118 : vector<8x512xf32>
    %c11_117 = arith.constant 11 : index
    %c0_118 = arith.constant 0 : index
    %c0_119 = arith.constant 0 : index
    %120 = vector.load %arg9[%c11_117, %c0_118, %c0_119] : memref<16x8x512xf32, #tpu.memory_space<vmem>>, vector<1x8x512xf32>
    %121 = vector.shape_cast %120 : vector<1x8x512xf32> to vector<8x512xf32>
    %122 = vector.shape_cast %119 : vector<8x512xf32> to vector<1x8x512xf32>
    tpu.vector_store %arg9[%c11_117, %c0_118, %c0_119], %122 {strides = array<i32>} : memref<16x8x512xf32, #tpu.memory_space<vmem>>, vector<1x8x512xf32>,
    %c12 = arith.constant 12 : index
    %c0_120 = arith.constant 0 : index
    %c0_121 = arith.constant 0 : index
    %123 = vector.load %arg2[%c12, %c0_120, %c0_121] : memref<16x8x32xf32, #tpu.memory_space<vmem>>, vector<1x8x32xf32>
    %124 = vector.shape_cast %123 : vector<1x8x32xf32> to vector<8x32xf32>
    %c0_122 = arith.constant 0 : index
    %c0_123 = arith.constant 0 : index
    %125 = vector.load %arg3[%c0_122, %c0_123] : memref<32x512xf32, #tpu.memory_space<vmem>>, vector<32x512xf32>
    %cst_124 = arith.constant dense<0.000000e+00> : vector<8x512xf32>
    %126 = tpu.matmul %124, %125, %cst_124 {dimension_numbers = #tpu.dot_dimension_numbers<[1], [0], [0], [1], [0, 0, 1, 1], [], []>} : vector<8x32xf32>, vector<32x512xf32>, vector<8x512xf32> -> vector<8x512xf32>
    %c0_125 = arith.constant 0 : index
    %c0_126 = arith.constant 0 : index
    %127 = vector.load %arg5[%c0_125, %c0_126] : memref<1x512xf32, #tpu.memory_space<vmem>>, vector<1x512xf32>
    %128 = vector.broadcast %127 : vector<1x512xf32> to vector<8x512xf32>
    %129 = arith.addf %126, %128 : vector<8x512xf32>
    %c12_127 = arith.constant 12 : index
    %c0_128 = arith.constant 0 : index
    %c0_129 = arith.constant 0 : index
    %130 = vector.load %arg9[%c12_127, %c0_128, %c0_129] : memref<16x8x512xf32, #tpu.memory_space<vmem>>, vector<1x8x512xf32>
    %131 = vector.shape_cast %130 : vector<1x8x512xf32> to vector<8x512xf32>
    %132 = vector.shape_cast %129 : vector<8x512xf32> to vector<1x8x512xf32>
    tpu.vector_store %arg9[%c12_127, %c0_128, %c0_129], %132 {strides = array<i32>} : memref<16x8x512xf32, #tpu.memory_space<vmem>>, vector<1x8x512xf32>,
    %c13 = arith.constant 13 : index
    %c0_130 = arith.constant 0 : index
    %c0_131 = arith.constant 0 : index
    %133 = vector.load %arg2[%c13, %c0_130, %c0_131] : memref<16x8x32xf32, #tpu.memory_space<vmem>>, vector<1x8x32xf32>
    %134 = vector.shape_cast %133 : vector<1x8x32xf32> to vector<8x32xf32>
    %c0_132 = arith.constant 0 : index
    %c0_133 = arith.constant 0 : index
    %135 = vector.load %arg3[%c0_132, %c0_133] : memref<32x512xf32, #tpu.memory_space<vmem>>, vector<32x512xf32>
    %cst_134 = arith.constant dense<0.000000e+00> : vector<8x512xf32>
    %136 = tpu.matmul %134, %135, %cst_134 {dimension_numbers = #tpu.dot_dimension_numbers<[1], [0], [0], [1], [0, 0, 1, 1], [], []>} : vector<8x32xf32>, vector<32x512xf32>, vector<8x512xf32> -> vector<8x512xf32>
    %c0_135 = arith.constant 0 : index
    %c0_136 = arith.constant 0 : index
    %137 = vector.load %arg5[%c0_135, %c0_136] : memref<1x512xf32, #tpu.memory_space<vmem>>, vector<1x512xf32>
    %138 = vector.broadcast %137 : vector<1x512xf32> to vector<8x512xf32>
    %139 = arith.addf %136, %138 : vector<8x512xf32>
    %c13_137 = arith.constant 13 : index
    %c0_138 = arith.constant 0 : index
    %c0_139 = arith.constant 0 : index
    %140 = vector.load %arg9[%c13_137, %c0_138, %c0_139] : memref<16x8x512xf32, #tpu.memory_space<vmem>>, vector<1x8x512xf32>
    %141 = vector.shape_cast %140 : vector<1x8x512xf32> to vector<8x512xf32>
    %142 = vector.shape_cast %139 : vector<8x512xf32> to vector<1x8x512xf32>
    tpu.vector_store %arg9[%c13_137, %c0_138, %c0_139], %142 {strides = array<i32>} : memref<16x8x512xf32, #tpu.memory_space<vmem>>, vector<1x8x512xf32>,
    %c14 = arith.constant 14 : index
    %c0_140 = arith.constant 0 : index
    %c0_141 = arith.constant 0 : index
    %143 = vector.load %arg2[%c14, %c0_140, %c0_141] : memref<16x8x32xf32, #tpu.memory_space<vmem>>, vector<1x8x32xf32>
    %144 = vector.shape_cast %143 : vector<1x8x32xf32> to vector<8x32xf32>
    %c0_142 = arith.constant 0 : index
    %c0_143 = arith.constant 0 : index
    %145 = vector.load %arg3[%c0_142, %c0_143] : memref<32x512xf32, #tpu.memory_space<vmem>>, vector<32x512xf32>
    %cst_144 = arith.constant dense<0.000000e+00> : vector<8x512xf32>
    %146 = tpu.matmul %144, %145, %cst_144 {dimension_numbers = #tpu.dot_dimension_numbers<[1], [0], [0], [1], [0, 0, 1, 1], [], []>} : vector<8x32xf32>, vector<32x512xf32>, vector<8x512xf32> -> vector<8x512xf32>
    %c0_145 = arith.constant 0 : index
    %c0_146 = arith.constant 0 : index
    %147 = vector.load %arg5[%c0_145, %c0_146] : memref<1x512xf32, #tpu.memory_space<vmem>>, vector<1x512xf32>
    %148 = vector.broadcast %147 : vector<1x512xf32> to vector<8x512xf32>
    %149 = arith.addf %146, %148 : vector<8x512xf32>
    %c14_147 = arith.constant 14 : index
    %c0_148 = arith.constant 0 : index
    %c0_149 = arith.constant 0 : index
    %150 = vector.load %arg9[%c14_147, %c0_148, %c0_149] : memref<16x8x512xf32, #tpu.memory_space<vmem>>, vector<1x8x512xf32>
    %151 = vector.shape_cast %150 : vector<1x8x512xf32> to vector<8x512xf32>
    %152 = vector.shape_cast %149 : vector<8x512xf32> to vector<1x8x512xf32>
    tpu.vector_store %arg9[%c14_147, %c0_148, %c0_149], %152 {strides = array<i32>} : memref<16x8x512xf32, #tpu.memory_space<vmem>>, vector<1x8x512xf32>,
    %c15 = arith.constant 15 : index
    %c0_150 = arith.constant 0 : index
    %c0_151 = arith.constant 0 : index
    %153 = vector.load %arg2[%c15, %c0_150, %c0_151] : memref<16x8x32xf32, #tpu.memory_space<vmem>>, vector<1x8x32xf32>
    %154 = vector.shape_cast %153 : vector<1x8x32xf32> to vector<8x32xf32>
    %c0_152 = arith.constant 0 : index
    %c0_153 = arith.constant 0 : index
    %155 = vector.load %arg3[%c0_152, %c0_153] : memref<32x512xf32, #tpu.memory_space<vmem>>, vector<32x512xf32>
    %cst_154 = arith.constant dense<0.000000e+00> : vector<8x512xf32>
    %156 = tpu.matmul %154, %155, %cst_154 {dimension_numbers = #tpu.dot_dimension_numbers<[1], [0], [0], [1], [0, 0, 1, 1], [], []>} : vector<8x32xf32>, vector<32x512xf32>, vector<8x512xf32> -> vector<8x512xf32>
    %c0_155 = arith.constant 0 : index
    %c0_156 = arith.constant 0 : index
    %157 = vector.load %arg5[%c0_155, %c0_156] : memref<1x512xf32, #tpu.memory_space<vmem>>, vector<1x512xf32>
    %158 = vector.broadcast %157 : vector<1x512xf32> to vector<8x512xf32>
    %159 = arith.addf %156, %158 : vector<8x512xf32>
    %c15_157 = arith.constant 15 : index
    %c0_158 = arith.constant 0 : index
    %c0_159 = arith.constant 0 : index
    %160 = vector.load %arg9[%c15_157, %c0_158, %c0_159] : memref<16x8x512xf32, #tpu.memory_space<vmem>>, vector<1x8x512xf32>
    %161 = vector.shape_cast %160 : vector<1x8x512xf32> to vector<8x512xf32>
    %162 = vector.shape_cast %159 : vector<8x512xf32> to vector<1x8x512xf32>
    tpu.vector_store %arg9[%c15_157, %c0_158, %c0_159], %162 {strides = array<i32>} : memref<16x8x512xf32, #tpu.memory_space<vmem>>, vector<1x8x512xf32>,
    %c0_160 = arith.constant 0 : index
    %c0_161 = arith.constant 0 : index
    %163 = vector.load %arg10[%c0_160, %c0_161] : memref<8x128xf32, #tpu.memory_space<vmem>>, vector<8x128xf32>
    %c0_162 = arith.constant 0 : index
    %c0_163 = arith.constant 0 : index
    %164 = vector.load %arg11[%c0_162, %c0_163] : memref<8x128xf32, #tpu.memory_space<vmem>>, vector<8x128xf32>
    %c0_164 = arith.constant 0 : index
    %c0_165 = arith.constant 0 : index
    %c0_166 = arith.constant 0 : index
    %165 = vector.load %arg9[%c0_164, %c0_165, %c0_166] : memref<16x8x512xf32, #tpu.memory_space<vmem>>, vector<1x8x512xf32>
    %166 = vector.shape_cast %165 : vector<1x8x512xf32> to vector<8x512xf32>
    %c0_167 = arith.constant 0 : index
    %c0_168 = arith.constant 0 : index
    %167 = vector.load %arg4[%c0_167, %c0_168] : memref<128x512xf32, #tpu.memory_space<vmem>>, vector<128x512xf32>
    %cst_169 = arith.constant dense<0.000000e+00> : vector<8x512xf32>
    %168 = tpu.matmul %163, %167, %cst_169 {dimension_numbers = #tpu.dot_dimension_numbers<[1], [0], [0], [1], [0, 0, 1, 1], [], []>} : vector<8x128xf32>, vector<128x512xf32>, vector<8x512xf32> -> vector<8x512xf32>
    %169 = arith.addf %166, %168 : vector<8x512xf32>
    %170 = vector.extract_strided_slice %169 {offsets = [0, 0], sizes = [8, 128], strides = [1, 1]} : vector<8x512xf32> to vector<8x128xf32>
    %171 = arith.negf %170 : vector<8x128xf32>
    %172 = math.exp %171 : vector<8x128xf32>
    %cst_170 = arith.constant 1.000000e+00 : f32
    %173 = vector.broadcast %cst_170 : f32 to vector<8x128xf32>
    %174 = arith.addf %173, %172 : vector<8x128xf32>
    %175 = arith.divf %173, %174 : vector<8x128xf32>
    %176 = vector.extract_strided_slice %169 {offsets = [0, 128], sizes = [8, 128], strides = [1, 1]} : vector<8x512xf32> to vector<8x128xf32>
    %177 = arith.negf %176 : vector<8x128xf32>
    %178 = math.exp %177 : vector<8x128xf32>
    %cst_171 = arith.constant 1.000000e+00 : f32
    %179 = vector.broadcast %cst_171 : f32 to vector<8x128xf32>
    %180 = arith.addf %179, %178 : vector<8x128xf32>
    %181 = arith.divf %179, %180 : vector<8x128xf32>
    %182 = vector.extract_strided_slice %169 {offsets = [0, 256], sizes = [8, 128], strides = [1, 1]} : vector<8x512xf32> to vector<8x128xf32>
    %183 = math.tanh %182 : vector<8x128xf32>
    %184 = vector.extract_strided_slice %169 {offsets = [0, 384], sizes = [8, 128], strides = [1, 1]} : vector<8x512xf32> to vector<8x128xf32>
    %185 = arith.negf %184 : vector<8x128xf32>
    %186 = math.exp %185 : vector<8x128xf32>
    %cst_172 = arith.constant 1.000000e+00 : f32
    %187 = vector.broadcast %cst_172 : f32 to vector<8x128xf32>
    %188 = arith.addf %187, %186 : vector<8x128xf32>
    %189 = arith.divf %187, %188 : vector<8x128xf32>
    %190 = arith.mulf %181, %164 : vector<8x128xf32>
    %191 = arith.mulf %175, %183 : vector<8x128xf32>
    %192 = arith.addf %190, %191 : vector<8x128xf32>
    %193 = math.tanh %192 : vector<8x128xf32>
    %194 = arith.mulf %189, %193 : vector<8x128xf32>
    %c0_173 = arith.constant 0 : index
    %c0_174 = arith.constant 0 : index
    %195 = vector.load %arg6[%c0_173, %c0_174] : memref<128x128xf32, #tpu.memory_space<vmem>>, vector<128x128xf32>
    %cst_175 = arith.constant dense<0.000000e+00> : vector<8x128xf32>
    %196 = tpu.matmul %194, %195, %cst_175 {dimension_numbers = #tpu.dot_dimension_numbers<[1], [0], [0], [1], [0, 0, 1, 1], [], []>} : vector<8x128xf32>, vector<128x128xf32>, vector<8x128xf32> -> vector<8x128xf32>
    %c0_176 = arith.constant 0 : index
    %c0_177 = arith.constant 0 : index
    %197 = vector.load %arg7[%c0_176, %c0_177] : memref<1x128xf32, #tpu.memory_space<vmem>>, vector<1x128xf32>
    %198 = vector.broadcast %197 : vector<1x128xf32> to vector<8x128xf32>
    %199 = arith.addf %196, %198 : vector<8x128xf32>
    %cst_178 = arith.constant dense<0xFF800000> : vector<8xf32>
    %200 = vector.multi_reduction <maximumf>, %199, %cst_178 [1] : vector<8x128xf32> to vector<8xf32>
    %cst_179 = arith.constant 0xFF800000 : f32
    %201 = vector.broadcast %cst_179 : f32 to vector<8xf32>
    %202 = arith.maximumf %201, %200 : vector<8xf32>
    %203 = vector.shape_cast %202 : vector<8xf32> to vector<8x1xf32>
    %204 = vector.broadcast %203 : vector<8x1xf32> to vector<8x128xf32>
    %205 = arith.subf %199, %204 : vector<8x128xf32>
    %206 = math.exp %205 : vector<8x128xf32>
    %cst_180 = arith.constant dense<0.000000e+00> : vector<8xf32>
    %207 = vector.multi_reduction <add>, %206, %cst_180 [1] : vector<8x128xf32> to vector<8xf32>
    %208 = vector.shape_cast %207 : vector<8xf32> to vector<8x1xf32>
    %209 = math.log %208 : vector<8x1xf32>
    %210 = vector.broadcast %209 : vector<8x1xf32> to vector<8x128xf32>
    %211 = arith.subf %205, %210 : vector<8x128xf32>
    %c0_181 = arith.constant 0 : index
    %c0_182 = arith.constant 0 : index
    %c0_183 = arith.constant 0 : index
    %212 = vector.load %arg8[%c0_181, %c0_182, %c0_183] : memref<16x8x128xf32, #tpu.memory_space<vmem>>, vector<1x8x128xf32>
    %213 = vector.shape_cast %212 : vector<1x8x128xf32> to vector<8x128xf32>
    %214 = vector.shape_cast %211 : vector<8x128xf32> to vector<1x8x128xf32>
    tpu.vector_store %arg8[%c0_181, %c0_182, %c0_183], %214 {strides = array<i32>} : memref<16x8x128xf32, #tpu.memory_space<vmem>>, vector<1x8x128xf32>,
    %c1_184 = arith.constant 1 : index
    %c0_185 = arith.constant 0 : index
    %c0_186 = arith.constant 0 : index
    %215 = vector.load %arg9[%c1_184, %c0_185, %c0_186] : memref<16x8x512xf32, #tpu.memory_space<vmem>>, vector<1x8x512xf32>
    %216 = vector.shape_cast %215 : vector<1x8x512xf32> to vector<8x512xf32>
    %c0_187 = arith.constant 0 : index
    %c0_188 = arith.constant 0 : index
    %217 = vector.load %arg4[%c0_187, %c0_188] : memref<128x512xf32, #tpu.memory_space<vmem>>, vector<128x512xf32>
    %cst_189 = arith.constant dense<0.000000e+00> : vector<8x512xf32>
    %218 = tpu.matmul %194, %217, %cst_189 {dimension_numbers = #tpu.dot_dimension_numbers<[1], [0], [0], [1], [0, 0, 1, 1], [], []>} : vector<8x128xf32>, vector<128x512xf32>, vector<8x512xf32> -> vector<8x512xf32>
    %219 = arith.addf %216, %218 : vector<8x512xf32>
    %220 = vector.extract_strided_slice %219 {offsets = [0, 0], sizes = [8, 128], strides = [1, 1]} : vector<8x512xf32> to vector<8x128xf32>
    %221 = arith.negf %220 : vector<8x128xf32>
    %222 = math.exp %221 : vector<8x128xf32>
    %cst_190 = arith.constant 1.000000e+00 : f32
    %223 = vector.broadcast %cst_190 : f32 to vector<8x128xf32>
    %224 = arith.addf %223, %222 : vector<8x128xf32>
    %225 = arith.divf %223, %224 : vector<8x128xf32>
    %226 = vector.extract_strided_slice %219 {offsets = [0, 128], sizes = [8, 128], strides = [1, 1]} : vector<8x512xf32> to vector<8x128xf32>
    %227 = arith.negf %226 : vector<8x128xf32>
    %228 = math.exp %227 : vector<8x128xf32>
    %cst_191 = arith.constant 1.000000e+00 : f32
    %229 = vector.broadcast %cst_191 : f32 to vector<8x128xf32>
    %230 = arith.addf %229, %228 : vector<8x128xf32>
    %231 = arith.divf %229, %230 : vector<8x128xf32>
    %232 = vector.extract_strided_slice %219 {offsets = [0, 256], sizes = [8, 128], strides = [1, 1]} : vector<8x512xf32> to vector<8x128xf32>
    %233 = math.tanh %232 : vector<8x128xf32>
    %234 = vector.extract_strided_slice %219 {offsets = [0, 384], sizes = [8, 128], strides = [1, 1]} : vector<8x512xf32> to vector<8x128xf32>
    %235 = arith.negf %234 : vector<8x128xf32>
    %236 = math.exp %235 : vector<8x128xf32>
    %cst_192 = arith.constant 1.000000e+00 : f32
    %237 = vector.broadcast %cst_192 : f32 to vector<8x128xf32>
    %238 = arith.addf %237, %236 : vector<8x128xf32>
    %239 = arith.divf %237, %238 : vector<8x128xf32>
    %240 = arith.mulf %231, %192 : vector<8x128xf32>
    %241 = arith.mulf %225, %233 : vector<8x128xf32>
    %242 = arith.addf %240, %241 : vector<8x128xf32>
    %243 = math.tanh %242 : vector<8x128xf32>
    %244 = arith.mulf %239, %243 : vector<8x128xf32>
    %c0_193 = arith.constant 0 : index
    %c0_194 = arith.constant 0 : index
    %245 = vector.load %arg6[%c0_193, %c0_194] : memref<128x128xf32, #tpu.memory_space<vmem>>, vector<128x128xf32>
    %cst_195 = arith.constant dense<0.000000e+00> : vector<8x128xf32>
    %246 = tpu.matmul %244, %245, %cst_195 {dimension_numbers = #tpu.dot_dimension_numbers<[1], [0], [0], [1], [0, 0, 1, 1], [], []>} : vector<8x128xf32>, vector<128x128xf32>, vector<8x128xf32> -> vector<8x128xf32>
    %c0_196 = arith.constant 0 : index
    %c0_197 = arith.constant 0 : index
    %247 = vector.load %arg7[%c0_196, %c0_197] : memref<1x128xf32, #tpu.memory_space<vmem>>, vector<1x128xf32>
    %248 = vector.broadcast %247 : vector<1x128xf32> to vector<8x128xf32>
    %249 = arith.addf %246, %248 : vector<8x128xf32>
    %cst_198 = arith.constant dense<0xFF800000> : vector<8xf32>
    %250 = vector.multi_reduction <maximumf>, %249, %cst_198 [1] : vector<8x128xf32> to vector<8xf32>
    %cst_199 = arith.constant 0xFF800000 : f32
    %251 = vector.broadcast %cst_199 : f32 to vector<8xf32>
    %252 = arith.maximumf %251, %250 : vector<8xf32>
    %253 = vector.shape_cast %252 : vector<8xf32> to vector<8x1xf32>
    %254 = vector.broadcast %253 : vector<8x1xf32> to vector<8x128xf32>
    %255 = arith.subf %249, %254 : vector<8x128xf32>
    %256 = math.exp %255 : vector<8x128xf32>
    %cst_200 = arith.constant dense<0.000000e+00> : vector<8xf32>
    %257 = vector.multi_reduction <add>, %256, %cst_200 [1] : vector<8x128xf32> to vector<8xf32>
    %258 = vector.shape_cast %257 : vector<8xf32> to vector<8x1xf32>
    %259 = math.log %258 : vector<8x1xf32>
    %260 = vector.broadcast %259 : vector<8x1xf32> to vector<8x128xf32>
    %261 = arith.subf %255, %260 : vector<8x128xf32>
    %c1_201 = arith.constant 1 : index
    %c0_202 = arith.constant 0 : index
    %c0_203 = arith.constant 0 : index
    %262 = vector.load %arg8[%c1_201, %c0_202, %c0_203] : memref<16x8x128xf32, #tpu.memory_space<vmem>>, vector<1x8x128xf32>
    %263 = vector.shape_cast %262 : vector<1x8x128xf32> to vector<8x128xf32>
    %264 = vector.shape_cast %261 : vector<8x128xf32> to vector<1x8x128xf32>
    tpu.vector_store %arg8[%c1_201, %c0_202, %c0_203], %264 {strides = array<i32>} : memref<16x8x128xf32, #tpu.memory_space<vmem>>, vector<1x8x128xf32>,
    %c2_204 = arith.constant 2 : index
    %c0_205 = arith.constant 0 : index
    %c0_206 = arith.constant 0 : index
    %265 = vector.load %arg9[%c2_204, %c0_205, %c0_206] : memref<16x8x512xf32, #tpu.memory_space<vmem>>, vector<1x8x512xf32>
    %266 = vector.shape_cast %265 : vector<1x8x512xf32> to vector<8x512xf32>
    %c0_207 = arith.constant 0 : index
    %c0_208 = arith.constant 0 : index
    %267 = vector.load %arg4[%c0_207, %c0_208] : memref<128x512xf32, #tpu.memory_space<vmem>>, vector<128x512xf32>
    %cst_209 = arith.constant dense<0.000000e+00> : vector<8x512xf32>
    %268 = tpu.matmul %244, %267, %cst_209 {dimension_numbers = #tpu.dot_dimension_numbers<[1], [0], [0], [1], [0, 0, 1, 1], [], []>} : vector<8x128xf32>, vector<128x512xf32>, vector<8x512xf32> -> vector<8x512xf32>
    %269 = arith.addf %266, %268 : vector<8x512xf32>
    %270 = vector.extract_strided_slice %269 {offsets = [0, 0], sizes = [8, 128], strides = [1, 1]} : vector<8x512xf32> to vector<8x128xf32>
    %271 = arith.negf %270 : vector<8x128xf32>
    %272 = math.exp %271 : vector<8x128xf32>
    %cst_210 = arith.constant 1.000000e+00 : f32
    %273 = vector.broadcast %cst_210 : f32 to vector<8x128xf32>
    %274 = arith.addf %273, %272 : vector<8x128xf32>
    %275 = arith.divf %273, %274 : vector<8x128xf32>
    %276 = vector.extract_strided_slice %269 {offsets = [0, 128], sizes = [8, 128], strides = [1, 1]} : vector<8x512xf32> to vector<8x128xf32>
    %277 = arith.negf %276 : vector<8x128xf32>
    %278 = math.exp %277 : vector<8x128xf32>
    %cst_211 = arith.constant 1.000000e+00 : f32
    %279 = vector.broadcast %cst_211 : f32 to vector<8x128xf32>
    %280 = arith.addf %279, %278 : vector<8x128xf32>
    %281 = arith.divf %279, %280 : vector<8x128xf32>
    %282 = vector.extract_strided_slice %269 {offsets = [0, 256], sizes = [8, 128], strides = [1, 1]} : vector<8x512xf32> to vector<8x128xf32>
    %283 = math.tanh %282 : vector<8x128xf32>
    %284 = vector.extract_strided_slice %269 {offsets = [0, 384], sizes = [8, 128], strides = [1, 1]} : vector<8x512xf32> to vector<8x128xf32>
    %285 = arith.negf %284 : vector<8x128xf32>
    %286 = math.exp %285 : vector<8x128xf32>
    %cst_212 = arith.constant 1.000000e+00 : f32
    %287 = vector.broadcast %cst_212 : f32 to vector<8x128xf32>
    %288 = arith.addf %287, %286 : vector<8x128xf32>
    %289 = arith.divf %287, %288 : vector<8x128xf32>
    %290 = arith.mulf %281, %242 : vector<8x128xf32>
    %291 = arith.mulf %275, %283 : vector<8x128xf32>
    %292 = arith.addf %290, %291 : vector<8x128xf32>
    %293 = math.tanh %292 : vector<8x128xf32>
    %294 = arith.mulf %289, %293 : vector<8x128xf32>
    %c0_213 = arith.constant 0 : index
    %c0_214 = arith.constant 0 : index
    %295 = vector.load %arg6[%c0_213, %c0_214] : memref<128x128xf32, #tpu.memory_space<vmem>>, vector<128x128xf32>
    %cst_215 = arith.constant dense<0.000000e+00> : vector<8x128xf32>
    %296 = tpu.matmul %294, %295, %cst_215 {dimension_numbers = #tpu.dot_dimension_numbers<[1], [0], [0], [1], [0, 0, 1, 1], [], []>} : vector<8x128xf32>, vector<128x128xf32>, vector<8x128xf32> -> vector<8x128xf32>
    %c0_216 = arith.constant 0 : index
    %c0_217 = arith.constant 0 : index
    %297 = vector.load %arg7[%c0_216, %c0_217] : memref<1x128xf32, #tpu.memory_space<vmem>>, vector<1x128xf32>
    %298 = vector.broadcast %297 : vector<1x128xf32> to vector<8x128xf32>
    %299 = arith.addf %296, %298 : vector<8x128xf32>
    %cst_218 = arith.constant dense<0xFF800000> : vector<8xf32>
    %300 = vector.multi_reduction <maximumf>, %299, %cst_218 [1] : vector<8x128xf32> to vector<8xf32>
    %cst_219 = arith.constant 0xFF800000 : f32
    %301 = vector.broadcast %cst_219 : f32 to vector<8xf32>
    %302 = arith.maximumf %301, %300 : vector<8xf32>
    %303 = vector.shape_cast %302 : vector<8xf32> to vector<8x1xf32>
    %304 = vector.broadcast %303 : vector<8x1xf32> to vector<8x128xf32>
    %305 = arith.subf %299, %304 : vector<8x128xf32>
    %306 = math.exp %305 : vector<8x128xf32>
    %cst_220 = arith.constant dense<0.000000e+00> : vector<8xf32>
    %307 = vector.multi_reduction <add>, %306, %cst_220 [1] : vector<8x128xf32> to vector<8xf32>
    %308 = vector.shape_cast %307 : vector<8xf32> to vector<8x1xf32>
    %309 = math.log %308 : vector<8x1xf32>
    %310 = vector.broadcast %309 : vector<8x1xf32> to vector<8x128xf32>
    %311 = arith.subf %305, %310 : vector<8x128xf32>
    %c2_221 = arith.constant 2 : index
    %c0_222 = arith.constant 0 : index
    %c0_223 = arith.constant 0 : index
    %312 = vector.load %arg8[%c2_221, %c0_222, %c0_223] : memref<16x8x128xf32, #tpu.memory_space<vmem>>, vector<1x8x128xf32>
    %313 = vector.shape_cast %312 : vector<1x8x128xf32> to vector<8x128xf32>
    %314 = vector.shape_cast %311 : vector<8x128xf32> to vector<1x8x128xf32>
    tpu.vector_store %arg8[%c2_221, %c0_222, %c0_223], %314 {strides = array<i32>} : memref<16x8x128xf32, #tpu.memory_space<vmem>>, vector<1x8x128xf32>,
    %c3_224 = arith.constant 3 : index
    %c0_225 = arith.constant 0 : index
    %c0_226 = arith.constant 0 : index
    %315 = vector.load %arg9[%c3_224, %c0_225, %c0_226] : memref<16x8x512xf32, #tpu.memory_space<vmem>>, vector<1x8x512xf32>
    %316 = vector.shape_cast %315 : vector<1x8x512xf32> to vector<8x512xf32>
    %c0_227 = arith.constant 0 : index
    %c0_228 = arith.constant 0 : index
    %317 = vector.load %arg4[%c0_227, %c0_228] : memref<128x512xf32, #tpu.memory_space<vmem>>, vector<128x512xf32>
    %cst_229 = arith.constant dense<0.000000e+00> : vector<8x512xf32>
    %318 = tpu.matmul %294, %317, %cst_229 {dimension_numbers = #tpu.dot_dimension_numbers<[1], [0], [0], [1], [0, 0, 1, 1], [], []>} : vector<8x128xf32>, vector<128x512xf32>, vector<8x512xf32> -> vector<8x512xf32>
    %319 = arith.addf %316, %318 : vector<8x512xf32>
    %320 = vector.extract_strided_slice %319 {offsets = [0, 0], sizes = [8, 128], strides = [1, 1]} : vector<8x512xf32> to vector<8x128xf32>
    %321 = arith.negf %320 : vector<8x128xf32>
    %322 = math.exp %321 : vector<8x128xf32>
    %cst_230 = arith.constant 1.000000e+00 : f32
    %323 = vector.broadcast %cst_230 : f32 to vector<8x128xf32>
    %324 = arith.addf %323, %322 : vector<8x128xf32>
    %325 = arith.divf %323, %324 : vector<8x128xf32>
    %326 = vector.extract_strided_slice %319 {offsets = [0, 128], sizes = [8, 128], strides = [1, 1]} : vector<8x512xf32> to vector<8x128xf32>
    %327 = arith.negf %326 : vector<8x128xf32>
    %328 = math.exp %327 : vector<8x128xf32>
    %cst_231 = arith.constant 1.000000e+00 : f32
    %329 = vector.broadcast %cst_231 : f32 to vector<8x128xf32>
    %330 = arith.addf %329, %328 : vector<8x128xf32>
    %331 = arith.divf %329, %330 : vector<8x128xf32>
    %332 = vector.extract_strided_slice %319 {offsets = [0, 256], sizes = [8, 128], strides = [1, 1]} : vector<8x512xf32> to vector<8x128xf32>
    %333 = math.tanh %332 : vector<8x128xf32>
    %334 = vector.extract_strided_slice %319 {offsets = [0, 384], sizes = [8, 128], strides = [1, 1]} : vector<8x512xf32> to vector<8x128xf32>
    %335 = arith.negf %334 : vector<8x128xf32>
    %336 = math.exp %335 : vector<8x128xf32>
    %cst_232 = arith.constant 1.000000e+00 : f32
    %337 = vector.broadcast %cst_232 : f32 to vector<8x128xf32>
    %338 = arith.addf %337, %336 : vector<8x128xf32>
    %339 = arith.divf %337, %338 : vector<8x128xf32>
    %340 = arith.mulf %331, %292 : vector<8x128xf32>
    %341 = arith.mulf %325, %333 : vector<8x128xf32>
    %342 = arith.addf %340, %341 : vector<8x128xf32>
    %343 = math.tanh %342 : vector<8x128xf32>
    %344 = arith.mulf %339, %343 : vector<8x128xf32>
    %c0_233 = arith.constant 0 : index
    %c0_234 = arith.constant 0 : index
    %345 = vector.load %arg6[%c0_233, %c0_234] : memref<128x128xf32, #tpu.memory_space<vmem>>, vector<128x128xf32>
    %cst_235 = arith.constant dense<0.000000e+00> : vector<8x128xf32>
    %346 = tpu.matmul %344, %345, %cst_235 {dimension_numbers = #tpu.dot_dimension_numbers<[1], [0], [0], [1], [0, 0, 1, 1], [], []>} : vector<8x128xf32>, vector<128x128xf32>, vector<8x128xf32> -> vector<8x128xf32>
    %c0_236 = arith.constant 0 : index
    %c0_237 = arith.constant 0 : index
    %347 = vector.load %arg7[%c0_236, %c0_237] : memref<1x128xf32, #tpu.memory_space<vmem>>, vector<1x128xf32>
    %348 = vector.broadcast %347 : vector<1x128xf32> to vector<8x128xf32>
    %349 = arith.addf %346, %348 : vector<8x128xf32>
    %cst_238 = arith.constant dense<0xFF800000> : vector<8xf32>
    %350 = vector.multi_reduction <maximumf>, %349, %cst_238 [1] : vector<8x128xf32> to vector<8xf32>
    %cst_239 = arith.constant 0xFF800000 : f32
    %351 = vector.broadcast %cst_239 : f32 to vector<8xf32>
    %352 = arith.maximumf %351, %350 : vector<8xf32>
    %353 = vector.shape_cast %352 : vector<8xf32> to vector<8x1xf32>
    %354 = vector.broadcast %353 : vector<8x1xf32> to vector<8x128xf32>
    %355 = arith.subf %349, %354 : vector<8x128xf32>
    %356 = math.exp %355 : vector<8x128xf32>
    %cst_240 = arith.constant dense<0.000000e+00> : vector<8xf32>
    %357 = vector.multi_reduction <add>, %356, %cst_240 [1] : vector<8x128xf32> to vector<8xf32>
    %358 = vector.shape_cast %357 : vector<8xf32> to vector<8x1xf32>
    %359 = math.log %358 : vector<8x1xf32>
    %360 = vector.broadcast %359 : vector<8x1xf32> to vector<8x128xf32>
    %361 = arith.subf %355, %360 : vector<8x128xf32>
    %c3_241 = arith.constant 3 : index
    %c0_242 = arith.constant 0 : index
    %c0_243 = arith.constant 0 : index
    %362 = vector.load %arg8[%c3_241, %c0_242, %c0_243] : memref<16x8x128xf32, #tpu.memory_space<vmem>>, vector<1x8x128xf32>
    %363 = vector.shape_cast %362 : vector<1x8x128xf32> to vector<8x128xf32>
    %364 = vector.shape_cast %361 : vector<8x128xf32> to vector<1x8x128xf32>
    tpu.vector_store %arg8[%c3_241, %c0_242, %c0_243], %364 {strides = array<i32>} : memref<16x8x128xf32, #tpu.memory_space<vmem>>, vector<1x8x128xf32>,
    %c4_244 = arith.constant 4 : index
    %c0_245 = arith.constant 0 : index
    %c0_246 = arith.constant 0 : index
    %365 = vector.load %arg9[%c4_244, %c0_245, %c0_246] : memref<16x8x512xf32, #tpu.memory_space<vmem>>, vector<1x8x512xf32>
    %366 = vector.shape_cast %365 : vector<1x8x512xf32> to vector<8x512xf32>
    %c0_247 = arith.constant 0 : index
    %c0_248 = arith.constant 0 : index
    %367 = vector.load %arg4[%c0_247, %c0_248] : memref<128x512xf32, #tpu.memory_space<vmem>>, vector<128x512xf32>
    %cst_249 = arith.constant dense<0.000000e+00> : vector<8x512xf32>
    %368 = tpu.matmul %344, %367, %cst_249 {dimension_numbers = #tpu.dot_dimension_numbers<[1], [0], [0], [1], [0, 0, 1, 1], [], []>} : vector<8x128xf32>, vector<128x512xf32>, vector<8x512xf32> -> vector<8x512xf32>
    %369 = arith.addf %366, %368 : vector<8x512xf32>
    %370 = vector.extract_strided_slice %369 {offsets = [0, 0], sizes = [8, 128], strides = [1, 1]} : vector<8x512xf32> to vector<8x128xf32>
    %371 = arith.negf %370 : vector<8x128xf32>
    %372 = math.exp %371 : vector<8x128xf32>
    %cst_250 = arith.constant 1.000000e+00 : f32
    %373 = vector.broadcast %cst_250 : f32 to vector<8x128xf32>
    %374 = arith.addf %373, %372 : vector<8x128xf32>
    %375 = arith.divf %373, %374 : vector<8x128xf32>
    %376 = vector.extract_strided_slice %369 {offsets = [0, 128], sizes = [8, 128], strides = [1, 1]} : vector<8x512xf32> to vector<8x128xf32>
    %377 = arith.negf %376 : vector<8x128xf32>
    %378 = math.exp %377 : vector<8x128xf32>
    %cst_251 = arith.constant 1.000000e+00 : f32
    %379 = vector.broadcast %cst_251 : f32 to vector<8x128xf32>
    %380 = arith.addf %379, %378 : vector<8x128xf32>
    %381 = arith.divf %379, %380 : vector<8x128xf32>
    %382 = vector.extract_strided_slice %369 {offsets = [0, 256], sizes = [8, 128], strides = [1, 1]} : vector<8x512xf32> to vector<8x128xf32>
    %383 = math.tanh %382 : vector<8x128xf32>
    %384 = vector.extract_strided_slice %369 {offsets = [0, 384], sizes = [8, 128], strides = [1, 1]} : vector<8x512xf32> to vector<8x128xf32>
    %385 = arith.negf %384 : vector<8x128xf32>
    %386 = math.exp %385 : vector<8x128xf32>
    %cst_252 = arith.constant 1.000000e+00 : f32
    %387 = vector.broadcast %cst_252 : f32 to vector<8x128xf32>
    %388 = arith.addf %387, %386 : vector<8x128xf32>
    %389 = arith.divf %387, %388 : vector<8x128xf32>
    %390 = arith.mulf %381, %342 : vector<8x128xf32>
    %391 = arith.mulf %375, %383 : vector<8x128xf32>
    %392 = arith.addf %390, %391 : vector<8x128xf32>
    %393 = math.tanh %392 : vector<8x128xf32>
    %394 = arith.mulf %389, %393 : vector<8x128xf32>
    %c0_253 = arith.constant 0 : index
    %c0_254 = arith.constant 0 : index
    %395 = vector.load %arg6[%c0_253, %c0_254] : memref<128x128xf32, #tpu.memory_space<vmem>>, vector<128x128xf32>
    %cst_255 = arith.constant dense<0.000000e+00> : vector<8x128xf32>
    %396 = tpu.matmul %394, %395, %cst_255 {dimension_numbers = #tpu.dot_dimension_numbers<[1], [0], [0], [1], [0, 0, 1, 1], [], []>} : vector<8x128xf32>, vector<128x128xf32>, vector<8x128xf32> -> vector<8x128xf32>
    %c0_256 = arith.constant 0 : index
    %c0_257 = arith.constant 0 : index
    %397 = vector.load %arg7[%c0_256, %c0_257] : memref<1x128xf32, #tpu.memory_space<vmem>>, vector<1x128xf32>
    %398 = vector.broadcast %397 : vector<1x128xf32> to vector<8x128xf32>
    %399 = arith.addf %396, %398 : vector<8x128xf32>
    %cst_258 = arith.constant dense<0xFF800000> : vector<8xf32>
    %400 = vector.multi_reduction <maximumf>, %399, %cst_258 [1] : vector<8x128xf32> to vector<8xf32>
    %cst_259 = arith.constant 0xFF800000 : f32
    %401 = vector.broadcast %cst_259 : f32 to vector<8xf32>
    %402 = arith.maximumf %401, %400 : vector<8xf32>
    %403 = vector.shape_cast %402 : vector<8xf32> to vector<8x1xf32>
    %404 = vector.broadcast %403 : vector<8x1xf32> to vector<8x128xf32>
    %405 = arith.subf %399, %404 : vector<8x128xf32>
    %406 = math.exp %405 : vector<8x128xf32>
    %cst_260 = arith.constant dense<0.000000e+00> : vector<8xf32>
    %407 = vector.multi_reduction <add>, %406, %cst_260 [1] : vector<8x128xf32> to vector<8xf32>
    %408 = vector.shape_cast %407 : vector<8xf32> to vector<8x1xf32>
    %409 = math.log %408 : vector<8x1xf32>
    %410 = vector.broadcast %409 : vector<8x1xf32> to vector<8x128xf32>
    %411 = arith.subf %405, %410 : vector<8x128xf32>
    %c4_261 = arith.constant 4 : index
    %c0_262 = arith.constant 0 : index
    %c0_263 = arith.constant 0 : index
    %412 = vector.load %arg8[%c4_261, %c0_262, %c0_263] : memref<16x8x128xf32, #tpu.memory_space<vmem>>, vector<1x8x128xf32>
    %413 = vector.shape_cast %412 : vector<1x8x128xf32> to vector<8x128xf32>
    %414 = vector.shape_cast %411 : vector<8x128xf32> to vector<1x8x128xf32>
    tpu.vector_store %arg8[%c4_261, %c0_262, %c0_263], %414 {strides = array<i32>} : memref<16x8x128xf32, #tpu.memory_space<vmem>>, vector<1x8x128xf32>,
    %c5_264 = arith.constant 5 : index
    %c0_265 = arith.constant 0 : index
    %c0_266 = arith.constant 0 : index
    %415 = vector.load %arg9[%c5_264, %c0_265, %c0_266] : memref<16x8x512xf32, #tpu.memory_space<vmem>>, vector<1x8x512xf32>
    %416 = vector.shape_cast %415 : vector<1x8x512xf32> to vector<8x512xf32>
    %c0_267 = arith.constant 0 : index
    %c0_268 = arith.constant 0 : index
    %417 = vector.load %arg4[%c0_267, %c0_268] : memref<128x512xf32, #tpu.memory_space<vmem>>, vector<128x512xf32>
    %cst_269 = arith.constant dense<0.000000e+00> : vector<8x512xf32>
    %418 = tpu.matmul %394, %417, %cst_269 {dimension_numbers = #tpu.dot_dimension_numbers<[1], [0], [0], [1], [0, 0, 1, 1], [], []>} : vector<8x128xf32>, vector<128x512xf32>, vector<8x512xf32> -> vector<8x512xf32>
    %419 = arith.addf %416, %418 : vector<8x512xf32>
    %420 = vector.extract_strided_slice %419 {offsets = [0, 0], sizes = [8, 128], strides = [1, 1]} : vector<8x512xf32> to vector<8x128xf32>
    %421 = arith.negf %420 : vector<8x128xf32>
    %422 = math.exp %421 : vector<8x128xf32>
    %cst_270 = arith.constant 1.000000e+00 : f32
    %423 = vector.broadcast %cst_270 : f32 to vector<8x128xf32>
    %424 = arith.addf %423, %422 : vector<8x128xf32>
    %425 = arith.divf %423, %424 : vector<8x128xf32>
    %426 = vector.extract_strided_slice %419 {offsets = [0, 128], sizes = [8, 128], strides = [1, 1]} : vector<8x512xf32> to vector<8x128xf32>
    %427 = arith.negf %426 : vector<8x128xf32>
    %428 = math.exp %427 : vector<8x128xf32>
    %cst_271 = arith.constant 1.000000e+00 : f32
    %429 = vector.broadcast %cst_271 : f32 to vector<8x128xf32>
    %430 = arith.addf %429, %428 : vector<8x128xf32>
    %431 = arith.divf %429, %430 : vector<8x128xf32>
    %432 = vector.extract_strided_slice %419 {offsets = [0, 256], sizes = [8, 128], strides = [1, 1]} : vector<8x512xf32> to vector<8x128xf32>
    %433 = math.tanh %432 : vector<8x128xf32>
    %434 = vector.extract_strided_slice %419 {offsets = [0, 384], sizes = [8, 128], strides = [1, 1]} : vector<8x512xf32> to vector<8x128xf32>
    %435 = arith.negf %434 : vector<8x128xf32>
    %436 = math.exp %435 : vector<8x128xf32>
    %cst_272 = arith.constant 1.000000e+00 : f32
    %437 = vector.broadcast %cst_272 : f32 to vector<8x128xf32>
    %438 = arith.addf %437, %436 : vector<8x128xf32>
    %439 = arith.divf %437, %438 : vector<8x128xf32>
    %440 = arith.mulf %431, %392 : vector<8x128xf32>
    %441 = arith.mulf %425, %433 : vector<8x128xf32>
    %442 = arith.addf %440, %441 : vector<8x128xf32>
    %443 = math.tanh %442 : vector<8x128xf32>
    %444 = arith.mulf %439, %443 : vector<8x128xf32>
    %c0_273 = arith.constant 0 : index
    %c0_274 = arith.constant 0 : index
    %445 = vector.load %arg6[%c0_273, %c0_274] : memref<128x128xf32, #tpu.memory_space<vmem>>, vector<128x128xf32>
    %cst_275 = arith.constant dense<0.000000e+00> : vector<8x128xf32>
    %446 = tpu.matmul %444, %445, %cst_275 {dimension_numbers = #tpu.dot_dimension_numbers<[1], [0], [0], [1], [0, 0, 1, 1], [], []>} : vector<8x128xf32>, vector<128x128xf32>, vector<8x128xf32> -> vector<8x128xf32>
    %c0_276 = arith.constant 0 : index
    %c0_277 = arith.constant 0 : index
    %447 = vector.load %arg7[%c0_276, %c0_277] : memref<1x128xf32, #tpu.memory_space<vmem>>, vector<1x128xf32>
    %448 = vector.broadcast %447 : vector<1x128xf32> to vector<8x128xf32>
    %449 = arith.addf %446, %448 : vector<8x128xf32>
    %cst_278 = arith.constant dense<0xFF800000> : vector<8xf32>
    %450 = vector.multi_reduction <maximumf>, %449, %cst_278 [1] : vector<8x128xf32> to vector<8xf32>
    %cst_279 = arith.constant 0xFF800000 : f32
    %451 = vector.broadcast %cst_279 : f32 to vector<8xf32>
    %452 = arith.maximumf %451, %450 : vector<8xf32>
    %453 = vector.shape_cast %452 : vector<8xf32> to vector<8x1xf32>
    %454 = vector.broadcast %453 : vector<8x1xf32> to vector<8x128xf32>
    %455 = arith.subf %449, %454 : vector<8x128xf32>
    %456 = math.exp %455 : vector<8x128xf32>
    %cst_280 = arith.constant dense<0.000000e+00> : vector<8xf32>
    %457 = vector.multi_reduction <add>, %456, %cst_280 [1] : vector<8x128xf32> to vector<8xf32>
    %458 = vector.shape_cast %457 : vector<8xf32> to vector<8x1xf32>
    %459 = math.log %458 : vector<8x1xf32>
    %460 = vector.broadcast %459 : vector<8x1xf32> to vector<8x128xf32>
    %461 = arith.subf %455, %460 : vector<8x128xf32>
    %c5_281 = arith.constant 5 : index
    %c0_282 = arith.constant 0 : index
    %c0_283 = arith.constant 0 : index
    %462 = vector.load %arg8[%c5_281, %c0_282, %c0_283] : memref<16x8x128xf32, #tpu.memory_space<vmem>>, vector<1x8x128xf32>
    %463 = vector.shape_cast %462 : vector<1x8x128xf32> to vector<8x128xf32>
    %464 = vector.shape_cast %461 : vector<8x128xf32> to vector<1x8x128xf32>
    tpu.vector_store %arg8[%c5_281, %c0_282, %c0_283], %464 {strides = array<i32>} : memref<16x8x128xf32, #tpu.memory_space<vmem>>, vector<1x8x128xf32>,
    %c6_284 = arith.constant 6 : index
    %c0_285 = arith.constant 0 : index
    %c0_286 = arith.constant 0 : index
    %465 = vector.load %arg9[%c6_284, %c0_285, %c0_286] : memref<16x8x512xf32, #tpu.memory_space<vmem>>, vector<1x8x512xf32>
    %466 = vector.shape_cast %465 : vector<1x8x512xf32> to vector<8x512xf32>
    %c0_287 = arith.constant 0 : index
    %c0_288 = arith.constant 0 : index
    %467 = vector.load %arg4[%c0_287, %c0_288] : memref<128x512xf32, #tpu.memory_space<vmem>>, vector<128x512xf32>
    %cst_289 = arith.constant dense<0.000000e+00> : vector<8x512xf32>
    %468 = tpu.matmul %444, %467, %cst_289 {dimension_numbers = #tpu.dot_dimension_numbers<[1], [0], [0], [1], [0, 0, 1, 1], [], []>} : vector<8x128xf32>, vector<128x512xf32>, vector<8x512xf32> -> vector<8x512xf32>
    %469 = arith.addf %466, %468 : vector<8x512xf32>
    %470 = vector.extract_strided_slice %469 {offsets = [0, 0], sizes = [8, 128], strides = [1, 1]} : vector<8x512xf32> to vector<8x128xf32>
    %471 = arith.negf %470 : vector<8x128xf32>
    %472 = math.exp %471 : vector<8x128xf32>
    %cst_290 = arith.constant 1.000000e+00 : f32
    %473 = vector.broadcast %cst_290 : f32 to vector<8x128xf32>
    %474 = arith.addf %473, %472 : vector<8x128xf32>
    %475 = arith.divf %473, %474 : vector<8x128xf32>
    %476 = vector.extract_strided_slice %469 {offsets = [0, 128], sizes = [8, 128], strides = [1, 1]} : vector<8x512xf32> to vector<8x128xf32>
    %477 = arith.negf %476 : vector<8x128xf32>
    %478 = math.exp %477 : vector<8x128xf32>
    %cst_291 = arith.constant 1.000000e+00 : f32
    %479 = vector.broadcast %cst_291 : f32 to vector<8x128xf32>
    %480 = arith.addf %479, %478 : vector<8x128xf32>
    %481 = arith.divf %479, %480 : vector<8x128xf32>
    %482 = vector.extract_strided_slice %469 {offsets = [0, 256], sizes = [8, 128], strides = [1, 1]} : vector<8x512xf32> to vector<8x128xf32>
    %483 = math.tanh %482 : vector<8x128xf32>
    %484 = vector.extract_strided_slice %469 {offsets = [0, 384], sizes = [8, 128], strides = [1, 1]} : vector<8x512xf32> to vector<8x128xf32>
    %485 = arith.negf %484 : vector<8x128xf32>
    %486 = math.exp %485 : vector<8x128xf32>
    %cst_292 = arith.constant 1.000000e+00 : f32
    %487 = vector.broadcast %cst_292 : f32 to vector<8x128xf32>
    %488 = arith.addf %487, %486 : vector<8x128xf32>
    %489 = arith.divf %487, %488 : vector<8x128xf32>
    %490 = arith.mulf %481, %442 : vector<8x128xf32>
    %491 = arith.mulf %475, %483 : vector<8x128xf32>
    %492 = arith.addf %490, %491 : vector<8x128xf32>
    %493 = math.tanh %492 : vector<8x128xf32>
    %494 = arith.mulf %489, %493 : vector<8x128xf32>
    %c0_293 = arith.constant 0 : index
    %c0_294 = arith.constant 0 : index
    %495 = vector.load %arg6[%c0_293, %c0_294] : memref<128x128xf32, #tpu.memory_space<vmem>>, vector<128x128xf32>
    %cst_295 = arith.constant dense<0.000000e+00> : vector<8x128xf32>
    %496 = tpu.matmul %494, %495, %cst_295 {dimension_numbers = #tpu.dot_dimension_numbers<[1], [0], [0], [1], [0, 0, 1, 1], [], []>} : vector<8x128xf32>, vector<128x128xf32>, vector<8x128xf32> -> vector<8x128xf32>
    %c0_296 = arith.constant 0 : index
    %c0_297 = arith.constant 0 : index
    %497 = vector.load %arg7[%c0_296, %c0_297] : memref<1x128xf32, #tpu.memory_space<vmem>>, vector<1x128xf32>
    %498 = vector.broadcast %497 : vector<1x128xf32> to vector<8x128xf32>
    %499 = arith.addf %496, %498 : vector<8x128xf32>
    %cst_298 = arith.constant dense<0xFF800000> : vector<8xf32>
    %500 = vector.multi_reduction <maximumf>, %499, %cst_298 [1] : vector<8x128xf32> to vector<8xf32>
    %cst_299 = arith.constant 0xFF800000 : f32
    %501 = vector.broadcast %cst_299 : f32 to vector<8xf32>
    %502 = arith.maximumf %501, %500 : vector<8xf32>
    %503 = vector.shape_cast %502 : vector<8xf32> to vector<8x1xf32>
    %504 = vector.broadcast %503 : vector<8x1xf32> to vector<8x128xf32>
    %505 = arith.subf %499, %504 : vector<8x128xf32>
    %506 = math.exp %505 : vector<8x128xf32>
    %cst_300 = arith.constant dense<0.000000e+00> : vector<8xf32>
    %507 = vector.multi_reduction <add>, %506, %cst_300 [1] : vector<8x128xf32> to vector<8xf32>
    %508 = vector.shape_cast %507 : vector<8xf32> to vector<8x1xf32>
    %509 = math.log %508 : vector<8x1xf32>
    %510 = vector.broadcast %509 : vector<8x1xf32> to vector<8x128xf32>
    %511 = arith.subf %505, %510 : vector<8x128xf32>
    %c6_301 = arith.constant 6 : index
    %c0_302 = arith.constant 0 : index
    %c0_303 = arith.constant 0 : index
    %512 = vector.load %arg8[%c6_301, %c0_302, %c0_303] : memref<16x8x128xf32, #tpu.memory_space<vmem>>, vector<1x8x128xf32>
    %513 = vector.shape_cast %512 : vector<1x8x128xf32> to vector<8x128xf32>
    %514 = vector.shape_cast %511 : vector<8x128xf32> to vector<1x8x128xf32>
    tpu.vector_store %arg8[%c6_301, %c0_302, %c0_303], %514 {strides = array<i32>} : memref<16x8x128xf32, #tpu.memory_space<vmem>>, vector<1x8x128xf32>,
    %c7_304 = arith.constant 7 : index
    %c0_305 = arith.constant 0 : index
    %c0_306 = arith.constant 0 : index
    %515 = vector.load %arg9[%c7_304, %c0_305, %c0_306] : memref<16x8x512xf32, #tpu.memory_space<vmem>>, vector<1x8x512xf32>
    %516 = vector.shape_cast %515 : vector<1x8x512xf32> to vector<8x512xf32>
    %c0_307 = arith.constant 0 : index
    %c0_308 = arith.constant 0 : index
    %517 = vector.load %arg4[%c0_307, %c0_308] : memref<128x512xf32, #tpu.memory_space<vmem>>, vector<128x512xf32>
    %cst_309 = arith.constant dense<0.000000e+00> : vector<8x512xf32>
    %518 = tpu.matmul %494, %517, %cst_309 {dimension_numbers = #tpu.dot_dimension_numbers<[1], [0], [0], [1], [0, 0, 1, 1], [], []>} : vector<8x128xf32>, vector<128x512xf32>, vector<8x512xf32> -> vector<8x512xf32>
    %519 = arith.addf %516, %518 : vector<8x512xf32>
    %520 = vector.extract_strided_slice %519 {offsets = [0, 0], sizes = [8, 128], strides = [1, 1]} : vector<8x512xf32> to vector<8x128xf32>
    %521 = arith.negf %520 : vector<8x128xf32>
    %522 = math.exp %521 : vector<8x128xf32>
    %cst_310 = arith.constant 1.000000e+00 : f32
    %523 = vector.broadcast %cst_310 : f32 to vector<8x128xf32>
    %524 = arith.addf %523, %522 : vector<8x128xf32>
    %525 = arith.divf %523, %524 : vector<8x128xf32>
    %526 = vector.extract_strided_slice %519 {offsets = [0, 128], sizes = [8, 128], strides = [1, 1]} : vector<8x512xf32> to vector<8x128xf32>
    %527 = arith.negf %526 : vector<8x128xf32>
    %528 = math.exp %527 : vector<8x128xf32>
    %cst_311 = arith.constant 1.000000e+00 : f32
    %529 = vector.broadcast %cst_311 : f32 to vector<8x128xf32>
    %530 = arith.addf %529, %528 : vector<8x128xf32>
    %531 = arith.divf %529, %530 : vector<8x128xf32>
    %532 = vector.extract_strided_slice %519 {offsets = [0, 256], sizes = [8, 128], strides = [1, 1]} : vector<8x512xf32> to vector<8x128xf32>
    %533 = math.tanh %532 : vector<8x128xf32>
    %534 = vector.extract_strided_slice %519 {offsets = [0, 384], sizes = [8, 128], strides = [1, 1]} : vector<8x512xf32> to vector<8x128xf32>
    %535 = arith.negf %534 : vector<8x128xf32>
    %536 = math.exp %535 : vector<8x128xf32>
    %cst_312 = arith.constant 1.000000e+00 : f32
    %537 = vector.broadcast %cst_312 : f32 to vector<8x128xf32>
    %538 = arith.addf %537, %536 : vector<8x128xf32>
    %539 = arith.divf %537, %538 : vector<8x128xf32>
    %540 = arith.mulf %531, %492 : vector<8x128xf32>
    %541 = arith.mulf %525, %533 : vector<8x128xf32>
    %542 = arith.addf %540, %541 : vector<8x128xf32>
    %543 = math.tanh %542 : vector<8x128xf32>
    %544 = arith.mulf %539, %543 : vector<8x128xf32>
    %c0_313 = arith.constant 0 : index
    %c0_314 = arith.constant 0 : index
    %545 = vector.load %arg6[%c0_313, %c0_314] : memref<128x128xf32, #tpu.memory_space<vmem>>, vector<128x128xf32>
    %cst_315 = arith.constant dense<0.000000e+00> : vector<8x128xf32>
    %546 = tpu.matmul %544, %545, %cst_315 {dimension_numbers = #tpu.dot_dimension_numbers<[1], [0], [0], [1], [0, 0, 1, 1], [], []>} : vector<8x128xf32>, vector<128x128xf32>, vector<8x128xf32> -> vector<8x128xf32>
    %c0_316 = arith.constant 0 : index
    %c0_317 = arith.constant 0 : index
    %547 = vector.load %arg7[%c0_316, %c0_317] : memref<1x128xf32, #tpu.memory_space<vmem>>, vector<1x128xf32>
    %548 = vector.broadcast %547 : vector<1x128xf32> to vector<8x128xf32>
    %549 = arith.addf %546, %548 : vector<8x128xf32>
    %cst_318 = arith.constant dense<0xFF800000> : vector<8xf32>
    %550 = vector.multi_reduction <maximumf>, %549, %cst_318 [1] : vector<8x128xf32> to vector<8xf32>
    %cst_319 = arith.constant 0xFF800000 : f32
    %551 = vector.broadcast %cst_319 : f32 to vector<8xf32>
    %552 = arith.maximumf %551, %550 : vector<8xf32>
    %553 = vector.shape_cast %552 : vector<8xf32> to vector<8x1xf32>
    %554 = vector.broadcast %553 : vector<8x1xf32> to vector<8x128xf32>
    %555 = arith.subf %549, %554 : vector<8x128xf32>
    %556 = math.exp %555 : vector<8x128xf32>
    %cst_320 = arith.constant dense<0.000000e+00> : vector<8xf32>
    %557 = vector.multi_reduction <add>, %556, %cst_320 [1] : vector<8x128xf32> to vector<8xf32>
    %558 = vector.shape_cast %557 : vector<8xf32> to vector<8x1xf32>
    %559 = math.log %558 : vector<8x1xf32>
    %560 = vector.broadcast %559 : vector<8x1xf32> to vector<8x128xf32>
    %561 = arith.subf %555, %560 : vector<8x128xf32>
    %c7_321 = arith.constant 7 : index
    %c0_322 = arith.constant 0 : index
    %c0_323 = arith.constant 0 : index
    %562 = vector.load %arg8[%c7_321, %c0_322, %c0_323] : memref<16x8x128xf32, #tpu.memory_space<vmem>>, vector<1x8x128xf32>
    %563 = vector.shape_cast %562 : vector<1x8x128xf32> to vector<8x128xf32>
    %564 = vector.shape_cast %561 : vector<8x128xf32> to vector<1x8x128xf32>
    tpu.vector_store %arg8[%c7_321, %c0_322, %c0_323], %564 {strides = array<i32>} : memref<16x8x128xf32, #tpu.memory_space<vmem>>, vector<1x8x128xf32>,
    %c8_324 = arith.constant 8 : index
    %c0_325 = arith.constant 0 : index
    %c0_326 = arith.constant 0 : index
    %565 = vector.load %arg9[%c8_324, %c0_325, %c0_326] : memref<16x8x512xf32, #tpu.memory_space<vmem>>, vector<1x8x512xf32>
    %566 = vector.shape_cast %565 : vector<1x8x512xf32> to vector<8x512xf32>
    %c0_327 = arith.constant 0 : index
    %c0_328 = arith.constant 0 : index
    %567 = vector.load %arg4[%c0_327, %c0_328] : memref<128x512xf32, #tpu.memory_space<vmem>>, vector<128x512xf32>
    %cst_329 = arith.constant dense<0.000000e+00> : vector<8x512xf32>
    %568 = tpu.matmul %544, %567, %cst_329 {dimension_numbers = #tpu.dot_dimension_numbers<[1], [0], [0], [1], [0, 0, 1, 1], [], []>} : vector<8x128xf32>, vector<128x512xf32>, vector<8x512xf32> -> vector<8x512xf32>
    %569 = arith.addf %566, %568 : vector<8x512xf32>
    %570 = vector.extract_strided_slice %569 {offsets = [0, 0], sizes = [8, 128], strides = [1, 1]} : vector<8x512xf32> to vector<8x128xf32>
    %571 = arith.negf %570 : vector<8x128xf32>
    %572 = math.exp %571 : vector<8x128xf32>
    %cst_330 = arith.constant 1.000000e+00 : f32
    %573 = vector.broadcast %cst_330 : f32 to vector<8x128xf32>
    %574 = arith.addf %573, %572 : vector<8x128xf32>
    %575 = arith.divf %573, %574 : vector<8x128xf32>
    %576 = vector.extract_strided_slice %569 {offsets = [0, 128], sizes = [8, 128], strides = [1, 1]} : vector<8x512xf32> to vector<8x128xf32>
    %577 = arith.negf %576 : vector<8x128xf32>
    %578 = math.exp %577 : vector<8x128xf32>
    %cst_331 = arith.constant 1.000000e+00 : f32
    %579 = vector.broadcast %cst_331 : f32 to vector<8x128xf32>
    %580 = arith.addf %579, %578 : vector<8x128xf32>
    %581 = arith.divf %579, %580 : vector<8x128xf32>
    %582 = vector.extract_strided_slice %569 {offsets = [0, 256], sizes = [8, 128], strides = [1, 1]} : vector<8x512xf32> to vector<8x128xf32>
    %583 = math.tanh %582 : vector<8x128xf32>
    %584 = vector.extract_strided_slice %569 {offsets = [0, 384], sizes = [8, 128], strides = [1, 1]} : vector<8x512xf32> to vector<8x128xf32>
    %585 = arith.negf %584 : vector<8x128xf32>
    %586 = math.exp %585 : vector<8x128xf32>
    %cst_332 = arith.constant 1.000000e+00 : f32
    %587 = vector.broadcast %cst_332 : f32 to vector<8x128xf32>
    %588 = arith.addf %587, %586 : vector<8x128xf32>
    %589 = arith.divf %587, %588 : vector<8x128xf32>
    %590 = arith.mulf %581, %542 : vector<8x128xf32>
    %591 = arith.mulf %575, %583 : vector<8x128xf32>
    %592 = arith.addf %590, %591 : vector<8x128xf32>
    %593 = math.tanh %592 : vector<8x128xf32>
    %594 = arith.mulf %589, %593 : vector<8x128xf32>
    %c0_333 = arith.constant 0 : index
    %c0_334 = arith.constant 0 : index
    %595 = vector.load %arg6[%c0_333, %c0_334] : memref<128x128xf32, #tpu.memory_space<vmem>>, vector<128x128xf32>
    %cst_335 = arith.constant dense<0.000000e+00> : vector<8x128xf32>
    %596 = tpu.matmul %594, %595, %cst_335 {dimension_numbers = #tpu.dot_dimension_numbers<[1], [0], [0], [1], [0, 0, 1, 1], [], []>} : vector<8x128xf32>, vector<128x128xf32>, vector<8x128xf32> -> vector<8x128xf32>
    %c0_336 = arith.constant 0 : index
    %c0_337 = arith.constant 0 : index
    %597 = vector.load %arg7[%c0_336, %c0_337] : memref<1x128xf32, #tpu.memory_space<vmem>>, vector<1x128xf32>
    %598 = vector.broadcast %597 : vector<1x128xf32> to vector<8x128xf32>
    %599 = arith.addf %596, %598 : vector<8x128xf32>
    %cst_338 = arith.constant dense<0xFF800000> : vector<8xf32>
    %600 = vector.multi_reduction <maximumf>, %599, %cst_338 [1] : vector<8x128xf32> to vector<8xf32>
    %cst_339 = arith.constant 0xFF800000 : f32
    %601 = vector.broadcast %cst_339 : f32 to vector<8xf32>
    %602 = arith.maximumf %601, %600 : vector<8xf32>
    %603 = vector.shape_cast %602 : vector<8xf32> to vector<8x1xf32>
    %604 = vector.broadcast %603 : vector<8x1xf32> to vector<8x128xf32>
    %605 = arith.subf %599, %604 : vector<8x128xf32>
    %606 = math.exp %605 : vector<8x128xf32>
    %cst_340 = arith.constant dense<0.000000e+00> : vector<8xf32>
    %607 = vector.multi_reduction <add>, %606, %cst_340 [1] : vector<8x128xf32> to vector<8xf32>
    %608 = vector.shape_cast %607 : vector<8xf32> to vector<8x1xf32>
    %609 = math.log %608 : vector<8x1xf32>
    %610 = vector.broadcast %609 : vector<8x1xf32> to vector<8x128xf32>
    %611 = arith.subf %605, %610 : vector<8x128xf32>
    %c8_341 = arith.constant 8 : index
    %c0_342 = arith.constant 0 : index
    %c0_343 = arith.constant 0 : index
    %612 = vector.load %arg8[%c8_341, %c0_342, %c0_343] : memref<16x8x128xf32, #tpu.memory_space<vmem>>, vector<1x8x128xf32>
    %613 = vector.shape_cast %612 : vector<1x8x128xf32> to vector<8x128xf32>
    %614 = vector.shape_cast %611 : vector<8x128xf32> to vector<1x8x128xf32>
    tpu.vector_store %arg8[%c8_341, %c0_342, %c0_343], %614 {strides = array<i32>} : memref<16x8x128xf32, #tpu.memory_space<vmem>>, vector<1x8x128xf32>,
    %c9_344 = arith.constant 9 : index
    %c0_345 = arith.constant 0 : index
    %c0_346 = arith.constant 0 : index
    %615 = vector.load %arg9[%c9_344, %c0_345, %c0_346] : memref<16x8x512xf32, #tpu.memory_space<vmem>>, vector<1x8x512xf32>
    %616 = vector.shape_cast %615 : vector<1x8x512xf32> to vector<8x512xf32>
    %c0_347 = arith.constant 0 : index
    %c0_348 = arith.constant 0 : index
    %617 = vector.load %arg4[%c0_347, %c0_348] : memref<128x512xf32, #tpu.memory_space<vmem>>, vector<128x512xf32>
    %cst_349 = arith.constant dense<0.000000e+00> : vector<8x512xf32>
    %618 = tpu.matmul %594, %617, %cst_349 {dimension_numbers = #tpu.dot_dimension_numbers<[1], [0], [0], [1], [0, 0, 1, 1], [], []>} : vector<8x128xf32>, vector<128x512xf32>, vector<8x512xf32> -> vector<8x512xf32>
    %619 = arith.addf %616, %618 : vector<8x512xf32>
    %620 = vector.extract_strided_slice %619 {offsets = [0, 0], sizes = [8, 128], strides = [1, 1]} : vector<8x512xf32> to vector<8x128xf32>
    %621 = arith.negf %620 : vector<8x128xf32>
    %622 = math.exp %621 : vector<8x128xf32>
    %cst_350 = arith.constant 1.000000e+00 : f32
    %623 = vector.broadcast %cst_350 : f32 to vector<8x128xf32>
    %624 = arith.addf %623, %622 : vector<8x128xf32>
    %625 = arith.divf %623, %624 : vector<8x128xf32>
    %626 = vector.extract_strided_slice %619 {offsets = [0, 128], sizes = [8, 128], strides = [1, 1]} : vector<8x512xf32> to vector<8x128xf32>
    %627 = arith.negf %626 : vector<8x128xf32>
    %628 = math.exp %627 : vector<8x128xf32>
    %cst_351 = arith.constant 1.000000e+00 : f32
    %629 = vector.broadcast %cst_351 : f32 to vector<8x128xf32>
    %630 = arith.addf %629, %628 : vector<8x128xf32>
    %631 = arith.divf %629, %630 : vector<8x128xf32>
    %632 = vector.extract_strided_slice %619 {offsets = [0, 256], sizes = [8, 128], strides = [1, 1]} : vector<8x512xf32> to vector<8x128xf32>
    %633 = math.tanh %632 : vector<8x128xf32>
    %634 = vector.extract_strided_slice %619 {offsets = [0, 384], sizes = [8, 128], strides = [1, 1]} : vector<8x512xf32> to vector<8x128xf32>
    %635 = arith.negf %634 : vector<8x128xf32>
    %636 = math.exp %635 : vector<8x128xf32>
    %cst_352 = arith.constant 1.000000e+00 : f32
    %637 = vector.broadcast %cst_352 : f32 to vector<8x128xf32>
    %638 = arith.addf %637, %636 : vector<8x128xf32>
    %639 = arith.divf %637, %638 : vector<8x128xf32>
    %640 = arith.mulf %631, %592 : vector<8x128xf32>
    %641 = arith.mulf %625, %633 : vector<8x128xf32>
    %642 = arith.addf %640, %641 : vector<8x128xf32>
    %643 = math.tanh %642 : vector<8x128xf32>
    %644 = arith.mulf %639, %643 : vector<8x128xf32>
    %c0_353 = arith.constant 0 : index
    %c0_354 = arith.constant 0 : index
    %645 = vector.load %arg6[%c0_353, %c0_354] : memref<128x128xf32, #tpu.memory_space<vmem>>, vector<128x128xf32>
    %cst_355 = arith.constant dense<0.000000e+00> : vector<8x128xf32>
    %646 = tpu.matmul %644, %645, %cst_355 {dimension_numbers = #tpu.dot_dimension_numbers<[1], [0], [0], [1], [0, 0, 1, 1], [], []>} : vector<8x128xf32>, vector<128x128xf32>, vector<8x128xf32> -> vector<8x128xf32>
    %c0_356 = arith.constant 0 : index
    %c0_357 = arith.constant 0 : index
    %647 = vector.load %arg7[%c0_356, %c0_357] : memref<1x128xf32, #tpu.memory_space<vmem>>, vector<1x128xf32>
    %648 = vector.broadcast %647 : vector<1x128xf32> to vector<8x128xf32>
    %649 = arith.addf %646, %648 : vector<8x128xf32>
    %cst_358 = arith.constant dense<0xFF800000> : vector<8xf32>
    %650 = vector.multi_reduction <maximumf>, %649, %cst_358 [1] : vector<8x128xf32> to vector<8xf32>
    %cst_359 = arith.constant 0xFF800000 : f32
    %651 = vector.broadcast %cst_359 : f32 to vector<8xf32>
    %652 = arith.maximumf %651, %650 : vector<8xf32>
    %653 = vector.shape_cast %652 : vector<8xf32> to vector<8x1xf32>
    %654 = vector.broadcast %653 : vector<8x1xf32> to vector<8x128xf32>
    %655 = arith.subf %649, %654 : vector<8x128xf32>
    %656 = math.exp %655 : vector<8x128xf32>
    %cst_360 = arith.constant dense<0.000000e+00> : vector<8xf32>
    %657 = vector.multi_reduction <add>, %656, %cst_360 [1] : vector<8x128xf32> to vector<8xf32>
    %658 = vector.shape_cast %657 : vector<8xf32> to vector<8x1xf32>
    %659 = math.log %658 : vector<8x1xf32>
    %660 = vector.broadcast %659 : vector<8x1xf32> to vector<8x128xf32>
    %661 = arith.subf %655, %660 : vector<8x128xf32>
    %c9_361 = arith.constant 9 : index
    %c0_362 = arith.constant 0 : index
    %c0_363 = arith.constant 0 : index
    %662 = vector.load %arg8[%c9_361, %c0_362, %c0_363] : memref<16x8x128xf32, #tpu.memory_space<vmem>>, vector<1x8x128xf32>
    %663 = vector.shape_cast %662 : vector<1x8x128xf32> to vector<8x128xf32>
    %664 = vector.shape_cast %661 : vector<8x128xf32> to vector<1x8x128xf32>
    tpu.vector_store %arg8[%c9_361, %c0_362, %c0_363], %664 {strides = array<i32>} : memref<16x8x128xf32, #tpu.memory_space<vmem>>, vector<1x8x128xf32>,
    %c10_364 = arith.constant 10 : index
    %c0_365 = arith.constant 0 : index
    %c0_366 = arith.constant 0 : index
    %665 = vector.load %arg9[%c10_364, %c0_365, %c0_366] : memref<16x8x512xf32, #tpu.memory_space<vmem>>, vector<1x8x512xf32>
    %666 = vector.shape_cast %665 : vector<1x8x512xf32> to vector<8x512xf32>
    %c0_367 = arith.constant 0 : index
    %c0_368 = arith.constant 0 : index
    %667 = vector.load %arg4[%c0_367, %c0_368] : memref<128x512xf32, #tpu.memory_space<vmem>>, vector<128x512xf32>
    %cst_369 = arith.constant dense<0.000000e+00> : vector<8x512xf32>
    %668 = tpu.matmul %644, %667, %cst_369 {dimension_numbers = #tpu.dot_dimension_numbers<[1], [0], [0], [1], [0, 0, 1, 1], [], []>} : vector<8x128xf32>, vector<128x512xf32>, vector<8x512xf32> -> vector<8x512xf32>
    %669 = arith.addf %666, %668 : vector<8x512xf32>
    %670 = vector.extract_strided_slice %669 {offsets = [0, 0], sizes = [8, 128], strides = [1, 1]} : vector<8x512xf32> to vector<8x128xf32>
    %671 = arith.negf %670 : vector<8x128xf32>
    %672 = math.exp %671 : vector<8x128xf32>
    %cst_370 = arith.constant 1.000000e+00 : f32
    %673 = vector.broadcast %cst_370 : f32 to vector<8x128xf32>
    %674 = arith.addf %673, %672 : vector<8x128xf32>
    %675 = arith.divf %673, %674 : vector<8x128xf32>
    %676 = vector.extract_strided_slice %669 {offsets = [0, 128], sizes = [8, 128], strides = [1, 1]} : vector<8x512xf32> to vector<8x128xf32>
    %677 = arith.negf %676 : vector<8x128xf32>
    %678 = math.exp %677 : vector<8x128xf32>
    %cst_371 = arith.constant 1.000000e+00 : f32
    %679 = vector.broadcast %cst_371 : f32 to vector<8x128xf32>
    %680 = arith.addf %679, %678 : vector<8x128xf32>
    %681 = arith.divf %679, %680 : vector<8x128xf32>
    %682 = vector.extract_strided_slice %669 {offsets = [0, 256], sizes = [8, 128], strides = [1, 1]} : vector<8x512xf32> to vector<8x128xf32>
    %683 = math.tanh %682 : vector<8x128xf32>
    %684 = vector.extract_strided_slice %669 {offsets = [0, 384], sizes = [8, 128], strides = [1, 1]} : vector<8x512xf32> to vector<8x128xf32>
    %685 = arith.negf %684 : vector<8x128xf32>
    %686 = math.exp %685 : vector<8x128xf32>
    %cst_372 = arith.constant 1.000000e+00 : f32
    %687 = vector.broadcast %cst_372 : f32 to vector<8x128xf32>
    %688 = arith.addf %687, %686 : vector<8x128xf32>
    %689 = arith.divf %687, %688 : vector<8x128xf32>
    %690 = arith.mulf %681, %642 : vector<8x128xf32>
    %691 = arith.mulf %675, %683 : vector<8x128xf32>
    %692 = arith.addf %690, %691 : vector<8x128xf32>
    %693 = math.tanh %692 : vector<8x128xf32>
    %694 = arith.mulf %689, %693 : vector<8x128xf32>
    %c0_373 = arith.constant 0 : index
    %c0_374 = arith.constant 0 : index
    %695 = vector.load %arg6[%c0_373, %c0_374] : memref<128x128xf32, #tpu.memory_space<vmem>>, vector<128x128xf32>
    %cst_375 = arith.constant dense<0.000000e+00> : vector<8x128xf32>
    %696 = tpu.matmul %694, %695, %cst_375 {dimension_numbers = #tpu.dot_dimension_numbers<[1], [0], [0], [1], [0, 0, 1, 1], [], []>} : vector<8x128xf32>, vector<128x128xf32>, vector<8x128xf32> -> vector<8x128xf32>
    %c0_376 = arith.constant 0 : index
    %c0_377 = arith.constant 0 : index
    %697 = vector.load %arg7[%c0_376, %c0_377] : memref<1x128xf32, #tpu.memory_space<vmem>>, vector<1x128xf32>
    %698 = vector.broadcast %697 : vector<1x128xf32> to vector<8x128xf32>
    %699 = arith.addf %696, %698 : vector<8x128xf32>
    %cst_378 = arith.constant dense<0xFF800000> : vector<8xf32>
    %700 = vector.multi_reduction <maximumf>, %699, %cst_378 [1] : vector<8x128xf32> to vector<8xf32>
    %cst_379 = arith.constant 0xFF800000 : f32
    %701 = vector.broadcast %cst_379 : f32 to vector<8xf32>
    %702 = arith.maximumf %701, %700 : vector<8xf32>
    %703 = vector.shape_cast %702 : vector<8xf32> to vector<8x1xf32>
    %704 = vector.broadcast %703 : vector<8x1xf32> to vector<8x128xf32>
    %705 = arith.subf %699, %704 : vector<8x128xf32>
    %706 = math.exp %705 : vector<8x128xf32>
    %cst_380 = arith.constant dense<0.000000e+00> : vector<8xf32>
    %707 = vector.multi_reduction <add>, %706, %cst_380 [1] : vector<8x128xf32> to vector<8xf32>
    %708 = vector.shape_cast %707 : vector<8xf32> to vector<8x1xf32>
    %709 = math.log %708 : vector<8x1xf32>
    %710 = vector.broadcast %709 : vector<8x1xf32> to vector<8x128xf32>
    %711 = arith.subf %705, %710 : vector<8x128xf32>
    %c10_381 = arith.constant 10 : index
    %c0_382 = arith.constant 0 : index
    %c0_383 = arith.constant 0 : index
    %712 = vector.load %arg8[%c10_381, %c0_382, %c0_383] : memref<16x8x128xf32, #tpu.memory_space<vmem>>, vector<1x8x128xf32>
    %713 = vector.shape_cast %712 : vector<1x8x128xf32> to vector<8x128xf32>
    %714 = vector.shape_cast %711 : vector<8x128xf32> to vector<1x8x128xf32>
    tpu.vector_store %arg8[%c10_381, %c0_382, %c0_383], %714 {strides = array<i32>} : memref<16x8x128xf32, #tpu.memory_space<vmem>>, vector<1x8x128xf32>,
    %c11_384 = arith.constant 11 : index
    %c0_385 = arith.constant 0 : index
    %c0_386 = arith.constant 0 : index
    %715 = vector.load %arg9[%c11_384, %c0_385, %c0_386] : memref<16x8x512xf32, #tpu.memory_space<vmem>>, vector<1x8x512xf32>
    %716 = vector.shape_cast %715 : vector<1x8x512xf32> to vector<8x512xf32>
    %c0_387 = arith.constant 0 : index
    %c0_388 = arith.constant 0 : index
    %717 = vector.load %arg4[%c0_387, %c0_388] : memref<128x512xf32, #tpu.memory_space<vmem>>, vector<128x512xf32>
    %cst_389 = arith.constant dense<0.000000e+00> : vector<8x512xf32>
    %718 = tpu.matmul %694, %717, %cst_389 {dimension_numbers = #tpu.dot_dimension_numbers<[1], [0], [0], [1], [0, 0, 1, 1], [], []>} : vector<8x128xf32>, vector<128x512xf32>, vector<8x512xf32> -> vector<8x512xf32>
    %719 = arith.addf %716, %718 : vector<8x512xf32>
    %720 = vector.extract_strided_slice %719 {offsets = [0, 0], sizes = [8, 128], strides = [1, 1]} : vector<8x512xf32> to vector<8x128xf32>
    %721 = arith.negf %720 : vector<8x128xf32>
    %722 = math.exp %721 : vector<8x128xf32>
    %cst_390 = arith.constant 1.000000e+00 : f32
    %723 = vector.broadcast %cst_390 : f32 to vector<8x128xf32>
    %724 = arith.addf %723, %722 : vector<8x128xf32>
    %725 = arith.divf %723, %724 : vector<8x128xf32>
    %726 = vector.extract_strided_slice %719 {offsets = [0, 128], sizes = [8, 128], strides = [1, 1]} : vector<8x512xf32> to vector<8x128xf32>
    %727 = arith.negf %726 : vector<8x128xf32>
    %728 = math.exp %727 : vector<8x128xf32>
    %cst_391 = arith.constant 1.000000e+00 : f32
    %729 = vector.broadcast %cst_391 : f32 to vector<8x128xf32>
    %730 = arith.addf %729, %728 : vector<8x128xf32>
    %731 = arith.divf %729, %730 : vector<8x128xf32>
    %732 = vector.extract_strided_slice %719 {offsets = [0, 256], sizes = [8, 128], strides = [1, 1]} : vector<8x512xf32> to vector<8x128xf32>
    %733 = math.tanh %732 : vector<8x128xf32>
    %734 = vector.extract_strided_slice %719 {offsets = [0, 384], sizes = [8, 128], strides = [1, 1]} : vector<8x512xf32> to vector<8x128xf32>
    %735 = arith.negf %734 : vector<8x128xf32>
    %736 = math.exp %735 : vector<8x128xf32>
    %cst_392 = arith.constant 1.000000e+00 : f32
    %737 = vector.broadcast %cst_392 : f32 to vector<8x128xf32>
    %738 = arith.addf %737, %736 : vector<8x128xf32>
    %739 = arith.divf %737, %738 : vector<8x128xf32>
    %740 = arith.mulf %731, %692 : vector<8x128xf32>
    %741 = arith.mulf %725, %733 : vector<8x128xf32>
    %742 = arith.addf %740, %741 : vector<8x128xf32>
    %743 = math.tanh %742 : vector<8x128xf32>
    %744 = arith.mulf %739, %743 : vector<8x128xf32>
    %c0_393 = arith.constant 0 : index
    %c0_394 = arith.constant 0 : index
    %745 = vector.load %arg6[%c0_393, %c0_394] : memref<128x128xf32, #tpu.memory_space<vmem>>, vector<128x128xf32>
    %cst_395 = arith.constant dense<0.000000e+00> : vector<8x128xf32>
    %746 = tpu.matmul %744, %745, %cst_395 {dimension_numbers = #tpu.dot_dimension_numbers<[1], [0], [0], [1], [0, 0, 1, 1], [], []>} : vector<8x128xf32>, vector<128x128xf32>, vector<8x128xf32> -> vector<8x128xf32>
    %c0_396 = arith.constant 0 : index
    %c0_397 = arith.constant 0 : index
    %747 = vector.load %arg7[%c0_396, %c0_397] : memref<1x128xf32, #tpu.memory_space<vmem>>, vector<1x128xf32>
    %748 = vector.broadcast %747 : vector<1x128xf32> to vector<8x128xf32>
    %749 = arith.addf %746, %748 : vector<8x128xf32>
    %cst_398 = arith.constant dense<0xFF800000> : vector<8xf32>
    %750 = vector.multi_reduction <maximumf>, %749, %cst_398 [1] : vector<8x128xf32> to vector<8xf32>
    %cst_399 = arith.constant 0xFF800000 : f32
    %751 = vector.broadcast %cst_399 : f32 to vector<8xf32>
    %752 = arith.maximumf %751, %750 : vector<8xf32>
    %753 = vector.shape_cast %752 : vector<8xf32> to vector<8x1xf32>
    %754 = vector.broadcast %753 : vector<8x1xf32> to vector<8x128xf32>
    %755 = arith.subf %749, %754 : vector<8x128xf32>
    %756 = math.exp %755 : vector<8x128xf32>
    %cst_400 = arith.constant dense<0.000000e+00> : vector<8xf32>
    %757 = vector.multi_reduction <add>, %756, %cst_400 [1] : vector<8x128xf32> to vector<8xf32>
    %758 = vector.shape_cast %757 : vector<8xf32> to vector<8x1xf32>
    %759 = math.log %758 : vector<8x1xf32>
    %760 = vector.broadcast %759 : vector<8x1xf32> to vector<8x128xf32>
    %761 = arith.subf %755, %760 : vector<8x128xf32>
    %c11_401 = arith.constant 11 : index
    %c0_402 = arith.constant 0 : index
    %c0_403 = arith.constant 0 : index
    %762 = vector.load %arg8[%c11_401, %c0_402, %c0_403] : memref<16x8x128xf32, #tpu.memory_space<vmem>>, vector<1x8x128xf32>
    %763 = vector.shape_cast %762 : vector<1x8x128xf32> to vector<8x128xf32>
    %764 = vector.shape_cast %761 : vector<8x128xf32> to vector<1x8x128xf32>
    tpu.vector_store %arg8[%c11_401, %c0_402, %c0_403], %764 {strides = array<i32>} : memref<16x8x128xf32, #tpu.memory_space<vmem>>, vector<1x8x128xf32>,
    %c12_404 = arith.constant 12 : index
    %c0_405 = arith.constant 0 : index
    %c0_406 = arith.constant 0 : index
    %765 = vector.load %arg9[%c12_404, %c0_405, %c0_406] : memref<16x8x512xf32, #tpu.memory_space<vmem>>, vector<1x8x512xf32>
    %766 = vector.shape_cast %765 : vector<1x8x512xf32> to vector<8x512xf32>
    %c0_407 = arith.constant 0 : index
    %c0_408 = arith.constant 0 : index
    %767 = vector.load %arg4[%c0_407, %c0_408] : memref<128x512xf32, #tpu.memory_space<vmem>>, vector<128x512xf32>
    %cst_409 = arith.constant dense<0.000000e+00> : vector<8x512xf32>
    %768 = tpu.matmul %744, %767, %cst_409 {dimension_numbers = #tpu.dot_dimension_numbers<[1], [0], [0], [1], [0, 0, 1, 1], [], []>} : vector<8x128xf32>, vector<128x512xf32>, vector<8x512xf32> -> vector<8x512xf32>
    %769 = arith.addf %766, %768 : vector<8x512xf32>
    %770 = vector.extract_strided_slice %769 {offsets = [0, 0], sizes = [8, 128], strides = [1, 1]} : vector<8x512xf32> to vector<8x128xf32>
    %771 = arith.negf %770 : vector<8x128xf32>
    %772 = math.exp %771 : vector<8x128xf32>
    %cst_410 = arith.constant 1.000000e+00 : f32
    %773 = vector.broadcast %cst_410 : f32 to vector<8x128xf32>
    %774 = arith.addf %773, %772 : vector<8x128xf32>
    %775 = arith.divf %773, %774 : vector<8x128xf32>
    %776 = vector.extract_strided_slice %769 {offsets = [0, 128], sizes = [8, 128], strides = [1, 1]} : vector<8x512xf32> to vector<8x128xf32>
    %777 = arith.negf %776 : vector<8x128xf32>
    %778 = math.exp %777 : vector<8x128xf32>
    %cst_411 = arith.constant 1.000000e+00 : f32
    %779 = vector.broadcast %cst_411 : f32 to vector<8x128xf32>
    %780 = arith.addf %779, %778 : vector<8x128xf32>
    %781 = arith.divf %779, %780 : vector<8x128xf32>
    %782 = vector.extract_strided_slice %769 {offsets = [0, 256], sizes = [8, 128], strides = [1, 1]} : vector<8x512xf32> to vector<8x128xf32>
    %783 = math.tanh %782 : vector<8x128xf32>
    %784 = vector.extract_strided_slice %769 {offsets = [0, 384], sizes = [8, 128], strides = [1, 1]} : vector<8x512xf32> to vector<8x128xf32>
    %785 = arith.negf %784 : vector<8x128xf32>
    %786 = math.exp %785 : vector<8x128xf32>
    %cst_412 = arith.constant 1.000000e+00 : f32
    %787 = vector.broadcast %cst_412 : f32 to vector<8x128xf32>
    %788 = arith.addf %787, %786 : vector<8x128xf32>
    %789 = arith.divf %787, %788 : vector<8x128xf32>
    %790 = arith.mulf %781, %742 : vector<8x128xf32>
    %791 = arith.mulf %775, %783 : vector<8x128xf32>
    %792 = arith.addf %790, %791 : vector<8x128xf32>
    %793 = math.tanh %792 : vector<8x128xf32>
    %794 = arith.mulf %789, %793 : vector<8x128xf32>
    %c0_413 = arith.constant 0 : index
    %c0_414 = arith.constant 0 : index
    %795 = vector.load %arg6[%c0_413, %c0_414] : memref<128x128xf32, #tpu.memory_space<vmem>>, vector<128x128xf32>
    %cst_415 = arith.constant dense<0.000000e+00> : vector<8x128xf32>
    %796 = tpu.matmul %794, %795, %cst_415 {dimension_numbers = #tpu.dot_dimension_numbers<[1], [0], [0], [1], [0, 0, 1, 1], [], []>} : vector<8x128xf32>, vector<128x128xf32>, vector<8x128xf32> -> vector<8x128xf32>
    %c0_416 = arith.constant 0 : index
    %c0_417 = arith.constant 0 : index
    %797 = vector.load %arg7[%c0_416, %c0_417] : memref<1x128xf32, #tpu.memory_space<vmem>>, vector<1x128xf32>
    %798 = vector.broadcast %797 : vector<1x128xf32> to vector<8x128xf32>
    %799 = arith.addf %796, %798 : vector<8x128xf32>
    %cst_418 = arith.constant dense<0xFF800000> : vector<8xf32>
    %800 = vector.multi_reduction <maximumf>, %799, %cst_418 [1] : vector<8x128xf32> to vector<8xf32>
    %cst_419 = arith.constant 0xFF800000 : f32
    %801 = vector.broadcast %cst_419 : f32 to vector<8xf32>
    %802 = arith.maximumf %801, %800 : vector<8xf32>
    %803 = vector.shape_cast %802 : vector<8xf32> to vector<8x1xf32>
    %804 = vector.broadcast %803 : vector<8x1xf32> to vector<8x128xf32>
    %805 = arith.subf %799, %804 : vector<8x128xf32>
    %806 = math.exp %805 : vector<8x128xf32>
    %cst_420 = arith.constant dense<0.000000e+00> : vector<8xf32>
    %807 = vector.multi_reduction <add>, %806, %cst_420 [1] : vector<8x128xf32> to vector<8xf32>
    %808 = vector.shape_cast %807 : vector<8xf32> to vector<8x1xf32>
    %809 = math.log %808 : vector<8x1xf32>
    %810 = vector.broadcast %809 : vector<8x1xf32> to vector<8x128xf32>
    %811 = arith.subf %805, %810 : vector<8x128xf32>
    %c12_421 = arith.constant 12 : index
    %c0_422 = arith.constant 0 : index
    %c0_423 = arith.constant 0 : index
    %812 = vector.load %arg8[%c12_421, %c0_422, %c0_423] : memref<16x8x128xf32, #tpu.memory_space<vmem>>, vector<1x8x128xf32>
    %813 = vector.shape_cast %812 : vector<1x8x128xf32> to vector<8x128xf32>
    %814 = vector.shape_cast %811 : vector<8x128xf32> to vector<1x8x128xf32>
    tpu.vector_store %arg8[%c12_421, %c0_422, %c0_423], %814 {strides = array<i32>} : memref<16x8x128xf32, #tpu.memory_space<vmem>>, vector<1x8x128xf32>,
    %c13_424 = arith.constant 13 : index
    %c0_425 = arith.constant 0 : index
    %c0_426 = arith.constant 0 : index
    %815 = vector.load %arg9[%c13_424, %c0_425, %c0_426] : memref<16x8x512xf32, #tpu.memory_space<vmem>>, vector<1x8x512xf32>
    %816 = vector.shape_cast %815 : vector<1x8x512xf32> to vector<8x512xf32>
    %c0_427 = arith.constant 0 : index
    %c0_428 = arith.constant 0 : index
    %817 = vector.load %arg4[%c0_427, %c0_428] : memref<128x512xf32, #tpu.memory_space<vmem>>, vector<128x512xf32>
    %cst_429 = arith.constant dense<0.000000e+00> : vector<8x512xf32>
    %818 = tpu.matmul %794, %817, %cst_429 {dimension_numbers = #tpu.dot_dimension_numbers<[1], [0], [0], [1], [0, 0, 1, 1], [], []>} : vector<8x128xf32>, vector<128x512xf32>, vector<8x512xf32> -> vector<8x512xf32>
    %819 = arith.addf %816, %818 : vector<8x512xf32>
    %820 = vector.extract_strided_slice %819 {offsets = [0, 0], sizes = [8, 128], strides = [1, 1]} : vector<8x512xf32> to vector<8x128xf32>
    %821 = arith.negf %820 : vector<8x128xf32>
    %822 = math.exp %821 : vector<8x128xf32>
    %cst_430 = arith.constant 1.000000e+00 : f32
    %823 = vector.broadcast %cst_430 : f32 to vector<8x128xf32>
    %824 = arith.addf %823, %822 : vector<8x128xf32>
    %825 = arith.divf %823, %824 : vector<8x128xf32>
    %826 = vector.extract_strided_slice %819 {offsets = [0, 128], sizes = [8, 128], strides = [1, 1]} : vector<8x512xf32> to vector<8x128xf32>
    %827 = arith.negf %826 : vector<8x128xf32>
    %828 = math.exp %827 : vector<8x128xf32>
    %cst_431 = arith.constant 1.000000e+00 : f32
    %829 = vector.broadcast %cst_431 : f32 to vector<8x128xf32>
    %830 = arith.addf %829, %828 : vector<8x128xf32>
    %831 = arith.divf %829, %830 : vector<8x128xf32>
    %832 = vector.extract_strided_slice %819 {offsets = [0, 256], sizes = [8, 128], strides = [1, 1]} : vector<8x512xf32> to vector<8x128xf32>
    %833 = math.tanh %832 : vector<8x128xf32>
    %834 = vector.extract_strided_slice %819 {offsets = [0, 384], sizes = [8, 128], strides = [1, 1]} : vector<8x512xf32> to vector<8x128xf32>
    %835 = arith.negf %834 : vector<8x128xf32>
    %836 = math.exp %835 : vector<8x128xf32>
    %cst_432 = arith.constant 1.000000e+00 : f32
    %837 = vector.broadcast %cst_432 : f32 to vector<8x128xf32>
    %838 = arith.addf %837, %836 : vector<8x128xf32>
    %839 = arith.divf %837, %838 : vector<8x128xf32>
    %840 = arith.mulf %831, %792 : vector<8x128xf32>
    %841 = arith.mulf %825, %833 : vector<8x128xf32>
    %842 = arith.addf %840, %841 : vector<8x128xf32>
    %843 = math.tanh %842 : vector<8x128xf32>
    %844 = arith.mulf %839, %843 : vector<8x128xf32>
    %c0_433 = arith.constant 0 : index
    %c0_434 = arith.constant 0 : index
    %845 = vector.load %arg6[%c0_433, %c0_434] : memref<128x128xf32, #tpu.memory_space<vmem>>, vector<128x128xf32>
    %cst_435 = arith.constant dense<0.000000e+00> : vector<8x128xf32>
    %846 = tpu.matmul %844, %845, %cst_435 {dimension_numbers = #tpu.dot_dimension_numbers<[1], [0], [0], [1], [0, 0, 1, 1], [], []>} : vector<8x128xf32>, vector<128x128xf32>, vector<8x128xf32> -> vector<8x128xf32>
    %c0_436 = arith.constant 0 : index
    %c0_437 = arith.constant 0 : index
    %847 = vector.load %arg7[%c0_436, %c0_437] : memref<1x128xf32, #tpu.memory_space<vmem>>, vector<1x128xf32>
    %848 = vector.broadcast %847 : vector<1x128xf32> to vector<8x128xf32>
    %849 = arith.addf %846, %848 : vector<8x128xf32>
    %cst_438 = arith.constant dense<0xFF800000> : vector<8xf32>
    %850 = vector.multi_reduction <maximumf>, %849, %cst_438 [1] : vector<8x128xf32> to vector<8xf32>
    %cst_439 = arith.constant 0xFF800000 : f32
    %851 = vector.broadcast %cst_439 : f32 to vector<8xf32>
    %852 = arith.maximumf %851, %850 : vector<8xf32>
    %853 = vector.shape_cast %852 : vector<8xf32> to vector<8x1xf32>
    %854 = vector.broadcast %853 : vector<8x1xf32> to vector<8x128xf32>
    %855 = arith.subf %849, %854 : vector<8x128xf32>
    %856 = math.exp %855 : vector<8x128xf32>
    %cst_440 = arith.constant dense<0.000000e+00> : vector<8xf32>
    %857 = vector.multi_reduction <add>, %856, %cst_440 [1] : vector<8x128xf32> to vector<8xf32>
    %858 = vector.shape_cast %857 : vector<8xf32> to vector<8x1xf32>
    %859 = math.log %858 : vector<8x1xf32>
    %860 = vector.broadcast %859 : vector<8x1xf32> to vector<8x128xf32>
    %861 = arith.subf %855, %860 : vector<8x128xf32>
    %c13_441 = arith.constant 13 : index
    %c0_442 = arith.constant 0 : index
    %c0_443 = arith.constant 0 : index
    %862 = vector.load %arg8[%c13_441, %c0_442, %c0_443] : memref<16x8x128xf32, #tpu.memory_space<vmem>>, vector<1x8x128xf32>
    %863 = vector.shape_cast %862 : vector<1x8x128xf32> to vector<8x128xf32>
    %864 = vector.shape_cast %861 : vector<8x128xf32> to vector<1x8x128xf32>
    tpu.vector_store %arg8[%c13_441, %c0_442, %c0_443], %864 {strides = array<i32>} : memref<16x8x128xf32, #tpu.memory_space<vmem>>, vector<1x8x128xf32>,
    %c14_444 = arith.constant 14 : index
    %c0_445 = arith.constant 0 : index
    %c0_446 = arith.constant 0 : index
    %865 = vector.load %arg9[%c14_444, %c0_445, %c0_446] : memref<16x8x512xf32, #tpu.memory_space<vmem>>, vector<1x8x512xf32>
    %866 = vector.shape_cast %865 : vector<1x8x512xf32> to vector<8x512xf32>
    %c0_447 = arith.constant 0 : index
    %c0_448 = arith.constant 0 : index
    %867 = vector.load %arg4[%c0_447, %c0_448] : memref<128x512xf32, #tpu.memory_space<vmem>>, vector<128x512xf32>
    %cst_449 = arith.constant dense<0.000000e+00> : vector<8x512xf32>
    %868 = tpu.matmul %844, %867, %cst_449 {dimension_numbers = #tpu.dot_dimension_numbers<[1], [0], [0], [1], [0, 0, 1, 1], [], []>} : vector<8x128xf32>, vector<128x512xf32>, vector<8x512xf32> -> vector<8x512xf32>
    %869 = arith.addf %866, %868 : vector<8x512xf32>
    %870 = vector.extract_strided_slice %869 {offsets = [0, 0], sizes = [8, 128], strides = [1, 1]} : vector<8x512xf32> to vector<8x128xf32>
    %871 = arith.negf %870 : vector<8x128xf32>
    %872 = math.exp %871 : vector<8x128xf32>
    %cst_450 = arith.constant 1.000000e+00 : f32
    %873 = vector.broadcast %cst_450 : f32 to vector<8x128xf32>
    %874 = arith.addf %873, %872 : vector<8x128xf32>
    %875 = arith.divf %873, %874 : vector<8x128xf32>
    %876 = vector.extract_strided_slice %869 {offsets = [0, 128], sizes = [8, 128], strides = [1, 1]} : vector<8x512xf32> to vector<8x128xf32>
    %877 = arith.negf %876 : vector<8x128xf32>
    %878 = math.exp %877 : vector<8x128xf32>
    %cst_451 = arith.constant 1.000000e+00 : f32
    %879 = vector.broadcast %cst_451 : f32 to vector<8x128xf32>
    %880 = arith.addf %879, %878 : vector<8x128xf32>
    %881 = arith.divf %879, %880 : vector<8x128xf32>
    %882 = vector.extract_strided_slice %869 {offsets = [0, 256], sizes = [8, 128], strides = [1, 1]} : vector<8x512xf32> to vector<8x128xf32>
    %883 = math.tanh %882 : vector<8x128xf32>
    %884 = vector.extract_strided_slice %869 {offsets = [0, 384], sizes = [8, 128], strides = [1, 1]} : vector<8x512xf32> to vector<8x128xf32>
    %885 = arith.negf %884 : vector<8x128xf32>
    %886 = math.exp %885 : vector<8x128xf32>
    %cst_452 = arith.constant 1.000000e+00 : f32
    %887 = vector.broadcast %cst_452 : f32 to vector<8x128xf32>
    %888 = arith.addf %887, %886 : vector<8x128xf32>
    %889 = arith.divf %887, %888 : vector<8x128xf32>
    %890 = arith.mulf %881, %842 : vector<8x128xf32>
    %891 = arith.mulf %875, %883 : vector<8x128xf32>
    %892 = arith.addf %890, %891 : vector<8x128xf32>
    %893 = math.tanh %892 : vector<8x128xf32>
    %894 = arith.mulf %889, %893 : vector<8x128xf32>
    %c0_453 = arith.constant 0 : index
    %c0_454 = arith.constant 0 : index
    %895 = vector.load %arg6[%c0_453, %c0_454] : memref<128x128xf32, #tpu.memory_space<vmem>>, vector<128x128xf32>
    %cst_455 = arith.constant dense<0.000000e+00> : vector<8x128xf32>
    %896 = tpu.matmul %894, %895, %cst_455 {dimension_numbers = #tpu.dot_dimension_numbers<[1], [0], [0], [1], [0, 0, 1, 1], [], []>} : vector<8x128xf32>, vector<128x128xf32>, vector<8x128xf32> -> vector<8x128xf32>
    %c0_456 = arith.constant 0 : index
    %c0_457 = arith.constant 0 : index
    %897 = vector.load %arg7[%c0_456, %c0_457] : memref<1x128xf32, #tpu.memory_space<vmem>>, vector<1x128xf32>
    %898 = vector.broadcast %897 : vector<1x128xf32> to vector<8x128xf32>
    %899 = arith.addf %896, %898 : vector<8x128xf32>
    %cst_458 = arith.constant dense<0xFF800000> : vector<8xf32>
    %900 = vector.multi_reduction <maximumf>, %899, %cst_458 [1] : vector<8x128xf32> to vector<8xf32>
    %cst_459 = arith.constant 0xFF800000 : f32
    %901 = vector.broadcast %cst_459 : f32 to vector<8xf32>
    %902 = arith.maximumf %901, %900 : vector<8xf32>
    %903 = vector.shape_cast %902 : vector<8xf32> to vector<8x1xf32>
    %904 = vector.broadcast %903 : vector<8x1xf32> to vector<8x128xf32>
    %905 = arith.subf %899, %904 : vector<8x128xf32>
    %906 = math.exp %905 : vector<8x128xf32>
    %cst_460 = arith.constant dense<0.000000e+00> : vector<8xf32>
    %907 = vector.multi_reduction <add>, %906, %cst_460 [1] : vector<8x128xf32> to vector<8xf32>
    %908 = vector.shape_cast %907 : vector<8xf32> to vector<8x1xf32>
    %909 = math.log %908 : vector<8x1xf32>
    %910 = vector.broadcast %909 : vector<8x1xf32> to vector<8x128xf32>
    %911 = arith.subf %905, %910 : vector<8x128xf32>
    %c14_461 = arith.constant 14 : index
    %c0_462 = arith.constant 0 : index
    %c0_463 = arith.constant 0 : index
    %912 = vector.load %arg8[%c14_461, %c0_462, %c0_463] : memref<16x8x128xf32, #tpu.memory_space<vmem>>, vector<1x8x128xf32>
    %913 = vector.shape_cast %912 : vector<1x8x128xf32> to vector<8x128xf32>
    %914 = vector.shape_cast %911 : vector<8x128xf32> to vector<1x8x128xf32>
    tpu.vector_store %arg8[%c14_461, %c0_462, %c0_463], %914 {strides = array<i32>} : memref<16x8x128xf32, #tpu.memory_space<vmem>>, vector<1x8x128xf32>,
    %c15_464 = arith.constant 15 : index
    %c0_465 = arith.constant 0 : index
    %c0_466 = arith.constant 0 : index
    %915 = vector.load %arg9[%c15_464, %c0_465, %c0_466] : memref<16x8x512xf32, #tpu.memory_space<vmem>>, vector<1x8x512xf32>
    %916 = vector.shape_cast %915 : vector<1x8x512xf32> to vector<8x512xf32>
    %c0_467 = arith.constant 0 : index
    %c0_468 = arith.constant 0 : index
    %917 = vector.load %arg4[%c0_467, %c0_468] : memref<128x512xf32, #tpu.memory_space<vmem>>, vector<128x512xf32>
    %cst_469 = arith.constant dense<0.000000e+00> : vector<8x512xf32>
    %918 = tpu.matmul %894, %917, %cst_469 {dimension_numbers = #tpu.dot_dimension_numbers<[1], [0], [0], [1], [0, 0, 1, 1], [], []>} : vector<8x128xf32>, vector<128x512xf32>, vector<8x512xf32> -> vector<8x512xf32>
    %919 = arith.addf %916, %918 : vector<8x512xf32>
    %920 = vector.extract_strided_slice %919 {offsets = [0, 0], sizes = [8, 128], strides = [1, 1]} : vector<8x512xf32> to vector<8x128xf32>
    %921 = arith.negf %920 : vector<8x128xf32>
    %922 = math.exp %921 : vector<8x128xf32>
    %cst_470 = arith.constant 1.000000e+00 : f32
    %923 = vector.broadcast %cst_470 : f32 to vector<8x128xf32>
    %924 = arith.addf %923, %922 : vector<8x128xf32>
    %925 = arith.divf %923, %924 : vector<8x128xf32>
    %926 = vector.extract_strided_slice %919 {offsets = [0, 128], sizes = [8, 128], strides = [1, 1]} : vector<8x512xf32> to vector<8x128xf32>
    %927 = arith.negf %926 : vector<8x128xf32>
    %928 = math.exp %927 : vector<8x128xf32>
    %cst_471 = arith.constant 1.000000e+00 : f32
    %929 = vector.broadcast %cst_471 : f32 to vector<8x128xf32>
    %930 = arith.addf %929, %928 : vector<8x128xf32>
    %931 = arith.divf %929, %930 : vector<8x128xf32>
    %932 = vector.extract_strided_slice %919 {offsets = [0, 256], sizes = [8, 128], strides = [1, 1]} : vector<8x512xf32> to vector<8x128xf32>
    %933 = math.tanh %932 : vector<8x128xf32>
    %934 = vector.extract_strided_slice %919 {offsets = [0, 384], sizes = [8, 128], strides = [1, 1]} : vector<8x512xf32> to vector<8x128xf32>
    %935 = arith.negf %934 : vector<8x128xf32>
    %936 = math.exp %935 : vector<8x128xf32>
    %cst_472 = arith.constant 1.000000e+00 : f32
    %937 = vector.broadcast %cst_472 : f32 to vector<8x128xf32>
    %938 = arith.addf %937, %936 : vector<8x128xf32>
    %939 = arith.divf %937, %938 : vector<8x128xf32>
    %940 = arith.mulf %931, %892 : vector<8x128xf32>
    %941 = arith.mulf %925, %933 : vector<8x128xf32>
    %942 = arith.addf %940, %941 : vector<8x128xf32>
    %943 = math.tanh %942 : vector<8x128xf32>
    %944 = arith.mulf %939, %943 : vector<8x128xf32>
    %c0_473 = arith.constant 0 : index
    %c0_474 = arith.constant 0 : index
    %945 = vector.load %arg6[%c0_473, %c0_474] : memref<128x128xf32, #tpu.memory_space<vmem>>, vector<128x128xf32>
    %cst_475 = arith.constant dense<0.000000e+00> : vector<8x128xf32>
    %946 = tpu.matmul %944, %945, %cst_475 {dimension_numbers = #tpu.dot_dimension_numbers<[1], [0], [0], [1], [0, 0, 1, 1], [], []>} : vector<8x128xf32>, vector<128x128xf32>, vector<8x128xf32> -> vector<8x128xf32>
    %c0_476 = arith.constant 0 : index
    %c0_477 = arith.constant 0 : index
    %947 = vector.load %arg7[%c0_476, %c0_477] : memref<1x128xf32, #tpu.memory_space<vmem>>, vector<1x128xf32>
    %948 = vector.broadcast %947 : vector<1x128xf32> to vector<8x128xf32>
    %949 = arith.addf %946, %948 : vector<8x128xf32>
    %cst_478 = arith.constant dense<0xFF800000> : vector<8xf32>
    %950 = vector.multi_reduction <maximumf>, %949, %cst_478 [1] : vector<8x128xf32> to vector<8xf32>
    %cst_479 = arith.constant 0xFF800000 : f32
    %951 = vector.broadcast %cst_479 : f32 to vector<8xf32>
    %952 = arith.maximumf %951, %950 : vector<8xf32>
    %953 = vector.shape_cast %952 : vector<8xf32> to vector<8x1xf32>
    %954 = vector.broadcast %953 : vector<8x1xf32> to vector<8x128xf32>
    %955 = arith.subf %949, %954 : vector<8x128xf32>
    %956 = math.exp %955 : vector<8x128xf32>
    %cst_480 = arith.constant dense<0.000000e+00> : vector<8xf32>
    %957 = vector.multi_reduction <add>, %956, %cst_480 [1] : vector<8x128xf32> to vector<8xf32>
    %958 = vector.shape_cast %957 : vector<8xf32> to vector<8x1xf32>
    %959 = math.log %958 : vector<8x1xf32>
    %960 = vector.broadcast %959 : vector<8x1xf32> to vector<8x128xf32>
    %961 = arith.subf %955, %960 : vector<8x128xf32>
    %c15_481 = arith.constant 15 : index
    %c0_482 = arith.constant 0 : index
    %c0_483 = arith.constant 0 : index
    %962 = vector.load %arg8[%c15_481, %c0_482, %c0_483] : memref<16x8x128xf32, #tpu.memory_space<vmem>>, vector<1x8x128xf32>
    %963 = vector.shape_cast %962 : vector<1x8x128xf32> to vector<8x128xf32>
    %964 = vector.shape_cast %961 : vector<8x128xf32> to vector<1x8x128xf32>
    tpu.vector_store %arg8[%c15_481, %c0_482, %c0_483], %964 {strides = array<i32>} : memref<16x8x128xf32, #tpu.memory_space<vmem>>, vector<1x8x128xf32>,
    %c0_484 = arith.constant 0 : index
    %c0_485 = arith.constant 0 : index
    %965 = vector.load %arg10[%c0_484, %c0_485] : memref<8x128xf32, #tpu.memory_space<vmem>>, vector<8x128xf32>
    tpu.vector_store %arg10[%c0_484, %c0_485], %944 {strides = array<i32>} : memref<8x128xf32, #tpu.memory_space<vmem>>, vector<8x128xf32>,
    %c0_486 = arith.constant 0 : index
    %c0_487 = arith.constant 0 : index
    %966 = vector.load %arg11[%c0_486, %c0_487] : memref<8x128xf32, #tpu.memory_space<vmem>>, vector<8x128xf32>
    tpu.vector_store %arg11[%c0_486, %c0_487], %942 {strides = array<i32>} : memref<8x128xf32, #tpu.memory_space<vmem>>, vector<8x128xf32>,
    return
  }
  func.func @transform_0(%arg0: i32, %arg1: i32) -> (i32, i32, i32) {
    %c0_i32 = arith.constant 0 : i32
    %c0_i32_0 = arith.constant 0 : i32
    return %arg1, %arg0, %c0_i32 : i32, i32, i32
  }
  func.func @transform_1(%arg0: i32, %arg1: i32) -> (i32, i32) {
    %c0_i32 = arith.constant 0 : i32
    %c0_i32_0 = arith.constant 0 : i32
    %c0_i32_1 = arith.constant 0 : i32
    return %c0_i32, %c0_i32_0 : i32, i32
  }
  func.func @transform_2(%arg0: i32, %arg1: i32) -> (i32, i32) {
    %c0_i32 = arith.constant 0 : i32
    %c0_i32_0 = arith.constant 0 : i32
    %c0_i32_1 = arith.constant 0 : i32
    return %c0_i32, %c0_i32_0 : i32, i32
  }
  func.func @transform_3(%arg0: i32, %arg1: i32) -> (i32, i32) {
    %c0_i32 = arith.constant 0 : i32
    %c0_i32_0 = arith.constant 0 : i32
    %c0_i32_1 = arith.constant 0 : i32
    return %c0_i32, %c0_i32_0 : i32, i32
  }
  func.func @transform_4(%arg0: i32, %arg1: i32) -> (i32, i32) {
    %c0_i32 = arith.constant 0 : i32
    %c0_i32_0 = arith.constant 0 : i32
    %c0_i32_1 = arith.constant 0 : i32
    return %c0_i32, %c0_i32_0 : i32, i32
  }
  func.func @transform_5(%arg0: i32, %arg1: i32) -> (i32, i32) {
    %c0_i32 = arith.constant 0 : i32
    %c0_i32_0 = arith.constant 0 : i32
    %c0_i32_1 = arith.constant 0 : i32
    return %c0_i32, %c0_i32_0 : i32, i32
  }
  func.func @transform_6(%arg0: i32, %arg1: i32) -> (i32, i32, i32) {
    %c0_i32 = arith.constant 0 : i32
    %c0_i32_0 = arith.constant 0 : i32
    return %arg1, %arg0, %c0_i32 : i32, i32, i32
  }
}

</mosaic_0001>

<bundles_post_ra>
// kernel: tpu_custom_call.1
= control target key start
LH: loop header
LB: loop body
LE: loop exit
PB: predicated region body
PF: predicated region fallthrough
CT: control target
= control target key end

     0   :  { %s14505_s0 = inlined_call_operand.hbm [shape: f32[32,8,32], index: 0, kind: input, shape index: {}]   ;;  %s14506_s1 = inlined_call_operand.hbm [shape: f32[32,512], index: 1, kind: input, shape index: {}]   ;;  %s14507_s2 = inlined_call_operand.hbm [shape: f32[128,512], index: 2, kind: input, shape index: {}]   ;;  %s14508_s3 = inlined_call_operand.vmem [shape: f32[1,512], index: 3, kind: input, shape index: {}]   ;;  %s14509_s4 = inlined_call_operand.hbm [shape: f32[128,128], index: 4, kind: input, shape index: {}]   ;;  %s14510_s5 = inlined_call_operand.vmem [shape: f32[1,128], index: 5, kind: input, shape index: {}]   ;;  %s14511_s6 = inlined_call_operand.hbm [shape: f32[32,8,128], index: 6, kind: output, shape index: {}]  }
   0x1   :  { %14544 = sst [smem:[#allocation34_spill]] %s14511_s6 }
   0x2   :  { %11 = vsyncpa [#allocation6], 0 }
   0x3   :  { %13 = vsyncpa [#allocation6 + $0x1], 0 }
   0x4   :  { %14 = vsyncpa [#allocation9], 0 }
   0x5   :  { %15 = vsyncpa [#allocation12], 0 }
   0x6   :  { %16 = vsyncpa [#allocation7], 0 }
   0x7   :  { %18 = vsyncpa [#allocation7 + $0x1], 0  ;;  %s12451_s21 = smov 0   ;;  %s12453_s22 = smov 0  }
   0x8   :  { %s12455_s23 = smov 0   ;;  %s12457_s24 = smov 0  }
   0x9   :  { %s12459_s25 = smov 0   ;;  %s12461_s26 = smov 0  }
   0xa LB: > { %14545 = sst [smem:[#allocation18_spill]] %s12379_s21  ;;  %s8998_s27 = sadd.s32 4294967295, %s12399_s26   ;;  %s12399_s26 = sphi %s12461_s26, %s24_s26   ;;  %s12395_s25 = sphi %s12459_s25, %s14614_s25   ;;  %s12391_s24 = sphi %s12457_s24, %s14613_s24   ;;  %s12387_s23 = sphi %s12455_s23, %s14612_s23   ;;  %s12383_s22 = sphi %s12453_s22, %s14611_s22   ;;  %s12379_s21 = sphi %s12451_s21, %s14610_s21  }
   0xb   : > { %s8999_s28 = sadd.s32 4294967294, %s12399_s26   ;;  %p58_p0 = scmp.ne.s32.totalorder %s12383_s22, %s12379_s21 }
   0xc   : > { %p12485_p1 = scmp.eq.s32.totalorder %s8998_s27, 0  ;;  %p12489_p2 = scmp.eq.s32.totalorder %s8998_s27, 1 }
   0xd   : > { %p195_p3 = scmp.eq.s32.totalorder %s8999_s28, 1  ;;  %p9000_p5 = scmp.ge.s32.totalorder %s12399_s26, 1 }
   0xe   : > { %s14546_s29 = scalar_select %p12485_p1, 1, 0 }
   0xf   : > { %s14547_s30 = scalar_select %p12489_p2, 1, 0 }
  0x10   : > { %p12495_p4 = por %p12485_p1, %p58_p0  ;;  %p12500_p6 = por %p195_p3, %p58_p0 }
  0x11   : > { %p202_p7 = scmp.lt.s32.totalorder %s12399_s26, 3  ;;  %s12401_s10 = smov [#allocation8]  }
  0x12   : > { %s14548_s7 = scalar_select %p12495_p4, 1, 0 }
  0x13   : > { %s14549_s8 = scalar_select %p12500_p6, 1, 0 }
  0x14   : > { %p12505_p8 = pnand %p9000_p5, %p202_p7  ;;  %s214_s11 = sshll.u32 %s12401_s10, 4  ;;  %s12509_s11 = int_to_ptr.vmem [resolvable:$true] %s214_s11 }
  0x15   : > { %14550 = sst [smem:[#allocation19_spill]] %s14549_s8  ;;  %s12402_s13 = smov [#allocation10]  }
  0x16   : > { %s14551_s9 = scalar_select %p12505_p8, 1, 0 }
  0x17   : > { %p11788_p9 = pneg %p12505_p8  ;;  %s227_s14 = sshll.u32 %s12402_s13, 4  ;;  %s12520_s14 = int_to_ptr.vmem [resolvable:$true] %s227_s14 }
  0x18   : > { %s12403_s15 = smov [#allocation11]   ;;  %s12195_s19 = scalar_lea.hbm %s14506_s1, 2048 }
  0x19   : > { %p12516_p11 = pnand %p11788_p9, %p12485_p1  ;;  %s12522_s16 = sshll.u32 %s12403_s15, 4  ;;  %s244_s16 = int_to_ptr.vmem [resolvable:$true] %s12522_s16 }
  0x1a   : > { %p12196_p12 = scmp.ne.s32.totalorder %s14506_s1, %s12195_s19  ;;  %p12202_p5 = scmp.lt.u32.totalorder %s12195_s19, %s14506_s1 }
  0x1b   : > { %p12532_p13 = pneg %p12516_p11 }
  0x1d   : > { %p12198_p0 = pnand %p12532_p13, %p12196_p12 }
  0x1f   : > { %p12199_p3 = pneg %p12198_p0 }
  0x21   : > { %p12204_p7 = pnand %p12202_p5, %p12199_p3 }
  0x23   : > { %12207 = shalt.err (!%p12204_p7)
}
  0x24   : > { %s12208_s15 = scalar_lea.vmem %s12509_s11, 2048  ;;  %p12216_p1 = scmp.lt.s32.totalorder %s12509_s11, %s12509_s11 }
  0x25   : > { %p12209_p9 = scmp.ne.s32.totalorder %s12509_s11, %s12208_s15  ;;  %p12217_p4 = scmp.lt.s32.totalorder %s12208_s15, %s12208_s15 }
  0x27   : > { %p12211_p10 = pnand %p12209_p9, %p12532_p13  ;;  %p12218_p12 = por %p12217_p4, %p12216_p1 }
  0x29   : > { %p12212_p6 = pneg %p12211_p10 }
  0x2b   : > { %p12219_p0 = pnand %p12218_p12, %p12212_p6 }
  0x2d   : > { %12222 = shalt.err (!%p12219_p0)
}
  0x2e   : > { %s12404_s17 = smov 512   ;;  %s12405_s18 = smov 32  }
  0x2f   : > { %11791 = dma.hbm_to_vmem [thread:$0]  (!%p12516_p11), %s14506_s1, 2048, %s12509_s11, [#allocation9], %s12404_s17, %s12404_s17, %s12405_s18  }
  0x30   : > { %s12223_s13 = scalar_lea.hbm %s14507_s2, 8192 }
  0x31   : > { %p12224_p1 = scmp.ne.s32.totalorder %s14507_s2, %s12223_s13  ;;  %p12230_p10 = scmp.lt.u32.totalorder %s12223_s13, %s14507_s2 }
  0x33   : > { %p12226_p4 = pnand %p12224_p1, %p12532_p13 }
  0x35   : > { %p12227_p6 = pneg %p12226_p4 }
  0x37   : > { %p12232_p3 = pnand %p12230_p10, %p12227_p6 }
  0x39   : > { %12235 = shalt.err (!%p12232_p3)
}
  0x3a   : > { %s12236_s11 = scalar_lea.vmem %s12520_s14, 8192  ;;  %p12244_p12 = scmp.lt.s32.totalorder %s12520_s14, %s12520_s14 }
  0x3b   : > { %p12237_p5 = scmp.ne.s32.totalorder %s12520_s14, %s12236_s11  ;;  %p12245_p0 = scmp.lt.s32.totalorder %s12236_s11, %s12236_s11 }
  0x3d   : > { %p12239_p7 = pnand %p12237_p5, %p12532_p13  ;;  %p12246_p1 = por %p12245_p0, %p12244_p12 }
  0x3f   : > { %p12240_p9 = pneg %p12239_p7 }
  0x41   : > { %p12247_p4 = pnand %p12246_p1, %p12240_p9 }
  0x43   : > { %12250 = shalt.err (!%p12247_p4)
}
  0x44   : > { %11794 = dma.hbm_to_vmem [thread:$0]  (!%p12516_p11), %s14507_s2, 8192, %s12520_s14, [#allocation9], %s12404_s17, %s12404_s17, %s12405_s18  }
  0x45   : > { %s12251_s20 = scalar_lea.hbm %s14509_s4, 2048 }
  0x46   : > { %p12252_p6 = scmp.ne.s32.totalorder %s14509_s4, %s12251_s20  ;;  %p12258_p5 = scmp.lt.u32.totalorder %s12251_s20, %s14509_s4 }
  0x48   : > { %p12254_p10 = pnand %p12252_p6, %p12532_p13 }
  0x4a   : > { %p12255_p3 = pneg %p12254_p10 }
  0x4c   : > { %p12260_p7 = pnand %p12258_p5, %p12255_p3 }
  0x4e   : > { %12263 = shalt.err (!%p12260_p7)
}
  0x4f   : > { %s12264_s11 = scalar_lea.vmem %s244_s16, 2048  ;;  %p12272_p1 = scmp.lt.s32.totalorder %s244_s16, %s244_s16 }
  0x50   : > { %p12265_p9 = scmp.ne.s32.totalorder %s244_s16, %s12264_s11  ;;  %p12273_p4 = scmp.lt.s32.totalorder %s12264_s11, %s12264_s11 }
  0x52   : > { %p12267_p12 = pnand %p12265_p9, %p12532_p13  ;;  %p12274_p8 = por %p12273_p4, %p12272_p1 }
  0x54   : > { %p12268_p0 = pneg %p12267_p12 }
  0x56   : > { %p12275_p2 = pnand %p12274_p8, %p12268_p0 }
  0x58   : > { %12278 = shalt.err (!%p12275_p2)
}
  0x59   : > { %s12406_s14 = smov 128   ;;  %s12407_s28 = smov 8  }
  0x5a   : > { %11797 = dma.hbm_to_vmem [thread:$0]  (!%p12516_p11), %s14509_s4, 2048, %s244_s16, [#allocation12], %s12406_s14, %s12406_s14, %s12407_s28  }
  0x5b   : > { %s45_s6 = sadd.s32 1, %s12387_s23  ;;  %s33_s21 = sadd.s32 1, %s12395_s25 }
  0x5c   : > { %p52_p2 = scmp.ne.s32.totalorder %s12387_s23, %s12383_s22  ;;  %p34_p8 = scmp.ge.s32.totalorder %s33_s21, 2 }
  0x5d   : > { %p53_p13 = scmp.eq.s32.totalorder %s12399_s26, 0  ;;  %p14554_p6 = scmp.ne.s32.totalorder %s14547_s30, 0 }
  0x5e   : > { %p11809_p3 = scmp.lt.s32.totalorder %s12399_s26, 2  ;;  %s14616_s21 = smov (%p34_p8, %s33_s21), 0 }
  0x5f   : > { %p12605_p10 = por %p14554_p6, %p52_p2  ;;  %p54_p5 = por %p53_p13, %p52_p2 }
  0x60   : > { %s260_s12 = sand.u32 1, %s12387_s23   ;;  %s40_s19 = ssub.s32 %s12395_s25, %s14616_s21 }
  0x61   : > { %p43_p7 = scmp.eq.s32.totalorder %s40_s19, 0  ;;  %s9005_s16 = sshll.u32 %s260_s12, 7 }
  0x62   : > { %s9146_s20 = sshll.u32 %s12395_s25, 11  ;;  %s264_s15 = scalar_lea.vmem [#allocation5], %s9005_s16 }
  0x63   : > { %s12617_s27 = scalar_select %p43_p7, %s12387_s23, %s45_s6  }
  0x64   : > { %s12622_s30 = scalar_lea.hbm %s14505_s0, %s9146_s20  ;;  %s272_s11 = sshll.u32 %s264_s15, 4  ;;  %s12624_s11 = int_to_ptr.vmem [resolvable:$true] %s272_s11 }
  0x65   : > { %p12628_p11 = pnand %p11809_p3, %p54_p5  ;;  %s12632_s18 = scalar_lea.sflag [#allocation6], %s260_s12 }
  0x66   : > { %s12279_s6 = scalar_lea.hbm %s12622_s30, 2048  ;;  %s12284_s20 = scalar_lea.hbm %s14505_s0, 4096 }
  0x67   : > { %p12280_p9 = scmp.ne.s32.totalorder %s12622_s30, %s12279_s6  ;;  %p12281_p12 = pneg %p12628_p11 }
  0x68   : > { %p12285_p4 = scmp.lt.u32.totalorder %s12622_s30, %s14505_s0  ;;  %p12286_p2 = scmp.lt.u32.totalorder %s12284_s20, %s12279_s6 }
  0x69   : > { %p12282_p0 = pnand %p12281_p12, %p12280_p9  ;;  %p12288_p13 = scmp.lt.u32.totalorder %s12279_s6, %s12622_s30 }
  0x6a   : > { %p12287_p8 = por %p12286_p2, %p12285_p4 }
  0x6b   : > { %p12283_p1 = pneg %p12282_p0 }
  0x6c   : > { %p12289_p6 = por %p12288_p13, %p12287_p8 }
  0x6e   : > { %p12290_p3 = pnand %p12289_p6, %p12283_p1 }
  0x70   : > { %12293 = shalt.err (!%p12290_p3)
}
  0x71   : > { %s12294_s12 = scalar_lea.vmem %s12624_s11, 2048  ;;  %s12408_s15 = smov [#allocation5]  }
  0x72   : > { %p12295_p5 = scmp.ne.s32.totalorder %s12624_s11, %s12294_s12  ;;  %s12299_s19 = sshll.u32 %s12408_s15, 4  ;;  %s12300_s19 = int_to_ptr.vmem [resolvable:$false] %s12299_s19 }
  0x73   : > { %s12301_s16 = scalar_lea.vmem %s12300_s19, 4096  ;;  %p12302_p0 = scmp.lt.s32.totalorder %s12624_s11, %s12300_s19 }
  0x74   : > { %p12297_p7 = pnand %p12295_p5, %p12281_p12  ;;  %p12303_p4 = scmp.lt.s32.totalorder %s12301_s16, %s12294_s12 }
  0x76   : > { %p12298_p9 = pneg %p12297_p7  ;;  %p12304_p2 = por %p12303_p4, %p12302_p0 }
  0x78   : > { %p12305_p8 = pnand %p12304_p2, %p12298_p9 }
  0x7a   : > { %12308 = shalt.err (!%p12305_p8)
}
  0x7b   : > { %11801 = dma.hbm_to_vmem [thread:$0]  (!%p12628_p11), %s12622_s30, 2048, %s12624_s11, %s12632_s18, %s12406_s14, %s12406_s14, %s12407_s28  }
  0x7c   : > { %p14557_p12 = scmp.ne.s32.totalorder %s14551_s9, 0 }
  0x7e   : > { %284 = sbr.rel (%p14557_p12) target bundleno = 5361 (0x14f1), region = 44 }
  0x85   : > { %s12666_s6 = sand.u32 1, %s12383_s22   ;;  %p14558_p1 = scmp.ne.s32.totalorder %s14548_s7, 0 }
  0x86   : > { %s9009_s20 = sshll.u32 %s12666_s6, 7  ;;  %s287_s10 = scalar_lea.sflag [#allocation6], %s12666_s6 }
  0x87   : > { %s12670_s13 = scalar_lea.vmem [#allocation5], %s9009_s20 }
  0x88   : > { %12362 = dma.done.wait (%p14558_p1), %s287_s10, 2048  }
  0x89   : > { %12364 = vsyncadd (%p14558_p1), %s287_s10, 4294965248  ;;  %p14559_p11 = scmp.ne.s32.totalorder %s14546_s29, 0 }
  0x8b   : > { %12366 = dma.done.wait (%p14559_p11), [#allocation9], 10240  }
  0x8c   : > { %12368 = vsyncadd (%p14559_p11), [#allocation9], 4294957056 }
  0x8d   : > { %12370 = dma.done.wait (%p14559_p11), [#allocation12], 2048  }
  0x8e   : > { %12372 = vsyncadd (%p14559_p11), [#allocation12], 4294965248  ;;  %s12684_s9 = scalar_lea.vmem [#allocation13], %s9009_s20  ;;  %p9014_p13 = scmp.ne.s32.totalorder %s12391_s24, 0 }
  0x8f   : > { %v12409_v0 = vmov (!%p9014_p13), 0.0  }
  0x90   : > { %336 = sbr.rel (%p9014_p13) target bundleno = 151 (0x97), region = 64  ;;  %337 = vst [vmem:[#allocation3] sm:$0xff] (!%p9014_p13), %v12409_v0  ;;  %338 = vst [vmem:[#allocation4] sm:$0xff] (!%p9014_p13), %v12409_v0 }
  0x97 PF: > { %v341_v1 = vld [vmem:[#allocation8 + $0x8] sm:$0xff]  ;;  %v343_v3 = vld [vmem:[#allocation8 + $0x18] sm:$0xff]  ;;  %v340_v6 = vld [vmem:[#allocation8] sm:$0xff]  ;;  %v14521_v8 = vmov 0.0   ;;  %vm378_vm0 = vcmask 261120   ;;  %vm12412_vm1 = vmmov 0  }
  0x98   : > { %v345_v2 = vld [vmem:[#allocation8 + $0x28] sm:$0xff]  ;;  %v347_v5 = vld [vmem:[#allocation8 + $0x38] sm:$0xff]  ;;  %v344_v7 = vld [vmem:[#allocation8 + $0x20] sm:$0xff]  ;;  %446 = vmatprep.mubr.f32.mxu0 %v14521_v8  ;;  %517 = vmatprep.mubr.f32.mxu1 %v14521_v8  ;;  %s8884_s29 = sshll.u32 %s12684_s9, 4  ;;  %s14604_s28 = sld [smem:[#allocation34_spill]]  ;;  %s14455_s29 = int_to_ptr.vmem [resolvable:$true] %s8884_s29 }
  0x99   : > { %v12687_v4 = vpack.c.bf16 %v345_v2, %v341_v1  ;;  %v12691_v9 = vpack.c.bf16 %v347_v5, %v343_v3  ;;  %v12693_v10 = vpack.c.bf16 %v344_v7, %v340_v6  ;;  %v342_v11 = vld [vmem:[#allocation8 + $0x10] sm:$0xff]  ;;  %v349_v13 = vld [vmem:[#allocation8 + $0x48] sm:$0xff]  ;;  %v351_v16 = vld [vmem:[#allocation8 + $0x58] sm:$0xff]  ;;  %s8870_s11 = scalar_lea.sflag [#allocation7], %s12666_s6  ;;  %s12309_s17 = scalar_lea.vmem %s14455_s29, 2048 }
  0x9a   : > { %v346_v12 = vld [vmem:[#allocation8 + $0x30] sm:$0xff]  ;;  %v353_v15 = vld [vmem:[#allocation8 + $0x68] sm:$0xff]  ;;  %v355_v17 = vld [vmem:[#allocation8 + $0x78] sm:$0xff]  ;;  %p12310_p6 = scmp.ne.s32.totalorder %s14455_s29, %s12309_s17 }
  0x9b   : > { %9981 = vmatprep.subr.bf16.mxu0 %v12687_v4  ;;  %v12696_v14 = vpack.c.bf16 %v346_v12, %v342_v11  ;;  %9989 = vmatprep.subr.bf16.mxu1 %v12691_v9  ;;  %v12700_v18 = vpack.c.bf16 %v353_v15, %v349_v13  ;;  %v12702_v19 = vpack.c.bf16 %v355_v17, %v351_v16  ;;  %v348_v20 = vld [vmem:[#allocation8 + $0x40] sm:$0xff]  ;;  %v350_v22 = vld [vmem:[#allocation8 + $0x50] sm:$0xff]  ;;  %v9017_v27 = vld [vmem:[%s12670_s13 + $0x8] sm:$0xff] }
  0x9c   : > { %9983 = vmatpush1.bf16.msra.mxu0 %v12693_v10  ;;  %v352_v21 = vld [vmem:[#allocation8 + $0x60] sm:$0xff]  ;;  %v354_v24 = vld [vmem:[#allocation8 + $0x70] sm:$0xff]  ;;  %v9023_v29 = vld [vmem:[%s12670_s13 + $0x18] sm:$0xff]  ;;  %p12311_p3 = pnand %p12310_p6, %p12605_p10 }
  0x9d   : > { %9991 = vmatpush1.bf16.msra.mxu1 %v12696_v14  ;;  %v12705_v23 = vpack.c.bf16 %v352_v21, %v348_v20  ;;  %9985 = vmatprep.subr.bf16.mxu0 %v12700_v18  ;;  %v12709_v25 = vpack.c.bf16 %v354_v24, %v350_v22  ;;  %v339_v26 = vld [vmem:[%s12670_s13] sm:$0xff]  ;;  %v9020_v28 = vld [vmem:[%s12670_s13 + $0x10] sm:$0xff]  ;;  %v9029_v31 = vld [vmem:[%s12670_s13 + $0x28] sm:$0xff] }
  0x9e   : > { %9993 = vmatprep.subr.bf16.mxu1 %v12702_v19  ;;  %v9026_v30 = vld [vmem:[%s12670_s13 + $0x20] sm:$0xff]  ;;  %v9032_v32 = vld [vmem:[%s12670_s13 + $0x30] sm:$0xff]  ;;  %v9035_v33 = vld [vmem:[%s12670_s13 + $0x38] sm:$0xff]  ;;  %p12312_p5 = pneg %p12311_p3 }
  0x9f   : > { %v9038_v34 = vld [vmem:[%s12670_s13 + $0x40] sm:$0xff]  ;;  %v9041_v35 = vld [vmem:[%s12670_s13 + $0x48] sm:$0xff]  ;;  %v9044_v36 = vld [vmem:[%s12670_s13 + $0x50] sm:$0xff] }
  0xa0   : > { %9987 = vmatpush1.bf16.msra.mxu0 %v12705_v23  ;;  %v9047_v37 = vld [vmem:[%s12670_s13 + $0x58] sm:$0xff]  ;;  %v9050_v38 = vld [vmem:[%s12670_s13 + $0x60] sm:$0xff]  ;;  %v3001_v39 = vld [vmem:[#allocation8 + $0x8] sm:$0xff] }
  0xa1   : > { %9995 = vmatpush1.bf16.msra.mxu1 %v12709_v25  ;;  %9997 = vmatprep.subr.bf16.mxu0 %v12687_v4  ;;  %v3005_v40 = vld [vmem:[#allocation8 + $0x28] sm:$0xff]  ;;  %v3003_v41 = vld [vmem:[#allocation8 + $0x18] sm:$0xff]  ;;  %v3000_v44 = vld [vmem:[#allocation8] sm:$0xff] }
  0xa2   : > { %10005 = vmatprep.subr.bf16.mxu1 %v12691_v9  ;;  %v3007_v42 = vld [vmem:[#allocation8 + $0x38] sm:$0xff]  ;;  %v10204_v43 = vpack.c.bf16 %v3005_v40, %v3001_v39  ;;  %v3004_v45 = vld [vmem:[#allocation8 + $0x20] sm:$0xff]  ;;  %v3002_v46 = vld [vmem:[#allocation8 + $0x10] sm:$0xff] }
  0xa3   : > { %9015 = vmatmul.mubr.msk.f32.vlgmr.msra.gmra.mrb[0].mxu0 %vm378_vm0, %v339_v26  ;;  %v10212_v47 = vpack.c.bf16 %v3007_v42, %v3003_v41  ;;  %v3006_v48 = vld [vmem:[#allocation8 + $0x30] sm:$0xff]  ;;  %v3009_v49 = vld [vmem:[#allocation8 + $0x48] sm:$0xff]  ;;  %v3011_v51 = vld [vmem:[#allocation8 + $0x58] sm:$0xff]  ;;  %v10206_v54 = vpack.c.bf16 %v3004_v45, %v3000_v44 }
  0xa4   : > { %9016 = vmatmul.mubr.msk.f32.vlgmr.msra.gmra.mrb[0].mxu1 %vm378_vm0, %v339_v26  ;;  %9999 = vmatpush1.bf16.msra.mxu0 %v12693_v10  ;;  %v3013_v50 = vld [vmem:[#allocation8 + $0x68] sm:$0xff]  ;;  %v3015_v52 = vld [vmem:[#allocation8 + $0x78] sm:$0xff]  ;;  %v10214_v55 = vpack.c.bf16 %v3006_v48, %v3002_v46  ;;  %v3008_v57 = vld [vmem:[#allocation8 + $0x40] sm:$0xff] }
  0xa5   : > { %10007 = vmatpush1.bf16.msra.mxu1 %v12696_v14  ;;  %10001 = vmatprep.subr.bf16.mxu0 %v12700_v18  ;;  %v9053_v53 = vld [vmem:[%s12670_s13 + $0x68] sm:$0xff]  ;;  %v10208_v56 = vpack.c.bf16 %v3013_v50, %v3009_v49  ;;  %v3012_v58 = vld [vmem:[#allocation8 + $0x60] sm:$0xff]  ;;  %v10216_v59 = vpack.c.bf16 %v3015_v52, %v3011_v51  ;;  %v3010_v60 = vld [vmem:[#allocation8 + $0x50] sm:$0xff] }
  0xa6   : > { %10009 = vmatprep.subr.bf16.mxu1 %v12702_v19  ;;  %635 = vmatprep.mubr.f32.mxu0 %v14521_v8  ;;  %v3014_v61 = vld [vmem:[#allocation8 + $0x70] sm:$0xff]  ;;  %v10210_v62 = vpack.c.bf16 %v3012_v58, %v3008_v57  ;;  %v3385_v1 = vld [vmem:[#allocation10 + $0x8] sm:$0xff]  ;;  %v3387_v3 = vld [vmem:[#allocation10 + $0x18] sm:$0xff] }
  0xa7   : > { %706 = vmatprep.mubr.f32.mxu1 %v14521_v8  ;;  %v10218_v63 = vpack.c.bf16 %v3014_v61, %v3010_v60  ;;  %v9056_v0 = vld [vmem:[%s12670_s13 + $0x70] sm:$0xff]  ;;  %v3389_v2 = vld [vmem:[#allocation10 + $0x28] sm:$0xff]  ;;  %v3384_v6 = vld [vmem:[#allocation10] sm:$0xff] }
  0xa8   : > { %10003 = vmatpush1.bf16.msra.mxu0 %v12705_v23  ;;  %v12890_v5 = vpack.c.bf16 %v3389_v2, %v3385_v1  ;;  %v3388_v7 = vld [vmem:[#allocation10 + $0x20] sm:$0xff]  ;;  %v3390_v11 = vld [vmem:[#allocation10 + $0x30] sm:$0xff]  ;;  %v3393_v12 = vld [vmem:[#allocation10 + $0x48] sm:$0xff] }
  0xa9   : > { %10011 = vmatpush1.bf16.msra.mxu1 %v12709_v25  ;;  %10013 = vmatprep.subr.bf16.mxu0 %v12687_v4  ;;  %v3397_v13 = vld [vmem:[#allocation10 + $0x68] sm:$0xff]  ;;  %v3399_v15 = vld [vmem:[#allocation10 + $0x78] sm:$0xff]  ;;  %v12897_v17 = vpack.c.bf16 %v3388_v7, %v3384_v6  ;;  %v3392_v20 = vld [vmem:[#allocation10 + $0x40] sm:$0xff] }
  0xaa   : > { %10021 = vmatprep.subr.bf16.mxu1 %v12691_v9  ;;  %v9059_v16 = vld [vmem:[%s12670_s13 + $0x78] sm:$0xff]  ;;  %v3396_v21 = vld [vmem:[#allocation10 + $0x60] sm:$0xff]  ;;  %v3394_v22 = vld [vmem:[#allocation10 + $0x50] sm:$0xff]  ;;  %s9147_s13 = sshll.u32 %s12391_s24, 11  ;;  %s12413_s24 = smov [#allocation13]  }
  0xab   : > { %9018 = vmatmul.mubr.msk.f32.vlgmr.msra.gmra.mrb[2].mxu0 %vm378_vm0, %v9017_v27  ;;  %v3398_v24 = vld [vmem:[#allocation10 + $0x70] sm:$0xff]  ;;  %v3405_v26 = vld [vmem:[#allocation10 + $0xa8] sm:$0xff]  ;;  %v3411_v39 = vld [vmem:[#allocation10 + $0xd8] sm:$0xff]  ;;  %s14453_s30 = scalar_lea.hbm %s14604_s28, %s9147_s13  ;;  %s12313_s18 = sshll.u32 %s12413_s24, 4  ;;  %s12314_s18 = int_to_ptr.vmem [resolvable:$false] %s12313_s18 }
  0xac   : > { %9019 = vmatmul.mubr.msk.f32.vlgmr.msra.gmra.mrb[2].mxu1 %vm378_vm0, %v9017_v27  ;;  %10015 = vmatpush1.bf16.msra.mxu0 %v12693_v10  ;;  %v3403_v27 = vld [vmem:[#allocation10 + $0x98] sm:$0xff]  ;;  %v3408_v44 = vld [vmem:[#allocation10 + $0xc0] sm:$0xff]  ;;  %v3410_v46 = vld [vmem:[#allocation10 + $0xd0] sm:$0xff]  ;;  %s12315_s12 = scalar_lea.vmem %s12314_s18, 4096  ;;  %p12316_p7 = scmp.lt.s32.totalorder %s14455_s29, %s12314_s18 }
  0xad   : > { %10023 = vmatpush1.bf16.msra.mxu1 %v12696_v14  ;;  %10017 = vmatprep.subr.bf16.mxu0 %v12700_v18  ;;  %v3415_v40 = vld [vmem:[#allocation10 + $0xf8] sm:$0xff]  ;;  %v3412_v45 = vld [vmem:[#allocation10 + $0xe0] sm:$0xff]  ;;  %v3414_v48 = vld [vmem:[#allocation10 + $0xf0] sm:$0xff]  ;;  %p12317_p9 = scmp.lt.s32.totalorder %s12315_s12, %s12309_s17 }
  0xae   : > { %10025 = vmatprep.subr.bf16.mxu1 %v12702_v19  ;;  %825 = vmatprep.mubr.f32.mxu0 %v14521_v8  ;;  %v3417_v49 = vld [vmem:[#allocation10 + $0x108] sm:$0xff]  ;;  %v3419_v51 = vld [vmem:[#allocation10 + $0x118] sm:$0xff]  ;;  %v3420_v57 = vld [vmem:[#allocation10 + $0x120] sm:$0xff] }
  0xaf   : > { %896 = vmatprep.mubr.f32.mxu1 %v14521_v8  ;;  %v3421_v50 = vld [vmem:[#allocation10 + $0x128] sm:$0xff]  ;;  %v3423_v52 = vld [vmem:[#allocation10 + $0x138] sm:$0xff]  ;;  %v3418_v58 = vld [vmem:[#allocation10 + $0x110] sm:$0xff]  ;;  %p12318_p0 = por %p12317_p9, %p12316_p7 }
  0xb0   : > { %10019 = vmatpush1.bf16.msra.mxu0 %v12705_v23  ;;  %v3422_v60 = vld [vmem:[#allocation10 + $0x130] sm:$0xff]  ;;  %v3425_v61 = vld [vmem:[#allocation10 + $0x148] sm:$0xff]  ;;  %v3428_v6 = vld [vmem:[#allocation10 + $0x160] sm:$0xff] }
  0xb1   : > { %10027 = vmatpush1.bf16.msra.mxu1 %v12709_v25  ;;  %10029 = vmatprep.subr.bf16.mxu0 %v12687_v4  ;;  %v12952_v2 = vpack.c.bf16 %v3422_v60, %v3418_v58  ;;  %v3426_v7 = vld [vmem:[#allocation10 + $0x150] sm:$0xff]  ;;  %v3621_v60 = vld [vmem:[#allocation11 + $0x18] sm:$0xff]  ;;  %p12319_p4 = pnand %p12318_p0, %p12312_p5 }
  0xb2   : > { %10037 = vmatprep.subr.bf16.mxu1 %v12691_v9  ;;  %v3620_v58 = vld [vmem:[#allocation11 + $0x10] sm:$0xff] }
  0xb3   : > { %9021 = vmatmul.mubr.msk.f32.vlgmr.msra.gmra.mrb[4].mxu0 %vm378_vm0, %v9020_v28 }
  0xb4   : > { %9022 = vmatmul.mubr.msk.f32.vlgmr.msra.gmra.mrb[4].mxu1 %vm378_vm0, %v9020_v28  ;;  %10031 = vmatpush1.bf16.msra.mxu0 %v12693_v10  ;;  %v3407_v28 = vld [vmem:[#allocation10 + $0xb8] sm:$0xff] }
  0xb5   : > { %10039 = vmatpush1.bf16.msra.mxu1 %v12696_v14  ;;  %10033 = vmatprep.subr.bf16.mxu0 %v12700_v18 }
  0xb6   : > { %10041 = vmatprep.subr.bf16.mxu1 %v12702_v19  ;;  %1015 = vmatprep.mubr.f32.mxu0 %v14521_v8 }
  0xb7   : > { %1086 = vmatprep.mubr.f32.mxu1 %v14521_v8 }
  0xb8   : > { %10035 = vmatpush1.bf16.msra.mxu0 %v12705_v23 }
  0xb9   : > { %10043 = vmatpush1.bf16.msra.mxu1 %v12709_v25  ;;  %10045 = vmatprep.subr.bf16.mxu0 %v12687_v4 }
  0xba   : > { %10053 = vmatprep.subr.bf16.mxu1 %v12691_v9 }
  0xbb   : > { %9024 = vmatmul.mubr.msk.f32.vlgmr.msra.gmra.mrb[6].mxu0 %vm378_vm0, %v9023_v29 }
  0xbc   : > { %9025 = vmatmul.mubr.msk.f32.vlgmr.msra.gmra.mrb[6].mxu1 %vm378_vm0, %v9023_v29  ;;  %10047 = vmatpush1.bf16.msra.mxu0 %v12693_v10  ;;  %v12910_v29 = vpack.c.bf16 %v3396_v21, %v3392_v20 }
  0xbd   : > { %10055 = vmatpush1.bf16.msra.mxu1 %v12696_v14  ;;  %10049 = vmatprep.subr.bf16.mxu0 %v12700_v18 }
  0xbe   : > { %10057 = vmatprep.subr.bf16.mxu1 %v12702_v19  ;;  %1205 = vmatprep.mubr.f32.mxu0 %v14521_v8 }
  0xbf   : > { %1276 = vmatprep.mubr.f32.mxu1 %v14521_v8 }
  0xc0   : > { %10051 = vmatpush1.bf16.msra.mxu0 %v12705_v23 }
  0xc1   : > { %10059 = vmatpush1.bf16.msra.mxu1 %v12709_v25  ;;  %10061 = vmatprep.subr.bf16.mxu0 %v12687_v4 }
  0xc2   : > { %10069 = vmatprep.subr.bf16.mxu1 %v12691_v9 }
  0xc3   : > { %9027 = vmatmul.mubr.msk.f32.vlgmr.msra.gmra.mrb[8].mxu0 %vm378_vm0, %v9026_v30 }
  0xc4   : > { %9028 = vmatmul.mubr.msk.f32.vlgmr.msra.gmra.mrb[8].mxu1 %vm378_vm0, %v9026_v30  ;;  %10063 = vmatpush1.bf16.msra.mxu0 %v12693_v10  ;;  %v12914_v30 = vpack.c.bf16 %v3398_v24, %v3394_v22  ;;  %v3432_v22 = vld [vmem:[#allocation10 + $0x180] sm:$0xff] }
  0xc5   : > { %10071 = vmatpush1.bf16.msra.mxu1 %v12696_v14  ;;  %10065 = vmatprep.subr.bf16.mxu0 %v12700_v18  ;;  %v3436_v24 = vld [vmem:[#allocation10 + $0x1a0] sm:$0xff] }
  0xc6   : > { %10073 = vmatprep.subr.bf16.mxu1 %v12702_v19  ;;  %1395 = vmatprep.mubr.f32.mxu0 %v14521_v8 }
  0xc7   : > { %1466 = vmatprep.mubr.f32.mxu1 %v14521_v8 }
  0xc8   : > { %10067 = vmatpush1.bf16.msra.mxu0 %v12705_v23 }
  0xc9   : > { %10075 = vmatpush1.bf16.msra.mxu1 %v12709_v25  ;;  %10077 = vmatprep.subr.bf16.mxu0 %v12687_v4 }
  0xca   : > { %10085 = vmatprep.subr.bf16.mxu1 %v12691_v9 }
  0xcb   : > { %9030 = vmatmul.mubr.msk.f32.vlgmr.msra.gmra.mrb[10].mxu0 %vm378_vm0, %v9029_v31 }
  0xcc   : > { %9031 = vmatmul.mubr.msk.f32.vlgmr.msra.gmra.mrb[10].mxu1 %vm378_vm0, %v9029_v31  ;;  %10079 = vmatpush1.bf16.msra.mxu0 %v12693_v10 }
  0xcd   : > { %10087 = vmatpush1.bf16.msra.mxu1 %v12696_v14  ;;  %10081 = vmatprep.subr.bf16.mxu0 %v12700_v18 }
  0xce   : > { %10089 = vmatprep.subr.bf16.mxu1 %v12702_v19  ;;  %1585 = vmatprep.mubr.f32.mxu0 %v14521_v8 }
  0xcf   : > { %1656 = vmatprep.mubr.f32.mxu1 %v14521_v8 }
  0xd0   : > { %10083 = vmatpush1.bf16.msra.mxu0 %v12705_v23 }
  0xd1   : > { %10091 = vmatpush1.bf16.msra.mxu1 %v12709_v25  ;;  %10093 = vmatprep.subr.bf16.mxu0 %v12687_v4 }
  0xd2   : > { %10101 = vmatprep.subr.bf16.mxu1 %v12691_v9 }
  0xd3   : > { %9033 = vmatmul.mubr.msk.f32.vlgmr.msra.gmra.mrb[12].mxu0 %vm378_vm0, %v9032_v32 }
  0xd4   : > { %9034 = vmatmul.mubr.msk.f32.vlgmr.msra.gmra.mrb[12].mxu1 %vm378_vm0, %v9032_v32  ;;  %10095 = vmatpush1.bf16.msra.mxu0 %v12693_v10  ;;  %v3400_v32 = vld [vmem:[#allocation10 + $0x80] sm:$0xff] }
  0xd5   : > { %10103 = vmatpush1.bf16.msra.mxu1 %v12696_v14  ;;  %10097 = vmatprep.subr.bf16.mxu0 %v12700_v18 }
  0xd6   : > { %10105 = vmatprep.subr.bf16.mxu1 %v12702_v19  ;;  %1775 = vmatprep.mubr.f32.mxu0 %v14521_v8 }
  0xd7   : > { %1846 = vmatprep.mubr.f32.mxu1 %v14521_v8 }
  0xd8   : > { %10099 = vmatpush1.bf16.msra.mxu0 %v12705_v23 }
  0xd9   : > { %10107 = vmatpush1.bf16.msra.mxu1 %v12709_v25  ;;  %10109 = vmatprep.subr.bf16.mxu0 %v12687_v4 }
  0xda   : > { %10117 = vmatprep.subr.bf16.mxu1 %v12691_v9 }
  0xdb   : > { %9036 = vmatmul.mubr.msk.f32.vlgmr.msra.gmra.mrb[14].mxu0 %vm378_vm0, %v9035_v33 }
  0xdc   : > { %9037 = vmatmul.mubr.msk.f32.vlgmr.msra.gmra.mrb[14].mxu1 %vm378_vm0, %v9035_v33  ;;  %10111 = vmatpush1.bf16.msra.mxu0 %v12693_v10  ;;  %v3404_v33 = vld [vmem:[#allocation10 + $0xa0] sm:$0xff] }
  0xdd   : > { %10119 = vmatpush1.bf16.msra.mxu1 %v12696_v14  ;;  %10113 = vmatprep.subr.bf16.mxu0 %v12700_v18  ;;  %v12924_v41 = vpack.c.bf16 %v3404_v33, %v3400_v32  ;;  %v3445_v32 = vld [vmem:[#allocation10 + $0x1e8] sm:$0xff]  ;;  %v3443_v33 = vld [vmem:[#allocation10 + $0x1d8] sm:$0xff] }
  0xde   : > { %10121 = vmatprep.subr.bf16.mxu1 %v12702_v19  ;;  %1965 = vmatprep.mubr.f32.mxu0 %v14521_v8 }
  0xdf   : > { %2036 = vmatprep.mubr.f32.mxu1 %v14521_v8 }
  0xe0   : > { %10115 = vmatpush1.bf16.msra.mxu0 %v12705_v23 }
  0xe1   : > { %10123 = vmatpush1.bf16.msra.mxu1 %v12709_v25  ;;  %10125 = vmatprep.subr.bf16.mxu0 %v12687_v4 }
  0xe2   : > { %10133 = vmatprep.subr.bf16.mxu1 %v12691_v9 }
  0xe3   : > { %9039 = vmatmul.mubr.msk.f32.vlgmr.msra.gmra.mrb[16].mxu0 %vm378_vm0, %v9038_v34 }
  0xe4   : > { %9040 = vmatmul.mubr.msk.f32.vlgmr.msra.gmra.mrb[16].mxu1 %vm378_vm0, %v9038_v34  ;;  %10127 = vmatpush1.bf16.msra.mxu0 %v12693_v10  ;;  %v3402_v34 = vld [vmem:[#allocation10 + $0x90] sm:$0xff] }
  0xe5   : > { %10135 = vmatpush1.bf16.msra.mxu1 %v12696_v14  ;;  %10129 = vmatprep.subr.bf16.mxu0 %v12700_v18 }
  0xe6   : > { %10137 = vmatprep.subr.bf16.mxu1 %v12702_v19  ;;  %2155 = vmatprep.mubr.f32.mxu0 %v14521_v8 }
  0xe7   : > { %2226 = vmatprep.mubr.f32.mxu1 %v14521_v8 }
  0xe8   : > { %10131 = vmatpush1.bf16.msra.mxu0 %v12705_v23 }
  0xe9   : > { %10139 = vmatpush1.bf16.msra.mxu1 %v12709_v25  ;;  %10141 = vmatprep.subr.bf16.mxu0 %v12687_v4 }
  0xea   : > { %10149 = vmatprep.subr.bf16.mxu1 %v12691_v9 }
  0xeb   : > { %9042 = vmatmul.mubr.msk.f32.vlgmr.msra.gmra.mrb[18].mxu0 %vm378_vm0, %v9041_v35 }
  0xec   : > { %9043 = vmatmul.mubr.msk.f32.vlgmr.msra.gmra.mrb[18].mxu1 %vm378_vm0, %v9041_v35  ;;  %10143 = vmatpush1.bf16.msra.mxu0 %v12693_v10  ;;  %v12919_v35 = vpack.c.bf16 %v3407_v28, %v3403_v27  ;;  %v3438_v27 = vld [vmem:[#allocation10 + $0x1b0] sm:$0xff]  ;;  %v3441_v28 = vld [vmem:[#allocation10 + $0x1c8] sm:$0xff] }
  0xed   : > { %10151 = vmatpush1.bf16.msra.mxu1 %v12696_v14  ;;  %10145 = vmatprep.subr.bf16.mxu0 %v12700_v18 }
  0xee   : > { %10153 = vmatprep.subr.bf16.mxu1 %v12702_v19  ;;  %2345 = vmatprep.mubr.f32.mxu0 %v14521_v8 }
  0xef   : > { %2416 = vmatprep.mubr.f32.mxu1 %v14521_v8 }
  0xf0   : > { %10147 = vmatpush1.bf16.msra.mxu0 %v12705_v23 }
  0xf1   : > { %10155 = vmatpush1.bf16.msra.mxu1 %v12709_v25  ;;  %10157 = vmatprep.subr.bf16.mxu0 %v12687_v4 }
  0xf2   : > { %10165 = vmatprep.subr.bf16.mxu1 %v12691_v9 }
  0xf3   : > { %9045 = vmatmul.mubr.msk.f32.vlgmr.msra.gmra.mrb[20].mxu0 %vm378_vm0, %v9044_v36 }
  0xf4   : > { %9046 = vmatmul.mubr.msk.f32.vlgmr.msra.gmra.mrb[20].mxu1 %vm378_vm0, %v9044_v36  ;;  %10159 = vmatpush1.bf16.msra.mxu0 %v12693_v10  ;;  %v3406_v36 = vld [vmem:[#allocation10 + $0xb0] sm:$0xff] }
  0xf5   : > { %10167 = vmatpush1.bf16.msra.mxu1 %v12696_v14  ;;  %10161 = vmatprep.subr.bf16.mxu0 %v12700_v18  ;;  %v12928_v42 = vpack.c.bf16 %v3406_v36, %v3402_v34  ;;  %v3447_v34 = vld [vmem:[#allocation10 + $0x1f8] sm:$0xff]  ;;  %v12972_v36 = vpack.c.bf16 %v3436_v24, %v3432_v22  ;;  %v3630_v24 = vld [vmem:[#allocation11 + $0x60] sm:$0xff] }
  0xf6   : > { %10169 = vmatprep.subr.bf16.mxu1 %v12702_v19  ;;  %2535 = vmatprep.mubr.f32.mxu0 %v14521_v8 }
  0xf7   : > { %2606 = vmatprep.mubr.f32.mxu1 %v14521_v8 }
  0xf8   : > { %10163 = vmatpush1.bf16.msra.mxu0 %v12705_v23 }
  0xf9   : > { %10171 = vmatpush1.bf16.msra.mxu1 %v12709_v25  ;;  %10173 = vmatprep.subr.bf16.mxu0 %v12687_v4 }
  0xfa   : > { %10181 = vmatprep.subr.bf16.mxu1 %v12691_v9 }
  0xfb   : > { %9048 = vmatmul.mubr.msk.f32.vlgmr.msra.gmra.mrb[22].mxu0 %vm378_vm0, %v9047_v37 }
  0xfc   : > { %9049 = vmatmul.mubr.msk.f32.vlgmr.msra.gmra.mrb[22].mxu1 %vm378_vm0, %v9047_v37  ;;  %10175 = vmatpush1.bf16.msra.mxu0 %v12693_v10  ;;  %v3409_v37 = vld [vmem:[#allocation10 + $0xc8] sm:$0xff] }
  0xfd   : > { %10183 = vmatpush1.bf16.msra.mxu1 %v12696_v14  ;;  %10177 = vmatprep.subr.bf16.mxu0 %v12700_v18 }
  0xfe   : > { %10185 = vmatprep.subr.bf16.mxu1 %v12702_v19  ;;  %2725 = vmatprep.mubr.f32.mxu0 %v14521_v8 }
  0xff   : > { %2796 = vmatprep.mubr.f32.mxu1 %v14521_v8 }
 0x100   : > { %10179 = vmatpush1.bf16.msra.mxu0 %v12705_v23 }
 0x101   : > { %10187 = vmatpush1.bf16.msra.mxu1 %v12709_v25  ;;  %10189 = vmatprep.subr.bf16.mxu0 %v12687_v4  ;;  %v3391_v4 = vld [vmem:[#allocation10 + $0x38] sm:$0xff] }
 0x102   : > { %10197 = vmatprep.subr.bf16.mxu1 %v12691_v9  ;;  %v3386_v9 = vld [vmem:[#allocation10 + $0x10] sm:$0xff] }
 0x103   : > { %9051 = vmatmul.mubr.msk.f32.vlgmr.msra.gmra.mrb[24].mxu0 %vm378_vm0, %v9050_v38 }
 0x104   : > { %9052 = vmatmul.mubr.msk.f32.vlgmr.msra.gmra.mrb[24].mxu1 %vm378_vm0, %v9050_v38  ;;  %10191 = vmatpush1.bf16.msra.mxu0 %v12693_v10  ;;  %v12893_v10 = vpack.c.bf16 %v3391_v4, %v3387_v3  ;;  %v3413_v38 = vld [vmem:[#allocation10 + $0xe8] sm:$0xff]  ;;  %v3424_v4 = vld [vmem:[#allocation10 + $0x140] sm:$0xff] }
 0x105   : > { %10199 = vmatpush1.bf16.msra.mxu1 %v12696_v14  ;;  %10193 = vmatprep.subr.bf16.mxu0 %v12700_v18  ;;  %v3395_v14 = vld [vmem:[#allocation10 + $0x58] sm:$0xff]  ;;  %v12900_v18 = vpack.c.bf16 %v3390_v11, %v3386_v9  ;;  %v3430_v11 = vld [vmem:[#allocation10 + $0x170] sm:$0xff] }
 0x106   : > { %10201 = vmatprep.subr.bf16.mxu1 %v12702_v19  ;;  %2915 = vmatprep.mubr.f32.mxu0 %v14521_v8  ;;  %v12902_v19 = vpack.c.bf16 %v3397_v13, %v3393_v12  ;;  %v3433_v12 = vld [vmem:[#allocation10 + $0x188] sm:$0xff]  ;;  %v12964_v20 = vpack.c.bf16 %v3430_v11, %v3426_v7  ;;  %v3626_v11 = vld [vmem:[#allocation11 + $0x40] sm:$0xff] }
 0x107   : > { %2986 = vmatprep.mubr.f32.mxu1 %v14521_v8  ;;  %v3437_v13 = vld [vmem:[#allocation10 + $0x1a8] sm:$0xff] }
 0x108   : > { %10195 = vmatpush1.bf16.msra.mxu0 %v12705_v23  ;;  %v12905_v23 = vpack.c.bf16 %v3399_v15, %v3395_v14  ;;  %v3435_v14 = vld [vmem:[#allocation10 + $0x198] sm:$0xff]  ;;  %v12966_v21 = vpack.c.bf16 %v3437_v13, %v3433_v12  ;;  %v3627_v12 = vld [vmem:[#allocation11 + $0x48] sm:$0xff] }
 0x109   : > { %10203 = vmatpush1.bf16.msra.mxu1 %v12709_v25  ;;  %10205 = vmatprep.subr.bf16.mxu0 %v10204_v43  ;;  %v3401_v25 = vld [vmem:[#allocation10 + $0x88] sm:$0xff]  ;;  %v3439_v15 = vld [vmem:[#allocation10 + $0x1b8] sm:$0xff]  ;;  %v13028_v13 = vpack.c.bf16 %v3627_v12, %v3626_v11 }
 0x10a   : > { %10213 = vmatprep.subr.bf16.mxu1 %v10212_v47  ;;  %v12916_v31 = vpack.c.bf16 %v3405_v26, %v3401_v25  ;;  %v3434_v25 = vld [vmem:[#allocation10 + $0x190] sm:$0xff]  ;;  %v12969_v26 = vpack.c.bf16 %v3439_v15, %v3435_v14  ;;  %v3629_v15 = vld [vmem:[#allocation11 + $0x58] sm:$0xff] }
 0x10b   : > { %9054 = vmatmul.mubr.msk.f32.vlgmr.msra.gmra.mrb[26].mxu0 %vm378_vm0, %v9053_v53  ;;  %v3628_v14 = vld [vmem:[#allocation11 + $0x50] sm:$0xff] }
 0x10c   : > { %9055 = vmatmul.mubr.msk.f32.vlgmr.msra.gmra.mrb[26].mxu1 %vm378_vm0, %v9053_v53  ;;  %10207 = vmatpush1.bf16.msra.mxu0 %v10206_v54  ;;  %v12936_v53 = vpack.c.bf16 %v3412_v45, %v3408_v44  ;;  %v12981_v44 = vpack.c.bf16 %v3447_v34, %v3443_v33  ;;  %v3442_v45 = vld [vmem:[#allocation10 + $0x1d0] sm:$0xff]  ;;  %v13032_v22 = vpack.c.bf16 %v3629_v15, %v3628_v14  ;;  %v358_v34 = vlaneseq }
 0x10d   : > { %10215 = vmatpush1.bf16.msra.mxu1 %v10214_v55  ;;  %10209 = vmatprep.subr.bf16.mxu0 %v10208_v56 }
 0x10e   : > { %10217 = vmatprep.subr.bf16.mxu1 %v10216_v59  ;;  %3105 = vmatprep.mubr.f32.mxu0 %v14521_v8 }
 0x10f   : > { %3176 = vmatprep.mubr.f32.mxu1 %v14521_v8 }
 0x110   : > { %10211 = vmatpush1.bf16.msra.mxu0 %v10210_v62 }
 0x111   : > { %10219 = vmatpush1.bf16.msra.mxu1 %v10218_v63  ;;  %10221 = vmatprep.subr.bf16.mxu0 %v10204_v43  ;;  %v12930_v43 = vpack.c.bf16 %v3413_v38, %v3409_v37  ;;  %v12976_v37 = vpack.c.bf16 %v3438_v27, %v3434_v25  ;;  %v12978_v38 = vpack.c.bf16 %v3445_v32, %v3441_v28  ;;  %v3631_v25 = vld [vmem:[#allocation11 + $0x68] sm:$0xff]  ;;  %v3632_v28 = vld [vmem:[#allocation11 + $0x70] sm:$0xff]  ;;  %v3633_v32 = vld [vmem:[#allocation11 + $0x78] sm:$0xff] }
 0x112   : > { %10229 = vmatprep.subr.bf16.mxu1 %v10212_v47  ;;  %v12933_v47 = vpack.c.bf16 %v3415_v40, %v3411_v39  ;;  %v3440_v39 = vld [vmem:[#allocation10 + $0x1c0] sm:$0xff]  ;;  %v13037_v27 = vpack.c.bf16 %v3631_v25, %v3630_v24  ;;  %v13041_v33 = vpack.c.bf16 %v3633_v32, %v3632_v28 }
 0x113   : > { %9057 = vmatmul.mubr.msk.f32.vlgmr.msra.gmra.mrb[28].mxu0 %vm378_vm0, %v9056_v0  ;;  %v3444_v40 = vld [vmem:[#allocation10 + $0x1e0] sm:$0xff] }
 0x114   : > { %9058 = vmatmul.mubr.msk.f32.vlgmr.msra.gmra.mrb[28].mxu1 %vm378_vm0, %v9056_v0  ;;  %10223 = vmatpush1.bf16.msra.mxu0 %v10206_v54  ;;  %v12940_v54 = vpack.c.bf16 %v3414_v48, %v3410_v46  ;;  %v3431_v0 = vld [vmem:[#allocation10 + $0x178] sm:$0xff]  ;;  %v3446_v46 = vld [vmem:[#allocation10 + $0x1f0] sm:$0xff]  ;;  %v12984_v48 = vpack.c.bf16 %v3444_v40, %v3440_v39  ;;  %v359_v39 = vshrl.u32 %v358_v34, 7 }
 0x115   : > { %10231 = vmatpush1.bf16.msra.mxu1 %v10214_v55  ;;  %10225 = vmatprep.subr.bf16.mxu0 %v10208_v56  ;;  %v12942_v55 = vpack.c.bf16 %v3421_v50, %v3417_v49  ;;  %v3416_v56 = vld [vmem:[#allocation10 + $0x100] sm:$0xff]  ;;  %v12988_v49 = vpack.c.bf16 %v3446_v46, %v3442_v45  ;;  %v3378_v50 = vld [vmem:[#allocation3] sm:$0xff] }
 0x116   : > { %10233 = vmatprep.subr.bf16.mxu1 %v10216_v59  ;;  %3295 = vmatprep.mubr.f32.mxu0 %v14521_v8  ;;  %v12945_v59 = vpack.c.bf16 %v3423_v52, %v3419_v51  ;;  %v12948_v1 = vpack.c.bf16 %v3420_v57, %v3416_v56  ;;  %v3618_v51 = vld [vmem:[#allocation11] sm:$0xff]  ;;  %v3619_v52 = vld [vmem:[#allocation11 + $0x8] sm:$0xff]  ;;  %v14519_v57 = vmov 0.0|0.0   ;;  %v13046_v40 = vsub.s32 0, %v359_v39  ;;  %v356_v45 = vld [vmem:[%s14508_s3] sm:$0xf] }
 0x117   : > { %3366 = vmatprep.mubr.f32.mxu1 %v14521_v8  ;;  %v13010_v56 = vpack.c.bf16 %v3619_v52, %v3618_v51  ;;  %v13051_v46 = vsub.s32 1, %v359_v39  ;;  %v13058_v15 = vsub.s32 2, %v359_v39 }
 0x118   : > { %10227 = vmatpush1.bf16.msra.mxu0 %v10210_v62  ;;  %v3429_v62 = vld [vmem:[#allocation10 + $0x168] sm:$0xff] }
 0x119   : > { %10235 = vmatpush1.bf16.msra.mxu1 %v10218_v63  ;;  %10237 = vmatprep.subr.bf16.mxu0 %v12890_v5  ;;  %v3427_v63 = vld [vmem:[#allocation10 + $0x158] sm:$0xff]  ;;  %v12954_v3 = vpack.c.bf16 %v3429_v62, %v3425_v61  ;;  %v13016_v61 = vpack.c.bf16 %v3621_v60, %v3620_v58  ;;  %v3622_v62 = vld [vmem:[#allocation11 + $0x20] sm:$0xff]  ;;  %v365_v51 = vrot.slane %v356_v45, %v13051_v46  ;;  %v13055_v58 = vsub.s32 3, %v359_v39 }
 0x11a   : > { %10269 = vmatprep.subr.bf16.mxu1 %v12893_v10  ;;  %v12957_v9 = vpack.c.bf16 %v3431_v0, %v3427_v63  ;;  %v3623_v63 = vld [vmem:[#allocation11 + $0x28] sm:$0xff]  ;;  %v369_v25 = vrot.slane %v356_v45, %v13058_v15 }
 0x11b   : > { %9060 = vmatmul.mubr.msk.f32.vlgmr.msra.gmra.mrb[30].mxu0 %vm378_vm0, %v9059_v16  ;;  %v13020_v0 = vpack.c.bf16 %v3623_v63, %v3622_v62  ;;  %v373_v14 = vrot.slane %v356_v45, %v13055_v58 }
 0x11c   : > { %9061 = vmatmul.mubr.msk.f32.vlgmr.msra.gmra.mrb[30].mxu1 %vm378_vm0, %v9059_v16  ;;  %10239 = vmatpush1.bf16.msra.mxu0 %v12897_v17  ;;  %v12960_v16 = vpack.c.bf16 %v3428_v6, %v3424_v4  ;;  %v3624_v4 = vld [vmem:[#allocation11 + $0x30] sm:$0xff]  ;;  %v3625_v6 = vld [vmem:[#allocation11 + $0x38] sm:$0xff] }
 0x11d   : > { %10271 = vmatpush1.bf16.msra.mxu1 %v12900_v18  ;;  %10241 = vmatprep.subr.bf16.mxu0 %v12902_v19  ;;  %v13024_v7 = vpack.c.bf16 %v3625_v6, %v3624_v4 }
 0x11e   : > { %10273 = vmatprep.subr.bf16.mxu1 %v12905_v23  ;;  %3512 = vmatprep.mubr.f32.mxu0 %v14521_v8 }
 0x11f   : > { %3583 = vmatprep.mubr.f32.mxu1 %v14521_v8 }
 0x120   : > { %10243 = vmatpush1.bf16.msra.mxu0 %v12910_v29 }
 0x121   : > { %10275 = vmatpush1.bf16.msra.mxu1 %v12914_v30  ;;  %10245 = vmatprep.subr.bf16.mxu0 %v12916_v31 }
 0x122   : > { %10277 = vmatprep.subr.bf16.mxu1 %v12919_v35 }
 0x124   : > { %10247 = vmatpush1.bf16.msra.mxu0 %v12924_v41 }
 0x125   : > { %10279 = vmatpush1.bf16.msra.mxu1 %v12928_v42  ;;  %10249 = vmatprep.subr.bf16.mxu0 %v12930_v43 }
 0x126   : > { %10281 = vmatprep.subr.bf16.mxu1 %v12933_v47 }
 0x128   : > { %10251 = vmatpush1.bf16.msra.mxu0 %v12936_v53 }
 0x129   : > { %10283 = vmatpush1.bf16.msra.mxu1 %v12940_v54  ;;  %10253 = vmatprep.subr.bf16.mxu0 %v12942_v55 }
 0x12a   : > { %10285 = vmatprep.subr.bf16.mxu1 %v12945_v59 }
 0x12c   : > { %10255 = vmatpush1.bf16.msra.mxu0 %v12948_v1 }
 0x12d   : > { %10287 = vmatpush1.bf16.msra.mxu1 %v12952_v2  ;;  %10257 = vmatprep.subr.bf16.mxu0 %v12954_v3 }
 0x12e   : > { %10289 = vmatprep.subr.bf16.mxu1 %v12957_v9 }
 0x130   : > { %10259 = vmatpush1.bf16.msra.mxu0 %v12960_v16 }
 0x131   : > { %10291 = vmatpush1.bf16.msra.mxu1 %v12964_v20  ;;  %10261 = vmatprep.subr.bf16.mxu0 %v12966_v21 }
 0x132   : > { %10293 = vmatprep.subr.bf16.mxu1 %v12969_v26 }
 0x134   : > { %10263 = vmatpush1.bf16.msra.mxu0 %v12972_v36 }
 0x135   : > { %10295 = vmatpush1.bf16.msra.mxu1 %v12976_v37  ;;  %10265 = vmatprep.subr.bf16.mxu0 %v12978_v38 }
 0x136   : > { %10297 = vmatprep.subr.bf16.mxu1 %v12981_v44 }
 0x138   : > { %10267 = vmatpush1.bf16.msra.mxu0 %v12984_v48 }
 0x139   : > { %10299 = vmatpush1.bf16.msra.mxu1 %v12988_v49  ;;  %10300 = vmatprep.subr.bf16.mxu0 %v14519_v57 }
 0x13a   : > { %10357 = vmatprep.subr.bf16.mxu1 %v12893_v10 }
 0x13b   : > { %3513 = vmatmul.mubr.f32.vlgmr.msra.gmra.mrb[0].mxu0 %v3378_v50 }
 0x13c   : > { %3584 = vmatmul.mubr.f32.vlgmr.msra.gmra.mrb[0].mxu1 %v3378_v50  ;;  %10302 = vmatpush3.bf16.msra.mxu0 %v13010_v56  ;;  %v361_v50 = vrot.slane %v356_v45, %v13046_v40 }
 0x13d   : > { %10359 = vmatpush1.bf16.msra.mxu1 %v12900_v18  ;;  %3925 = vmatprep.mubr.f32.mxu1 %v14521_v8 }
 0x13e   : > { %10361 = vmatprep.subr.bf16.mxu1 %v12905_v23  ;;  %10303 = vmatprep.subr.bf16.mxu0 %v14519_v57 }
 0x13f   : > { %9452 = vmatprep.mubr.msk.f32.mxu0 %vm12412_vm1, %v14521_v8 }
 0x140   : > { %10305 = vmatpush3.bf16.msra.mxu0 %v13016_v61 }
 0x141   : > { %10363 = vmatpush1.bf16.msra.mxu1 %v12914_v30  ;;  %10306 = vmatprep.subr.bf16.mxu0 %v14519_v57 }
 0x142   : > { %10365 = vmatprep.subr.bf16.mxu1 %v12919_v35 }
 0x144   : > { %10308 = vmatpush3.bf16.msra.mxu0 %v13020_v0 }
 0x145   : > { %10367 = vmatpush1.bf16.msra.mxu1 %v12928_v42  ;;  %10309 = vmatprep.subr.bf16.mxu0 %v14519_v57 }
 0x146   : > { %10369 = vmatprep.subr.bf16.mxu1 %v12933_v47 }
 0x148   : > { %10311 = vmatpush3.bf16.msra.mxu0 %v13024_v7 }
 0x149   : > { %10371 = vmatpush1.bf16.msra.mxu1 %v12940_v54  ;;  %10312 = vmatprep.subr.bf16.mxu0 %v14519_v57 }
 0x14a   : > { %10373 = vmatprep.subr.bf16.mxu1 %v12945_v59 }
 0x14c   : > { %10314 = vmatpush3.bf16.msra.mxu0 %v13028_v13 }
 0x14d   : > { %10375 = vmatpush1.bf16.msra.mxu1 %v12952_v2  ;;  %10315 = vmatprep.subr.bf16.mxu0 %v14519_v57 }
 0x14e   : > { %10377 = vmatprep.subr.bf16.mxu1 %v12957_v9 }
 0x150   : > { %10317 = vmatpush3.bf16.msra.mxu0 %v13032_v22 }
 0x151   : > { %10379 = vmatpush1.bf16.msra.mxu1 %v12964_v20  ;;  %10318 = vmatprep.subr.bf16.mxu0 %v14519_v57 }
 0x152   : > { %10381 = vmatprep.subr.bf16.mxu1 %v12969_v26 }
 0x154   : > { %10320 = vmatpush3.bf16.msra.mxu0 %v13037_v27 }
 0x155   : > { %10383 = vmatpush1.bf16.msra.mxu1 %v12976_v37  ;;  %10321 = vmatprep.subr.bf16.mxu0 %v14519_v57 }
 0x156   : > { %10385 = vmatprep.subr.bf16.mxu1 %v12981_v44 }
 0x158   : > { %10323 = vmatpush3.bf16.msra.mxu0 %v13041_v33 }
 0x159   : > { %10387 = vmatpush1.bf16.msra.mxu1 %v12988_v49  ;;  %10325 = vmatprep.subr.bf16.mxu0 %v12890_v5 }
 0x15a   : > { %10388 = vmatprep.subr.bf16.mxu1 %v14519_v57 }
 0x20e   : > { %v3514_v52 = vpop.f32.mrb[0].mxu0 }
 0x20f   : > { %v11644_v60 = vadd.f32 %v3514_v52, %v361_v50  ;;  %v3585_v62 = vpop.f32.mrb[0].mxu1  ;;  %v3516_v63 = vpop.f32.mrb[1].mxu0 }
 0x210   : > { %v11645_v4 = vadd.f32 %v3516_v63, %v365_v51  ;;  %v3587_v6 = vpop.f32.mrb[1].mxu1  ;;  %v11646_v32 = vadd.f32 %v3585_v62, %v369_v25  ;;  %v3379_v63 = vld [vmem:[#allocation4] sm:$0xff] }
 0x211   : > { %v9062_v11 = vmul.f32 -1.442695, %v11644_v60  ;;  %v11647_v24 = vadd.f32 %v3587_v6, %v373_v14 }
 0x212   : > { %v9063_v12 = vmul.f32 -1.442695, %v11645_v4 }
 0x213   : > { %11875 = vpow2.f32 %v9062_v11  ;;  %v9064_v28 = vmul.f32 -1.442695, %v11647_v24 }
 0x214   : > { %11877 = vpow2.f32 %v9063_v12 }
 0x215   : > { %11879 = vpow2.f32 %v9064_v28 }
 0x216   : > { %11881 = vtanh.f32 %v11646_v32 }
 0x21d   : > { %v11876_v34 = vpop.eup %11875 }
 0x21e   : > { %v11878_v57 = vpop.eup %11877  ;;  %v3597_v50 = vadd.f32 1.0, %v11876_v34 }
 0x21f   : > { %v3603_v51 = vadd.f32 1.0, %v11878_v57  ;;  %v11880_v52 = vpop.eup %11879  ;;  %v14560_v57 = vmov 0.0|0.0  }
 0x220   : > { %11883 = vrcp.f32 %v3597_v50  ;;  %v11882_v60 = vpop.eup %11881  ;;  %v3610_v12 = vadd.f32 1.0, %v11880_v52 }
 0x221   : > { %11885 = vrcp.f32 %v3603_v51 }
 0x222   : > { %11887 = vrcp.f32 %v3610_v12 }
 0x22a   : > { %v11884_v4 = vpop.eup %11883 }
 0x22b   : > { %v11886_v39 = vpop.eup %11885  ;;  %v3614_v11 = vmul.f32 %v11884_v4, %v11882_v60 }
 0x22c   : > { %v3613_v6 = vmul.f32 %v11886_v39, %v3379_v63  ;;  %v11888_v45 = vpop.eup %11887 }
 0x22e   : > { %v13061_v14 = vadd.f32 %v3614_v11, %v3613_v6 }
 0x230   : > { %11889 = vtanh.f32 %v13061_v14 }
 0x23a   : > { %v11890_v62 = vpop.eup %11889 }
 0x23b   : > { %v3617_v24 = vmul.f32 %v11890_v62, %v11888_v45 }
 0x23d   : > { %9453 = vmatmul.mubr.f32.vlgmr.msra.gmra.mrb[32].mxu0 %v3617_v24  ;;  %3926 = vmatmul.mubr.f32.vlgmr.msra.gmra.mrb[2].mxu1 %v3617_v24 }
 0x23e   : > { %10327 = vmatpush1.bf16.msra.mxu0 %v12897_v17  ;;  %3854 = vmatprep.mubr.f32.mxu0 %v14521_v8 }
 0x23f   : > { %10329 = vmatprep.subr.bf16.mxu0 %v12902_v19  ;;  %10390 = vmatpush3.bf16.msra.mxu1 %v13010_v56 }
 0x240   : > { %10391 = vmatprep.subr.bf16.mxu1 %v14560_v57  ;;  %9487 = vmatprep.mubr.msk.f32.mxu1 %vm12412_vm1, %v14521_v8 }
 0x242   : > { %10331 = vmatpush1.bf16.msra.mxu0 %v12910_v29 }
 0x243   : > { %10333 = vmatprep.subr.bf16.mxu0 %v12916_v31  ;;  %10393 = vmatpush3.bf16.msra.mxu1 %v13016_v61 }
 0x244   : > { %10394 = vmatprep.subr.bf16.mxu1 %v14560_v57 }
 0x246   : > { %10335 = vmatpush1.bf16.msra.mxu0 %v12924_v41 }
 0x247   : > { %10337 = vmatprep.subr.bf16.mxu0 %v12930_v43  ;;  %10396 = vmatpush3.bf16.msra.mxu1 %v13020_v0 }
 0x248   : > { %10397 = vmatprep.subr.bf16.mxu1 %v14560_v57 }
 0x24a   : > { %10339 = vmatpush1.bf16.msra.mxu0 %v12936_v53 }
 0x24b   : > { %10341 = vmatprep.subr.bf16.mxu0 %v12942_v55  ;;  %10399 = vmatpush3.bf16.msra.mxu1 %v13024_v7 }
 0x24c   : > { %10400 = vmatprep.subr.bf16.mxu1 %v14560_v57 }
 0x24e   : > { %10343 = vmatpush1.bf16.msra.mxu0 %v12948_v1 }
 0x24f   : > { %10345 = vmatprep.subr.bf16.mxu0 %v12954_v3  ;;  %10402 = vmatpush3.bf16.msra.mxu1 %v13028_v13 }
 0x250   : > { %10403 = vmatprep.subr.bf16.mxu1 %v14560_v57 }
 0x252   : > { %10347 = vmatpush1.bf16.msra.mxu0 %v12960_v16 }
 0x253   : > { %10349 = vmatprep.subr.bf16.mxu0 %v12966_v21  ;;  %10405 = vmatpush3.bf16.msra.mxu1 %v13032_v22 }
 0x254   : > { %10406 = vmatprep.subr.bf16.mxu1 %v14560_v57 }
 0x256   : > { %10351 = vmatpush1.bf16.msra.mxu0 %v12972_v36 }
 0x257   : > { %10353 = vmatprep.subr.bf16.mxu0 %v12978_v38  ;;  %10408 = vmatpush3.bf16.msra.mxu1 %v13037_v27 }
 0x258   : > { %10409 = vmatprep.subr.bf16.mxu1 %v14560_v57 }
 0x25a   : > { %10355 = vmatpush1.bf16.msra.mxu0 %v12984_v48 }
 0x25b   : > { %10413 = vmatprep.subr.bf16.mxu0 %v12890_v5  ;;  %10411 = vmatpush3.bf16.msra.mxu1 %v13041_v33  ;;  %v13119_v5 = vld [vmem:[%s14510_s5] ss:$0 sm:$0xff] }
 0x25c   : > { %10445 = vmatprep.subr.bf16.mxu1 %v12893_v10 }
 0x25d   : > { %3855 = vmatmul.mubr.f32.vlgmr.msra.gmra.mrb[2].mxu0 %v3617_v24 }
 0x25e   : > { %10415 = vmatpush1.bf16.msra.mxu0 %v12897_v17  ;;  %4197 = vmatprep.mubr.f32.mxu0 %v14521_v8 }
 0x25f   : > { %10417 = vmatprep.subr.bf16.mxu0 %v12902_v19 }
 0x262   : > { %10419 = vmatpush1.bf16.msra.mxu0 %v12910_v29 }
 0x263   : > { %10421 = vmatprep.subr.bf16.mxu0 %v12916_v31 }
 0x266   : > { %10423 = vmatpush1.bf16.msra.mxu0 %v12924_v41  ;;  %v546_v41 = vld [vmem:[%s14508_s3] sm:$0xf] }
 0x267   : > { %10425 = vmatprep.subr.bf16.mxu0 %v12930_v43  ;;  %v551_v43 = vrot.slane %v546_v41, %v13046_v40  ;;  %v559_v25 = vrot.slane %v546_v41, %v13058_v15 }
 0x26a   : > { %10427 = vmatpush1.bf16.msra.mxu0 %v12936_v53  ;;  %v555_v53 = vrot.slane %v546_v41, %v13051_v46 }
 0x26b   : > { %10429 = vmatprep.subr.bf16.mxu0 %v12942_v55 }
 0x26e   : > { %10431 = vmatpush1.bf16.msra.mxu0 %v12948_v1 }
 0x26f   : > { %10433 = vmatprep.subr.bf16.mxu0 %v12954_v3 }
 0x272   : > { %10435 = vmatpush1.bf16.msra.mxu0 %v12960_v16 }
 0x273   : > { %10437 = vmatprep.subr.bf16.mxu0 %v12966_v21 }
 0x276   : > { %10439 = vmatpush1.bf16.msra.mxu0 %v12972_v36  ;;  %v563_v36 = vrot.slane %v546_v41, %v13055_v58  ;;  %v4446_v41 = vld [vmem:[#allocation10 + $0x110] sm:$0xff] }
 0x277   : > { %10441 = vmatprep.subr.bf16.mxu0 %v12978_v38 }
 0x27a   : > { %10443 = vmatpush1.bf16.msra.mxu0 %v12984_v48 }
 0x27b   : > { %10476 = vmatprep.subr.bf16.mxu0 %v14560_v57 }
 0x310   : > { %v3707_v10 = vpop.f32.mrb[32].mxu0  ;;  %v3927_v17 = vpop.f32.mrb[2].mxu1 }
 0x311   : > { %v13122_v19 = vadd.f32 %v13119_v5, %v3707_v10  ;;  %v9454_v29 = vpop.f32.mrb[33].mxu0  ;;  %v3929_v31 = vpop.f32.mrb[3].mxu1  ;;  %v11650_v32 = vadd.f32 %v3927_v17, %v559_v25  ;;  %v4447_v17 = vld [vmem:[#allocation10 + $0x118] sm:$0xff]  ;;  %v4462_v25 = vld [vmem:[#allocation10 + $0x190] sm:$0xff] }
 0x312   : > { %v11651_v48 = vadd.f32 %v3929_v31, %v563_v36  ;;  %v4451_v29 = vld [vmem:[#allocation10 + $0x138] sm:$0xff] }
 0x313   : > { %14561 = vst [vmem:[#allocation20_spill] sm:$0xff] %v13122_v19  ;;  %3711 = vmax.xlane.f32.xlu0 %v13122_v19  ;;  %v13194_v31 = vpack.c.bf16 %v4451_v29, %v4447_v17 }
 0x314   : > { %v9068_v28 = vmul.f32 -1.442695, %v11651_v48  ;;  %v4467_v48 = vld [vmem:[#allocation10 + $0x1b8] sm:$0xff] }
 0x330   : > { %v3856_v55 = vpop.f32.mrb[2].mxu0 }
 0x331   : > { %v11648_v1 = vadd.f32 %v3856_v55, %v551_v43  ;;  %v3858_v3 = vpop.f32.mrb[3].mxu0  ;;  %v4450_v43 = vld [vmem:[#allocation10 + $0x130] sm:$0xff]  ;;  %v4455_v55 = vld [vmem:[#allocation10 + $0x158] sm:$0xff] }
 0x332   : > { %v11649_v16 = vadd.f32 %v3858_v3, %v555_v53  ;;  %v13196_v53 = vpack.c.bf16 %v4450_v43, %v4446_v41 }
 0x333   : > { %v9066_v21 = vmul.f32 -1.442695, %v11648_v1  ;;  %v4459_v1 = vld [vmem:[#allocation10 + $0x178] sm:$0xff] }
 0x334   : > { %v9067_v38 = vmul.f32 -1.442695, %v11649_v16  ;;  %v13200_v3 = vpack.c.bf16 %v4459_v1, %v4455_v55  ;;  %v4454_v16 = vld [vmem:[#allocation10 + $0x150] sm:$0xff] }
 0x335   : > { %11891 = vpow2.f32 %v9066_v21  ;;  %v4458_v21 = vld [vmem:[#allocation10 + $0x170] sm:$0xff] }
 0x336   : > { %11893 = vpow2.f32 %v9067_v38  ;;  %v13202_v36 = vpack.c.bf16 %v4458_v21, %v4454_v16  ;;  %v4463_v38 = vld [vmem:[#allocation10 + $0x198] sm:$0xff] }
 0x337   : > { %11895 = vpow2.f32 %v9068_v28  ;;  %v13205_v28 = vpack.c.bf16 %v4467_v48, %v4463_v38 }
 0x338   : > { %11897 = vtanh.f32 %v11650_v32  ;;  %v4466_v32 = vld [vmem:[#allocation10 + $0x1b0] sm:$0xff] }
 0x33f   : > { %v11892_v34 = vpop.eup %11891 }
 0x340   : > { %v11894_v50 = vpop.eup %11893  ;;  %v3939_v51 = vadd.f32 1.0, %v11892_v34  ;;  %v4471_v34 = vld [vmem:[#allocation10 + $0x1d8] sm:$0xff] }
 0x341   : > { %v3945_v52 = vadd.f32 1.0, %v11894_v50  ;;  %v11896_v60 = vpop.eup %11895  ;;  %v4475_v50 = vld [vmem:[#allocation10 + $0x1f8] sm:$0xff] }
 0x342   : > { %11899 = vrcp.f32 %v3939_v51  ;;  %v11898_v63 = vpop.eup %11897  ;;  %v3952_v11 = vadd.f32 1.0, %v11896_v60  ;;  %v13208_v51 = vpack.c.bf16 %v4466_v32, %v4462_v25  ;;  %v13211_v60 = vpack.c.bf16 %v4475_v50, %v4471_v34  ;;  %v4412_v32 = vld [vmem:[#allocation10] sm:$0xff]  ;;  %v4421_v50 = vld [vmem:[#allocation10 + $0x48] sm:$0xff] }
 0x343   : > { %11901 = vrcp.f32 %v3945_v52  ;;  %v4413_v52 = vld [vmem:[#allocation10 + $0x8] sm:$0xff]  ;;  %v4416_v34 = vld [vmem:[#allocation10 + $0x20] sm:$0xff] }
 0x344   : > { %11903 = vrcp.f32 %v3952_v11 }
 0x34c   : > { %v11900_v4 = vpop.eup %11899 }
 0x34d   : > { %v11902_v39 = vpop.eup %11901  ;;  %v3956_v12 = vmul.f32 %v11900_v4, %v11898_v63  ;;  %v4470_v63 = vld [vmem:[#allocation10 + $0x1d0] sm:$0xff] }
 0x34e   : > { %v3955_v6 = vmul.f32 %v11902_v39, %v13061_v14  ;;  %v11904_v62 = vpop.eup %11903  ;;  %v4474_v4 = vld [vmem:[#allocation10 + $0x1f0] sm:$0xff]  ;;  %v4417_v39 = vld [vmem:[#allocation10 + $0x28] sm:$0xff] }
 0x34f   : > { %v13213_v11 = vpack.c.bf16 %v4417_v39, %v4413_v52  ;;  %v4425_v52 = vld [vmem:[#allocation10 + $0x68] sm:$0xff]  ;;  %v13237_v39 = vpack.c.bf16 %v4416_v34, %v4412_v32 }
 0x350   : > { %v13133_v45 = vadd.f32 %v3956_v12, %v3955_v6  ;;  %v13216_v12 = vpack.c.bf16 %v4474_v4, %v4470_v63 }
 0x352   : > { %11905 = vtanh.f32 %v13133_v45 }
 0x35c   : > { %v11906_v24 = vpop.eup %11905 }
 0x35d   : > { %v3959_v10 = vmul.f32 %v11906_v24, %v11904_v62 }
 0x35f   : > { %9488 = vmatmul.mubr.f32.vlgmr.msra.gmra.mrb[32].mxu1 %v3959_v10  ;;  %4198 = vmatmul.mubr.f32.vlgmr.msra.gmra.mrb[4].mxu0 %v3959_v10 }
 0x360   : > { %10447 = vmatpush1.bf16.msra.mxu1 %v12900_v18  ;;  %4268 = vmatprep.mubr.f32.mxu1 %v14521_v8  ;;  %v4415_v18 = vld [vmem:[#allocation10 + $0x18] sm:$0xff] }
 0x361   : > { %10449 = vmatprep.subr.bf16.mxu1 %v12905_v23  ;;  %10478 = vmatpush3.bf16.msra.mxu0 %v13010_v56  ;;  %v4419_v23 = vld [vmem:[#allocation10 + $0x38] sm:$0xff]  ;;  %v4430_v56 = vld [vmem:[#allocation10 + $0x90] sm:$0xff] }
 0x362   : > { %10479 = vmatprep.subr.bf16.mxu0 %v14560_v57  ;;  %9522 = vmatprep.mubr.msk.f32.mxu0 %vm12412_vm1, %v14521_v8 }
 0x364   : > { %10451 = vmatpush1.bf16.msra.mxu1 %v12914_v30  ;;  %v13170_v30 = vpack.c.bf16 %v4419_v23, %v4415_v18 }
 0x365   : > { %10453 = vmatprep.subr.bf16.mxu1 %v12919_v35  ;;  %10481 = vmatpush3.bf16.msra.mxu0 %v13016_v61  ;;  %v4414_v35 = vld [vmem:[#allocation10 + $0x10] sm:$0xff] }
 0x366   : > { %10482 = vmatprep.subr.bf16.mxu0 %v14560_v57  ;;  %v4434_v61 = vld [vmem:[#allocation10 + $0xb0] sm:$0xff] }
 0x368   : > { %10455 = vmatpush1.bf16.msra.mxu1 %v12928_v42  ;;  %v4418_v42 = vld [vmem:[#allocation10 + $0x30] sm:$0xff] }
 0x369   : > { %10457 = vmatprep.subr.bf16.mxu1 %v12933_v47  ;;  %10484 = vmatpush3.bf16.msra.mxu0 %v13020_v0  ;;  %v13172_v47 = vpack.c.bf16 %v4418_v42, %v4414_v35  ;;  %v13184_v0 = vpack.c.bf16 %v4434_v61, %v4430_v56 }
 0x36a   : > { %10485 = vmatprep.subr.bf16.mxu0 %v14560_v57 }
 0x36c   : > { %10459 = vmatpush1.bf16.msra.mxu1 %v12940_v54  ;;  %v4423_v54 = vld [vmem:[#allocation10 + $0x58] sm:$0xff] }
 0x36d   : > { %10461 = vmatprep.subr.bf16.mxu1 %v12945_v59  ;;  %10487 = vmatpush3.bf16.msra.mxu0 %v13024_v7  ;;  %v4427_v59 = vld [vmem:[#allocation10 + $0x78] sm:$0xff] }
 0x36e   : > { %10488 = vmatprep.subr.bf16.mxu0 %v14560_v57  ;;  %v4439_v7 = vld [vmem:[#allocation10 + $0xd8] sm:$0xff] }
 0x370   : > { %10463 = vmatpush1.bf16.msra.mxu1 %v12952_v2  ;;  %v13176_v2 = vpack.c.bf16 %v4427_v59, %v4423_v54 }
 0x371   : > { %10465 = vmatprep.subr.bf16.mxu1 %v12957_v9  ;;  %10490 = vmatpush3.bf16.msra.mxu0 %v13028_v13  ;;  %v4422_v9 = vld [vmem:[#allocation10 + $0x50] sm:$0xff]  ;;  %v4443_v13 = vld [vmem:[#allocation10 + $0xf8] sm:$0xff] }
 0x372   : > { %10491 = vmatprep.subr.bf16.mxu0 %v14560_v57 }
 0x374   : > { %10467 = vmatpush1.bf16.msra.mxu1 %v12964_v20  ;;  %v4426_v20 = vld [vmem:[#allocation10 + $0x70] sm:$0xff] }
 0x375   : > { %10469 = vmatprep.subr.bf16.mxu1 %v12969_v26  ;;  %10493 = vmatpush3.bf16.msra.mxu0 %v13032_v22  ;;  %v13178_v26 = vpack.c.bf16 %v4426_v20, %v4422_v9  ;;  %v13188_v22 = vpack.c.bf16 %v4443_v13, %v4439_v7 }
 0x376   : > { %10494 = vmatprep.subr.bf16.mxu0 %v14560_v57 }
 0x378   : > { %10471 = vmatpush1.bf16.msra.mxu1 %v12976_v37  ;;  %v4431_v37 = vld [vmem:[#allocation10 + $0x98] sm:$0xff] }
 0x379   : > { %10473 = vmatprep.subr.bf16.mxu1 %v12981_v44  ;;  %10496 = vmatpush3.bf16.msra.mxu0 %v13037_v27  ;;  %v4435_v44 = vld [vmem:[#allocation10 + $0xb8] sm:$0xff]  ;;  %v4438_v27 = vld [vmem:[#allocation10 + $0xd0] sm:$0xff] }
 0x37a   : > { %10497 = vmatprep.subr.bf16.mxu0 %v14560_v57 }
 0x37c   : > { %10475 = vmatpush1.bf16.msra.mxu1 %v12988_v49  ;;  %v13182_v49 = vpack.c.bf16 %v4435_v44, %v4431_v37 }
 0x37d   : > { %10499 = vmatpush3.bf16.msra.mxu0 %v13041_v33  ;;  %10533 = vmatprep.subr.bf16.mxu1 %v13170_v30  ;;  %v4442_v33 = vld [vmem:[#allocation10 + $0xf0] sm:$0xff] }
 0x37e   : > { %v13190_v14 = vpack.c.bf16 %v4442_v33, %v4438_v27  ;;  %10501 = vmatprep.subr.bf16.mxu0 %v13213_v11 }
 0x37f   : > { %4269 = vmatmul.mubr.f32.vlgmr.msra.gmra.mrb[4].mxu1 %v3959_v10  ;;  %v736_v10 = vld [vmem:[%s14508_s3] sm:$0xf] }
 0x380   : > { %4611 = vmatprep.mubr.f32.mxu1 %v14521_v8  ;;  %10535 = vmatpush1.bf16.msra.mxu1 %v13172_v47  ;;  %v745_v35 = vrot.slane %v736_v10, %v13051_v46  ;;  %v741_v42 = vrot.slane %v736_v10, %v13046_v40  ;;  %v749_v61 = vrot.slane %v736_v10, %v13058_v15 }
 0x381   : > { %10537 = vmatprep.subr.bf16.mxu1 %v13176_v2  ;;  %v753_v13 = vrot.slane %v736_v10, %v13055_v58  ;;  %v4424_v10 = vld [vmem:[#allocation10 + $0x60] sm:$0xff] }
 0x384   : > { %10539 = vmatpush1.bf16.msra.mxu1 %v13178_v26 }
 0x385   : > { %10541 = vmatprep.subr.bf16.mxu1 %v13182_v49 }
 0x388   : > { %10543 = vmatpush1.bf16.msra.mxu1 %v13184_v0 }
 0x389   : > { %10545 = vmatprep.subr.bf16.mxu1 %v13188_v22 }
 0x38c   : > { %10547 = vmatpush1.bf16.msra.mxu1 %v13190_v14 }
 0x38d   : > { %10549 = vmatprep.subr.bf16.mxu1 %v13194_v31 }
 0x390   : > { %10551 = vmatpush1.bf16.msra.mxu1 %v13196_v53 }
 0x391   : > { %10553 = vmatprep.subr.bf16.mxu1 %v13200_v3 }
 0x394   : > { %10555 = vmatpush1.bf16.msra.mxu1 %v13202_v36 }
 0x395   : > { %10557 = vmatprep.subr.bf16.mxu1 %v13205_v28 }
 0x398   : > { %10559 = vmatpush1.bf16.msra.mxu1 %v13208_v51 }
 0x399   : > { %10561 = vmatprep.subr.bf16.mxu1 %v13211_v60 }
 0x39c   : > { %10563 = vmatpush1.bf16.msra.mxu1 %v13216_v12 }
 0x39d   : > { %10564 = vmatprep.subr.bf16.mxu1 %v14560_v57 }
 0x432   : > { %v4049_v6 = vpop.f32.mrb[32].mxu1  ;;  %v4199_v62 = vpop.f32.mrb[4].mxu0 }
 0x433   : > { %v13223_v24 = vadd.f32 %v13119_v5, %v4049_v6  ;;  %v9489_v18 = vpop.f32.mrb[33].mxu1  ;;  %v4201_v23 = vpop.f32.mrb[5].mxu0  ;;  %v11652_v59 = vadd.f32 %v4199_v62, %v741_v42  ;;  %v13239_v62 = vpack.c.bf16 %v4425_v52, %v4421_v50  ;;  %v4460_v50 = vld [vmem:[#allocation10 + $0x180] sm:$0xff] }
 0x434   : > { %v11653_v54 = vadd.f32 %v4201_v23, %v745_v35  ;;  %v4429_v18 = vld [vmem:[#allocation10 + $0x88] sm:$0xff]  ;;  %v4464_v52 = vld [vmem:[#allocation10 + $0x1a0] sm:$0xff] }
 0x435   : > { %14562 = vst [vmem:[#allocation21_spill] sm:$0xff] %v13223_v24  ;;  %4053 = vmax.xlane.f32.xlu0 %v13223_v24  ;;  %v9071_v20 = vmul.f32 -1.442695, %v11652_v59  ;;  %v4433_v23 = vld [vmem:[#allocation10 + $0xa8] sm:$0xff]  ;;  %v4432_v59 = vld [vmem:[#allocation10 + $0xa0] sm:$0xff] }
 0x436   : > { %v9072_v9 = vmul.f32 -1.442695, %v11653_v54  ;;  %v13246_v42 = vpack.c.bf16 %v4433_v23, %v4429_v18  ;;  %v4428_v54 = vld [vmem:[#allocation10 + $0x80] sm:$0xff] }
 0x437   : > { %v4468_v18 = vld [vmem:[#allocation10 + $0x1c0] sm:$0xff] }
 0x438   : > { %11907 = vpow2.f32 %v9072_v9  ;;  %v4437_v9 = vld [vmem:[#allocation10 + $0xc8] sm:$0xff]  ;;  %v4472_v23 = vld [vmem:[#allocation10 + $0x1e0] sm:$0xff] }
 0x439   : > { %11909 = vpow2.f32 %v9071_v20  ;;  %v4441_v20 = vld [vmem:[#allocation10 + $0xe8] sm:$0xff] }
 0x442   : > { %v11908_v37 = vpop.eup %11907 }
 0x443   : > { %v11910_v44 = vpop.eup %11909  ;;  %v4288_v56 = vadd.f32 1.0, %v11908_v37  ;;  %v13251_v37 = vpack.c.bf16 %v4432_v59, %v4428_v54  ;;  %v13281_v54 = vpack.c.bf16 %v4472_v23, %v4468_v18  ;;  %v4647_v59 = vld [vmem:[#allocation11 + $0x8] sm:$0xff]  ;;  %v4660_v23 = vld [vmem:[#allocation11 + $0x70] sm:$0xff] }
 0x444   : > { %v4282_v7 = vadd.f32 1.0, %v11910_v44  ;;  %v13254_v44 = vpack.c.bf16 %v4441_v20, %v4437_v9  ;;  %v4648_v20 = vld [vmem:[#allocation11 + $0x10] sm:$0xff] }
 0x445   : > { %11911 = vrcp.f32 %v4288_v56  ;;  %v4436_v56 = vld [vmem:[#allocation10 + $0xc0] sm:$0xff]  ;;  %14564 = vst [vmem:[#allocation23_spill] sm:$0xff] %v13281_v54 }
 0x446   : > { %11913 = vrcp.f32 %v4282_v7  ;;  %v4445_v7 = vld [vmem:[#allocation10 + $0x108] sm:$0xff] }
 0x44f   : > { %v11912_v43 = vpop.eup %11911 }
 0x450   : > { %v11914_v55 = vpop.eup %11913  ;;  %v4298_v16 = vmul.f32 %v11912_v43, %v13133_v45  ;;  %v4420_v45 = vld [vmem:[#allocation10 + $0x40] sm:$0xff]  ;;  %v4457_v43 = vld [vmem:[#allocation10 + $0x168] sm:$0xff] }
 0x451   : > { %v13242_v35 = vpack.c.bf16 %v4424_v10, %v4420_v45  ;;  %v13275_v45 = vpack.c.bf16 %v4464_v52, %v4460_v50  ;;  %v4657_v50 = vld [vmem:[#allocation11 + $0x58] sm:$0xff]  ;;  %v4658_v52 = vld [vmem:[#allocation11 + $0x60] sm:$0xff] }
 0x452   : > { %v4270_v27 = vpop.f32.mrb[4].mxu1 }
 0x453   : > { %v11654_v33 = vadd.f32 %v4270_v27, %v749_v61  ;;  %v4272_v17 = vpop.f32.mrb[5].mxu1  ;;  %v4440_v61 = vld [vmem:[#allocation10 + $0xe0] sm:$0xff] }
 0x454   : > { %v11655_v29 = vadd.f32 %v4272_v17, %v753_v13  ;;  %v4449_v13 = vld [vmem:[#allocation10 + $0x128] sm:$0xff]  ;;  %v13257_v27 = vpack.c.bf16 %v4440_v61, %v4436_v56  ;;  %v4444_v17 = vld [vmem:[#allocation10 + $0x100] sm:$0xff]  ;;  %v4649_v56 = vld [vmem:[#allocation11 + $0x18] sm:$0xff] }
 0x455   : > { %11915 = vtanh.f32 %v11654_v33  ;;  %v13260_v33 = vpack.c.bf16 %v4449_v13, %v4445_v7  ;;  %v13307_v61 = vpack.c.bf16 %v4649_v56, %v4648_v20  ;;  %v4650_v7 = vld [vmem:[#allocation11 + $0x20] sm:$0xff]  ;;  %v4651_v13 = vld [vmem:[#allocation11 + $0x28] sm:$0xff] }
 0x456   : > { %v9073_v41 = vmul.f32 -1.442695, %v11655_v29  ;;  %v4448_v29 = vld [vmem:[#allocation10 + $0x120] sm:$0xff] }
 0x458   : > { %11917 = vpow2.f32 %v9073_v41  ;;  %v4453_v41 = vld [vmem:[#allocation10 + $0x148] sm:$0xff] }
 0x45f   : > { %v11916_v1 = vpop.eup %11915 }
 0x460   : > { %v4299_v21 = vmul.f32 %v11916_v1, %v11914_v55  ;;  %v13263_v55 = vpack.c.bf16 %v4448_v29, %v4444_v17  ;;  %v13266_v1 = vpack.c.bf16 %v4457_v43, %v4453_v41  ;;  %v13311_v17 = vpack.c.bf16 %v4651_v13, %v4650_v7  ;;  %v4652_v29 = vld [vmem:[#allocation11 + $0x30] sm:$0xff]  ;;  %v4653_v41 = vld [vmem:[#allocation11 + $0x38] sm:$0xff] }
 0x461   : > { %v13315_v43 = vpack.c.bf16 %v4653_v41, %v4652_v29  ;;  %v926_v41 = vld [vmem:[%s14508_s3] sm:$0xf] }
 0x462   : > { %v11918_v38 = vpop.eup %11917  ;;  %v13234_v48 = vadd.f32 %v4299_v21, %v4298_v16  ;;  %v4452_v16 = vld [vmem:[#allocation10 + $0x140] sm:$0xff] }
 0x463   : > { %v4295_v25 = vadd.f32 1.0, %v11918_v38  ;;  %v4456_v21 = vld [vmem:[#allocation10 + $0x160] sm:$0xff]  ;;  %v4461_v38 = vld [vmem:[#allocation10 + $0x188] sm:$0xff] }
 0x464   : > { %11919 = vtanh.f32 %v13234_v48  ;;  %v13269_v32 = vpack.c.bf16 %v4456_v21, %v4452_v16  ;;  %v4654_v16 = vld [vmem:[#allocation11 + $0x40] sm:$0xff]  ;;  %v4655_v21 = vld [vmem:[#allocation11 + $0x48] sm:$0xff] }
 0x465   : > { %11921 = vrcp.f32 %v4295_v25  ;;  %v4465_v25 = vld [vmem:[#allocation10 + $0x1a8] sm:$0xff] }
 0x466   : > { %v13272_v34 = vpack.c.bf16 %v4465_v25, %v4461_v38  ;;  %v13319_v38 = vpack.c.bf16 %v4655_v21, %v4654_v16  ;;  %v4656_v25 = vld [vmem:[#allocation11 + $0x50] sm:$0xff]  ;;  %v931_v16 = vrot.slane %v926_v41, %v13046_v40  ;;  %v935_v21 = vrot.slane %v926_v41, %v13051_v46 }
 0x46e   : > { %v11920_v63 = vpop.eup %11919 }
 0x46f   : > { %v11922_v4 = vpop.eup %11921 }
 0x470   : > { %v4302_v6 = vmul.f32 %v11922_v4, %v11920_v63  ;;  %v4469_v63 = vld [vmem:[#allocation10 + $0x1c8] sm:$0xff] }
 0x471   : > { %v4473_v4 = vld [vmem:[#allocation10 + $0x1e8] sm:$0xff] }
 0x472   : > { %9523 = vmatmul.mubr.f32.vlgmr.msra.gmra.mrb[34].mxu0 %v4302_v6  ;;  %4612 = vmatmul.mubr.f32.vlgmr.msra.gmra.mrb[6].mxu1 %v4302_v6  ;;  %v13278_v10 = vpack.c.bf16 %v4473_v4, %v4469_v63  ;;  %v13323_v63 = vpack.c.bf16 %v4657_v50, %v4656_v25  ;;  %v4659_v4 = vld [vmem:[#allocation11 + $0x68] sm:$0xff] }
 0x473   : > { %10503 = vmatpush1.bf16.msra.mxu0 %v13237_v39  ;;  %4540 = vmatprep.mubr.f32.mxu0 %v14521_v8  ;;  %v13326_v18 = vpack.c.bf16 %v4659_v4, %v4658_v52 }
 0x474   : > { %10505 = vmatprep.subr.bf16.mxu0 %v13239_v62  ;;  %9557 = vmatprep.mubr.msk.f32.mxu1 %vm12412_vm1, %v14521_v8  ;;  %14563 = vst [vmem:[#allocation22_spill] sm:$0xff] %v13278_v10 }
 0x477   : > { %10507 = vmatpush1.bf16.msra.mxu0 %v13242_v35 }
 0x478   : > { %10509 = vmatprep.subr.bf16.mxu0 %v13246_v42 }
 0x47b   : > { %10511 = vmatpush1.bf16.msra.mxu0 %v13251_v37 }
 0x47c   : > { %10513 = vmatprep.subr.bf16.mxu0 %v13254_v44 }
 0x47f   : > { %10515 = vmatpush1.bf16.msra.mxu0 %v13257_v27 }
 0x480   : > { %10517 = vmatprep.subr.bf16.mxu0 %v13260_v33 }
 0x483   : > { %10519 = vmatpush1.bf16.msra.mxu0 %v13263_v55 }
 0x484   : > { %10521 = vmatprep.subr.bf16.mxu0 %v13266_v1 }
 0x487   : > { %10523 = vmatpush1.bf16.msra.mxu0 %v13269_v32 }
 0x488   : > { %10525 = vmatprep.subr.bf16.mxu0 %v13272_v34 }
 0x48b   : > { %10527 = vmatpush1.bf16.msra.mxu0 %v13275_v45 }
 0x48c   : > { %10529 = vmatprep.subr.bf16.mxu0 %v13278_v10 }
 0x48f   : > { %10531 = vmatpush1.bf16.msra.mxu0 %v13281_v54 }
 0x490   : > { %10589 = vmatprep.subr.bf16.mxu0 %v13213_v11 }
 0x492   : > { %4541 = vmatmul.mubr.f32.vlgmr.msra.gmra.mrb[6].mxu0 %v4302_v6  ;;  %v4646_v6 = vld [vmem:[#allocation11] sm:$0xff] }
 0x493   : > { %10591 = vmatpush1.bf16.msra.mxu0 %v13237_v39  ;;  %4883 = vmatprep.mubr.f32.mxu0 %v14521_v8  ;;  %v13303_v9 = vpack.c.bf16 %v4647_v59, %v4646_v6  ;;  %v4661_v6 = vld [vmem:[#allocation11 + $0x78] sm:$0xff] }
 0x494   : > { %10593 = vmatprep.subr.bf16.mxu0 %v13239_v62  ;;  %v13330_v59 = vpack.c.bf16 %v4661_v6, %v4660_v23 }
 0x495   : > { %10566 = vmatpush3.bf16.msra.mxu1 %v13303_v9 }
 0x496   : > { %10567 = vmatprep.subr.bf16.mxu1 %v14560_v57 }
 0x497   : > { %10595 = vmatpush1.bf16.msra.mxu0 %v13242_v35 }
 0x498   : > { %10597 = vmatprep.subr.bf16.mxu0 %v13246_v42 }
 0x499   : > { %10569 = vmatpush3.bf16.msra.mxu1 %v13307_v61 }
 0x49a   : > { %10570 = vmatprep.subr.bf16.mxu1 %v14560_v57 }
 0x49b   : > { %10599 = vmatpush1.bf16.msra.mxu0 %v13251_v37 }
 0x49c   : > { %10601 = vmatprep.subr.bf16.mxu0 %v13254_v44 }
 0x49d   : > { %10572 = vmatpush3.bf16.msra.mxu1 %v13311_v17 }
 0x49e   : > { %10573 = vmatprep.subr.bf16.mxu1 %v14560_v57 }
 0x49f   : > { %10603 = vmatpush1.bf16.msra.mxu0 %v13257_v27 }
 0x4a0   : > { %10605 = vmatprep.subr.bf16.mxu0 %v13260_v33 }
 0x4a1   : > { %10575 = vmatpush3.bf16.msra.mxu1 %v13315_v43 }
 0x4a2   : > { %10576 = vmatprep.subr.bf16.mxu1 %v14560_v57 }
 0x4a3   : > { %10607 = vmatpush1.bf16.msra.mxu0 %v13263_v55 }
 0x4a4   : > { %10609 = vmatprep.subr.bf16.mxu0 %v13266_v1 }
 0x4a5   : > { %10578 = vmatpush3.bf16.msra.mxu1 %v13319_v38 }
 0x4a6   : > { %10579 = vmatprep.subr.bf16.mxu1 %v14560_v57 }
 0x4a7   : > { %10611 = vmatpush1.bf16.msra.mxu0 %v13269_v32 }
 0x4a8   : > { %10613 = vmatprep.subr.bf16.mxu0 %v13272_v34 }
 0x4a9   : > { %10581 = vmatpush3.bf16.msra.mxu1 %v13323_v63 }
 0x4aa   : > { %10582 = vmatprep.subr.bf16.mxu1 %v14560_v57 }
 0x4ab   : > { %10615 = vmatpush1.bf16.msra.mxu0 %v13275_v45 }
 0x4ac   : > { %10617 = vmatprep.subr.bf16.mxu0 %v13278_v10 }
 0x4ad   : > { %10584 = vmatpush3.bf16.msra.mxu1 %v13326_v18 }
 0x4ae   : > { %10585 = vmatprep.subr.bf16.mxu1 %v14560_v57 }
 0x4af   : > { %10619 = vmatpush1.bf16.msra.mxu0 %v13281_v54 }
 0x4b0   : > { %10652 = vmatprep.subr.bf16.mxu0 %v14560_v57 }
 0x4b1   : > { %10587 = vmatpush3.bf16.msra.mxu1 %v13330_v59 }
 0x4b2   : > { %10621 = vmatprep.subr.bf16.mxu1 %v13170_v30 }
 0x545   : > { %v4392_v20 = vpop.f32.mrb[34].mxu0  ;;  %v4613_v56 = vpop.f32.mrb[6].mxu1 }
 0x546   : > { %v13336_v7 = vadd.f32 %v13119_v5, %v4392_v20  ;;  %v9524_v13 = vpop.f32.mrb[35].mxu0  ;;  %v4615_v29 = vpop.f32.mrb[7].mxu1  ;;  %v943_v5 = vrot.slane %v926_v41, %v13055_v58 }
 0x547   : > { %v939_v13 = vrot.slane %v926_v41, %v13058_v15 }
 0x548   : > { %14565 = vst [vmem:[#allocation24_spill] sm:$0xff] %v13336_v7  ;;  %4396 = vmax.xlane.f32.xlu1 %v13336_v7  ;;  %v11659_v20 = vadd.f32 %v4615_v29, %v943_v5 }
 0x549   : > { %v11658_v24 = vadd.f32 %v4613_v56, %v939_v13 }
 0x54a   : > { %v9078_v8 = vmul.f32 -1.442695, %v11659_v20 }
 0x565   : > { %v4542_v25 = vpop.f32.mrb[6].mxu0 }
 0x566   : > { %v11656_v50 = vadd.f32 %v4542_v25, %v931_v16  ;;  %v4544_v52 = vpop.f32.mrb[7].mxu0 }
 0x567   : > { %v11657_v4 = vadd.f32 %v4544_v52, %v935_v21 }
 0x568   : > { %v9076_v23 = vmul.f32 -1.442695, %v11656_v50 }
 0x569   : > { %v9077_v6 = vmul.f32 -1.442695, %v11657_v4 }
 0x56a   : > { %11923 = vpow2.f32 %v9076_v23 }
 0x56b   : > { %11925 = vpow2.f32 %v9077_v6 }
 0x56c   : > { %11927 = vpow2.f32 %v9078_v8 }
 0x56d   : > { %11929 = vtanh.f32 %v11658_v24 }
 0x574   : > { %v11924_v7 = vpop.eup %11923 }
 0x575   : > { %v11926_v19 = vpop.eup %11925  ;;  %v4625_v54 = vadd.f32 1.0, %v11924_v7 }
 0x576   : > { %v4631_v10 = vadd.f32 1.0, %v11926_v19  ;;  %v11928_v16 = vpop.eup %11927  ;;  %v14566_v19 = vmov 0.0  }
 0x577   : > { %11931 = vrcp.f32 %v4625_v54  ;;  %v11930_v21 = vpop.eup %11929  ;;  %v4638_v52 = vadd.f32 1.0, %v11928_v16 }
 0x578   : > { %11933 = vrcp.f32 %v4631_v10 }
 0x579   : > { %11935 = vrcp.f32 %v4638_v52 }
 0x581   : > { %v11932_v25 = vpop.eup %11931 }
 0x582   : > { %v11934_v50 = vpop.eup %11933  ;;  %v4642_v4 = vmul.f32 %v11932_v25, %v11930_v21 }
 0x583   : > { %v4641_v29 = vmul.f32 %v11934_v50, %v13234_v48  ;;  %v11936_v56 = vpop.eup %11935 }
 0x585   : > { %v13347_v23 = vadd.f32 %v4642_v4, %v4641_v29 }
 0x587   : > { %11937 = vtanh.f32 %v13347_v23 }
 0x591   : > { %v11938_v8 = vpop.eup %11937 }
 0x592   : > { %v4645_v7 = vmul.f32 %v11938_v8, %v11936_v56 }
 0x594   : > { %9558 = vmatmul.mubr.f32.vlgmr.msra.gmra.mrb[34].mxu1 %v4645_v7  ;;  %4884 = vmatmul.mubr.f32.vlgmr.msra.gmra.mrb[8].mxu0 %v4645_v7 }
 0x595   : > { %10623 = vmatpush1.bf16.msra.mxu1 %v13172_v47  ;;  %4954 = vmatprep.mubr.f32.mxu1 %v14566_v19 }
 0x596   : > { %10625 = vmatprep.subr.bf16.mxu1 %v13176_v2  ;;  %10654 = vmatpush3.bf16.msra.mxu0 %v13303_v9 }
 0x597   : > { %10655 = vmatprep.subr.bf16.mxu0 %v14560_v57  ;;  %9592 = vmatprep.mubr.msk.f32.mxu0 %vm12412_vm1, %v14566_v19 }
 0x599   : > { %10627 = vmatpush1.bf16.msra.mxu1 %v13178_v26 }
 0x59a   : > { %10629 = vmatprep.subr.bf16.mxu1 %v13182_v49  ;;  %10657 = vmatpush3.bf16.msra.mxu0 %v13307_v61 }
 0x59b   : > { %10658 = vmatprep.subr.bf16.mxu0 %v14560_v57 }
 0x59d   : > { %10631 = vmatpush1.bf16.msra.mxu1 %v13184_v0 }
 0x59e   : > { %10633 = vmatprep.subr.bf16.mxu1 %v13188_v22  ;;  %10660 = vmatpush3.bf16.msra.mxu0 %v13311_v17 }
 0x59f   : > { %10661 = vmatprep.subr.bf16.mxu0 %v14560_v57 }
 0x5a1   : > { %10635 = vmatpush1.bf16.msra.mxu1 %v13190_v14 }
 0x5a2   : > { %10637 = vmatprep.subr.bf16.mxu1 %v13194_v31  ;;  %10663 = vmatpush3.bf16.msra.mxu0 %v13315_v43 }
 0x5a3   : > { %10664 = vmatprep.subr.bf16.mxu0 %v14560_v57 }
 0x5a5   : > { %10639 = vmatpush1.bf16.msra.mxu1 %v13196_v53 }
 0x5a6   : > { %10641 = vmatprep.subr.bf16.mxu1 %v13200_v3  ;;  %10666 = vmatpush3.bf16.msra.mxu0 %v13319_v38 }
 0x5a7   : > { %10667 = vmatprep.subr.bf16.mxu0 %v14560_v57 }
 0x5a9   : > { %10643 = vmatpush1.bf16.msra.mxu1 %v13202_v36 }
 0x5aa   : > { %10645 = vmatprep.subr.bf16.mxu1 %v13205_v28  ;;  %10669 = vmatpush3.bf16.msra.mxu0 %v13323_v63 }
 0x5ab   : > { %10670 = vmatprep.subr.bf16.mxu0 %v14560_v57 }
 0x5ad   : > { %10647 = vmatpush1.bf16.msra.mxu1 %v13208_v51 }
 0x5ae   : > { %10649 = vmatprep.subr.bf16.mxu1 %v13211_v60  ;;  %10672 = vmatpush3.bf16.msra.mxu0 %v13326_v18 }
 0x5af   : > { %10673 = vmatprep.subr.bf16.mxu0 %v14560_v57 }
 0x5b1   : > { %10651 = vmatpush1.bf16.msra.mxu1 %v13216_v12 }
 0x5b2   : > { %10709 = vmatprep.subr.bf16.mxu1 %v13170_v30  ;;  %10675 = vmatpush3.bf16.msra.mxu0 %v13330_v59  ;;  %v13405_v30 = vld [vmem:[%s14510_s5] ss:$0 sm:$0xff] }
 0x5b3   : > { %10677 = vmatprep.subr.bf16.mxu0 %v13213_v11 }
 0x5b4   : > { %4955 = vmatmul.mubr.f32.vlgmr.msra.gmra.mrb[8].mxu1 %v4645_v7 }
 0x5b5   : > { %10711 = vmatpush1.bf16.msra.mxu1 %v13172_v47  ;;  %5297 = vmatprep.mubr.f32.mxu1 %v14566_v19 }
 0x5b6   : > { %10713 = vmatprep.subr.bf16.mxu1 %v13176_v2 }
 0x5b9   : > { %10715 = vmatpush1.bf16.msra.mxu1 %v13178_v26 }
 0x5ba   : > { %10717 = vmatprep.subr.bf16.mxu1 %v13182_v49  ;;  %v1116_v49 = vld [vmem:[%s14508_s3] sm:$0xf] }
 0x5bb   : > { %v1133_v48 = vrot.slane %v1116_v49, %v13055_v58 }
 0x5bd   : > { %10719 = vmatpush1.bf16.msra.mxu1 %v13184_v0 }
 0x5be   : > { %10721 = vmatprep.subr.bf16.mxu1 %v13188_v22 }
 0x5c1   : > { %10723 = vmatpush1.bf16.msra.mxu1 %v13190_v14  ;;  %v1125_v14 = vrot.slane %v1116_v49, %v13051_v46 }
 0x5c2   : > { %10725 = vmatprep.subr.bf16.mxu1 %v13194_v31  ;;  %v1121_v31 = vrot.slane %v1116_v49, %v13046_v40 }
 0x5c5   : > { %10727 = vmatpush1.bf16.msra.mxu1 %v13196_v53 }
 0x5c6   : > { %10729 = vmatprep.subr.bf16.mxu1 %v13200_v3 }
 0x5c9   : > { %10731 = vmatpush1.bf16.msra.mxu1 %v13202_v36 }
 0x5ca   : > { %10733 = vmatprep.subr.bf16.mxu1 %v13205_v28 }
 0x5cd   : > { %10735 = vmatpush1.bf16.msra.mxu1 %v13208_v51 }
 0x5ce   : > { %10737 = vmatprep.subr.bf16.mxu1 %v13211_v60 }
 0x5d1   : > { %10739 = vmatpush1.bf16.msra.mxu1 %v13216_v12  ;;  %v1129_v12 = vrot.slane %v1116_v49, %v13058_v15 }
 0x5d2   : > { %10740 = vmatprep.subr.bf16.mxu1 %v14560_v57 }
 0x667   : > { %v4735_v47 = vpop.f32.mrb[34].mxu1  ;;  %v4885_v2 = vpop.f32.mrb[8].mxu0 }
 0x668   : > { %v13408_v26 = vadd.f32 %v13405_v30, %v4735_v47  ;;  %v9559_v0 = vpop.f32.mrb[35].mxu1  ;;  %v4887_v22 = vpop.f32.mrb[9].mxu0  ;;  %v11660_v3 = vadd.f32 %v4885_v2, %v1121_v31  ;;  %v5465_v47 = vld [vmem:[#allocation10 + $0xc0] sm:$0xff] }
 0x669   : > { %v11661_v53 = vadd.f32 %v4887_v22, %v1125_v14  ;;  %v5469_v2 = vld [vmem:[#allocation10 + $0xe0] sm:$0xff]  ;;  %v5474_v0 = vld [vmem:[#allocation10 + $0x108] sm:$0xff] }
 0x66a   : > { %14567 = vst [vmem:[#allocation25_spill] sm:$0xff] %v13408_v26  ;;  %4739 = vmax.xlane.f32.xlu1 %v13408_v26  ;;  %v9081_v28 = vmul.f32 -1.442695, %v11660_v3  ;;  %v13476_v49 = vpack.c.bf16 %v5469_v2, %v5465_v47  ;;  %v5478_v22 = vld [vmem:[#allocation10 + $0x128] sm:$0xff]  ;;  %v5473_v31 = vld [vmem:[#allocation10 + $0x100] sm:$0xff] }
 0x66b   : > { %v9082_v36 = vmul.f32 -1.442695, %v11661_v53  ;;  %v13480_v14 = vpack.c.bf16 %v5478_v22, %v5474_v0  ;;  %v5477_v53 = vld [vmem:[#allocation10 + $0x120] sm:$0xff] }
 0x66c   : > { %v13482_v3 = vpack.c.bf16 %v5477_v53, %v5473_v31 }
 0x66d   : > { %11939 = vpow2.f32 %v9082_v36  ;;  %v5482_v36 = vld [vmem:[#allocation10 + $0x148] sm:$0xff] }
 0x66e   : > { %11941 = vpow2.f32 %v9081_v28  ;;  %v5486_v28 = vld [vmem:[#allocation10 + $0x168] sm:$0xff] }
 0x677   : > { %v11940_v51 = vpop.eup %11939 }
 0x678   : > { %v11942_v60 = vpop.eup %11941  ;;  %v4974_v11 = vadd.f32 1.0, %v11940_v51  ;;  %v5481_v51 = vld [vmem:[#allocation10 + $0x140] sm:$0xff] }
 0x679   : > { %v4968_v24 = vadd.f32 1.0, %v11942_v60  ;;  %v13486_v60 = vpack.c.bf16 %v5486_v28, %v5482_v36 }
 0x67a   : > { %11943 = vrcp.f32 %v4974_v11  ;;  %v5485_v11 = vld [vmem:[#allocation10 + $0x160] sm:$0xff] }
 0x67b   : > { %11945 = vrcp.f32 %v4968_v24  ;;  %v5494_v24 = vld [vmem:[#allocation10 + $0x1a8] sm:$0xff] }
 0x684   : > { %v11944_v20 = vpop.eup %11943 }
 0x685   : > { %v11946_v13 = vpop.eup %11945  ;;  %v4984_v21 = vmul.f32 %v11944_v20, %v13347_v23  ;;  %v5470_v23 = vld [vmem:[#allocation10 + $0xe8] sm:$0xff] }
 0x687   : > { %v4956_v10 = vpop.f32.mrb[8].mxu1 }
 0x688   : > { %v11662_v54 = vadd.f32 %v4956_v10, %v1129_v12  ;;  %v4958_v41 = vpop.f32.mrb[9].mxu1  ;;  %v5490_v12 = vld [vmem:[#allocation10 + $0x188] sm:$0xff] }
 0x689   : > { %v11663_v5 = vadd.f32 %v4958_v41, %v1133_v48  ;;  %v13488_v48 = vpack.c.bf16 %v5485_v11, %v5481_v51  ;;  %v13490_v10 = vpack.c.bf16 %v5494_v24, %v5490_v12  ;;  %v5493_v41 = vld [vmem:[#allocation10 + $0x1a0] sm:$0xff] }
 0x68a   : > { %11947 = vtanh.f32 %v11662_v54  ;;  %v5489_v54 = vld [vmem:[#allocation10 + $0x180] sm:$0xff] }
 0x68b   : > { %v9083_v6 = vmul.f32 -1.442695, %v11663_v5  ;;  %v5498_v5 = vld [vmem:[#allocation10 + $0x1c8] sm:$0xff]  ;;  %v13494_v20 = vpack.c.bf16 %v5493_v41, %v5489_v54  ;;  %v5443_v41 = vld [vmem:[#allocation10 + $0x10] sm:$0xff] }
 0x68d   : > { %11949 = vpow2.f32 %v9083_v6  ;;  %v5502_v6 = vld [vmem:[#allocation10 + $0x1e8] sm:$0xff] }
 0x694   : > { %v11948_v16 = vpop.eup %11947 }
 0x695   : > { %v4985_v25 = vmul.f32 %v11948_v16, %v11946_v13  ;;  %v5444_v13 = vld [vmem:[#allocation10 + $0x18] sm:$0xff] }
 0x696   : > { %v5448_v16 = vld [vmem:[#allocation10 + $0x38] sm:$0xff] }
 0x697   : > { %v11950_v50 = vpop.eup %11949  ;;  %v13419_v52 = vadd.f32 %v4985_v25, %v4984_v21  ;;  %v13497_v21 = vpack.c.bf16 %v5502_v6, %v5498_v5  ;;  %v5497_v25 = vld [vmem:[#allocation10 + $0x1c0] sm:$0xff]  ;;  %v5447_v5 = vld [vmem:[#allocation10 + $0x30] sm:$0xff]  ;;  %v5452_v6 = vld [vmem:[#allocation10 + $0x58] sm:$0xff] }
 0x698   : > { %v4981_v4 = vadd.f32 1.0, %v11950_v50  ;;  %v5501_v50 = vld [vmem:[#allocation10 + $0x1e0] sm:$0xff] }
 0x699   : > { %11951 = vtanh.f32 %v13419_v52 }
 0x69a   : > { %11953 = vrcp.f32 %v4981_v4  ;;  %v13499_v4 = vpack.c.bf16 %v5448_v16, %v5444_v13  ;;  %v5456_v13 = vld [vmem:[#allocation10 + $0x78] sm:$0xff] }
 0x6a3   : > { %v11952_v29 = vpop.eup %11951 }
 0x6a4   : > { %v11954_v56 = vpop.eup %11953 }
 0x6a5   : > { %v4988_v8 = vmul.f32 %v11954_v56, %v11952_v29  ;;  %v13503_v29 = vpack.c.bf16 %v5501_v50, %v5497_v25  ;;  %v13523_v50 = vpack.c.bf16 %v5447_v5, %v5443_v41 }
 0x6a7   : > { %9593 = vmatmul.mubr.f32.vlgmr.msra.gmra.mrb[36].mxu0 %v4988_v8  ;;  %5298 = vmatmul.mubr.f32.vlgmr.msra.gmra.mrb[10].mxu1 %v4988_v8 }
 0x6a8   : > { %10679 = vmatpush1.bf16.msra.mxu0 %v13237_v39  ;;  %5226 = vmatprep.mubr.f32.mxu0 %v14566_v19  ;;  %v14568_v39 = vld [vmem:[#allocation22_spill] sm:$0xff] }
 0x6a9   : > { %10681 = vmatprep.subr.bf16.mxu0 %v13239_v62  ;;  %10742 = vmatpush3.bf16.msra.mxu1 %v13303_v9  ;;  %v14569_v62 = vld [vmem:[#allocation23_spill] sm:$0xff] }
 0x6aa   : > { %10743 = vmatprep.subr.bf16.mxu1 %v14560_v57  ;;  %9627 = vmatprep.mubr.msk.f32.mxu1 %vm12412_vm1, %v14566_v19 }
 0x6ac   : > { %10683 = vmatpush1.bf16.msra.mxu0 %v13242_v35  ;;  %v5442_v35 = vld [vmem:[#allocation10 + $0x8] sm:$0xff] }
 0x6ad   : > { %10685 = vmatprep.subr.bf16.mxu0 %v13246_v42  ;;  %10745 = vmatpush3.bf16.msra.mxu1 %v13307_v61  ;;  %v5446_v42 = vld [vmem:[#allocation10 + $0x28] sm:$0xff] }
 0x6ae   : > { %10746 = vmatprep.subr.bf16.mxu1 %v14560_v57  ;;  %v5458_v61 = vld [vmem:[#allocation10 + $0x88] sm:$0xff] }
 0x6b0   : > { %10687 = vmatpush1.bf16.msra.mxu0 %v13251_v37  ;;  %v13456_v37 = vpack.c.bf16 %v5446_v42, %v5442_v35  ;;  %v1306_v42 = vld [vmem:[%s14508_s3] sm:$0xf] }
 0x6b1   : > { %10689 = vmatprep.subr.bf16.mxu0 %v13254_v44  ;;  %10748 = vmatpush3.bf16.msra.mxu1 %v13311_v17  ;;  %v5441_v44 = vld [vmem:[#allocation10] sm:$0xff]  ;;  %v5462_v17 = vld [vmem:[#allocation10 + $0xa8] sm:$0xff] }
 0x6b2   : > { %10749 = vmatprep.subr.bf16.mxu1 %v14560_v57 }
 0x6b4   : > { %10691 = vmatpush1.bf16.msra.mxu0 %v13257_v27  ;;  %v5445_v27 = vld [vmem:[#allocation10 + $0x20] sm:$0xff] }
 0x6b5   : > { %10693 = vmatprep.subr.bf16.mxu0 %v13260_v33  ;;  %10751 = vmatpush3.bf16.msra.mxu1 %v13315_v43  ;;  %v13458_v33 = vpack.c.bf16 %v5445_v27, %v5441_v44  ;;  %v13468_v43 = vpack.c.bf16 %v5462_v17, %v5458_v61  ;;  %v1311_v44 = vrot.slane %v1306_v42, %v13046_v40 }
 0x6b6   : > { %10752 = vmatprep.subr.bf16.mxu1 %v14560_v57  ;;  %v1315_v27 = vrot.slane %v1306_v42, %v13051_v46  ;;  %v1323_v17 = vrot.slane %v1306_v42, %v13055_v58 }
 0x6b8   : > { %10695 = vmatpush1.bf16.msra.mxu0 %v13263_v55  ;;  %v5450_v55 = vld [vmem:[#allocation10 + $0x48] sm:$0xff] }
 0x6b9   : > { %10697 = vmatprep.subr.bf16.mxu0 %v13266_v1  ;;  %10754 = vmatpush3.bf16.msra.mxu1 %v13319_v38  ;;  %v5454_v1 = vld [vmem:[#allocation10 + $0x68] sm:$0xff]  ;;  %v5457_v38 = vld [vmem:[#allocation10 + $0x80] sm:$0xff] }
 0x6ba   : > { %10755 = vmatprep.subr.bf16.mxu1 %v14560_v57 }
 0x6bc   : > { %10699 = vmatpush1.bf16.msra.mxu0 %v13269_v32  ;;  %v13462_v32 = vpack.c.bf16 %v5454_v1, %v5450_v55 }
 0x6bd   : > { %10701 = vmatprep.subr.bf16.mxu0 %v13272_v34  ;;  %10757 = vmatpush3.bf16.msra.mxu1 %v13323_v63  ;;  %v5449_v34 = vld [vmem:[#allocation10 + $0x40] sm:$0xff] }
 0x6be   : > { %10758 = vmatprep.subr.bf16.mxu1 %v14560_v57  ;;  %v5461_v63 = vld [vmem:[#allocation10 + $0xa0] sm:$0xff] }
 0x6c0   : > { %10703 = vmatpush1.bf16.msra.mxu0 %v13275_v45  ;;  %v5453_v45 = vld [vmem:[#allocation10 + $0x60] sm:$0xff] }
 0x6c1   : > { %10705 = vmatprep.subr.bf16.mxu0 %v14568_v39  ;;  %10760 = vmatpush3.bf16.msra.mxu1 %v13326_v18  ;;  %v13464_v9 = vpack.c.bf16 %v5453_v45, %v5449_v34  ;;  %v13470_v18 = vpack.c.bf16 %v5461_v63, %v5457_v38 }
 0x6c2   : > { %10761 = vmatprep.subr.bf16.mxu1 %v14560_v57 }
 0x6c4   : > { %10707 = vmatpush1.bf16.msra.mxu0 %v14569_v62 }
 0x6c5   : > { %10763 = vmatpush3.bf16.msra.mxu1 %v13330_v59  ;;  %10765 = vmatprep.subr.bf16.mxu0 %v13456_v37  ;;  %v5466_v59 = vld [vmem:[#allocation10 + $0xc8] sm:$0xff] }
 0x6c6   : > { %v13474_v7 = vpack.c.bf16 %v5470_v23, %v5466_v59  ;;  %10797 = vmatprep.subr.bf16.mxu1 %v13499_v4  ;;  %v1319_v59 = vrot.slane %v1306_v42, %v13058_v15  ;;  %v5460_v42 = vld [vmem:[#allocation10 + $0x98] sm:$0xff] }
 0x6c7   : > { %5227 = vmatmul.mubr.f32.vlgmr.msra.gmra.mrb[10].mxu0 %v4988_v8 }
 0x6c8   : > { %5569 = vmatprep.mubr.f32.mxu0 %v14566_v19  ;;  %10767 = vmatpush1.bf16.msra.mxu0 %v13458_v33 }
 0x6c9   : > { %10769 = vmatprep.subr.bf16.mxu0 %v13462_v32 }
 0x6cc   : > { %10771 = vmatpush1.bf16.msra.mxu0 %v13464_v9 }
 0x6cd   : > { %10773 = vmatprep.subr.bf16.mxu0 %v13468_v43 }
 0x6d0   : > { %10775 = vmatpush1.bf16.msra.mxu0 %v13470_v18 }
 0x6d1   : > { %10777 = vmatprep.subr.bf16.mxu0 %v13474_v7 }
 0x6d4   : > { %10779 = vmatpush1.bf16.msra.mxu0 %v13476_v49 }
 0x6d5   : > { %10781 = vmatprep.subr.bf16.mxu0 %v13480_v14 }
 0x6d8   : > { %10783 = vmatpush1.bf16.msra.mxu0 %v13482_v3 }
 0x6d9   : > { %10785 = vmatprep.subr.bf16.mxu0 %v13486_v60 }
 0x6dc   : > { %10787 = vmatpush1.bf16.msra.mxu0 %v13488_v48 }
 0x6dd   : > { %10789 = vmatprep.subr.bf16.mxu0 %v13490_v10 }
 0x6e0   : > { %10791 = vmatpush1.bf16.msra.mxu0 %v13494_v20 }
 0x6e1   : > { %10793 = vmatprep.subr.bf16.mxu0 %v13497_v21 }
 0x6e4   : > { %10795 = vmatpush1.bf16.msra.mxu0 %v13503_v29 }
 0x6e5   : > { %10828 = vmatprep.subr.bf16.mxu0 %v14560_v57 }
 0x77a   : > { %v5078_v56 = vpop.f32.mrb[36].mxu0  ;;  %v5299_v8 = vpop.f32.mrb[10].mxu1 }
 0x77b   : > { %v13509_v39 = vadd.f32 %v13405_v30, %v5078_v56  ;;  %v9594_v62 = vpop.f32.mrb[37].mxu0  ;;  %v5301_v35 = vpop.f32.mrb[11].mxu1  ;;  %v11666_v47 = vadd.f32 %v5299_v8, %v1319_v59  ;;  %v13525_v8 = vpack.c.bf16 %v5456_v13, %v5452_v6  ;;  %v5476_v59 = vld [vmem:[#allocation10 + $0x118] sm:$0xff]  ;;  %v5491_v6 = vld [vmem:[#allocation10 + $0x190] sm:$0xff] }
 0x77c   : > { %v11667_v63 = vadd.f32 %v5301_v35, %v1323_v17  ;;  %v5451_v62 = vld [vmem:[#allocation10 + $0x50] sm:$0xff] }
 0x77d   : > { %14570 = vst [vmem:[#allocation22_spill] sm:$0xff] %v13509_v39  ;;  %5082 = vmax.xlane.f32.xlu0 %v13509_v39  ;;  %v5455_v35 = vld [vmem:[#allocation10 + $0x70] sm:$0xff] }
 0x77e   : > { %v9088_v23 = vmul.f32 -1.442695, %v11667_v63  ;;  %v5471_v63 = vld [vmem:[#allocation10 + $0xf0] sm:$0xff] }
 0x77f   : > { %v5495_v13 = vld [vmem:[#allocation10 + $0x1b0] sm:$0xff] }
 0x79a   : > { %v5228_v55 = vpop.f32.mrb[10].mxu0 }
 0x79b   : > { %v11664_v1 = vadd.f32 %v5228_v55, %v1311_v44  ;;  %v5230_v34 = vpop.f32.mrb[11].mxu0  ;;  %v13528_v44 = vpack.c.bf16 %v5455_v35, %v5451_v62  ;;  %v5459_v55 = vld [vmem:[#allocation10 + $0x90] sm:$0xff]  ;;  %v13561_v62 = vpack.c.bf16 %v5495_v13, %v5491_v6  ;;  %v5686_v6 = vld [vmem:[#allocation11 + $0x58] sm:$0xff] }
 0x79c   : > { %v11665_v45 = vadd.f32 %v5230_v34, %v1315_v27  ;;  %v5468_v34 = vld [vmem:[#allocation10 + $0xd8] sm:$0xff] }
 0x79d   : > { %v9086_v61 = vmul.f32 -1.442695, %v11664_v1  ;;  %v5463_v1 = vld [vmem:[#allocation10 + $0xb0] sm:$0xff] }
 0x79e   : > { %v9087_v38 = vmul.f32 -1.442695, %v11665_v45  ;;  %v5472_v45 = vld [vmem:[#allocation10 + $0xf8] sm:$0xff] }
 0x79f   : > { %11955 = vpow2.f32 %v9086_v61  ;;  %v13537_v61 = vpack.c.bf16 %v5463_v1, %v5459_v55  ;;  %v13540_v17 = vpack.c.bf16 %v5472_v45, %v5468_v34  ;;  %v5676_v1 = vld [vmem:[#allocation11 + $0x8] sm:$0xff]  ;;  %v5677_v45 = vld [vmem:[#allocation11 + $0x10] sm:$0xff] }
 0x7a0   : > { %11957 = vpow2.f32 %v9087_v38  ;;  %v5467_v38 = vld [vmem:[#allocation10 + $0xd0] sm:$0xff] }
 0x7a1   : > { %11959 = vpow2.f32 %v9088_v23  ;;  %v5480_v23 = vld [vmem:[#allocation10 + $0x138] sm:$0xff] }
 0x7a2   : > { %11961 = vtanh.f32 %v11666_v47  ;;  %v13543_v47 = vpack.c.bf16 %v5471_v63, %v5467_v38  ;;  %v5678_v38 = vld [vmem:[#allocation11 + $0x18] sm:$0xff] }
 0x7a3   : > { %v13593_v63 = vpack.c.bf16 %v5678_v38, %v5677_v45 }
 0x7a9   : > { %v11956_v2 = vpop.eup %11955 }
 0x7aa   : > { %v11958_v0 = vpop.eup %11957  ;;  %v5311_v22 = vadd.f32 1.0, %v11956_v2  ;;  %v13546_v2 = vpack.c.bf16 %v5480_v23, %v5476_v59  ;;  %v5679_v59 = vld [vmem:[#allocation11 + $0x20] sm:$0xff]  ;;  %v5680_v23 = vld [vmem:[#allocation11 + $0x28] sm:$0xff] }
 0x7ab   : > { %v5317_v31 = vadd.f32 1.0, %v11958_v0  ;;  %v11960_v53 = vpop.eup %11959  ;;  %v5475_v0 = vld [vmem:[#allocation10 + $0x110] sm:$0xff] }
 0x7ac   : > { %11963 = vrcp.f32 %v5311_v22  ;;  %v11962_v36 = vpop.eup %11961  ;;  %v5324_v11 = vadd.f32 1.0, %v11960_v53  ;;  %v5479_v22 = vld [vmem:[#allocation10 + $0x130] sm:$0xff]  ;;  %v5488_v53 = vld [vmem:[#allocation10 + $0x178] sm:$0xff] }
 0x7ad   : > { %11965 = vrcp.f32 %v5317_v31  ;;  %v5484_v31 = vld [vmem:[#allocation10 + $0x158] sm:$0xff] }
 0x7ae   : > { %11967 = vrcp.f32 %v5324_v11  ;;  %v5487_v11 = vld [vmem:[#allocation10 + $0x170] sm:$0xff] }
 0x7b6   : > { %v11964_v28 = vpop.eup %11963 }
 0x7b7   : > { %v11966_v51 = vpop.eup %11965  ;;  %v5328_v12 = vmul.f32 %v11964_v28, %v11962_v36  ;;  %v13549_v36 = vpack.c.bf16 %v5479_v22, %v5475_v0  ;;  %v13552_v28 = vpack.c.bf16 %v5488_v53, %v5484_v31  ;;  %v13597_v0 = vpack.c.bf16 %v5680_v23, %v5679_v59  ;;  %v5681_v22 = vld [vmem:[#allocation11 + $0x30] sm:$0xff]  ;;  %v5682_v31 = vld [vmem:[#allocation11 + $0x38] sm:$0xff] }
 0x7b8   : > { %v5327_v24 = vmul.f32 %v11966_v51, %v13419_v52  ;;  %v11968_v16 = vpop.eup %11967  ;;  %v5464_v52 = vld [vmem:[#allocation10 + $0xb8] sm:$0xff]  ;;  %v5483_v51 = vld [vmem:[#allocation10 + $0x150] sm:$0xff]  ;;  %v13601_v53 = vpack.c.bf16 %v5682_v31, %v5681_v22 }
 0x7b9   : > { %v13532_v27 = vpack.c.bf16 %v5464_v52, %v5460_v42  ;;  %v13555_v41 = vpack.c.bf16 %v5487_v11, %v5483_v51  ;;  %v5499_v42 = vld [vmem:[#allocation10 + $0x1d0] sm:$0xff]  ;;  %v5683_v51 = vld [vmem:[#allocation11 + $0x40] sm:$0xff]  ;;  %v5684_v11 = vld [vmem:[#allocation11 + $0x48] sm:$0xff] }
 0x7ba   : > { %v13520_v54 = vadd.f32 %v5328_v12, %v5327_v24  ;;  %v5492_v12 = vld [vmem:[#allocation10 + $0x198] sm:$0xff]  ;;  %v5503_v52 = vld [vmem:[#allocation10 + $0x1f0] sm:$0xff] }
 0x7bb   : > { %v5496_v24 = vld [vmem:[#allocation10 + $0x1b8] sm:$0xff]  ;;  %v13567_v55 = vpack.c.bf16 %v5503_v52, %v5499_v42  ;;  %v5689_v52 = vld [vmem:[#allocation11 + $0x70] sm:$0xff] }
 0x7bc   : > { %11969 = vtanh.f32 %v13520_v54  ;;  %v13558_v5 = vpack.c.bf16 %v5496_v24, %v5492_v12  ;;  %v13605_v12 = vpack.c.bf16 %v5684_v11, %v5683_v51  ;;  %v5685_v24 = vld [vmem:[#allocation11 + $0x50] sm:$0xff] }
 0x7bd   : > { %14572 = vst [vmem:[#allocation26_spill] sm:$0xff] %v13567_v55  ;;  %v13609_v13 = vpack.c.bf16 %v5686_v6, %v5685_v24  ;;  %v1496_v23 = vld [vmem:[%s14508_s3] sm:$0xf] }
 0x7be   : > { %v1505_v51 = vrot.slane %v1496_v23, %v13051_v46  ;;  %v1501_v11 = vrot.slane %v1496_v23, %v13046_v40 }
 0x7c6   : > { %v11970_v25 = vpop.eup %11969 }
 0x7c7   : > { %v5331_v56 = vmul.f32 %v11970_v25, %v11968_v16  ;;  %v5500_v16 = vld [vmem:[#allocation10 + $0x1d8] sm:$0xff] }
 0x7c8   : > { %v5504_v25 = vld [vmem:[#allocation10 + $0x1f8] sm:$0xff] }
 0x7c9   : > { %9628 = vmatmul.mubr.f32.vlgmr.msra.gmra.mrb[36].mxu1 %v5331_v56  ;;  %5570 = vmatmul.mubr.f32.vlgmr.msra.gmra.mrb[12].mxu0 %v5331_v56  ;;  %v13564_v35 = vpack.c.bf16 %v5504_v25, %v5500_v16  ;;  %v5687_v16 = vld [vmem:[#allocation11 + $0x60] sm:$0xff]  ;;  %v5688_v25 = vld [vmem:[#allocation11 + $0x68] sm:$0xff] }
 0x7ca   : > { %10799 = vmatpush1.bf16.msra.mxu1 %v13523_v50  ;;  %5640 = vmatprep.mubr.f32.mxu1 %v14566_v19  ;;  %v13612_v42 = vpack.c.bf16 %v5688_v25, %v5687_v16 }
 0x7cb   : > { %10801 = vmatprep.subr.bf16.mxu1 %v13525_v8  ;;  %9662 = vmatprep.mubr.msk.f32.mxu0 %vm12412_vm1, %v14566_v19  ;;  %14571 = vst [vmem:[#allocation23_spill] sm:$0xff] %v13564_v35 }
 0x7ce   : > { %10803 = vmatpush1.bf16.msra.mxu1 %v13528_v44 }
 0x7cf   : > { %10805 = vmatprep.subr.bf16.mxu1 %v13532_v27 }
 0x7d2   : > { %10807 = vmatpush1.bf16.msra.mxu1 %v13537_v61 }
 0x7d3   : > { %10809 = vmatprep.subr.bf16.mxu1 %v13540_v17 }
 0x7d6   : > { %10811 = vmatpush1.bf16.msra.mxu1 %v13543_v47 }
 0x7d7   : > { %10813 = vmatprep.subr.bf16.mxu1 %v13546_v2 }
 0x7da   : > { %10815 = vmatpush1.bf16.msra.mxu1 %v13549_v36 }
 0x7db   : > { %10817 = vmatprep.subr.bf16.mxu1 %v13552_v28 }
 0x7de   : > { %10819 = vmatpush1.bf16.msra.mxu1 %v13555_v41 }
 0x7df   : > { %10821 = vmatprep.subr.bf16.mxu1 %v13558_v5 }
 0x7e2   : > { %10823 = vmatpush1.bf16.msra.mxu1 %v13561_v62 }
 0x7e3   : > { %10825 = vmatprep.subr.bf16.mxu1 %v13564_v35 }
 0x7e6   : > { %10827 = vmatpush1.bf16.msra.mxu1 %v13567_v55 }
 0x7e7   : > { %10885 = vmatprep.subr.bf16.mxu1 %v13499_v4 }
 0x7e9   : > { %5641 = vmatmul.mubr.f32.vlgmr.msra.gmra.mrb[12].mxu1 %v5331_v56  ;;  %v5675_v56 = vld [vmem:[#allocation11] sm:$0xff] }
 0x7ea   : > { %10887 = vmatpush1.bf16.msra.mxu1 %v13523_v50  ;;  %5983 = vmatprep.mubr.f32.mxu1 %v14566_v19  ;;  %v13589_v34 = vpack.c.bf16 %v5676_v1, %v5675_v56  ;;  %v5690_v56 = vld [vmem:[#allocation11 + $0x78] sm:$0xff] }
 0x7eb   : > { %10889 = vmatprep.subr.bf16.mxu1 %v13525_v8  ;;  %v13616_v1 = vpack.c.bf16 %v5690_v56, %v5689_v52 }
 0x7ec   : > { %10830 = vmatpush3.bf16.msra.mxu0 %v13589_v34 }
 0x7ed   : > { %10831 = vmatprep.subr.bf16.mxu0 %v14560_v57 }
 0x7ee   : > { %10891 = vmatpush1.bf16.msra.mxu1 %v13528_v44 }
 0x7ef   : > { %10893 = vmatprep.subr.bf16.mxu1 %v13532_v27 }
 0x7f0   : > { %10833 = vmatpush3.bf16.msra.mxu0 %v13593_v63 }
 0x7f1   : > { %10834 = vmatprep.subr.bf16.mxu0 %v14560_v57 }
 0x7f2   : > { %10895 = vmatpush1.bf16.msra.mxu1 %v13537_v61 }
 0x7f3   : > { %10897 = vmatprep.subr.bf16.mxu1 %v13540_v17 }
 0x7f4   : > { %10836 = vmatpush3.bf16.msra.mxu0 %v13597_v0 }
 0x7f5   : > { %10837 = vmatprep.subr.bf16.mxu0 %v14560_v57 }
 0x7f6   : > { %10899 = vmatpush1.bf16.msra.mxu1 %v13543_v47 }
 0x7f7   : > { %10901 = vmatprep.subr.bf16.mxu1 %v13546_v2 }
 0x7f8   : > { %10839 = vmatpush3.bf16.msra.mxu0 %v13601_v53 }
 0x7f9   : > { %10840 = vmatprep.subr.bf16.mxu0 %v14560_v57 }
 0x7fa   : > { %10903 = vmatpush1.bf16.msra.mxu1 %v13549_v36 }
 0x7fb   : > { %10905 = vmatprep.subr.bf16.mxu1 %v13552_v28 }
 0x7fc   : > { %10842 = vmatpush3.bf16.msra.mxu0 %v13605_v12 }
 0x7fd   : > { %10843 = vmatprep.subr.bf16.mxu0 %v14560_v57 }
 0x7fe   : > { %10907 = vmatpush1.bf16.msra.mxu1 %v13555_v41 }
 0x7ff   : > { %10909 = vmatprep.subr.bf16.mxu1 %v13558_v5 }
 0x800   : > { %10845 = vmatpush3.bf16.msra.mxu0 %v13609_v13 }
 0x801   : > { %10846 = vmatprep.subr.bf16.mxu0 %v14560_v57 }
 0x802   : > { %10911 = vmatpush1.bf16.msra.mxu1 %v13561_v62 }
 0x803   : > { %10913 = vmatprep.subr.bf16.mxu1 %v13564_v35 }
 0x804   : > { %10848 = vmatpush3.bf16.msra.mxu0 %v13612_v42 }
 0x805   : > { %10849 = vmatprep.subr.bf16.mxu0 %v14560_v57 }
 0x806   : > { %10915 = vmatpush1.bf16.msra.mxu1 %v13567_v55 }
 0x807   : > { %10916 = vmatprep.subr.bf16.mxu1 %v14560_v57 }
 0x808   : > { %10851 = vmatpush3.bf16.msra.mxu0 %v13616_v1 }
 0x809   : > { %10853 = vmatprep.subr.bf16.mxu0 %v13456_v37 }
 0x89c   : > { %v5421_v45 = vpop.f32.mrb[36].mxu1  ;;  %v5571_v38 = vpop.f32.mrb[12].mxu0 }
 0x89d   : > { %v13622_v59 = vadd.f32 %v13405_v30, %v5421_v45  ;;  %v9629_v22 = vpop.f32.mrb[37].mxu1  ;;  %v5573_v31 = vpop.f32.mrb[13].mxu0  ;;  %v11668_v6 = vadd.f32 %v5571_v38, %v1501_v11  ;;  %v1509_v45 = vrot.slane %v1496_v23, %v13058_v15 }
 0x89e   : > { %v11669_v24 = vadd.f32 %v5573_v31, %v1505_v51  ;;  %v1513_v22 = vrot.slane %v1496_v23, %v13055_v58 }
 0x89f   : > { %14573 = vst [vmem:[#allocation27_spill] sm:$0xff] %v13622_v59  ;;  %5425 = vmax.xlane.f32.xlu1 %v13622_v59  ;;  %v9091_v25 = vmul.f32 -1.442695, %v11668_v6 }
 0x8a0   : > { %v9092_v16 = vmul.f32 -1.442695, %v11669_v24 }
 0x8a2   : > { %11971 = vpow2.f32 %v9092_v16 }
 0x8a3   : > { %11973 = vpow2.f32 %v9091_v25 }
 0x8ac   : > { %v11972_v30 = vpop.eup %11971 }
 0x8ad   : > { %v11974_v52 = vpop.eup %11973  ;;  %v5660_v56 = vadd.f32 1.0, %v11972_v30 }
 0x8ae   : > { %v5654_v26 = vadd.f32 1.0, %v11974_v52 }
 0x8af   : > { %11975 = vrcp.f32 %v5660_v56 }
 0x8b0   : > { %11977 = vrcp.f32 %v5654_v26 }
 0x8b9   : > { %v11976_v31 = vpop.eup %11975 }
 0x8ba   : > { %v11978_v51 = vpop.eup %11977  ;;  %v5670_v24 = vmul.f32 %v11976_v31, %v13520_v54 }
 0x8bc   : > { %v5642_v39 = vpop.f32.mrb[12].mxu1 }
 0x8bd   : > { %v11670_v59 = vadd.f32 %v5642_v39, %v1509_v45  ;;  %v5644_v55 = vpop.f32.mrb[13].mxu1 }
 0x8be   : > { %v11671_v35 = vadd.f32 %v5644_v55, %v1513_v22 }
 0x8bf   : > { %11979 = vtanh.f32 %v11670_v59 }
 0x8c0   : > { %v9093_v38 = vmul.f32 -1.442695, %v11671_v35 }
 0x8c2   : > { %11981 = vpow2.f32 %v9093_v38 }
 0x8c9   : > { %v11980_v11 = vpop.eup %11979 }
 0x8ca   : > { %v5671_v6 = vmul.f32 %v11980_v11, %v11978_v51 }
 0x8cc   : > { %v11982_v16 = vpop.eup %11981  ;;  %v13633_v25 = vadd.f32 %v5671_v6, %v5670_v24 }
 0x8cd   : > { %v5667_v30 = vadd.f32 1.0, %v11982_v16 }
 0x8ce   : > { %11983 = vtanh.f32 %v13633_v25 }
 0x8cf   : > { %11985 = vrcp.f32 %v5667_v30 }
 0x8d8   : > { %v11984_v39 = vpop.eup %11983 }
 0x8d9   : > { %v11986_v23 = vpop.eup %11985 }
 0x8da   : > { %v5674_v26 = vmul.f32 %v11986_v23, %v11984_v39 }
 0x8dc   : > { %9663 = vmatmul.mubr.f32.vlgmr.msra.gmra.mrb[38].mxu0 %v5674_v26  ;;  %5984 = vmatmul.mubr.f32.vlgmr.msra.gmra.mrb[14].mxu1 %v5674_v26 }
 0x8dd   : > { %10855 = vmatpush1.bf16.msra.mxu0 %v13458_v33  ;;  %5912 = vmatprep.mubr.f32.mxu0 %v14566_v19 }
 0x8de   : > { %10857 = vmatprep.subr.bf16.mxu0 %v13462_v32  ;;  %10918 = vmatpush3.bf16.msra.mxu1 %v13589_v34 }
 0x8df   : > { %10919 = vmatprep.subr.bf16.mxu1 %v14560_v57  ;;  %9697 = vmatprep.mubr.msk.f32.mxu1 %vm12412_vm1, %v14566_v19 }
 0x8e1   : > { %10859 = vmatpush1.bf16.msra.mxu0 %v13464_v9 }
 0x8e2   : > { %10861 = vmatprep.subr.bf16.mxu0 %v13468_v43  ;;  %10921 = vmatpush3.bf16.msra.mxu1 %v13593_v63 }
 0x8e3   : > { %10922 = vmatprep.subr.bf16.mxu1 %v14560_v57 }
 0x8e5   : > { %10863 = vmatpush1.bf16.msra.mxu0 %v13470_v18 }
 0x8e6   : > { %10865 = vmatprep.subr.bf16.mxu0 %v13474_v7  ;;  %10924 = vmatpush3.bf16.msra.mxu1 %v13597_v0 }
 0x8e7   : > { %10925 = vmatprep.subr.bf16.mxu1 %v14560_v57 }
 0x8e9   : > { %10867 = vmatpush1.bf16.msra.mxu0 %v13476_v49 }
 0x8ea   : > { %10869 = vmatprep.subr.bf16.mxu0 %v13480_v14  ;;  %10927 = vmatpush3.bf16.msra.mxu1 %v13601_v53 }
 0x8eb   : > { %10928 = vmatprep.subr.bf16.mxu1 %v14560_v57 }
 0x8ed   : > { %10871 = vmatpush1.bf16.msra.mxu0 %v13482_v3 }
 0x8ee   : > { %10873 = vmatprep.subr.bf16.mxu0 %v13486_v60  ;;  %10930 = vmatpush3.bf16.msra.mxu1 %v13605_v12 }
 0x8ef   : > { %10931 = vmatprep.subr.bf16.mxu1 %v14560_v57 }
 0x8f1   : > { %10875 = vmatpush1.bf16.msra.mxu0 %v13488_v48 }
 0x8f2   : > { %10877 = vmatprep.subr.bf16.mxu0 %v13490_v10  ;;  %10933 = vmatpush3.bf16.msra.mxu1 %v13609_v13 }
 0x8f3   : > { %10934 = vmatprep.subr.bf16.mxu1 %v14560_v57 }
 0x8f5   : > { %10879 = vmatpush1.bf16.msra.mxu0 %v13494_v20 }
 0x8f6   : > { %10881 = vmatprep.subr.bf16.mxu0 %v13497_v21  ;;  %10936 = vmatpush3.bf16.msra.mxu1 %v13612_v42 }
 0x8f7   : > { %10937 = vmatprep.subr.bf16.mxu1 %v14560_v57 }
 0x8f9   : > { %10883 = vmatpush1.bf16.msra.mxu0 %v13503_v29 }
 0x8fa   : > { %10941 = vmatprep.subr.bf16.mxu0 %v13456_v37  ;;  %10939 = vmatpush3.bf16.msra.mxu1 %v13616_v1  ;;  %v13691_v37 = vld [vmem:[%s14510_s5] ss:$0 sm:$0xff] }
 0x8fb   : > { %10973 = vmatprep.subr.bf16.mxu1 %v13499_v4 }
 0x8fc   : > { %5913 = vmatmul.mubr.f32.vlgmr.msra.gmra.mrb[14].mxu0 %v5674_v26 }
 0x8fd   : > { %10943 = vmatpush1.bf16.msra.mxu0 %v13458_v33  ;;  %6255 = vmatprep.mubr.f32.mxu0 %v14566_v19 }
 0x8fe   : > { %10945 = vmatprep.subr.bf16.mxu0 %v13462_v32 }
 0x901   : > { %10947 = vmatpush1.bf16.msra.mxu0 %v13464_v9 }
 0x902   : > { %10949 = vmatprep.subr.bf16.mxu0 %v13468_v43 }
 0x905   : > { %10951 = vmatpush1.bf16.msra.mxu0 %v13470_v18 }
 0x906   : > { %10953 = vmatprep.subr.bf16.mxu0 %v13474_v7  ;;  %v1686_v7 = vld [vmem:[%s14508_s3] sm:$0xf] }
 0x907   : > { %v1699_v54 = vrot.slane %v1686_v7, %v13058_v15 }
 0x909   : > { %10955 = vmatpush1.bf16.msra.mxu0 %v13476_v49  ;;  %v1691_v49 = vrot.slane %v1686_v7, %v13046_v40 }
 0x90a   : > { %10957 = vmatprep.subr.bf16.mxu0 %v13480_v14  ;;  %v1695_v14 = vrot.slane %v1686_v7, %v13051_v46 }
 0x90d   : > { %10959 = vmatpush1.bf16.msra.mxu0 %v13482_v3 }
 0x90e   : > { %10961 = vmatprep.subr.bf16.mxu0 %v13486_v60 }
 0x911   : > { %10963 = vmatpush1.bf16.msra.mxu0 %v13488_v48 }
 0x912   : > { %10965 = vmatprep.subr.bf16.mxu0 %v13490_v10 }
 0x915   : > { %10967 = vmatpush1.bf16.msra.mxu0 %v13494_v20 }
 0x916   : > { %10969 = vmatprep.subr.bf16.mxu0 %v13497_v21  ;;  %v1703_v21 = vrot.slane %v1686_v7, %v13055_v58  ;;  %v6509_v7 = vld [vmem:[#allocation10 + $0x138] sm:$0xff] }
 0x919   : > { %10971 = vmatpush1.bf16.msra.mxu0 %v13503_v29 }
 0x91a   : > { %11004 = vmatprep.subr.bf16.mxu0 %v14560_v57 }
 0x9af   : > { %v5764_v33 = vpop.f32.mrb[38].mxu0  ;;  %v5985_v32 = vpop.f32.mrb[14].mxu1 }
 0x9b0   : > { %v13694_v9 = vadd.f32 %v13691_v37, %v5764_v33  ;;  %v9664_v43 = vpop.f32.mrb[39].mxu0  ;;  %v5987_v18 = vpop.f32.mrb[15].mxu1  ;;  %v11674_v55 = vadd.f32 %v5985_v32, %v1699_v54  ;;  %v6496_v33 = vld [vmem:[#allocation10 + $0xd0] sm:$0xff]  ;;  %v6521_v54 = vld [vmem:[#allocation10 + $0x198] sm:$0xff] }
 0x9b1   : > { %v11675_v29 = vadd.f32 %v5987_v18, %v1703_v21  ;;  %v6500_v32 = vld [vmem:[#allocation10 + $0xf0] sm:$0xff]  ;;  %v6505_v18 = vld [vmem:[#allocation10 + $0x118] sm:$0xff] }
 0x9b2   : > { %14574 = vst [vmem:[#allocation28_spill] sm:$0xff] %v13694_v9  ;;  %5768 = vmax.xlane.f32.xlu0 %v13694_v9  ;;  %v13762_v43 = vpack.c.bf16 %v6500_v32, %v6496_v33  ;;  %v6512_v21 = vld [vmem:[#allocation10 + $0x150] sm:$0xff] }
 0x9b3   : > { %v9098_v35 = vmul.f32 -1.442695, %v11675_v29 }
 0x9cf   : > { %v5914_v3 = vpop.f32.mrb[14].mxu0 }
 0x9d0   : > { %v11672_v60 = vadd.f32 %v5914_v3, %v1691_v49  ;;  %v5916_v48 = vpop.f32.mrb[15].mxu0  ;;  %v13766_v49 = vpack.c.bf16 %v6509_v7, %v6505_v18  ;;  %v6508_v3 = vld [vmem:[#allocation10 + $0x130] sm:$0xff] }
 0x9d1   : > { %v11673_v10 = vadd.f32 %v5916_v48, %v1695_v14  ;;  %v6504_v14 = vld [vmem:[#allocation10 + $0x110] sm:$0xff]  ;;  %v6513_v48 = vld [vmem:[#allocation10 + $0x158] sm:$0xff] }
 0x9d2   : > { %v9096_v20 = vmul.f32 -1.442695, %v11672_v60  ;;  %v13768_v60 = vpack.c.bf16 %v6508_v3, %v6504_v14 }
 0x9d3   : > { %v9097_v4 = vmul.f32 -1.442695, %v11673_v10  ;;  %v6517_v10 = vld [vmem:[#allocation10 + $0x178] sm:$0xff] }
 0x9d4   : > { %11987 = vpow2.f32 %v9096_v20  ;;  %v13772_v20 = vpack.c.bf16 %v6517_v10, %v6513_v48 }
 0x9d5   : > { %11989 = vpow2.f32 %v9097_v4  ;;  %v6516_v4 = vld [vmem:[#allocation10 + $0x170] sm:$0xff] }
 0x9d6   : > { %11991 = vpow2.f32 %v9098_v35  ;;  %v13774_v29 = vpack.c.bf16 %v6516_v4, %v6512_v21  ;;  %v6525_v35 = vld [vmem:[#allocation10 + $0x1b8] sm:$0xff] }
 0x9d7   : > { %11993 = vtanh.f32 %v11674_v55  ;;  %v6520_v55 = vld [vmem:[#allocation10 + $0x190] sm:$0xff] }
 0x9de   : > { %v11988_v59 = vpop.eup %11987 }
 0x9df   : > { %v11990_v52 = vpop.eup %11989  ;;  %v5997_v56 = vadd.f32 1.0, %v11988_v59  ;;  %v13777_v59 = vpack.c.bf16 %v6525_v35, %v6521_v54 }
 0x9e0   : > { %v6003_v45 = vadd.f32 1.0, %v11990_v52  ;;  %v11992_v22 = vpop.eup %11991  ;;  %v6524_v52 = vld [vmem:[#allocation10 + $0x1b0] sm:$0xff] }
 0x9e1   : > { %11995 = vrcp.f32 %v5997_v56  ;;  %v11994_v38 = vpop.eup %11993  ;;  %v6010_v11 = vadd.f32 1.0, %v11992_v22  ;;  %v6529_v56 = vld [vmem:[#allocation10 + $0x1d8] sm:$0xff]  ;;  %v13780_v22 = vpack.c.bf16 %v6524_v52, %v6520_v55  ;;  %v6470_v52 = vld [vmem:[#allocation10] sm:$0xff] }
 0x9e2   : > { %11997 = vrcp.f32 %v6003_v45  ;;  %v6533_v45 = vld [vmem:[#allocation10 + $0x1f8] sm:$0xff] }
 0x9e3   : > { %11999 = vrcp.f32 %v6010_v11  ;;  %v6532_v11 = vld [vmem:[#allocation10 + $0x1f0] sm:$0xff] }
 0x9eb   : > { %v11996_v31 = vpop.eup %11995 }
 0x9ec   : > { %v11998_v51 = vpop.eup %11997  ;;  %v6014_v24 = vmul.f32 %v11996_v31, %v11994_v38  ;;  %v6471_v38 = vld [vmem:[#allocation10 + $0x8] sm:$0xff]  ;;  %v13783_v31 = vpack.c.bf16 %v6533_v45, %v6529_v56  ;;  %v6474_v56 = vld [vmem:[#allocation10 + $0x20] sm:$0xff] }
 0x9ed   : > { %v6013_v6 = vmul.f32 %v11998_v51, %v13633_v25  ;;  %v12000_v30 = vpop.eup %11999  ;;  %v6501_v25 = vld [vmem:[#allocation10 + $0xf8] sm:$0xff]  ;;  %v6528_v51 = vld [vmem:[#allocation10 + $0x1d0] sm:$0xff]  ;;  %v6479_v45 = vld [vmem:[#allocation10 + $0x48] sm:$0xff] }
 0x9ef   : > { %v13705_v16 = vadd.f32 %v6014_v24, %v6013_v6  ;;  %v6475_v24 = vld [vmem:[#allocation10 + $0x28] sm:$0xff] }
 0x9f0   : > { %v13785_v6 = vpack.c.bf16 %v6475_v24, %v6471_v38  ;;  %v6483_v38 = vld [vmem:[#allocation10 + $0x68] sm:$0xff]  ;;  %v13809_v24 = vpack.c.bf16 %v6474_v56, %v6470_v52 }
 0x9f1   : > { %12001 = vtanh.f32 %v13705_v16 }
 0x9fb   : > { %v12002_v39 = vpop.eup %12001 }
 0x9fc   : > { %v6017_v23 = vmul.f32 %v12002_v39, %v12000_v30  ;;  %v13788_v30 = vpack.c.bf16 %v6532_v11, %v6528_v51 }
 0x9fe   : > { %9698 = vmatmul.mubr.f32.vlgmr.msra.gmra.mrb[38].mxu1 %v6017_v23  ;;  %6256 = vmatmul.mubr.f32.vlgmr.msra.gmra.mrb[16].mxu0 %v6017_v23 }
 0x9ff   : > { %10975 = vmatpush1.bf16.msra.mxu1 %v13523_v50  ;;  %6326 = vmatprep.mubr.f32.mxu1 %v14566_v19  ;;  %v14575_v50 = vld [vmem:[#allocation23_spill] sm:$0xff] }
 0xa00   : > { %10977 = vmatprep.subr.bf16.mxu1 %v13525_v8  ;;  %11006 = vmatpush3.bf16.msra.mxu0 %v13589_v34  ;;  %v14576_v8 = vld [vmem:[#allocation26_spill] sm:$0xff] }
 0xa01   : > { %11007 = vmatprep.subr.bf16.mxu0 %v14560_v57  ;;  %9732 = vmatprep.mubr.msk.f32.mxu0 %vm12412_vm1, %v14566_v19 }
 0xa03   : > { %10979 = vmatpush1.bf16.msra.mxu1 %v13528_v44  ;;  %v6473_v44 = vld [vmem:[#allocation10 + $0x18] sm:$0xff] }
 0xa04   : > { %10981 = vmatprep.subr.bf16.mxu1 %v13532_v27  ;;  %11009 = vmatpush3.bf16.msra.mxu0 %v13593_v63  ;;  %v6477_v27 = vld [vmem:[#allocation10 + $0x38] sm:$0xff] }
 0xa05   : > { %11010 = vmatprep.subr.bf16.mxu0 %v14560_v57  ;;  %v6489_v63 = vld [vmem:[#allocation10 + $0x98] sm:$0xff] }
 0xa07   : > { %10983 = vmatpush1.bf16.msra.mxu1 %v13537_v61  ;;  %v13742_v61 = vpack.c.bf16 %v6477_v27, %v6473_v44 }
 0xa08   : > { %10985 = vmatprep.subr.bf16.mxu1 %v13540_v17  ;;  %11012 = vmatpush3.bf16.msra.mxu0 %v13597_v0  ;;  %v6472_v17 = vld [vmem:[#allocation10 + $0x10] sm:$0xff]  ;;  %v6493_v0 = vld [vmem:[#allocation10 + $0xb8] sm:$0xff] }
 0xa09   : > { %11013 = vmatprep.subr.bf16.mxu0 %v14560_v57 }
 0xa0b   : > { %10987 = vmatpush1.bf16.msra.mxu1 %v13543_v47  ;;  %v6476_v47 = vld [vmem:[#allocation10 + $0x30] sm:$0xff] }
 0xa0c   : > { %10989 = vmatprep.subr.bf16.mxu1 %v13546_v2  ;;  %11015 = vmatpush3.bf16.msra.mxu0 %v13601_v53  ;;  %v13744_v2 = vpack.c.bf16 %v6476_v47, %v6472_v17  ;;  %v13754_v53 = vpack.c.bf16 %v6493_v0, %v6489_v63 }
 0xa0d   : > { %11016 = vmatprep.subr.bf16.mxu0 %v14560_v57 }
 0xa0f   : > { %10991 = vmatpush1.bf16.msra.mxu1 %v13549_v36  ;;  %v6481_v36 = vld [vmem:[#allocation10 + $0x58] sm:$0xff] }
 0xa10   : > { %10993 = vmatprep.subr.bf16.mxu1 %v13552_v28  ;;  %11018 = vmatpush3.bf16.msra.mxu0 %v13605_v12  ;;  %v6485_v28 = vld [vmem:[#allocation10 + $0x78] sm:$0xff]  ;;  %v6488_v12 = vld [vmem:[#allocation10 + $0x90] sm:$0xff] }
 0xa11   : > { %11019 = vmatprep.subr.bf16.mxu0 %v14560_v57 }
 0xa13   : > { %10995 = vmatpush1.bf16.msra.mxu1 %v13555_v41  ;;  %v13748_v41 = vpack.c.bf16 %v6485_v28, %v6481_v36 }
 0xa14   : > { %10997 = vmatprep.subr.bf16.mxu1 %v13558_v5  ;;  %11021 = vmatpush3.bf16.msra.mxu0 %v13609_v13  ;;  %v6480_v5 = vld [vmem:[#allocation10 + $0x50] sm:$0xff] }
 0xa15   : > { %11022 = vmatprep.subr.bf16.mxu0 %v14560_v57  ;;  %v6492_v13 = vld [vmem:[#allocation10 + $0xb0] sm:$0xff] }
 0xa17   : > { %10999 = vmatpush1.bf16.msra.mxu1 %v13561_v62  ;;  %v6484_v62 = vld [vmem:[#allocation10 + $0x70] sm:$0xff] }
 0xa18   : > { %11001 = vmatprep.subr.bf16.mxu1 %v14575_v50  ;;  %11024 = vmatpush3.bf16.msra.mxu0 %v13612_v42  ;;  %v13750_v34 = vpack.c.bf16 %v6484_v62, %v6480_v5  ;;  %v13756_v42 = vpack.c.bf16 %v6492_v13, %v6488_v12 }
 0xa19   : > { %11025 = vmatprep.subr.bf16.mxu0 %v14560_v57 }
 0xa1b   : > { %11003 = vmatpush1.bf16.msra.mxu1 %v14576_v8  ;;  %v1876_v8 = vld [vmem:[%s14508_s3] sm:$0xf] }
 0xa1c   : > { %11027 = vmatpush3.bf16.msra.mxu0 %v13616_v1  ;;  %11061 = vmatprep.subr.bf16.mxu1 %v13742_v61  ;;  %v6497_v1 = vld [vmem:[#allocation10 + $0xd8] sm:$0xff]  ;;  %v1885_v17 = vrot.slane %v1876_v8, %v13051_v46  ;;  %v1881_v47 = vrot.slane %v1876_v8, %v13046_v40  ;;  %v1889_v13 = vrot.slane %v1876_v8, %v13058_v15 }
 0xa1d   : > { %v13760_v26 = vpack.c.bf16 %v6501_v25, %v6497_v1  ;;  %11029 = vmatprep.subr.bf16.mxu0 %v13785_v6  ;;  %v1893_v25 = vrot.slane %v1876_v8, %v13055_v58  ;;  %v6482_v8 = vld [vmem:[#allocation10 + $0x60] sm:$0xff] }
 0xa1e   : > { %6327 = vmatmul.mubr.f32.vlgmr.msra.gmra.mrb[16].mxu1 %v6017_v23 }
 0xa1f   : > { %6669 = vmatprep.mubr.f32.mxu1 %v14566_v19  ;;  %11063 = vmatpush1.bf16.msra.mxu1 %v13744_v2 }
 0xa20   : > { %11065 = vmatprep.subr.bf16.mxu1 %v13748_v41 }
 0xa23   : > { %11067 = vmatpush1.bf16.msra.mxu1 %v13750_v34 }
 0xa24   : > { %11069 = vmatprep.subr.bf16.mxu1 %v13754_v53 }
 0xa27   : > { %11071 = vmatpush1.bf16.msra.mxu1 %v13756_v42 }
 0xa28   : > { %11073 = vmatprep.subr.bf16.mxu1 %v13760_v26 }
 0xa2b   : > { %11075 = vmatpush1.bf16.msra.mxu1 %v13762_v43 }
 0xa2c   : > { %11077 = vmatprep.subr.bf16.mxu1 %v13766_v49 }
 0xa2f   : > { %11079 = vmatpush1.bf16.msra.mxu1 %v13768_v60 }
 0xa30   : > { %11081 = vmatprep.subr.bf16.mxu1 %v13772_v20 }
 0xa33   : > { %11083 = vmatpush1.bf16.msra.mxu1 %v13774_v29 }
 0xa34   : > { %11085 = vmatprep.subr.bf16.mxu1 %v13777_v59 }
 0xa37   : > { %11087 = vmatpush1.bf16.msra.mxu1 %v13780_v22 }
 0xa38   : > { %11089 = vmatprep.subr.bf16.mxu1 %v13783_v31 }
 0xa3b   : > { %11091 = vmatpush1.bf16.msra.mxu1 %v13788_v30 }
 0xa3c   : > { %11092 = vmatprep.subr.bf16.mxu1 %v14560_v57 }
 0xad1   : > { %v6107_v39 = vpop.f32.mrb[38].mxu1  ;;  %v6257_v23 = vpop.f32.mrb[16].mxu0 }
 0xad2   : > { %v13795_v50 = vadd.f32 %v13691_v37, %v6107_v39  ;;  %v9699_v44 = vpop.f32.mrb[39].mxu1  ;;  %v6259_v27 = vpop.f32.mrb[17].mxu0  ;;  %v11676_v28 = vadd.f32 %v6257_v23, %v1881_v47  ;;  %v13811_v23 = vpack.c.bf16 %v6483_v38, %v6479_v45  ;;  %v6518_v45 = vld [vmem:[#allocation10 + $0x180] sm:$0xff] }
 0xad3   : > { %v11677_v36 = vadd.f32 %v6259_v27, %v1885_v17  ;;  %v6487_v44 = vld [vmem:[#allocation10 + $0x88] sm:$0xff]  ;;  %v6522_v38 = vld [vmem:[#allocation10 + $0x1a0] sm:$0xff] }
 0xad4   : > { %14577 = vst [vmem:[#allocation23_spill] sm:$0xff] %v13795_v50  ;;  %6111 = vmax.xlane.f32.xlu1 %v13795_v50  ;;  %v9101_v62 = vmul.f32 -1.442695, %v11676_v28  ;;  %v6491_v27 = vld [vmem:[#allocation10 + $0xa8] sm:$0xff]  ;;  %v6490_v28 = vld [vmem:[#allocation10 + $0xa0] sm:$0xff] }
 0xad5   : > { %v9102_v5 = vmul.f32 -1.442695, %v11677_v36  ;;  %v13818_v47 = vpack.c.bf16 %v6491_v27, %v6487_v44  ;;  %v6486_v36 = vld [vmem:[#allocation10 + $0x80] sm:$0xff] }
 0xad6   : > { %v6526_v44 = vld [vmem:[#allocation10 + $0x1c0] sm:$0xff] }
 0xad7   : > { %12003 = vpow2.f32 %v9102_v5  ;;  %v6495_v5 = vld [vmem:[#allocation10 + $0xc8] sm:$0xff]  ;;  %v6530_v27 = vld [vmem:[#allocation10 + $0x1e0] sm:$0xff] }
 0xad8   : > { %12005 = vpow2.f32 %v9101_v62  ;;  %v6499_v62 = vld [vmem:[#allocation10 + $0xe8] sm:$0xff] }
 0xae1   : > { %v12004_v63 = vpop.eup %12003 }
 0xae2   : > { %v12006_v0 = vpop.eup %12005  ;;  %v6346_v12 = vadd.f32 1.0, %v12004_v63  ;;  %v13823_v63 = vpack.c.bf16 %v6490_v28, %v6486_v36  ;;  %v13853_v36 = vpack.c.bf16 %v6530_v27, %v6526_v44  ;;  %v6705_v28 = vld [vmem:[#allocation11 + $0x8] sm:$0xff]  ;;  %v6718_v27 = vld [vmem:[#allocation11 + $0x70] sm:$0xff] }
 0xae3   : > { %v6340_v1 = vadd.f32 1.0, %v12006_v0  ;;  %v13826_v0 = vpack.c.bf16 %v6499_v62, %v6495_v5  ;;  %v6706_v62 = vld [vmem:[#allocation11 + $0x10] sm:$0xff] }
 0xae4   : > { %12007 = vrcp.f32 %v6346_v12  ;;  %v6494_v12 = vld [vmem:[#allocation10 + $0xc0] sm:$0xff]  ;;  %14580 = vst [vmem:[#allocation30_spill] sm:$0xff] %v13853_v36 }
 0xae5   : > { %12009 = vrcp.f32 %v6340_v1  ;;  %v6503_v1 = vld [vmem:[#allocation10 + $0x108] sm:$0xff] }
 0xaee   : > { %v12008_v3 = vpop.eup %12007 }
 0xaef   : > { %v12010_v48 = vpop.eup %12009  ;;  %v6356_v21 = vmul.f32 %v12008_v3, %v13705_v16  ;;  %v6478_v16 = vld [vmem:[#allocation10 + $0x40] sm:$0xff]  ;;  %v6515_v3 = vld [vmem:[#allocation10 + $0x168] sm:$0xff] }
 0xaf0   : > { %v13814_v17 = vpack.c.bf16 %v6482_v8, %v6478_v16  ;;  %v13847_v16 = vpack.c.bf16 %v6522_v38, %v6518_v45  ;;  %v6715_v45 = vld [vmem:[#allocation11 + $0x58] sm:$0xff]  ;;  %v6716_v38 = vld [vmem:[#allocation11 + $0x60] sm:$0xff] }
 0xaf1   : > { %v6328_v33 = vpop.f32.mrb[16].mxu1 }
 0xaf2   : > { %v11678_v32 = vadd.f32 %v6328_v33, %v1889_v13  ;;  %v6330_v18 = vpop.f32.mrb[17].mxu1  ;;  %v6498_v13 = vld [vmem:[#allocation10 + $0xe0] sm:$0xff]  ;;  %14578 = vst [vmem:[#allocation26_spill] sm:$0xff] %v13847_v16 }
 0xaf3   : > { %v11679_v7 = vadd.f32 %v6330_v18, %v1893_v25  ;;  %v6507_v25 = vld [vmem:[#allocation10 + $0x128] sm:$0xff]  ;;  %v13829_v33 = vpack.c.bf16 %v6498_v13, %v6494_v12  ;;  %v6502_v18 = vld [vmem:[#allocation10 + $0x100] sm:$0xff]  ;;  %v6707_v12 = vld [vmem:[#allocation11 + $0x18] sm:$0xff] }
 0xaf4   : > { %12011 = vtanh.f32 %v11678_v32  ;;  %v13832_v32 = vpack.c.bf16 %v6507_v25, %v6503_v1  ;;  %v13879_v13 = vpack.c.bf16 %v6707_v12, %v6706_v62  ;;  %v6708_v1 = vld [vmem:[#allocation11 + $0x20] sm:$0xff]  ;;  %v6709_v25 = vld [vmem:[#allocation11 + $0x28] sm:$0xff] }
 0xaf5   : > { %v9103_v14 = vmul.f32 -1.442695, %v11679_v7  ;;  %v6506_v7 = vld [vmem:[#allocation10 + $0x120] sm:$0xff] }
 0xaf7   : > { %12013 = vpow2.f32 %v9103_v14  ;;  %v6511_v14 = vld [vmem:[#allocation10 + $0x148] sm:$0xff] }
 0xafe   : > { %v12012_v10 = vpop.eup %12011 }
 0xaff   : > { %v6357_v4 = vmul.f32 %v12012_v10, %v12010_v48  ;;  %v13835_v48 = vpack.c.bf16 %v6506_v7, %v6502_v18  ;;  %v13838_v10 = vpack.c.bf16 %v6515_v3, %v6511_v14  ;;  %v13883_v18 = vpack.c.bf16 %v6709_v25, %v6708_v1  ;;  %v6710_v7 = vld [vmem:[#allocation11 + $0x30] sm:$0xff]  ;;  %v6711_v14 = vld [vmem:[#allocation11 + $0x38] sm:$0xff] }
 0xb00   : > { %v13887_v3 = vpack.c.bf16 %v6711_v14, %v6710_v7  ;;  %v2066_v14 = vld [vmem:[%s14508_s3] sm:$0xf] }
 0xb01   : > { %v12014_v54 = vpop.eup %12013  ;;  %v13806_v35 = vadd.f32 %v6357_v4, %v6356_v21  ;;  %v6510_v21 = vld [vmem:[#allocation10 + $0x140] sm:$0xff] }
 0xb02   : > { %v6353_v55 = vadd.f32 1.0, %v12014_v54  ;;  %v6514_v4 = vld [vmem:[#allocation10 + $0x160] sm:$0xff]  ;;  %v6519_v54 = vld [vmem:[#allocation10 + $0x188] sm:$0xff] }
 0xb03   : > { %12015 = vtanh.f32 %v13806_v35  ;;  %v13841_v52 = vpack.c.bf16 %v6514_v4, %v6510_v21  ;;  %v6712_v21 = vld [vmem:[#allocation11 + $0x40] sm:$0xff]  ;;  %v6713_v4 = vld [vmem:[#allocation11 + $0x48] sm:$0xff] }
 0xb04   : > { %12017 = vrcp.f32 %v6353_v55  ;;  %v6523_v55 = vld [vmem:[#allocation10 + $0x1a8] sm:$0xff] }
 0xb05   : > { %v13844_v56 = vpack.c.bf16 %v6523_v55, %v6519_v54  ;;  %v13891_v54 = vpack.c.bf16 %v6713_v4, %v6712_v21  ;;  %v6714_v55 = vld [vmem:[#allocation11 + $0x50] sm:$0xff]  ;;  %v2071_v21 = vrot.slane %v2066_v14, %v13046_v40  ;;  %v2075_v4 = vrot.slane %v2066_v14, %v13051_v46 }
 0xb0d   : > { %v12016_v51 = vpop.eup %12015 }
 0xb0e   : > { %v12018_v11 = vpop.eup %12017 }
 0xb0f   : > { %v6360_v39 = vmul.f32 %v12018_v11, %v12016_v51  ;;  %v6527_v51 = vld [vmem:[#allocation10 + $0x1c8] sm:$0xff] }
 0xb10   : > { %v6531_v11 = vld [vmem:[#allocation10 + $0x1e8] sm:$0xff] }
 0xb11   : > { %9733 = vmatmul.mubr.f32.vlgmr.msra.gmra.mrb[40].mxu0 %v6360_v39  ;;  %6670 = vmatmul.mubr.f32.vlgmr.msra.gmra.mrb[18].mxu1 %v6360_v39  ;;  %v13850_v8 = vpack.c.bf16 %v6531_v11, %v6527_v51  ;;  %v13895_v51 = vpack.c.bf16 %v6715_v45, %v6714_v55  ;;  %v6717_v11 = vld [vmem:[#allocation11 + $0x68] sm:$0xff] }
 0xb12   : > { %11031 = vmatpush1.bf16.msra.mxu0 %v13809_v24  ;;  %6598 = vmatprep.mubr.f32.mxu0 %v14566_v19  ;;  %v13898_v44 = vpack.c.bf16 %v6717_v11, %v6716_v38 }
 0xb13   : > { %11033 = vmatprep.subr.bf16.mxu0 %v13811_v23  ;;  %9767 = vmatprep.mubr.msk.f32.mxu1 %vm12412_vm1, %v14566_v19  ;;  %14579 = vst [vmem:[#allocation29_spill] sm:$0xff] %v13850_v8 }
 0xb16   : > { %11035 = vmatpush1.bf16.msra.mxu0 %v13814_v17 }
 0xb17   : > { %11037 = vmatprep.subr.bf16.mxu0 %v13818_v47 }
 0xb1a   : > { %11039 = vmatpush1.bf16.msra.mxu0 %v13823_v63 }
 0xb1b   : > { %11041 = vmatprep.subr.bf16.mxu0 %v13826_v0 }
 0xb1e   : > { %11043 = vmatpush1.bf16.msra.mxu0 %v13829_v33 }
 0xb1f   : > { %11045 = vmatprep.subr.bf16.mxu0 %v13832_v32 }
 0xb22   : > { %11047 = vmatpush1.bf16.msra.mxu0 %v13835_v48 }
 0xb23   : > { %11049 = vmatprep.subr.bf16.mxu0 %v13838_v10 }
 0xb26   : > { %11051 = vmatpush1.bf16.msra.mxu0 %v13841_v52 }
 0xb27   : > { %11053 = vmatprep.subr.bf16.mxu0 %v13844_v56 }
 0xb2a   : > { %11055 = vmatpush1.bf16.msra.mxu0 %v13847_v16 }
 0xb2b   : > { %11057 = vmatprep.subr.bf16.mxu0 %v13850_v8 }
 0xb2e   : > { %11059 = vmatpush1.bf16.msra.mxu0 %v13853_v36 }
 0xb2f   : > { %11117 = vmatprep.subr.bf16.mxu0 %v13785_v6 }
 0xb31   : > { %6599 = vmatmul.mubr.f32.vlgmr.msra.gmra.mrb[18].mxu0 %v6360_v39  ;;  %v6704_v39 = vld [vmem:[#allocation11] sm:$0xff] }
 0xb32   : > { %11119 = vmatpush1.bf16.msra.mxu0 %v13809_v24  ;;  %6941 = vmatprep.mubr.f32.mxu0 %v14566_v19  ;;  %v13875_v5 = vpack.c.bf16 %v6705_v28, %v6704_v39  ;;  %v6719_v39 = vld [vmem:[#allocation11 + $0x78] sm:$0xff] }
 0xb33   : > { %11121 = vmatprep.subr.bf16.mxu0 %v13811_v23  ;;  %v13902_v28 = vpack.c.bf16 %v6719_v39, %v6718_v27 }
 0xb34   : > { %11094 = vmatpush3.bf16.msra.mxu1 %v13875_v5 }
 0xb35   : > { %11095 = vmatprep.subr.bf16.mxu1 %v14560_v57 }
 0xb36   : > { %11123 = vmatpush1.bf16.msra.mxu0 %v13814_v17 }
 0xb37   : > { %11125 = vmatprep.subr.bf16.mxu0 %v13818_v47 }
 0xb38   : > { %11097 = vmatpush3.bf16.msra.mxu1 %v13879_v13 }
 0xb39   : > { %11098 = vmatprep.subr.bf16.mxu1 %v14560_v57 }
 0xb3a   : > { %11127 = vmatpush1.bf16.msra.mxu0 %v13823_v63 }
 0xb3b   : > { %11129 = vmatprep.subr.bf16.mxu0 %v13826_v0 }
 0xb3c   : > { %11100 = vmatpush3.bf16.msra.mxu1 %v13883_v18 }
 0xb3d   : > { %11101 = vmatprep.subr.bf16.mxu1 %v14560_v57 }
 0xb3e   : > { %11131 = vmatpush1.bf16.msra.mxu0 %v13829_v33 }
 0xb3f   : > { %11133 = vmatprep.subr.bf16.mxu0 %v13832_v32 }
 0xb40   : > { %11103 = vmatpush3.bf16.msra.mxu1 %v13887_v3 }
 0xb41   : > { %11104 = vmatprep.subr.bf16.mxu1 %v14560_v57 }
 0xb42   : > { %11135 = vmatpush1.bf16.msra.mxu0 %v13835_v48 }
 0xb43   : > { %11137 = vmatprep.subr.bf16.mxu0 %v13838_v10 }
 0xb44   : > { %11106 = vmatpush3.bf16.msra.mxu1 %v13891_v54 }
 0xb45   : > { %11107 = vmatprep.subr.bf16.mxu1 %v14560_v57 }
 0xb46   : > { %11139 = vmatpush1.bf16.msra.mxu0 %v13841_v52 }
 0xb47   : > { %11141 = vmatprep.subr.bf16.mxu0 %v13844_v56 }
 0xb48   : > { %11109 = vmatpush3.bf16.msra.mxu1 %v13895_v51 }
 0xb49   : > { %11110 = vmatprep.subr.bf16.mxu1 %v14560_v57 }
 0xb4a   : > { %11143 = vmatpush1.bf16.msra.mxu0 %v13847_v16 }
 0xb4b   : > { %11145 = vmatprep.subr.bf16.mxu0 %v13850_v8 }
 0xb4c   : > { %11112 = vmatpush3.bf16.msra.mxu1 %v13898_v44 }
 0xb4d   : > { %11113 = vmatprep.subr.bf16.mxu1 %v14560_v57 }
 0xb4e   : > { %11147 = vmatpush1.bf16.msra.mxu0 %v13853_v36 }
 0xb4f   : > { %11180 = vmatprep.subr.bf16.mxu0 %v14560_v57 }
 0xb50   : > { %11115 = vmatpush3.bf16.msra.mxu1 %v13902_v28 }
 0xb51   : > { %11149 = vmatprep.subr.bf16.mxu1 %v13742_v61 }
 0xbe4   : > { %v6450_v62 = vpop.f32.mrb[40].mxu0  ;;  %v6671_v12 = vpop.f32.mrb[18].mxu1 }
 0xbe5   : > { %v13908_v1 = vadd.f32 %v13691_v37, %v6450_v62  ;;  %v9734_v25 = vpop.f32.mrb[41].mxu0  ;;  %v6673_v7 = vpop.f32.mrb[19].mxu1  ;;  %v2083_v37 = vrot.slane %v2066_v14, %v13055_v58 }
 0xbe6   : > { %v2079_v25 = vrot.slane %v2066_v14, %v13058_v15 }
 0xbe7   : > { %14581 = vst [vmem:[#allocation31_spill] sm:$0xff] %v13908_v1  ;;  %6454 = vmax.xlane.f32.xlu0 %v13908_v1  ;;  %v11683_v62 = vadd.f32 %v6673_v7, %v2083_v37 }
 0xbe8   : > { %v11682_v1 = vadd.f32 %v6671_v12, %v2079_v25 }
 0xbe9   : > { %v9108_v50 = vmul.f32 -1.442695, %v11683_v62 }
 0xc04   : > { %v6600_v55 = vpop.f32.mrb[18].mxu0 }
 0xc05   : > { %v11680_v45 = vadd.f32 %v6600_v55, %v2071_v21  ;;  %v6602_v38 = vpop.f32.mrb[19].mxu0 }
 0xc06   : > { %v11681_v11 = vadd.f32 %v6602_v38, %v2075_v4 }
 0xc07   : > { %v9106_v27 = vmul.f32 -1.442695, %v11680_v45 }
 0xc08   : > { %v9107_v39 = vmul.f32 -1.442695, %v11681_v11 }
 0xc09   : > { %12019 = vpow2.f32 %v9106_v27 }
 0xc0a   : > { %12021 = vpow2.f32 %v9107_v39 }
 0xc0b   : > { %12023 = vpow2.f32 %v9108_v50 }
 0xc0c   : > { %12025 = vtanh.f32 %v11682_v1 }
 0xc13   : > { %v12020_v9 = vpop.eup %12019 }
 0xc14   : > { %v12022_v36 = vpop.eup %12021  ;;  %v6683_v8 = vadd.f32 1.0, %v12020_v9 }
 0xc15   : > { %v6689_v16 = vadd.f32 1.0, %v12022_v36  ;;  %v12024_v21 = vpop.eup %12023 }
 0xc16   : > { %12027 = vrcp.f32 %v6683_v8  ;;  %v12026_v4 = vpop.eup %12025  ;;  %v6696_v38 = vadd.f32 1.0, %v12024_v21 }
 0xc17   : > { %12029 = vrcp.f32 %v6689_v16 }
 0xc18   : > { %12031 = vrcp.f32 %v6696_v38 }
 0xc20   : > { %v12028_v55 = vpop.eup %12027 }
 0xc21   : > { %v12030_v45 = vpop.eup %12029  ;;  %v6700_v11 = vmul.f32 %v12028_v55, %v12026_v4 }
 0xc22   : > { %v6699_v7 = vmul.f32 %v12030_v45, %v13806_v35  ;;  %v12032_v12 = vpop.eup %12031 }
 0xc24   : > { %v13919_v27 = vadd.f32 %v6700_v11, %v6699_v7 }
 0xc26   : > { %12033 = vtanh.f32 %v13919_v27 }
 0xc30   : > { %v12034_v50 = vpop.eup %12033 }
 0xc31   : > { %v6703_v9 = vmul.f32 %v12034_v50, %v12032_v12  ;;  %v7524_v50 = vld [vmem:[#allocation10 + $0xc8] sm:$0xff] }
 0xc33   : > { %9768 = vmatmul.mubr.f32.vlgmr.msra.gmra.mrb[40].mxu1 %v6703_v9  ;;  %6942 = vmatmul.mubr.f32.vlgmr.msra.gmra.mrb[20].mxu0 %v6703_v9 }
 0xc34   : > { %11151 = vmatpush1.bf16.msra.mxu1 %v13744_v2  ;;  %7012 = vmatprep.mubr.f32.mxu1 %v14566_v19 }
 0xc35   : > { %11153 = vmatprep.subr.bf16.mxu1 %v13748_v41  ;;  %11182 = vmatpush3.bf16.msra.mxu0 %v13875_v5 }
 0xc36   : > { %11183 = vmatprep.subr.bf16.mxu0 %v14560_v57  ;;  %9802 = vmatprep.mubr.msk.f32.mxu0 %vm12412_vm1, %v14566_v19 }
 0xc38   : > { %11155 = vmatpush1.bf16.msra.mxu1 %v13750_v34 }
 0xc39   : > { %11157 = vmatprep.subr.bf16.mxu1 %v13754_v53  ;;  %11185 = vmatpush3.bf16.msra.mxu0 %v13879_v13 }
 0xc3a   : > { %11186 = vmatprep.subr.bf16.mxu0 %v14560_v57 }
 0xc3c   : > { %11159 = vmatpush1.bf16.msra.mxu1 %v13756_v42 }
 0xc3d   : > { %11161 = vmatprep.subr.bf16.mxu1 %v13760_v26  ;;  %11188 = vmatpush3.bf16.msra.mxu0 %v13883_v18 }
 0xc3e   : > { %11189 = vmatprep.subr.bf16.mxu0 %v14560_v57 }
 0xc40   : > { %11163 = vmatpush1.bf16.msra.mxu1 %v13762_v43 }
 0xc41   : > { %11165 = vmatprep.subr.bf16.mxu1 %v13766_v49  ;;  %11191 = vmatpush3.bf16.msra.mxu0 %v13887_v3 }
 0xc42   : > { %11192 = vmatprep.subr.bf16.mxu0 %v14560_v57 }
 0xc44   : > { %11167 = vmatpush1.bf16.msra.mxu1 %v13768_v60 }
 0xc45   : > { %11169 = vmatprep.subr.bf16.mxu1 %v13772_v20  ;;  %11194 = vmatpush3.bf16.msra.mxu0 %v13891_v54 }
 0xc46   : > { %11195 = vmatprep.subr.bf16.mxu0 %v14560_v57 }
 0xc48   : > { %11171 = vmatpush1.bf16.msra.mxu1 %v13774_v29 }
 0xc49   : > { %11173 = vmatprep.subr.bf16.mxu1 %v13777_v59  ;;  %11197 = vmatpush3.bf16.msra.mxu0 %v13895_v51 }
 0xc4a   : > { %11198 = vmatprep.subr.bf16.mxu0 %v14560_v57 }
 0xc4c   : > { %11175 = vmatpush1.bf16.msra.mxu1 %v13780_v22 }
 0xc4d   : > { %11177 = vmatprep.subr.bf16.mxu1 %v13783_v31  ;;  %11200 = vmatpush3.bf16.msra.mxu0 %v13898_v44 }
 0xc4e   : > { %11201 = vmatprep.subr.bf16.mxu0 %v14560_v57 }
 0xc50   : > { %11179 = vmatpush1.bf16.msra.mxu1 %v13788_v30 }
 0xc51   : > { %11237 = vmatprep.subr.bf16.mxu1 %v13742_v61  ;;  %11203 = vmatpush3.bf16.msra.mxu0 %v13902_v28  ;;  %v13977_v61 = vld [vmem:[%s14510_s5] ss:$0 sm:$0xff] }
 0xc52   : > { %11205 = vmatprep.subr.bf16.mxu0 %v13785_v6 }
 0xc53   : > { %7013 = vmatmul.mubr.f32.vlgmr.msra.gmra.mrb[20].mxu1 %v6703_v9  ;;  %v7528_v9 = vld [vmem:[#allocation10 + $0xe8] sm:$0xff] }
 0xc54   : > { %11239 = vmatpush1.bf16.msra.mxu1 %v13744_v2  ;;  %7355 = vmatprep.mubr.f32.mxu1 %v14566_v19 }
 0xc55   : > { %11241 = vmatprep.subr.bf16.mxu1 %v13748_v41 }
 0xc58   : > { %11243 = vmatpush1.bf16.msra.mxu1 %v13750_v34 }
 0xc59   : > { %11245 = vmatprep.subr.bf16.mxu1 %v13754_v53  ;;  %v2256_v53 = vld [vmem:[%s14508_s3] sm:$0xf] }
 0xc5a   : > { %v2273_v16 = vrot.slane %v2256_v53, %v13055_v58 }
 0xc5c   : > { %11247 = vmatpush1.bf16.msra.mxu1 %v13756_v42 }
 0xc5d   : > { %11249 = vmatprep.subr.bf16.mxu1 %v13760_v26 }
 0xc60   : > { %11251 = vmatpush1.bf16.msra.mxu1 %v13762_v43  ;;  %v2265_v43 = vrot.slane %v2256_v53, %v13051_v46 }
 0xc61   : > { %11253 = vmatprep.subr.bf16.mxu1 %v13766_v49  ;;  %v2261_v49 = vrot.slane %v2256_v53, %v13046_v40 }
 0xc64   : > { %11255 = vmatpush1.bf16.msra.mxu1 %v13768_v60 }
 0xc65   : > { %11257 = vmatprep.subr.bf16.mxu1 %v13772_v20 }
 0xc68   : > { %11259 = vmatpush1.bf16.msra.mxu1 %v13774_v29 }
 0xc69   : > { %11261 = vmatprep.subr.bf16.mxu1 %v13777_v59 }
 0xc6c   : > { %11263 = vmatpush1.bf16.msra.mxu1 %v13780_v22 }
 0xc6d   : > { %11265 = vmatprep.subr.bf16.mxu1 %v13783_v31 }
 0xc70   : > { %11267 = vmatpush1.bf16.msra.mxu1 %v13788_v30  ;;  %v2269_v30 = vrot.slane %v2256_v53, %v13058_v15  ;;  %v7527_v53 = vld [vmem:[#allocation10 + $0xe0] sm:$0xff] }
 0xc71   : > { %11268 = vmatprep.subr.bf16.mxu1 %v14560_v57 }
 0xd06   : > { %v6793_v2 = vpop.f32.mrb[40].mxu1  ;;  %v6943_v41 = vpop.f32.mrb[20].mxu0 }
 0xd07   : > { %v13980_v34 = vadd.f32 %v13977_v61, %v6793_v2  ;;  %v9769_v42 = vpop.f32.mrb[41].mxu1  ;;  %v6945_v26 = vpop.f32.mrb[21].mxu0  ;;  %v11684_v20 = vadd.f32 %v6943_v41, %v2261_v49  ;;  %v14046_v2 = vpack.c.bf16 %v7528_v9, %v7524_v50  ;;  %v7523_v41 = vld [vmem:[#allocation10 + $0xc0] sm:$0xff] }
 0xd08   : > { %v11685_v60 = vadd.f32 %v6945_v26, %v2265_v43  ;;  %v14048_v42 = vpack.c.bf16 %v7527_v53, %v7523_v41  ;;  %v7532_v26 = vld [vmem:[#allocation10 + $0x108] sm:$0xff] }
 0xd09   : > { %14582 = vst [vmem:[#allocation32_spill] sm:$0xff] %v13980_v34  ;;  %6797 = vmax.xlane.f32.xlu1 %v13980_v34  ;;  %v9111_v59 = vmul.f32 -1.442695, %v11684_v20  ;;  %v7536_v43 = vld [vmem:[#allocation10 + $0x128] sm:$0xff]  ;;  %v7535_v20 = vld [vmem:[#allocation10 + $0x120] sm:$0xff] }
 0xd0a   : > { %v9112_v29 = vmul.f32 -1.442695, %v11685_v60  ;;  %v14052_v49 = vpack.c.bf16 %v7536_v43, %v7532_v26  ;;  %v7531_v60 = vld [vmem:[#allocation10 + $0x100] sm:$0xff] }
 0xd0c   : > { %12035 = vpow2.f32 %v9112_v29  ;;  %v14054_v29 = vpack.c.bf16 %v7535_v20, %v7531_v60 }
 0xd0d   : > { %12037 = vpow2.f32 %v9111_v59  ;;  %v7540_v59 = vld [vmem:[#allocation10 + $0x148] sm:$0xff] }
 0xd16   : > { %v12036_v22 = vpop.eup %12035 }
 0xd17   : > { %v12038_v31 = vpop.eup %12037  ;;  %v7032_v6 = vadd.f32 1.0, %v12036_v22  ;;  %v7544_v22 = vld [vmem:[#allocation10 + $0x168] sm:$0xff] }
 0xd18   : > { %v7026_v35 = vadd.f32 1.0, %v12038_v31  ;;  %v7539_v31 = vld [vmem:[#allocation10 + $0x140] sm:$0xff] }
 0xd19   : > { %12039 = vrcp.f32 %v7032_v6  ;;  %v14058_v6 = vpack.c.bf16 %v7544_v22, %v7540_v59 }
 0xd1a   : > { %12041 = vrcp.f32 %v7026_v35  ;;  %v7548_v35 = vld [vmem:[#allocation10 + $0x188] sm:$0xff] }
 0xd23   : > { %v12040_v39 = vpop.eup %12039 }
 0xd24   : > { %v12042_v62 = vpop.eup %12041  ;;  %v7042_v21 = vmul.f32 %v12040_v39, %v13919_v27  ;;  %v7560_v39 = vld [vmem:[#allocation10 + $0x1e8] sm:$0xff] }
 0xd26   : > { %v7014_v8 = vpop.f32.mrb[20].mxu1 }
 0xd27   : > { %v11686_v36 = vadd.f32 %v7014_v8, %v2269_v30  ;;  %v7016_v1 = vpop.f32.mrb[21].mxu1  ;;  %v7543_v30 = vld [vmem:[#allocation10 + $0x160] sm:$0xff] }
 0xd28   : > { %v11687_v14 = vadd.f32 %v7016_v1, %v2273_v16  ;;  %v7552_v16 = vld [vmem:[#allocation10 + $0x1a8] sm:$0xff]  ;;  %v14060_v8 = vpack.c.bf16 %v7543_v30, %v7539_v31  ;;  %v7547_v1 = vld [vmem:[#allocation10 + $0x180] sm:$0xff] }
 0xd29   : > { %12043 = vtanh.f32 %v11686_v36  ;;  %v14062_v36 = vpack.c.bf16 %v7552_v16, %v7548_v35 }
 0xd2a   : > { %v9113_v37 = vmul.f32 -1.442695, %v11687_v14  ;;  %v7551_v14 = vld [vmem:[#allocation10 + $0x1a0] sm:$0xff] }
 0xd2c   : > { %12045 = vpow2.f32 %v9113_v37  ;;  %v7556_v37 = vld [vmem:[#allocation10 + $0x1c8] sm:$0xff] }
 0xd33   : > { %v12044_v25 = vpop.eup %12043 }
 0xd34   : > { %v7043_v4 = vmul.f32 %v12044_v25, %v12042_v62  ;;  %v14066_v62 = vpack.c.bf16 %v7551_v14, %v7547_v1  ;;  %v7502_v25 = vld [vmem:[#allocation10 + $0x18] sm:$0xff]  ;;  %v7501_v14 = vld [vmem:[#allocation10 + $0x10] sm:$0xff] }
 0xd36   : > { %v12046_v55 = vpop.eup %12045  ;;  %v13991_v45 = vadd.f32 %v7043_v4, %v7042_v21  ;;  %v7506_v21 = vld [vmem:[#allocation10 + $0x38] sm:$0xff]  ;;  %v14069_v4 = vpack.c.bf16 %v7560_v39, %v7556_v37  ;;  %v7505_v37 = vld [vmem:[#allocation10 + $0x30] sm:$0xff] }
 0xd37   : > { %v7039_v38 = vadd.f32 1.0, %v12046_v55  ;;  %v7555_v55 = vld [vmem:[#allocation10 + $0x1c0] sm:$0xff]  ;;  %v7510_v39 = vld [vmem:[#allocation10 + $0x58] sm:$0xff] }
 0xd38   : > { %12047 = vtanh.f32 %v13991_v45 }
 0xd39   : > { %12049 = vrcp.f32 %v7039_v38  ;;  %v7559_v38 = vld [vmem:[#allocation10 + $0x1e0] sm:$0xff] }
 0xd42   : > { %v12048_v11 = vpop.eup %12047 }
 0xd43   : > { %v12050_v7 = vpop.eup %12049 }
 0xd44   : > { %v7046_v12 = vmul.f32 %v12050_v7, %v12048_v11  ;;  %v14071_v11 = vpack.c.bf16 %v7506_v21, %v7502_v25  ;;  %v14075_v7 = vpack.c.bf16 %v7559_v38, %v7555_v55  ;;  %v7514_v25 = vld [vmem:[#allocation10 + $0x78] sm:$0xff]  ;;  %v14095_v38 = vpack.c.bf16 %v7505_v37, %v7501_v14 }
 0xd46   : > { %9803 = vmatmul.mubr.f32.vlgmr.msra.gmra.mrb[42].mxu0 %v7046_v12  ;;  %7356 = vmatmul.mubr.f32.vlgmr.msra.gmra.mrb[22].mxu1 %v7046_v12 }
 0xd47   : > { %11207 = vmatpush1.bf16.msra.mxu0 %v13809_v24  ;;  %7284 = vmatprep.mubr.f32.mxu0 %v14566_v19  ;;  %v14583_v24 = vld [vmem:[#allocation26_spill] sm:$0xff] }
 0xd48   : > { %11209 = vmatprep.subr.bf16.mxu0 %v13811_v23  ;;  %11270 = vmatpush3.bf16.msra.mxu1 %v13875_v5  ;;  %v14584_v23 = vld [vmem:[#allocation29_spill] sm:$0xff]  ;;  %v7507_v5 = vld [vmem:[#allocation10 + $0x40] sm:$0xff] }
 0xd49   : > { %11271 = vmatprep.subr.bf16.mxu1 %v14560_v57  ;;  %9837 = vmatprep.mubr.msk.f32.mxu1 %vm12412_vm1, %v14566_v19 }
 0xd4b   : > { %11211 = vmatpush1.bf16.msra.mxu0 %v13814_v17  ;;  %v14585_v17 = vld [vmem:[#allocation30_spill] sm:$0xff] }
 0xd4c   : > { %11213 = vmatprep.subr.bf16.mxu0 %v13818_v47  ;;  %11273 = vmatpush3.bf16.msra.mxu1 %v13879_v13  ;;  %v7500_v47 = vld [vmem:[#allocation10 + $0x8] sm:$0xff]  ;;  %v7511_v13 = vld [vmem:[#allocation10 + $0x60] sm:$0xff] }
 0xd4d   : > { %11274 = vmatprep.subr.bf16.mxu1 %v14560_v57 }
 0xd4f   : > { %11215 = vmatpush1.bf16.msra.mxu0 %v13823_v63  ;;  %v7504_v63 = vld [vmem:[#allocation10 + $0x28] sm:$0xff] }
 0xd50   : > { %11217 = vmatprep.subr.bf16.mxu0 %v13826_v0  ;;  %11276 = vmatpush3.bf16.msra.mxu1 %v13883_v18  ;;  %v14028_v0 = vpack.c.bf16 %v7504_v63, %v7500_v47  ;;  %v14036_v18 = vpack.c.bf16 %v7511_v13, %v7507_v5  ;;  %v2446_v63 = vld [vmem:[%s14508_s3] sm:$0xf] }
 0xd51   : > { %11277 = vmatprep.subr.bf16.mxu1 %v14560_v57  ;;  %v2459_v50 = vrot.slane %v2446_v63, %v13058_v15 }
 0xd53   : > { %11219 = vmatpush1.bf16.msra.mxu0 %v13829_v33  ;;  %v7499_v33 = vld [vmem:[#allocation10] sm:$0xff] }
 0xd54   : > { %11221 = vmatprep.subr.bf16.mxu0 %v13832_v32  ;;  %11279 = vmatpush3.bf16.msra.mxu1 %v13887_v3  ;;  %v7503_v32 = vld [vmem:[#allocation10 + $0x20] sm:$0xff]  ;;  %v7516_v3 = vld [vmem:[#allocation10 + $0x88] sm:$0xff] }
 0xd55   : > { %11280 = vmatprep.subr.bf16.mxu1 %v14560_v57 }
 0xd57   : > { %11223 = vmatpush1.bf16.msra.mxu0 %v13835_v48  ;;  %v14030_v48 = vpack.c.bf16 %v7503_v32, %v7499_v33  ;;  %v2451_v33 = vrot.slane %v2446_v63, %v13046_v40  ;;  %v2455_v32 = vrot.slane %v2446_v63, %v13051_v46 }
 0xd58   : > { %11225 = vmatprep.subr.bf16.mxu0 %v13838_v10  ;;  %11282 = vmatpush3.bf16.msra.mxu1 %v13891_v54  ;;  %v7508_v10 = vld [vmem:[#allocation10 + $0x48] sm:$0xff] }
 0xd59   : > { %11283 = vmatprep.subr.bf16.mxu1 %v14560_v57  ;;  %v7520_v54 = vld [vmem:[#allocation10 + $0xa8] sm:$0xff] }
 0xd5b   : > { %11227 = vmatpush1.bf16.msra.mxu0 %v13841_v52  ;;  %v7512_v52 = vld [vmem:[#allocation10 + $0x68] sm:$0xff] }
 0xd5c   : > { %11229 = vmatprep.subr.bf16.mxu0 %v13844_v56  ;;  %11285 = vmatpush3.bf16.msra.mxu1 %v13895_v51  ;;  %v14034_v56 = vpack.c.bf16 %v7512_v52, %v7508_v10  ;;  %v14040_v51 = vpack.c.bf16 %v7520_v54, %v7516_v3  ;;  %v2463_v54 = vrot.slane %v2446_v63, %v13055_v58  ;;  %v7518_v63 = vld [vmem:[#allocation10 + $0x98] sm:$0xff] }
 0xd5d   : > { %11286 = vmatprep.subr.bf16.mxu1 %v14560_v57 }
 0xd5f   : > { %11231 = vmatpush1.bf16.msra.mxu0 %v14583_v24 }
 0xd60   : > { %11233 = vmatprep.subr.bf16.mxu0 %v14584_v23  ;;  %11288 = vmatpush3.bf16.msra.mxu1 %v13898_v44  ;;  %v7515_v44 = vld [vmem:[#allocation10 + $0x80] sm:$0xff] }
 0xd61   : > { %11289 = vmatprep.subr.bf16.mxu1 %v14560_v57 }
 0xd63   : > { %11235 = vmatpush1.bf16.msra.mxu0 %v14585_v17 }
 0xd64   : > { %11291 = vmatpush3.bf16.msra.mxu1 %v13902_v28  ;;  %11293 = vmatprep.subr.bf16.mxu0 %v14028_v0  ;;  %v7519_v28 = vld [vmem:[#allocation10 + $0xa0] sm:$0xff] }
 0xd65   : > { %v14042_v27 = vpack.c.bf16 %v7519_v28, %v7515_v44  ;;  %11325 = vmatprep.subr.bf16.mxu1 %v14071_v11 }
 0xd66   : > { %7285 = vmatmul.mubr.f32.vlgmr.msra.gmra.mrb[22].mxu0 %v7046_v12 }
 0xd67   : > { %7627 = vmatprep.mubr.f32.mxu0 %v14566_v19  ;;  %11295 = vmatpush1.bf16.msra.mxu0 %v14030_v48 }
 0xd68   : > { %11297 = vmatprep.subr.bf16.mxu0 %v14034_v56 }
 0xd6b   : > { %11299 = vmatpush1.bf16.msra.mxu0 %v14036_v18 }
 0xd6c   : > { %11301 = vmatprep.subr.bf16.mxu0 %v14040_v51 }
 0xd6f   : > { %11303 = vmatpush1.bf16.msra.mxu0 %v14042_v27 }
 0xd70   : > { %11305 = vmatprep.subr.bf16.mxu0 %v14046_v2 }
 0xd73   : > { %11307 = vmatpush1.bf16.msra.mxu0 %v14048_v42 }
 0xd74   : > { %11309 = vmatprep.subr.bf16.mxu0 %v14052_v49 }
 0xd77   : > { %11311 = vmatpush1.bf16.msra.mxu0 %v14054_v29 }
 0xd78   : > { %11313 = vmatprep.subr.bf16.mxu0 %v14058_v6 }
 0xd7b   : > { %11315 = vmatpush1.bf16.msra.mxu0 %v14060_v8 }
 0xd7c   : > { %11317 = vmatprep.subr.bf16.mxu0 %v14062_v36 }
 0xd7f   : > { %11319 = vmatpush1.bf16.msra.mxu0 %v14066_v62 }
 0xd80   : > { %11321 = vmatprep.subr.bf16.mxu0 %v14069_v4 }
 0xd83   : > { %11323 = vmatpush1.bf16.msra.mxu0 %v14075_v7 }
 0xd84   : > { %11356 = vmatprep.subr.bf16.mxu0 %v14560_v57 }
 0xe19   : > { %v7136_v12 = vpop.f32.mrb[42].mxu0  ;;  %v7357_v24 = vpop.f32.mrb[22].mxu1 }
 0xe1a   : > { %v14081_v23 = vadd.f32 %v13977_v61, %v7136_v12  ;;  %v9804_v17 = vpop.f32.mrb[43].mxu0  ;;  %v7359_v47 = vpop.f32.mrb[23].mxu1  ;;  %v11690_v41 = vadd.f32 %v7357_v24, %v2459_v50  ;;  %v14097_v24 = vpack.c.bf16 %v7514_v25, %v7510_v39  ;;  %v7534_v50 = vld [vmem:[#allocation10 + $0x118] sm:$0xff]  ;;  %v7549_v39 = vld [vmem:[#allocation10 + $0x190] sm:$0xff] }
 0xe1b   : > { %v11691_v28 = vadd.f32 %v7359_v47, %v2463_v54  ;;  %v7509_v17 = vld [vmem:[#allocation10 + $0x50] sm:$0xff] }
 0xe1c   : > { %14586 = vst [vmem:[#allocation26_spill] sm:$0xff] %v14081_v23  ;;  %7140 = vmax.xlane.f32.xlu0 %v14081_v23  ;;  %v7513_v47 = vld [vmem:[#allocation10 + $0x70] sm:$0xff] }
 0xe1d   : > { %v9118_v9 = vmul.f32 -1.442695, %v11691_v28  ;;  %v7529_v28 = vld [vmem:[#allocation10 + $0xf0] sm:$0xff] }
 0xe1e   : > { %v7553_v25 = vld [vmem:[#allocation10 + $0x1b0] sm:$0xff] }
 0xe39   : > { %v7286_v10 = vpop.f32.mrb[22].mxu0 }
 0xe3a   : > { %v11688_v52 = vadd.f32 %v7286_v10, %v2451_v33  ;;  %v7288_v5 = vpop.f32.mrb[23].mxu0  ;;  %v14100_v33 = vpack.c.bf16 %v7513_v47, %v7509_v17  ;;  %v7517_v10 = vld [vmem:[#allocation10 + $0x90] sm:$0xff]  ;;  %v14133_v17 = vpack.c.bf16 %v7553_v25, %v7549_v39  ;;  %v7744_v39 = vld [vmem:[#allocation11 + $0x58] sm:$0xff] }
 0xe3b   : > { %v11689_v13 = vadd.f32 %v7288_v5, %v2455_v32  ;;  %v7526_v5 = vld [vmem:[#allocation10 + $0xd8] sm:$0xff] }
 0xe3c   : > { %v9116_v3 = vmul.f32 -1.442695, %v11688_v52  ;;  %v7521_v52 = vld [vmem:[#allocation10 + $0xb0] sm:$0xff] }
 0xe3d   : > { %v9117_v44 = vmul.f32 -1.442695, %v11689_v13  ;;  %v7530_v13 = vld [vmem:[#allocation10 + $0xf8] sm:$0xff] }
 0xe3e   : > { %12051 = vpow2.f32 %v9116_v3  ;;  %v14109_v3 = vpack.c.bf16 %v7521_v52, %v7517_v10  ;;  %v14112_v54 = vpack.c.bf16 %v7530_v13, %v7526_v5  ;;  %v7734_v52 = vld [vmem:[#allocation11 + $0x8] sm:$0xff]  ;;  %v7735_v13 = vld [vmem:[#allocation11 + $0x10] sm:$0xff] }
 0xe3f   : > { %12053 = vpow2.f32 %v9117_v44  ;;  %v7525_v44 = vld [vmem:[#allocation10 + $0xd0] sm:$0xff] }
 0xe40   : > { %12055 = vpow2.f32 %v9118_v9  ;;  %v7538_v9 = vld [vmem:[#allocation10 + $0x138] sm:$0xff] }
 0xe41   : > { %12057 = vtanh.f32 %v11690_v41  ;;  %v14115_v41 = vpack.c.bf16 %v7529_v28, %v7525_v44  ;;  %v7736_v44 = vld [vmem:[#allocation11 + $0x18] sm:$0xff] }
 0xe42   : > { %v14165_v28 = vpack.c.bf16 %v7736_v44, %v7735_v13 }
 0xe48   : > { %v12052_v53 = vpop.eup %12051 }
 0xe49   : > { %v12054_v26 = vpop.eup %12053  ;;  %v7369_v43 = vadd.f32 1.0, %v12052_v53  ;;  %v14118_v53 = vpack.c.bf16 %v7538_v9, %v7534_v50  ;;  %v7737_v50 = vld [vmem:[#allocation11 + $0x20] sm:$0xff]  ;;  %v7738_v9 = vld [vmem:[#allocation11 + $0x28] sm:$0xff] }
 0xe4a   : > { %v7375_v60 = vadd.f32 1.0, %v12054_v26  ;;  %v12056_v20 = vpop.eup %12055  ;;  %v7533_v26 = vld [vmem:[#allocation10 + $0x110] sm:$0xff] }
 0xe4b   : > { %12059 = vrcp.f32 %v7369_v43  ;;  %v12058_v59 = vpop.eup %12057  ;;  %v7382_v30 = vadd.f32 1.0, %v12056_v20  ;;  %v7537_v43 = vld [vmem:[#allocation10 + $0x130] sm:$0xff]  ;;  %v7546_v20 = vld [vmem:[#allocation10 + $0x178] sm:$0xff] }
 0xe4c   : > { %12061 = vrcp.f32 %v7375_v60  ;;  %v7542_v60 = vld [vmem:[#allocation10 + $0x158] sm:$0xff] }
 0xe4d   : > { %12063 = vrcp.f32 %v7382_v30  ;;  %v7545_v30 = vld [vmem:[#allocation10 + $0x170] sm:$0xff] }
 0xe55   : > { %v12060_v22 = vpop.eup %12059 }
 0xe56   : > { %v12062_v31 = vpop.eup %12061  ;;  %v7386_v35 = vmul.f32 %v12060_v22, %v12058_v59  ;;  %v14121_v59 = vpack.c.bf16 %v7537_v43, %v7533_v26  ;;  %v14124_v22 = vpack.c.bf16 %v7546_v20, %v7542_v60  ;;  %v14169_v26 = vpack.c.bf16 %v7738_v9, %v7737_v50  ;;  %v7739_v43 = vld [vmem:[#allocation11 + $0x30] sm:$0xff]  ;;  %v7740_v60 = vld [vmem:[#allocation11 + $0x38] sm:$0xff] }
 0xe57   : > { %v7385_v16 = vmul.f32 %v12062_v31, %v13991_v45  ;;  %v12064_v21 = vpop.eup %12063  ;;  %v7522_v45 = vld [vmem:[#allocation10 + $0xb8] sm:$0xff]  ;;  %v7541_v31 = vld [vmem:[#allocation10 + $0x150] sm:$0xff]  ;;  %v14173_v20 = vpack.c.bf16 %v7740_v60, %v7739_v43 }
 0xe58   : > { %v14104_v32 = vpack.c.bf16 %v7522_v45, %v7518_v63  ;;  %v14127_v14 = vpack.c.bf16 %v7545_v30, %v7541_v31  ;;  %v7557_v63 = vld [vmem:[#allocation10 + $0x1d0] sm:$0xff]  ;;  %v7741_v31 = vld [vmem:[#allocation11 + $0x40] sm:$0xff]  ;;  %v7742_v30 = vld [vmem:[#allocation11 + $0x48] sm:$0xff] }
 0xe59   : > { %v14092_v1 = vadd.f32 %v7386_v35, %v7385_v16  ;;  %v7550_v35 = vld [vmem:[#allocation10 + $0x198] sm:$0xff]  ;;  %v7561_v45 = vld [vmem:[#allocation10 + $0x1f0] sm:$0xff] }
 0xe5a   : > { %v7554_v16 = vld [vmem:[#allocation10 + $0x1b8] sm:$0xff]  ;;  %v14139_v10 = vpack.c.bf16 %v7561_v45, %v7557_v63  ;;  %v7747_v45 = vld [vmem:[#allocation11 + $0x70] sm:$0xff] }
 0xe5b   : > { %12065 = vtanh.f32 %v14092_v1  ;;  %v14130_v37 = vpack.c.bf16 %v7554_v16, %v7550_v35  ;;  %v14177_v35 = vpack.c.bf16 %v7742_v30, %v7741_v31  ;;  %v7743_v16 = vld [vmem:[#allocation11 + $0x50] sm:$0xff] }
 0xe5c   : > { %14588 = vst [vmem:[#allocation30_spill] sm:$0xff] %v14139_v10  ;;  %v14181_v25 = vpack.c.bf16 %v7744_v39, %v7743_v16  ;;  %v2636_v9 = vld [vmem:[%s14508_s3] sm:$0xf] }
 0xe5d   : > { %v2645_v31 = vrot.slane %v2636_v9, %v13051_v46  ;;  %v2641_v30 = vrot.slane %v2636_v9, %v13046_v40 }
 0xe65   : > { %v12066_v55 = vpop.eup %12065 }
 0xe66   : > { %v7389_v12 = vmul.f32 %v12066_v55, %v12064_v21  ;;  %v7558_v21 = vld [vmem:[#allocation10 + $0x1d8] sm:$0xff] }
 0xe67   : > { %v7562_v55 = vld [vmem:[#allocation10 + $0x1f8] sm:$0xff] }
 0xe68   : > { %9838 = vmatmul.mubr.f32.vlgmr.msra.gmra.mrb[42].mxu1 %v7389_v12  ;;  %7628 = vmatmul.mubr.f32.vlgmr.msra.gmra.mrb[24].mxu0 %v7389_v12  ;;  %v14136_v47 = vpack.c.bf16 %v7562_v55, %v7558_v21  ;;  %v7745_v21 = vld [vmem:[#allocation11 + $0x60] sm:$0xff]  ;;  %v7746_v55 = vld [vmem:[#allocation11 + $0x68] sm:$0xff] }
 0xe69   : > { %11327 = vmatpush1.bf16.msra.mxu1 %v14095_v38  ;;  %7698 = vmatprep.mubr.f32.mxu1 %v14566_v19  ;;  %v14184_v63 = vpack.c.bf16 %v7746_v55, %v7745_v21 }
 0xe6a   : > { %11329 = vmatprep.subr.bf16.mxu1 %v14097_v24  ;;  %9872 = vmatprep.mubr.msk.f32.mxu0 %vm12412_vm1, %v14566_v19  ;;  %14587 = vst [vmem:[#allocation29_spill] sm:$0xff] %v14136_v47 }
 0xe6d   : > { %11331 = vmatpush1.bf16.msra.mxu1 %v14100_v33 }
 0xe6e   : > { %11333 = vmatprep.subr.bf16.mxu1 %v14104_v32 }
 0xe71   : > { %11335 = vmatpush1.bf16.msra.mxu1 %v14109_v3 }
 0xe72   : > { %11337 = vmatprep.subr.bf16.mxu1 %v14112_v54 }
 0xe75   : > { %11339 = vmatpush1.bf16.msra.mxu1 %v14115_v41 }
 0xe76   : > { %11341 = vmatprep.subr.bf16.mxu1 %v14118_v53 }
 0xe79   : > { %11343 = vmatpush1.bf16.msra.mxu1 %v14121_v59 }
 0xe7a   : > { %11345 = vmatprep.subr.bf16.mxu1 %v14124_v22 }
 0xe7d   : > { %11347 = vmatpush1.bf16.msra.mxu1 %v14127_v14 }
 0xe7e   : > { %11349 = vmatprep.subr.bf16.mxu1 %v14130_v37 }
 0xe81   : > { %11351 = vmatpush1.bf16.msra.mxu1 %v14133_v17 }
 0xe82   : > { %11353 = vmatprep.subr.bf16.mxu1 %v14136_v47 }
 0xe85   : > { %11355 = vmatpush1.bf16.msra.mxu1 %v14139_v10 }
 0xe86   : > { %11413 = vmatprep.subr.bf16.mxu1 %v14071_v11 }
 0xe88   : > { %7699 = vmatmul.mubr.f32.vlgmr.msra.gmra.mrb[24].mxu1 %v7389_v12  ;;  %v7733_v12 = vld [vmem:[#allocation11] sm:$0xff] }
 0xe89   : > { %11415 = vmatpush1.bf16.msra.mxu1 %v14095_v38  ;;  %8041 = vmatprep.mubr.f32.mxu1 %v14566_v19  ;;  %v14161_v5 = vpack.c.bf16 %v7734_v52, %v7733_v12  ;;  %v7748_v12 = vld [vmem:[#allocation11 + $0x78] sm:$0xff] }
 0xe8a   : > { %11417 = vmatprep.subr.bf16.mxu1 %v14097_v24  ;;  %v14188_v52 = vpack.c.bf16 %v7748_v12, %v7747_v45 }
 0xe8b   : > { %11358 = vmatpush3.bf16.msra.mxu0 %v14161_v5 }
 0xe8c   : > { %11359 = vmatprep.subr.bf16.mxu0 %v14560_v57 }
 0xe8d   : > { %11419 = vmatpush1.bf16.msra.mxu1 %v14100_v33 }
 0xe8e   : > { %11421 = vmatprep.subr.bf16.mxu1 %v14104_v32 }
 0xe8f   : > { %11361 = vmatpush3.bf16.msra.mxu0 %v14165_v28 }
 0xe90   : > { %11362 = vmatprep.subr.bf16.mxu0 %v14560_v57 }
 0xe91   : > { %11423 = vmatpush1.bf16.msra.mxu1 %v14109_v3 }
 0xe92   : > { %11425 = vmatprep.subr.bf16.mxu1 %v14112_v54 }
 0xe93   : > { %11364 = vmatpush3.bf16.msra.mxu0 %v14169_v26 }
 0xe94   : > { %11365 = vmatprep.subr.bf16.mxu0 %v14560_v57 }
 0xe95   : > { %11427 = vmatpush1.bf16.msra.mxu1 %v14115_v41 }
 0xe96   : > { %11429 = vmatprep.subr.bf16.mxu1 %v14118_v53 }
 0xe97   : > { %11367 = vmatpush3.bf16.msra.mxu0 %v14173_v20 }
 0xe98   : > { %11368 = vmatprep.subr.bf16.mxu0 %v14560_v57 }
 0xe99   : > { %11431 = vmatpush1.bf16.msra.mxu1 %v14121_v59 }
 0xe9a   : > { %11433 = vmatprep.subr.bf16.mxu1 %v14124_v22 }
 0xe9b   : > { %11370 = vmatpush3.bf16.msra.mxu0 %v14177_v35 }
 0xe9c   : > { %11371 = vmatprep.subr.bf16.mxu0 %v14560_v57 }
 0xe9d   : > { %11435 = vmatpush1.bf16.msra.mxu1 %v14127_v14 }
 0xe9e   : > { %11437 = vmatprep.subr.bf16.mxu1 %v14130_v37 }
 0xe9f   : > { %11373 = vmatpush3.bf16.msra.mxu0 %v14181_v25 }
 0xea0   : > { %11374 = vmatprep.subr.bf16.mxu0 %v14560_v57 }
 0xea1   : > { %11439 = vmatpush1.bf16.msra.mxu1 %v14133_v17 }
 0xea2   : > { %11441 = vmatprep.subr.bf16.mxu1 %v14136_v47 }
 0xea3   : > { %11376 = vmatpush3.bf16.msra.mxu0 %v14184_v63 }
 0xea4   : > { %11377 = vmatprep.subr.bf16.mxu0 %v14560_v57 }
 0xea5   : > { %11443 = vmatpush1.bf16.msra.mxu1 %v14139_v10 }
 0xea6   : > { %11444 = vmatprep.subr.bf16.mxu1 %v14560_v57 }
 0xea7   : > { %11379 = vmatpush3.bf16.msra.mxu0 %v14188_v52 }
 0xea8   : > { %11381 = vmatprep.subr.bf16.mxu0 %v14028_v0 }
 0xf3b   : > { %v7479_v13 = vpop.f32.mrb[42].mxu1  ;;  %v7629_v44 = vpop.f32.mrb[24].mxu0 }
 0xf3c   : > { %v14194_v50 = vadd.f32 %v13977_v61, %v7479_v13  ;;  %v9839_v43 = vpop.f32.mrb[43].mxu1  ;;  %v7631_v60 = vpop.f32.mrb[25].mxu0  ;;  %v11692_v39 = vadd.f32 %v7629_v44, %v2641_v30  ;;  %v2649_v13 = vrot.slane %v2636_v9, %v13058_v15 }
 0xf3d   : > { %v11693_v16 = vadd.f32 %v7631_v60, %v2645_v31  ;;  %v2653_v43 = vrot.slane %v2636_v9, %v13055_v58 }
 0xf3e   : > { %14589 = vst [vmem:[#allocation33_spill] sm:$0xff] %v14194_v50  ;;  %7483 = vmax.xlane.f32.xlu1 %v14194_v50  ;;  %v9121_v55 = vmul.f32 -1.442695, %v11692_v39 }
 0xf3f   : > { %v9122_v21 = vmul.f32 -1.442695, %v11693_v16 }
 0xf41   : > { %12067 = vpow2.f32 %v9122_v21 }
 0xf42   : > { %12069 = vpow2.f32 %v9121_v55 }
 0xf4b   : > { %v12068_v61 = vpop.eup %12067 }
 0xf4c   : > { %v12070_v45 = vpop.eup %12069  ;;  %v7718_v12 = vadd.f32 1.0, %v12068_v61 }
 0xf4d   : > { %v7712_v34 = vadd.f32 1.0, %v12070_v45 }
 0xf4e   : > { %12071 = vrcp.f32 %v7718_v12 }
 0xf4f   : > { %12073 = vrcp.f32 %v7712_v34 }
 0xf58   : > { %v12072_v60 = vpop.eup %12071 }
 0xf59   : > { %v12074_v31 = vpop.eup %12073  ;;  %v7728_v16 = vmul.f32 %v12072_v60, %v14092_v1 }
 0xf5b   : > { %v7700_v23 = vpop.f32.mrb[24].mxu1 }
 0xf5c   : > { %v11694_v50 = vadd.f32 %v7700_v23, %v2649_v13  ;;  %v7702_v10 = vpop.f32.mrb[25].mxu1 }
 0xf5d   : > { %v11695_v47 = vadd.f32 %v7702_v10, %v2653_v43 }
 0xf5e   : > { %12075 = vtanh.f32 %v11694_v50 }
 0xf5f   : > { %v9123_v44 = vmul.f32 -1.442695, %v11695_v47 }
 0xf61   : > { %12077 = vpow2.f32 %v9123_v44 }
 0xf68   : > { %v12076_v30 = vpop.eup %12075 }
 0xf69   : > { %v7729_v39 = vmul.f32 %v12076_v30, %v12074_v31 }
 0xf6b   : > { %v12078_v21 = vpop.eup %12077  ;;  %v14205_v55 = vadd.f32 %v7729_v39, %v7728_v16 }
 0xf6c   : > { %v7725_v61 = vadd.f32 1.0, %v12078_v21 }
 0xf6d   : > { %12079 = vtanh.f32 %v14205_v55 }
 0xf6e   : > { %12081 = vrcp.f32 %v7725_v61 }
 0xf77   : > { %v12080_v23 = vpop.eup %12079 }
 0xf78   : > { %v12082_v9 = vpop.eup %12081 }
 0xf79   : > { %v7732_v34 = vmul.f32 %v12082_v9, %v12080_v23 }
 0xf7b   : > { %9873 = vmatmul.mubr.f32.vlgmr.msra.gmra.mrb[44].mxu0 %v7732_v34  ;;  %8042 = vmatmul.mubr.f32.vlgmr.msra.gmra.mrb[26].mxu1 %v7732_v34 }
 0xf7c   : > { %11383 = vmatpush1.bf16.msra.mxu0 %v14030_v48  ;;  %7970 = vmatprep.mubr.f32.mxu0 %v14566_v19 }
 0xf7d   : > { %11385 = vmatprep.subr.bf16.mxu0 %v14034_v56  ;;  %11446 = vmatpush3.bf16.msra.mxu1 %v14161_v5 }
 0xf7e   : > { %11447 = vmatprep.subr.bf16.mxu1 %v14560_v57  ;;  %9907 = vmatprep.mubr.msk.f32.mxu1 %vm12412_vm1, %v14566_v19 }
 0xf80   : > { %11387 = vmatpush1.bf16.msra.mxu0 %v14036_v18 }
 0xf81   : > { %11389 = vmatprep.subr.bf16.mxu0 %v14040_v51  ;;  %11449 = vmatpush3.bf16.msra.mxu1 %v14165_v28 }
 0xf82   : > { %11450 = vmatprep.subr.bf16.mxu1 %v14560_v57 }
 0xf84   : > { %11391 = vmatpush1.bf16.msra.mxu0 %v14042_v27 }
 0xf85   : > { %11393 = vmatprep.subr.bf16.mxu0 %v14046_v2  ;;  %11452 = vmatpush3.bf16.msra.mxu1 %v14169_v26 }
 0xf86   : > { %11453 = vmatprep.subr.bf16.mxu1 %v14560_v57 }
 0xf88   : > { %11395 = vmatpush1.bf16.msra.mxu0 %v14048_v42 }
 0xf89   : > { %11397 = vmatprep.subr.bf16.mxu0 %v14052_v49  ;;  %11455 = vmatpush3.bf16.msra.mxu1 %v14173_v20 }
 0xf8a   : > { %11456 = vmatprep.subr.bf16.mxu1 %v14560_v57 }
 0xf8c   : > { %11399 = vmatpush1.bf16.msra.mxu0 %v14054_v29 }
 0xf8d   : > { %11401 = vmatprep.subr.bf16.mxu0 %v14058_v6  ;;  %11458 = vmatpush3.bf16.msra.mxu1 %v14177_v35 }
 0xf8e   : > { %11459 = vmatprep.subr.bf16.mxu1 %v14560_v57 }
 0xf90   : > { %11403 = vmatpush1.bf16.msra.mxu0 %v14060_v8 }
 0xf91   : > { %11405 = vmatprep.subr.bf16.mxu0 %v14062_v36  ;;  %11461 = vmatpush3.bf16.msra.mxu1 %v14181_v25 }
 0xf92   : > { %11462 = vmatprep.subr.bf16.mxu1 %v14560_v57 }
 0xf94   : > { %11407 = vmatpush1.bf16.msra.mxu0 %v14066_v62 }
 0xf95   : > { %11409 = vmatprep.subr.bf16.mxu0 %v14069_v4  ;;  %11464 = vmatpush3.bf16.msra.mxu1 %v14184_v63 }
 0xf96   : > { %11465 = vmatprep.subr.bf16.mxu1 %v14560_v57 }
 0xf98   : > { %11411 = vmatpush1.bf16.msra.mxu0 %v14075_v7 }
 0xf99   : > { %11469 = vmatprep.subr.bf16.mxu0 %v14028_v0  ;;  %11467 = vmatpush3.bf16.msra.mxu1 %v14188_v52  ;;  %v14263_v0 = vld [vmem:[%s14510_s5] ss:$0 sm:$0xff] }
 0xf9a   : > { %11501 = vmatprep.subr.bf16.mxu1 %v14071_v11 }
 0xf9b   : > { %7971 = vmatmul.mubr.f32.vlgmr.msra.gmra.mrb[26].mxu0 %v7732_v34 }
 0xf9c   : > { %11471 = vmatpush1.bf16.msra.mxu0 %v14030_v48  ;;  %8313 = vmatprep.mubr.f32.mxu0 %v14566_v19 }
 0xf9d   : > { %11473 = vmatprep.subr.bf16.mxu0 %v14034_v56 }
 0xfa0   : > { %11475 = vmatpush1.bf16.msra.mxu0 %v14036_v18 }
 0xfa1   : > { %11477 = vmatprep.subr.bf16.mxu0 %v14040_v51 }
 0xfa4   : > { %11479 = vmatpush1.bf16.msra.mxu0 %v14042_v27 }
 0xfa5   : > { %11481 = vmatprep.subr.bf16.mxu0 %v14046_v2  ;;  %v2826_v2 = vld [vmem:[%s14508_s3] sm:$0xf] }
 0xfa6   : > { %v2839_v1 = vrot.slane %v2826_v2, %v13058_v15 }
 0xfa8   : > { %11483 = vmatpush1.bf16.msra.mxu0 %v14048_v42  ;;  %v2831_v42 = vrot.slane %v2826_v2, %v13046_v40 }
 0xfa9   : > { %11485 = vmatprep.subr.bf16.mxu0 %v14052_v49  ;;  %v2835_v49 = vrot.slane %v2826_v2, %v13051_v46 }
 0xfac   : > { %11487 = vmatpush1.bf16.msra.mxu0 %v14054_v29 }
 0xfad   : > { %11489 = vmatprep.subr.bf16.mxu0 %v14058_v6 }
 0xfb0   : > { %11491 = vmatpush1.bf16.msra.mxu0 %v14060_v8 }
 0xfb1   : > { %11493 = vmatprep.subr.bf16.mxu0 %v14062_v36 }
 0xfb4   : > { %11495 = vmatpush1.bf16.msra.mxu0 %v14066_v62 }
 0xfb5   : > { %11497 = vmatprep.subr.bf16.mxu0 %v14069_v4  ;;  %v2843_v4 = vrot.slane %v2826_v2, %v13055_v58  ;;  %v8567_v2 = vld [vmem:[#allocation10 + $0x138] sm:$0xff] }
 0xfb8   : > { %11499 = vmatpush1.bf16.msra.mxu0 %v14075_v7 }
 0xfb9   : > { %11532 = vmatprep.subr.bf16.mxu0 %v14560_v57 }
0x104e   : > { %v7822_v48 = vpop.f32.mrb[44].mxu0  ;;  %v8043_v56 = vpop.f32.mrb[26].mxu1 }
0x104f   : > { %v14266_v18 = vadd.f32 %v14263_v0, %v7822_v48  ;;  %v9874_v51 = vpop.f32.mrb[45].mxu0  ;;  %v8045_v27 = vpop.f32.mrb[27].mxu1  ;;  %v11698_v10 = vadd.f32 %v8043_v56, %v2839_v1  ;;  %v8554_v48 = vld [vmem:[#allocation10 + $0xd0] sm:$0xff]  ;;  %v8579_v1 = vld [vmem:[#allocation10 + $0x198] sm:$0xff] }
0x1050   : > { %v11699_v7 = vadd.f32 %v8045_v27, %v2843_v4  ;;  %v8558_v56 = vld [vmem:[#allocation10 + $0xf0] sm:$0xff]  ;;  %v8563_v27 = vld [vmem:[#allocation10 + $0x118] sm:$0xff] }
0x1051   : > { %7826 = vmax.xlane.f32.xlu0 %v14266_v18  ;;  %v11602_v51 = vpack.c.bf16 %v8558_v56, %v8554_v48  ;;  %v8570_v4 = vld [vmem:[#allocation10 + $0x150] sm:$0xff] }
0x1052   : > { %v9128_v47 = vmul.f32 -1.442695, %v11699_v7 }
0x106e   : > { %v7972_v29 = vpop.f32.mrb[26].mxu0 }
0x106f   : > { %v11696_v6 = vadd.f32 %v7972_v29, %v2831_v42  ;;  %v7974_v8 = vpop.f32.mrb[27].mxu0  ;;  %v11604_v42 = vpack.c.bf16 %v8567_v2, %v8563_v27  ;;  %v8566_v29 = vld [vmem:[#allocation10 + $0x130] sm:$0xff] }
0x1070   : > { %v11697_v36 = vadd.f32 %v7974_v8, %v2835_v49  ;;  %v8562_v49 = vld [vmem:[#allocation10 + $0x110] sm:$0xff]  ;;  %v8571_v8 = vld [vmem:[#allocation10 + $0x158] sm:$0xff] }
0x1071   : > { %v9126_v62 = vmul.f32 -1.442695, %v11696_v6  ;;  %v11606_v6 = vpack.c.bf16 %v8566_v29, %v8562_v49  ;;  %v8528_v49 = vld [vmem:[#allocation10] sm:$0xff] }
0x1072   : > { %v9127_v11 = vmul.f32 -1.442695, %v11697_v36  ;;  %v8575_v36 = vld [vmem:[#allocation10 + $0x178] sm:$0xff]  ;;  %v8532_v29 = vld [vmem:[#allocation10 + $0x20] sm:$0xff] }
0x1073   : > { %12083 = vpow2.f32 %v9126_v62  ;;  %v11608_v62 = vpack.c.bf16 %v8575_v36, %v8571_v8  ;;  %v8541_v8 = vld [vmem:[#allocation10 + $0x68] sm:$0xff] }
0x1074   : > { %12085 = vpow2.f32 %v9127_v11  ;;  %v8574_v11 = vld [vmem:[#allocation10 + $0x170] sm:$0xff] }
0x1075   : > { %12087 = vpow2.f32 %v9128_v47  ;;  %v11610_v7 = vpack.c.bf16 %v8574_v11, %v8570_v4  ;;  %v8583_v47 = vld [vmem:[#allocation10 + $0x1b8] sm:$0xff]  ;;  %v11558_v4 = vpack.c.bf16 %v8532_v29, %v8528_v49  ;;  %v8767_v49 = vld [vmem:[#allocation11 + $0x28] sm:$0xff] }
0x1076   : > { %12089 = vtanh.f32 %v11698_v10  ;;  %v8578_v10 = vld [vmem:[#allocation10 + $0x190] sm:$0xff] }
0x107d   : > { %v12084_v50 = vpop.eup %12083 }
0x107e   : > { %v12086_v45 = vpop.eup %12085  ;;  %v8055_v12 = vadd.f32 1.0, %v12084_v50  ;;  %v11612_v50 = vpack.c.bf16 %v8583_v47, %v8579_v1  ;;  %v8536_v1 = vld [vmem:[#allocation10 + $0x40] sm:$0xff] }
0x107f   : > { %v8061_v13 = vadd.f32 1.0, %v12086_v45  ;;  %v12088_v43 = vpop.eup %12087  ;;  %v8582_v45 = vld [vmem:[#allocation10 + $0x1b0] sm:$0xff]  ;;  %v8540_v47 = vld [vmem:[#allocation10 + $0x60] sm:$0xff] }
0x1080   : > { %12091 = vrcp.f32 %v8055_v12  ;;  %v12090_v44 = vpop.eup %12089  ;;  %v8068_v30 = vadd.f32 1.0, %v12088_v43  ;;  %v8587_v12 = vld [vmem:[#allocation10 + $0x1d8] sm:$0xff]  ;;  %v11614_v43 = vpack.c.bf16 %v8582_v45, %v8578_v10  ;;  %v8549_v10 = vld [vmem:[#allocation10 + $0xa8] sm:$0xff] }
0x1081   : > { %12093 = vrcp.f32 %v8061_v13  ;;  %v8591_v13 = vld [vmem:[#allocation10 + $0x1f8] sm:$0xff] }
0x1082   : > { %12095 = vrcp.f32 %v8068_v30  ;;  %v8590_v30 = vld [vmem:[#allocation10 + $0x1f0] sm:$0xff] }
0x108a   : > { %v12092_v60 = vpop.eup %12091 }
0x108b   : > { %v12094_v31 = vpop.eup %12093  ;;  %v8072_v16 = vmul.f32 %v12092_v60, %v12090_v44  ;;  %v8529_v44 = vld [vmem:[#allocation10 + $0x8] sm:$0xff]  ;;  %v11616_v60 = vpack.c.bf16 %v8591_v13, %v8587_v12  ;;  %v8544_v12 = vld [vmem:[#allocation10 + $0x80] sm:$0xff] }
0x108c   : > { %v8071_v39 = vmul.f32 %v12094_v31, %v14205_v55  ;;  %v12096_v61 = vpop.eup %12095  ;;  %v8559_v55 = vld [vmem:[#allocation10 + $0xf8] sm:$0xff]  ;;  %v8586_v31 = vld [vmem:[#allocation10 + $0x1d0] sm:$0xff]  ;;  %v8548_v13 = vld [vmem:[#allocation10 + $0xa0] sm:$0xff] }
0x108e   : > { %v14277_v21 = vadd.f32 %v8072_v16, %v8071_v39  ;;  %v8533_v16 = vld [vmem:[#allocation10 + $0x28] sm:$0xff] }
0x108f   : > { %v11556_v39 = vpack.c.bf16 %v8533_v16, %v8529_v44  ;;  %v8557_v44 = vld [vmem:[#allocation10 + $0xe8] sm:$0xff]  ;;  %v8556_v16 = vld [vmem:[#allocation10 + $0xe0] sm:$0xff] }
0x1090   : > { %12097 = vtanh.f32 %v14277_v21 }
0x109a   : > { %v12098_v23 = vpop.eup %12097 }
0x109b   : > { %v8075_v9 = vmul.f32 %v12098_v23, %v12096_v61  ;;  %v11618_v61 = vpack.c.bf16 %v8590_v30, %v8586_v31  ;;  %v8552_v30 = vld [vmem:[#allocation10 + $0xc0] sm:$0xff] }
0x109d   : > { %9908 = vmatmul.mubr.f32.vlgmr.msra.gmra.mrb[44].mxu1 %v8075_v9  ;;  %8314 = vmatmul.mubr.f32.vlgmr.msra.gmra.mrb[28].mxu0 %v8075_v9 }
0x109e   : > { %11503 = vmatpush1.bf16.msra.mxu1 %v14095_v38  ;;  %8384 = vmatprep.mubr.f32.mxu1 %v14566_v19  ;;  %v14590_v38 = vld [vmem:[#allocation29_spill] sm:$0xff] }
0x109f   : > { %11505 = vmatprep.subr.bf16.mxu1 %v14097_v24  ;;  %11534 = vmatpush3.bf16.msra.mxu0 %v14161_v5  ;;  %v14591_v24 = vld [vmem:[#allocation30_spill] sm:$0xff] }
0x10a0   : > { %11535 = vmatprep.subr.bf16.mxu0 %v14560_v57  ;;  %9942 = vmatprep.mubr.msk.f32.mxu0 %vm12412_vm1, %v14566_v19 }
0x10a2   : > { %11507 = vmatpush1.bf16.msra.mxu1 %v14100_v33  ;;  %v8531_v33 = vld [vmem:[#allocation10 + $0x18] sm:$0xff] }
0x10a3   : > { %11509 = vmatprep.subr.bf16.mxu1 %v14104_v32  ;;  %11537 = vmatpush3.bf16.msra.mxu0 %v14165_v28  ;;  %v8535_v32 = vld [vmem:[#allocation10 + $0x38] sm:$0xff] }
0x10a4   : > { %11538 = vmatprep.subr.bf16.mxu0 %v14560_v57  ;;  %v8547_v28 = vld [vmem:[#allocation10 + $0x98] sm:$0xff] }
0x10a6   : > { %11511 = vmatpush1.bf16.msra.mxu1 %v14109_v3  ;;  %v11588_v3 = vpack.c.bf16 %v8535_v32, %v8531_v33 }
0x10a7   : > { %11513 = vmatprep.subr.bf16.mxu1 %v14112_v54  ;;  %11540 = vmatpush3.bf16.msra.mxu0 %v14169_v26  ;;  %v8530_v54 = vld [vmem:[#allocation10 + $0x10] sm:$0xff]  ;;  %v8551_v26 = vld [vmem:[#allocation10 + $0xb8] sm:$0xff] }
0x10a8   : > { %11541 = vmatprep.subr.bf16.mxu0 %v14560_v57 }
0x10aa   : > { %11515 = vmatpush1.bf16.msra.mxu1 %v14115_v41  ;;  %v8534_v41 = vld [vmem:[#allocation10 + $0x30] sm:$0xff] }
0x10ab   : > { %11517 = vmatprep.subr.bf16.mxu1 %v14118_v53  ;;  %11543 = vmatpush3.bf16.msra.mxu0 %v14173_v20  ;;  %v11590_v53 = vpack.c.bf16 %v8534_v41, %v8530_v54  ;;  %v11596_v20 = vpack.c.bf16 %v8551_v26, %v8547_v28 }
0x10ac   : > { %11544 = vmatprep.subr.bf16.mxu0 %v14560_v57 }
0x10ae   : > { %11519 = vmatpush1.bf16.msra.mxu1 %v14121_v59  ;;  %v8539_v59 = vld [vmem:[#allocation10 + $0x58] sm:$0xff] }
0x10af   : > { %11521 = vmatprep.subr.bf16.mxu1 %v14124_v22  ;;  %11546 = vmatpush3.bf16.msra.mxu0 %v14177_v35  ;;  %v8543_v22 = vld [vmem:[#allocation10 + $0x78] sm:$0xff]  ;;  %v8546_v35 = vld [vmem:[#allocation10 + $0x90] sm:$0xff] }
0x10b0   : > { %11547 = vmatprep.subr.bf16.mxu0 %v14560_v57 }
0x10b2   : > { %11523 = vmatpush1.bf16.msra.mxu1 %v14127_v14  ;;  %v11592_v14 = vpack.c.bf16 %v8543_v22, %v8539_v59 }
0x10b3   : > { %11525 = vmatprep.subr.bf16.mxu1 %v14130_v37  ;;  %11549 = vmatpush3.bf16.msra.mxu0 %v14181_v25  ;;  %v8538_v37 = vld [vmem:[#allocation10 + $0x50] sm:$0xff] }
0x10b4   : > { %11550 = vmatprep.subr.bf16.mxu0 %v14560_v57  ;;  %v8550_v25 = vld [vmem:[#allocation10 + $0xb0] sm:$0xff] }
0x10b6   : > { %11527 = vmatpush1.bf16.msra.mxu1 %v14133_v17  ;;  %v8542_v17 = vld [vmem:[#allocation10 + $0x70] sm:$0xff] }
0x10b7   : > { %11529 = vmatprep.subr.bf16.mxu1 %v14590_v38  ;;  %11552 = vmatpush3.bf16.msra.mxu0 %v14184_v63  ;;  %v11594_v5 = vpack.c.bf16 %v8542_v17, %v8538_v37  ;;  %v11598_v63 = vpack.c.bf16 %v8550_v25, %v8546_v35 }
0x10b8   : > { %11553 = vmatprep.subr.bf16.mxu0 %v14560_v57 }
0x10ba   : > { %11531 = vmatpush1.bf16.msra.mxu1 %v14591_v24  ;;  %v3016_v24 = vld [vmem:[%s14508_s3] sm:$0xf] }
0x10bb   : > { %11555 = vmatpush3.bf16.msra.mxu0 %v14188_v52  ;;  %11589 = vmatprep.subr.bf16.mxu1 %v11588_v3  ;;  %v8555_v52 = vld [vmem:[#allocation10 + $0xd8] sm:$0xff]  ;;  %v3025_v3 = vrot.slane %v3016_v24, %v13051_v46  ;;  %v3021_v54 = vrot.slane %v3016_v24, %v13046_v40  ;;  %v3033_v26 = vrot.slane %v3016_v24, %v13055_v58 }
0x10bc   : > { %v11600_v34 = vpack.c.bf16 %v8559_v55, %v8555_v52  ;;  %11557 = vmatprep.subr.bf16.mxu0 %v11556_v39  ;;  %v8561_v39 = vld [vmem:[#allocation10 + $0x108] sm:$0xff] }
0x10bd   : > { %8385 = vmatmul.mubr.f32.vlgmr.msra.gmra.mrb[28].mxu1 %v8075_v9 }
0x10be   : > { %8727 = vmatprep.mubr.f32.mxu1 %v14566_v19  ;;  %11591 = vmatpush1.bf16.msra.mxu1 %v11590_v53 }
0x10bf   : > { %11593 = vmatprep.subr.bf16.mxu1 %v11592_v14 }
0x10c2   : > { %11595 = vmatpush1.bf16.msra.mxu1 %v11594_v5  ;;  %v3029_v5 = vrot.slane %v3016_v24, %v13058_v15  ;;  %v8560_v24 = vld [vmem:[#allocation10 + $0x100] sm:$0xff] }
0x10c3   : > { %11597 = vmatprep.subr.bf16.mxu1 %v11596_v20 }
0x10c6   : > { %11599 = vmatpush1.bf16.msra.mxu1 %v11598_v63 }
0x10c7   : > { %11601 = vmatprep.subr.bf16.mxu1 %v11600_v34 }
0x10ca   : > { %11603 = vmatpush1.bf16.msra.mxu1 %v11602_v51 }
0x10cb   : > { %11605 = vmatprep.subr.bf16.mxu1 %v11604_v42 }
0x10ce   : > { %11607 = vmatpush1.bf16.msra.mxu1 %v11606_v6  ;;  %v8537_v6 = vld [vmem:[#allocation10 + $0x48] sm:$0xff] }
0x10cf   : > { %11609 = vmatprep.subr.bf16.mxu1 %v11608_v62 }
0x10d2   : > { %11611 = vmatpush1.bf16.msra.mxu1 %v11610_v7  ;;  %v11560_v7 = vpack.c.bf16 %v8541_v8, %v8537_v6  ;;  %v8768_v6 = vld [vmem:[#allocation11 + $0x30] sm:$0xff]  ;;  %v8769_v8 = vld [vmem:[#allocation11 + $0x38] sm:$0xff] }
0x10d3   : > { %11613 = vmatprep.subr.bf16.mxu1 %v11612_v50  ;;  %v11562_v50 = vpack.c.bf16 %v8540_v47, %v8536_v1  ;;  %v8773_v1 = vld [vmem:[#allocation11 + $0x58] sm:$0xff] }
0x10d6   : > { %11615 = vmatpush1.bf16.msra.mxu1 %v11614_v43  ;;  %v8553_v43 = vld [vmem:[#allocation10 + $0xc8] sm:$0xff] }
0x10d7   : > { %11617 = vmatprep.subr.bf16.mxu1 %v11616_v60  ;;  %v11566_v60 = vpack.c.bf16 %v8548_v13, %v8544_v12  ;;  %v11568_v31 = vpack.c.bf16 %v8557_v44, %v8553_v43  ;;  %v8777_v12 = vld [vmem:[#allocation11 + $0x78] sm:$0xff]  ;;  %v3712_v43 = vpop.xlane.xlu0 %3711 }
0x10da   : > { %11619 = vmatpush1.bf16.msra.mxu1 %v11618_v61  ;;  %v8565_v61 = vld [vmem:[#allocation10 + $0x128] sm:$0xff] }
0x10db   : > { %11620 = vmatprep.subr.bf16.mxu1 %v14560_v57  ;;  %v14340_v44 = vpop.xlane.xlu0 %4053 }
0x1170   : > { %v8165_v23 = vpop.f32.mrb[44].mxu1  ;;  %v8315_v9 = vpop.f32.mrb[28].mxu0 }
0x1171   : > { %v14316_v38 = vadd.f32 %v14263_v0, %v8165_v23  ;;  %v9909_v33 = vpop.f32.mrb[45].mxu1  ;;  %v8317_v32 = vpop.f32.mrb[29].mxu0  ;;  %v11700_v53 = vadd.f32 %v8315_v9, %v3021_v54  ;;  %v11570_v23 = vpack.c.bf16 %v8556_v16, %v8552_v30  ;;  %v11572_v9 = vpack.c.bf16 %v8565_v61, %v8561_v39  ;;  %v14593_v61 = vld [vmem:[#allocation24_spill] sm:$0xff] }
0x1172   : > { %v11701_v41 = vadd.f32 %v8317_v32, %v3025_v3  ;;  %v8564_v33 = vld [vmem:[#allocation10 + $0x120] sm:$0xff]  ;;  %v8569_v32 = vld [vmem:[#allocation10 + $0x148] sm:$0xff]  ;;  %v4397_v30 = vpop.xlane.xlu1 %4396  ;;  %v5083_v16 = vpop.xlane.xlu0 %5082 }
0x1173   : > { %8169 = vmax.xlane.f32.xlu1 %v14316_v38  ;;  %v9131_v22 = vmul.f32 -1.442695, %v11700_v53  ;;  %v8573_v3 = vld [vmem:[#allocation10 + $0x168] sm:$0xff]  ;;  %v8572_v53 = vld [vmem:[#allocation10 + $0x160] sm:$0xff] }
0x1174   : > { %v9132_v59 = vmul.f32 -1.442695, %v11701_v41  ;;  %v11576_v54 = vpack.c.bf16 %v8573_v3, %v8569_v32  ;;  %v8568_v41 = vld [vmem:[#allocation10 + $0x140] sm:$0xff] }
0x1176   : > { %12099 = vpow2.f32 %v9132_v59  ;;  %v8577_v59 = vld [vmem:[#allocation10 + $0x188] sm:$0xff] }
0x1177   : > { %12101 = vpow2.f32 %v9131_v22  ;;  %v8581_v22 = vld [vmem:[#allocation10 + $0x1a8] sm:$0xff] }
0x1180   : > { %v12100_v14 = vpop.eup %12099 }
0x1181   : > { %v12102_v37 = vpop.eup %12101  ;;  %v8404_v17 = vadd.f32 1.0, %v12100_v14  ;;  %v11578_v14 = vpack.c.bf16 %v8572_v53, %v8568_v41 }
0x1182   : > { %v8398_v28 = vadd.f32 1.0, %v12102_v37  ;;  %v11580_v37 = vpack.c.bf16 %v8581_v22, %v8577_v59 }
0x1183   : > { %12103 = vrcp.f32 %v8404_v17  ;;  %v8576_v17 = vld [vmem:[#allocation10 + $0x180] sm:$0xff] }
0x1184   : > { %12105 = vrcp.f32 %v8398_v28  ;;  %v8585_v28 = vld [vmem:[#allocation10 + $0x1c8] sm:$0xff] }
0x118d   : > { %v12104_v55 = vpop.eup %12103 }
0x118e   : > { %v12106_v34 = vpop.eup %12105  ;;  %v8414_v56 = vmul.f32 %v12104_v55, %v14277_v21  ;;  %v8545_v21 = vld [vmem:[#allocation10 + $0x88] sm:$0xff]  ;;  %v8762_v55 = vld [vmem:[#allocation11] sm:$0xff] }
0x118f   : > { %v11564_v45 = vpack.c.bf16 %v8549_v10, %v8545_v21  ;;  %v8774_v21 = vld [vmem:[#allocation11 + $0x60] sm:$0xff]  ;;  %v8775_v10 = vld [vmem:[#allocation11 + $0x68] sm:$0xff] }
0x1190   : > { %v8386_v20 = vpop.f32.mrb[28].mxu1 }
0x1191   : > { %v11702_v35 = vadd.f32 %v8386_v20, %v3029_v5  ;;  %v8388_v25 = vpop.f32.mrb[29].mxu1  ;;  %v8580_v5 = vld [vmem:[#allocation10 + $0x1a0] sm:$0xff] }
0x1192   : > { %v11703_v63 = vadd.f32 %v8388_v25, %v3033_v26  ;;  %v8589_v26 = vld [vmem:[#allocation10 + $0x1e8] sm:$0xff]  ;;  %v11582_v20 = vpack.c.bf16 %v8580_v5, %v8576_v17  ;;  %v8584_v25 = vld [vmem:[#allocation10 + $0x1c0] sm:$0xff]  ;;  %v14596_v17 = vld [vmem:[#allocation31_spill] sm:$0xff] }
0x1193   : > { %12107 = vtanh.f32 %v11702_v35  ;;  %v11584_v35 = vpack.c.bf16 %v8589_v26, %v8585_v28 }
0x1194   : > { %v9133_v52 = vmul.f32 -1.442695, %v11703_v63  ;;  %v8588_v63 = vld [vmem:[#allocation10 + $0x1e0] sm:$0xff] }
0x1196   : > { %12109 = vpow2.f32 %v9133_v52  ;;  %v11586_v52 = vpack.c.bf16 %v8588_v63, %v8584_v25 }
0x119d   : > { %v12108_v48 = vpop.eup %12107 }
0x119e   : > { %v8415_v51 = vmul.f32 %v12108_v48, %v12106_v34  ;;  %v8763_v34 = vld [vmem:[#allocation11 + $0x8] sm:$0xff] }
0x119f   : > { %v11621_v48 = vpack.c.bf16 %v8763_v34, %v8762_v55 }
0x11a0   : > { %v12110_v27 = vpop.eup %12109  ;;  %v14327_v2 = vadd.f32 %v8415_v51, %v8414_v56  ;;  %v8764_v56 = vld [vmem:[#allocation11 + $0x10] sm:$0xff]  ;;  %v8765_v51 = vld [vmem:[#allocation11 + $0x18] sm:$0xff] }
0x11a1   : > { %v8411_v42 = vadd.f32 1.0, %v12110_v27  ;;  %v11624_v27 = vpack.c.bf16 %v8765_v51, %v8764_v56 }
0x11a2   : > { %12111 = vtanh.f32 %v14327_v2 }
0x11a3   : > { %12113 = vrcp.f32 %v8411_v42  ;;  %v8766_v42 = vld [vmem:[#allocation11 + $0x20] sm:$0xff] }
0x11a4   : > { %v11627_v29 = vpack.c.bf16 %v8767_v49, %v8766_v42  ;;  %v3206_v42 = vld [vmem:[%s14508_s3] sm:$0xf] }
0x11a5   : > { %v3211_v49 = vrot.slane %v3206_v42, %v13046_v40 }
0x11ac   : > { %v12112_v36 = vpop.eup %12111 }
0x11ad   : > { %v12114_v62 = vpop.eup %12113 }
0x11ae   : > { %v8418_v11 = vmul.f32 %v12114_v62, %v12112_v36  ;;  %v11630_v36 = vpack.c.bf16 %v8769_v8, %v8768_v6  ;;  %v8770_v62 = vld [vmem:[#allocation11 + $0x40] sm:$0xff] }
0x11b0   : > { %9943 = vmatmul.mubr.f32.vlgmr.msra.gmra.mrb[46].mxu0 %v8418_v11  ;;  %8728 = vmatmul.mubr.f32.vlgmr.msra.gmra.mrb[30].mxu1 %v8418_v11 }
0x11b1   : > { %11559 = vmatpush1.bf16.msra.mxu0 %v11558_v4  ;;  %8656 = vmatprep.mubr.f32.mxu0 %v14566_v19  ;;  %v8771_v4 = vld [vmem:[#allocation11 + $0x48] sm:$0xff] }
0x11b2   : > { %11561 = vmatprep.subr.bf16.mxu0 %v11560_v7  ;;  %9977 = vmatprep.mubr.msk.f32.mxu1 %vm12412_vm1, %v14566_v19  ;;  %v11574_v19 = vpack.c.bf16 %v8564_v33, %v8560_v24  ;;  %v8772_v7 = vld [vmem:[#allocation11 + $0x50] sm:$0xff] }
0x11b3   : > { %11622 = vmatpush3.bf16.msra.mxu1 %v11621_v48  ;;  %v11636_v47 = vpack.c.bf16 %v8773_v1, %v8772_v7  ;;  %v14594_v33 = vld [vmem:[#allocation22_spill] sm:$0xff] }
0x11b4   : > { %11623 = vmatprep.subr.bf16.mxu1 %v14560_v57 }
0x11b5   : > { %11563 = vmatpush1.bf16.msra.mxu0 %v11562_v50  ;;  %v11639_v50 = vpack.c.bf16 %v8775_v10, %v8774_v21 }
0x11b6   : > { %11565 = vmatprep.subr.bf16.mxu0 %v11564_v45  ;;  %v8776_v45 = vld [vmem:[#allocation11 + $0x70] sm:$0xff] }
0x11b7   : > { %11625 = vmatpush3.bf16.msra.mxu1 %v11624_v27  ;;  %v11642_v13 = vpack.c.bf16 %v8777_v12, %v8776_v45 }
0x11b8   : > { %11626 = vmatprep.subr.bf16.mxu1 %v14560_v57 }
0x11b9   : > { %11567 = vmatpush1.bf16.msra.mxu0 %v11566_v60  ;;  %v14592_v60 = vld [vmem:[#allocation20_spill] sm:$0xff] }
0x11ba   : > { %11569 = vmatprep.subr.bf16.mxu0 %v11568_v31  ;;  %v14343_v31 = vsub.f32 %v14592_v60, %v3712_v43 }
0x11bb   : > { %11628 = vmatpush3.bf16.msra.mxu1 %v11627_v29  ;;  %v3215_v29 = vrot.slane %v3206_v42, %v13051_v46 }
0x11bc   : > { %11629 = vmatprep.subr.bf16.mxu1 %v14560_v57  ;;  %v3714_v39 = vmul.f32 1.442695, %v14343_v31 }
0x11bd   : > { %11571 = vmatpush1.bf16.msra.mxu0 %v11570_v23  ;;  %v14347_v23 = vsub.f32 %v14593_v61, %v4397_v30 }
0x11be   : > { %11573 = vmatprep.subr.bf16.mxu0 %v11572_v9  ;;  %v5769_v9 = vpop.xlane.xlu0 %5768  ;;  %12115 = vpow2.f32 %v3714_v39 }
0x11bf   : > { %11631 = vmatpush3.bf16.msra.mxu1 %v11630_v36  ;;  %v4399_v24 = vmul.f32 1.442695, %v14347_v23 }
0x11c0   : > { %11632 = vmatprep.subr.bf16.mxu1 %v14560_v57 }
0x11c1   : > { %11575 = vmatpush1.bf16.msra.mxu0 %v11574_v19  ;;  %12117 = vpow2.f32 %v4399_v24  ;;  %v14595_v19 = vld [vmem:[#allocation28_spill] sm:$0xff] }
0x11c2   : > { %11577 = vmatprep.subr.bf16.mxu0 %v11576_v54  ;;  %v6455_v32 = vpop.xlane.xlu0 %6454  ;;  %v14355_v54 = vsub.f32 %v14595_v19, %v5769_v9 }
0x11c3   : > { %v14363_v5 = vsub.f32 %v14596_v17, %v6455_v32 }
0x11c5   : > { %11579 = vmatpush1.bf16.msra.mxu0 %v11578_v14 }
0x11c6   : > { %11581 = vmatprep.subr.bf16.mxu0 %v11580_v37  ;;  %v5771_v37 = vmul.f32 1.442695, %v14355_v54  ;;  %v7141_v28 = vpop.xlane.xlu0 %7140 }
0x11c8   : > { %v12116_v26 = vpop.eup %12115 }
0x11c9   : > { %11583 = vmatpush1.bf16.msra.mxu0 %v11582_v20  ;;  %v6457_v20 = vmul.f32 1.442695, %v14363_v5 }
0x11ca   : > { %11585 = vmatprep.subr.bf16.mxu0 %v11584_v35  ;;  %v14597_v35 = vld [vmem:[#allocation26_spill] sm:$0xff] }
0x11cb   : > { %v14367_v25 = vsub.f32 %v14597_v35, %v7141_v28  ;;  %v12118_v63 = vpop.eup %12117 }
0x11cd   : > { %11587 = vmatpush1.bf16.msra.mxu0 %v11586_v52  ;;  %v7143_v52 = vmul.f32 1.442695, %v14367_v25 }
0x11d0   : > { %8657 = vmatmul.mubr.f32.vlgmr.msra.gmra.mrb[30].mxu0 %v8418_v11  ;;  %v11633_v11 = vpack.c.bf16 %v8771_v4, %v8770_v62 }
0x11d2   : > { %11634 = vmatpush3.bf16.msra.mxu1 %v11633_v11  ;;  %v3223_v11 = vrot.slane %v3206_v42, %v13055_v58 }
0x11d3   : > { %11635 = vmatprep.subr.bf16.mxu1 %v14560_v57 }
0x11d6   : > { %11637 = vmatpush3.bf16.msra.mxu1 %v11636_v47  ;;  %v3219_v47 = vrot.slane %v3206_v42, %v13058_v15 }
0x11d7   : > { %11638 = vmatprep.subr.bf16.mxu1 %v14560_v57 }
0x11da   : > { %11640 = vmatpush3.bf16.msra.mxu1 %v11639_v50 }
0x11db   : > { %11641 = vmatprep.subr.bf16.mxu1 %v14560_v57  ;;  %v14351_v57 = vsub.f32 %v14594_v33, %v5083_v16 }
0x11dd   : > { %v5085_v3 = vmul.f32 1.442695, %v14351_v57 }
0x11de   : > { %11643 = vmatpush3.bf16.msra.mxu1 %v11642_v13 }
0x11df   : > { %12119 = vpow2.f32 %v5085_v3 }
0x11e0   : > { %12121 = vpow2.f32 %v5771_v37 }
0x11e1   : > { %12123 = vpow2.f32 %v6457_v20 }
0x11e2   : > { %12125 = vpow2.f32 %v7143_v52 }
0x11e9   : > { %v12120_v34 = vpop.eup %12119 }
0x11ea   : > { %v12122_v56 = vpop.eup %12121 }
0x11eb   : > { %v12124_v51 = vpop.eup %12123 }
0x11ec   : > { %v12126_v27 = vpop.eup %12125 }
0x1283   : > { %v8508_v41 = vpop.f32.mrb[46].mxu0  ;;  %v8729_v53 = vpop.f32.mrb[30].mxu1 }
0x1284   : > { %v14358_v59 = vadd.f32 %v14263_v0, %v8508_v41  ;;  %v9944_v22 = vpop.f32.mrb[47].mxu0  ;;  %v8731_v14 = vpop.f32.mrb[31].mxu1  ;;  %v11706_v10 = vadd.f32 %v8729_v53, %v3219_v47  ;;  %v14601_v47 = vld [vmem:[#allocation23_spill] sm:$0xff] }
0x1285   : > { %v7827_v0 = vpop.xlane.xlu0 %7826  ;;  %v11707_v1 = vadd.f32 %v8731_v14, %v3223_v11  ;;  %v14600_v11 = vld [vmem:[#allocation27_spill] sm:$0xff] }
0x1286   : > { %8512 = vmax.xlane.f32.xlu0 %v14358_v59  ;;  %v14371_v55 = vsub.f32 %v14266_v18, %v7827_v0 }
0x1287   : > { %v9138_v21 = vmul.f32 -1.442695, %v11707_v1 }
0x1288   : > { %v7829_v48 = vmul.f32 1.442695, %v14371_v55 }
0x128a   : > { %3716 = vadd.xlane.f32.xlu0 %v12116_v26  ;;  %12127 = vpow2.f32 %v7829_v48 }
0x128e   : > { %4401 = vadd.xlane.f32.xlu0 %v12118_v63 }
0x1292   : > { %5087 = vadd.xlane.f32.xlu0 %v12120_v34 }
0x1294   : > { %v12128_v18 = vpop.eup %12127 }
0x1296   : > { %5773 = vadd.xlane.f32.xlu0 %v12122_v56 }
0x129a   : > { %6459 = vadd.xlane.f32.xlu0 %v12124_v51 }
0x129e   : > { %7145 = vadd.xlane.f32.xlu0 %v12126_v27 }
0x12a2   : > { %7831 = vadd.xlane.f32.xlu0 %v12128_v18 }
0x12a3   : > { %v8658_v6 = vpop.f32.mrb[30].mxu0 }
0x12a4   : > { %v11704_v8 = vadd.f32 %v8658_v6, %v3211_v49  ;;  %v8660_v36 = vpop.f32.mrb[31].mxu0  ;;  %v14598_v6 = vld [vmem:[#allocation21_spill] sm:$0xff] }
0x12a5   : > { %v11705_v62 = vadd.f32 %v8660_v36, %v3215_v29 }
0x12a6   : > { %v9136_v4 = vmul.f32 -1.442695, %v11704_v8  ;;  %v14402_v8 = vsub.f32 %v14598_v6, %v14340_v44 }
0x12a7   : > { %v9137_v7 = vmul.f32 -1.442695, %v11705_v62  ;;  %v14599_v62 = vld [vmem:[#allocation25_spill] sm:$0xff] }
0x12a8   : > { %12129 = vpow2.f32 %v9136_v4  ;;  %v4056_v36 = vmul.f32 1.442695, %v14402_v8 }
0x12a9   : > { %12131 = vpow2.f32 %v9137_v7 }
0x12aa   : > { %12133 = vpow2.f32 %v9138_v21 }
0x12ab   : > { %12135 = vtanh.f32 %v11706_v10 }
0x12b2   : > { %v12130_v40 = vpop.eup %12129 }
0x12b3   : > { %v12132_v50 = vpop.eup %12131  ;;  %v8741_v46 = vadd.f32 1.0, %v12130_v40 }
0x12b4   : > { %v8747_v45 = vadd.f32 1.0, %v12132_v50  ;;  %v12134_v12 = vpop.eup %12133 }
0x12b5   : > { %12137 = vrcp.f32 %v8741_v46  ;;  %v12136_v13 = vpop.eup %12135  ;;  %v8754_v60 = vadd.f32 1.0, %v12134_v12 }
0x12b6   : > { %12139 = vrcp.f32 %v8747_v45  ;;  %v14602_v45 = vld [vmem:[#allocation32_spill] sm:$0xff] }
0x12b7   : > { %12141 = vrcp.f32 %v8754_v60 }
0x12bf   : > { %v12138_v43 = vpop.eup %12137 }
0x12c0   : > { %v12140_v58 = vpop.eup %12139  ;;  %v8758_v30 = vmul.f32 %v12138_v43, %v12136_v13 }
0x12c1   : > { %v8757_v16 = vmul.f32 %v12140_v58, %v14327_v2  ;;  %v12142_v15 = vpop.eup %12141 }
0x12c3   : > { %v8759_v39 = vadd.f32 %v8758_v30, %v8757_v16  ;;  %v14603_v30 = vld [vmem:[#allocation33_spill] sm:$0xff] }
0x12c5   : > { %8868 = vst [vmem:[#allocation4] sm:$0xff] %v8759_v39  ;;  %12143 = vtanh.f32 %v8759_v39 }
0x12cf   : > { %v12144_v61 = vpop.eup %12143 }
0x12d0   : > { %v8761_v9 = vmul.f32 %v12144_v61, %v12142_v15 }
0x12d2   : > { %9978 = vmatmul.mubr.f32.vlgmr.msra.gmra.mrb[46].mxu1 %v8761_v9  ;;  %8867 = vst [vmem:[#allocation3] sm:$0xff] %v8761_v9 }
0x1313   : > { %v8513_v24 = vpop.xlane.xlu0 %8512 }
0x1314   : > { %v14383_v33 = vsub.f32 %v14358_v59, %v8513_v24 }
0x1316   : > { %v8515_v32 = vmul.f32 1.442695, %v14383_v33 }
0x1317   : > { %v3717_v3 = vpop.xlane.xlu0 %3716 }
0x1318   : > { %12145 = vpow2.f32 %v8515_v32 }
0x1319   : > { %12147 = vlog2.f32 %v3717_v3 }
0x131b   : > { %v4402_v2 = vpop.xlane.xlu0 %4401 }
0x131c   : > { %12149 = vlog2.f32 %v4402_v2 }
0x131f   : > { %v5088_v19 = vpop.xlane.xlu0 %5087 }
0x1320   : > { %12151 = vlog2.f32 %v5088_v19 }
0x1322   : > { %v12146_v41 = vpop.eup %12145 }
0x1323   : > { %v12148_v53 = vpop.eup %12147  ;;  %8517 = vadd.xlane.f32.xlu0 %v12146_v41  ;;  %v5774_v22 = vpop.xlane.xlu0 %5773 }
0x1324   : > { %v3719_v14 = vmul.f32 0.6931472, %v12148_v53  ;;  %12153 = vlog2.f32 %v5774_v22 }
0x1326   : > { %v12150_v59 = vpop.eup %12149  ;;  %v3720_v37 = vsub.f32 %v14343_v31, %v3719_v14 }
0x1327   : > { %v4404_v17 = vmul.f32 0.6931472, %v12150_v59  ;;  %v6460_v28 = vpop.xlane.xlu0 %6459 }
0x1328   : > { %3721 = vst [vmem:[%s12684_s9] sm:$0xff] %v3720_v37  ;;  %12155 = vlog2.f32 %v6460_v28 }
0x1329   : > { %v4405_v26 = vsub.f32 %v14347_v23, %v4404_v17 }
0x132a   : > { %v12152_v20 = vpop.eup %12151 }
0x132b   : > { %9075 = vst [vmem:[%s12684_s9 + $0x10] sm:$0xff] %v4405_v26  ;;  %v5090_v35 = vmul.f32 0.6931472, %v12152_v20  ;;  %v7146_v0 = vpop.xlane.xlu0 %7145 }
0x132c   : > { %12157 = vlog2.f32 %v7146_v0 }
0x132d   : > { %v5091_v63 = vsub.f32 %v14351_v57, %v5090_v35 }
0x132e   : > { %v12154_v52 = vpop.eup %12153 }
0x132f   : > { %9085 = vst [vmem:[%s12684_s9 + $0x20] sm:$0xff] %v5091_v63  ;;  %v5776_v34 = vmul.f32 0.6931472, %v12154_v52  ;;  %v7832_v31 = vpop.xlane.xlu0 %7831 }
0x1330   : > { %12159 = vlog2.f32 %v7832_v31 }
0x1331   : > { %v5777_v48 = vsub.f32 %v14355_v54, %v5776_v34  ;;  %v4740_v54 = vpop.xlane.xlu1 %4739  ;;  %12161 = vpow2.f32 %v4056_v36 }
0x1332   : > { %v12156_v56 = vpop.eup %12155 }
0x1333   : > { %9095 = vst [vmem:[%s12684_s9 + $0x30] sm:$0xff] %v5777_v48  ;;  %v6462_v23 = vmul.f32 0.6931472, %v12156_v56 }
0x1335   : > { %v6463_v51 = vsub.f32 %v14363_v5, %v6462_v23  ;;  %v14406_v5 = vsub.f32 %v14599_v62, %v4740_v54  ;;  %v5426_v4 = vpop.xlane.xlu1 %5425 }
0x1336   : > { %v12158_v27 = vpop.eup %12157  ;;  %v14410_v7 = vsub.f32 %v14600_v11, %v5426_v4 }
0x1337   : > { %9105 = vst [vmem:[%s12684_s9 + $0x40] sm:$0xff] %v6463_v51  ;;  %v7148_v42 = vmul.f32 0.6931472, %v12158_v27 }
0x1338   : > { %v5428_v44 = vmul.f32 1.442695, %v14410_v7 }
0x1339   : > { %v7149_v49 = vsub.f32 %v14367_v25, %v7148_v42  ;;  %v4742_v25 = vmul.f32 1.442695, %v14406_v5  ;;  %v6112_v1 = vpop.xlane.xlu1 %6111 }
0x133a   : > { %v12160_v57 = vpop.eup %12159  ;;  %v14417_v21 = vsub.f32 %v14601_v47, %v6112_v1 }
0x133b   : > { %9115 = vst [vmem:[%s12684_s9 + $0x50] sm:$0xff] %v7149_v49  ;;  %v7834_v18 = vmul.f32 0.6931472, %v12160_v57  ;;  %12163 = vpow2.f32 %v4742_v25  ;;  %v12162_v58 = vpop.eup %12161 }
0x133c   : > { %12165 = vpow2.f32 %v5428_v44  ;;  %v6114_v13 = vmul.f32 1.442695, %v14417_v21 }
0x133d   : > { %v7835_v29 = vsub.f32 %v14371_v55, %v7834_v18  ;;  %v9139_v55 = vld [vmem:[%s14510_s5] ss:$0 sm:$0xff]  ;;  %v6798_v10 = vpop.xlane.xlu1 %6797 }
0x133e   : > { %v14420_v12 = vsub.f32 %v14602_v45, %v6798_v10  ;;  %12167 = vpow2.f32 %v6114_v13 }
0x133f   : > { %9125 = vst [vmem:[%s12684_s9 + $0x60] sm:$0xff] %v7835_v29 }
0x1340   : > { %v6800_v60 = vmul.f32 1.442695, %v14420_v12 }
0x1341   : > { %v7484_v43 = vpop.xlane.xlu1 %7483 }
0x1342   : > { %v14425_v16 = vsub.f32 %v14603_v30, %v7484_v43  ;;  %12169 = vpow2.f32 %v6800_v60 }
0x1344   : > { %v7486_v9 = vmul.f32 1.442695, %v14425_v16 }
0x1345   : > { %v8170_v39 = vpop.xlane.xlu1 %8169  ;;  %v12164_v15 = vpop.eup %12163 }
0x1346   : > { %v14429_v24 = vsub.f32 %v14316_v38, %v8170_v39  ;;  %v12166_v32 = vpop.eup %12165 }
0x1348   : > { %v8172_v3 = vmul.f32 1.442695, %v14429_v24  ;;  %v12168_v2 = vpop.eup %12167 }
0x134c   : > { %v12170_v19 = vpop.eup %12169 }
0x13a5   : > { %v8851_v40 = vpop.f32.mrb[46].mxu1 }
0x13a6   : > { %v8852_v50 = vadd.f32 %v9139_v55, %v8851_v40  ;;  %v9979_v46 = vpop.f32.mrb[47].mxu1 }
0x13a8   : > { %8855 = vmax.xlane.f32.xlu1 %v8852_v50 }
0x13ac   : > { %4058 = vadd.xlane.f32.xlu1 %v12162_v58 }
0x13b0   : > { %4744 = vadd.xlane.f32.xlu1 %v12164_v15  ;;  %v8518_v61 = vpop.xlane.xlu0 %8517 }
0x13b1   : > { %12171 = vlog2.f32 %v8518_v61 }
0x13b2   : > { %12173 = vpow2.f32 %v7486_v9 }
0x13b3   : > { %12175 = vpow2.f32 %v8172_v3 }
0x13b4   : > { %5430 = vadd.xlane.f32.xlu1 %v12166_v32 }
0x13b8   : > { %6116 = vadd.xlane.f32.xlu1 %v12168_v2 }
0x13bb   : > { %v12172_v41 = vpop.eup %12171 }
0x13bc   : > { %v8520_v53 = vmul.f32 0.6931472, %v12172_v41  ;;  %6802 = vadd.xlane.f32.xlu1 %v12170_v19  ;;  %v12174_v14 = vpop.eup %12173 }
0x13bd   : > { %v12176_v38 = vpop.eup %12175 }
0x13be   : > { %v8521_v22 = vsub.f32 %v14383_v33, %v8520_v53 }
0x13c0   : > { %9135 = vst [vmem:[%s12684_s9 + $0x70] sm:$0xff] %v8521_v22  ;;  %7488 = vadd.xlane.f32.xlu1 %v12174_v14 }
0x13c4   : > { %8174 = vadd.xlane.f32.xlu1 %v12176_v38 }
0x1435   : > { %v8856_v59 = vpop.xlane.xlu1 %8855 }
0x1436   : > { %v8857_v37 = vsub.f32 %v8852_v50, %v8856_v59 }
0x1438   : > { %v8858_v17 = vmul.f32 1.442695, %v8857_v37 }
0x1439   : > { %v4059_v28 = vpop.xlane.xlu1 %4058 }
0x143a   : > { %12177 = vpow2.f32 %v8858_v17 }
0x143b   : > { %12179 = vlog2.f32 %v4059_v28 }
0x143d   : > { %v4745_v26 = vpop.xlane.xlu1 %4744 }
0x143e   : > { %12181 = vlog2.f32 %v4745_v26 }
0x1441   : > { %v5431_v20 = vpop.xlane.xlu1 %5430 }
0x1442   : > { %12183 = vlog2.f32 %v5431_v20 }
0x1444   : > { %v12178_v35 = vpop.eup %12177 }
0x1445   : > { %v12180_v0 = vpop.eup %12179  ;;  %8860 = vadd.xlane.f32.xlu1 %v12178_v35  ;;  %v6117_v33 = vpop.xlane.xlu1 %6116 }
0x1446   : > { %v4061_v63 = vmul.f32 0.6931472, %v12180_v0  ;;  %12185 = vlog2.f32 %v6117_v33 }
0x1448   : > { %v12182_v52 = vpop.eup %12181  ;;  %v4062_v34 = vsub.f32 %v14402_v8, %v4061_v63 }
0x1449   : > { %v4747_v31 = vmul.f32 0.6931472, %v12182_v52  ;;  %v6803_v48 = vpop.xlane.xlu1 %6802 }
0x144a   : > { %9070 = vst [vmem:[%s12684_s9 + $0x8] sm:$0xff] %v4062_v34  ;;  %12187 = vlog2.f32 %v6803_v48 }
0x144b   : > { %v4748_v56 = vsub.f32 %v14406_v5, %v4747_v31 }
0x144c   : > { %v12184_v23 = vpop.eup %12183 }
0x144d   : > { %9080 = vst [vmem:[%s12684_s9 + $0x18] sm:$0xff] %v4748_v56  ;;  %v5433_v51 = vmul.f32 0.6931472, %v12184_v23  ;;  %v7489_v27 = vpop.xlane.xlu1 %7488 }
0x144e   : > { %12189 = vlog2.f32 %v7489_v27 }
0x144f   : > { %v5434_v42 = vsub.f32 %v14410_v7, %v5433_v51 }
0x1450   : > { %v12186_v49 = vpop.eup %12185 }
0x1451   : > { %9090 = vst [vmem:[%s12684_s9 + $0x28] sm:$0xff] %v5434_v42  ;;  %v6119_v57 = vmul.f32 0.6931472, %v12186_v49  ;;  %v8175_v18 = vpop.xlane.xlu1 %8174 }
0x1452   : > { %12191 = vlog2.f32 %v8175_v18 }
0x1453   : > { %v6120_v29 = vsub.f32 %v14417_v21, %v6119_v57 }
0x1454   : > { %v12188_v6 = vpop.eup %12187 }
0x1455   : > { %9100 = vst [vmem:[%s12684_s9 + $0x38] sm:$0xff] %v6120_v29  ;;  %v6805_v8 = vmul.f32 0.6931472, %v12188_v6 }
0x1457   : > { %v6806_v54 = vsub.f32 %v14420_v12, %v6805_v8 }
0x1458   : > { %v12190_v36 = vpop.eup %12189 }
0x1459   : > { %9110 = vst [vmem:[%s12684_s9 + $0x48] sm:$0xff] %v6806_v54  ;;  %v7491_v62 = vmul.f32 0.6931472, %v12190_v36 }
0x145b   : > { %v7492_v5 = vsub.f32 %v14425_v16, %v7491_v62 }
0x145c   : > { %v12192_v4 = vpop.eup %12191 }
0x145d   : > { %9120 = vst [vmem:[%s12684_s9 + $0x58] sm:$0xff] %v7492_v5  ;;  %v8177_v25 = vmul.f32 0.6931472, %v12192_v4 }
0x145f   : > { %v8178_v11 = vsub.f32 %v14429_v24, %v8177_v25 }
0x1461   : > { %9130 = vst [vmem:[%s12684_s9 + $0x68] sm:$0xff] %v8178_v11 }
0x14d2   : > { %v8861_v7 = vpop.xlane.xlu1 %8860 }
0x14d3   : > { %12193 = vlog2.f32 %v8861_v7 }
0x14dd   : > { %v12194_v1 = vpop.eup %12193 }
0x14de   : > { %v8863_v55 = vmul.f32 0.6931472, %v12194_v1 }
0x14e0   : > { %v8864_v44 = vsub.f32 %v8857_v37, %v8863_v55 }
0x14e2   : > { %9140 = vst [vmem:[%s12684_s9 + $0x78] sm:$0xff] %v8864_v44 }
0x14e3   : > { %12322 = shalt.err (!%p12319_p4)
}
0x14e4   : > { %s12323_s9 = scalar_lea.hbm %s14453_s30, 2048  ;;  %s12327_s16 = scalar_lea.hbm %s14604_s28, 4096 }
0x14e5   : > { %p12324_p2 = scmp.ne.s32.totalorder %s14453_s30, %s12323_s9  ;;  %p12328_p1 = scmp.lt.u32.totalorder %s14453_s30, %s14604_s28 }
0x14e6   : > { %p12329_p11 = scmp.lt.u32.totalorder %s12327_s16, %s12323_s9  ;;  %p12331_p6 = scmp.lt.u32.totalorder %s12323_s9, %s14453_s30 }
0x14e7   : > { %p12325_p8 = pnand %p12324_p2, %p12605_p10 }
0x14e8   : > { %p12330_p13 = por %p12329_p11, %p12328_p1 }
0x14e9   : > { %p12326_p12 = pneg %p12325_p8 }
0x14ea   : > { %p12332_p3 = por %p12331_p6, %p12330_p13 }
0x14ec   : > { %p12333_p5 = pnand %p12332_p3, %p12326_p12 }
0x14ee   : > { %12336 = shalt.err (!%p12333_p5)
}
0x14ef   : > { %s12414_s13 = smov 128   ;;  %s12415_s7 = smov 8  }
0x14f0   : > { %11786 = dma.vmem_to_hbm [thread:$0]  (%p12605_p10), %s14455_s29, 2048, %s14453_s30, %s8870_s11, %s12414_s13, %s12414_s13, %s12415_s7  }
0x14f1 PF: > { %s14605_s14 = sld [smem:[#allocation18_spill]]  ;;  %s14606_s17 = sld [smem:[#allocation19_spill]] }
0x14f2   : > { %p14608_p9 = scmp.ge.s32.totalorder %s12399_s26, 2 }
0x14f7   : > { %s8899_s24 = sand.u32 1, %s14605_s14   ;;  %p14607_p7 = scmp.ne.s32.totalorder %s14606_s17, 0 }
0x14f8   : > { %s8900_s18 = scalar_lea.sflag [#allocation7], %s8899_s24 }
0x14f9   : > { %p11803_p0 = pnand %p14608_p9, %p14607_p7 }
0x14fb   : > { %12374 = dma.done.wait (!%p11803_p0), %s8900_s18, 2048  }
0x14fc   : > { %12376 = vsyncadd (!%p11803_p0), %s8900_s18, 4294965248  ;;  %s24_s26 = sadd.s32 1, %s12399_s26   ;;  %s14609_s8 = smov %s14616_s21 }
0x14fd   : > { %p21_p4 = scmp.ge.s32.totalorder %s24_s26, 4   ;;  %s14610_s21 = smov %s12383_s22 }
0x14fe   : > { %s14611_s22 = smov %s12387_s23  ;;  %s14612_s23 = smov %s12617_s27 }
0x14ff   : > { %s14613_s24 = smov %s12395_s25  ;;  %s14614_s25 = smov %s14609_s8 }
0x1500   :  { %23 = sbr.rel (!%p21_p4) target bundleno = 10 (0xa), region = 150 }
0x1507   :  { %8905 = vsyncpa [#allocation6], 1 }
0x1508   :  { %8907 = vsyncpa [#allocation6 + $0x1], 1 }
0x1509   :  { %8908 = vsyncpa [#allocation9], 1 }
0x150a   :  { %8909 = vsyncpa [#allocation12], 1 }
0x150b   :  { %8910 = vsyncpa [#allocation7], 1 }
0x150c   :  { %8912 = vsyncpa [#allocation7 + $0x1], 1 }

</bundles_post_ra>
